<compile_context>
chip_gen: v7x
topology: tpu7x:2x2x1
jax: 0.10.0
libtpu: 0.0.40
codegen_flags: <defaults>
</compile_context>

<pallas_src>
import jax
import jax.numpy as jnp
from jax.experimental import pallas as pl
from jax.experimental.pallas import tpu as pltpu


def _round_up(v, m):
    return ((v + m - 1) // m) * m


def _pad2d(x, rows, cols):
    r, c = x.shape
    return jnp.pad(x, ((0, rows - r), (0, cols - c)))


# --------------------------- hardware-aware knobs ---------------------------------- #

def _vmem_limit_bytes():
    """~80% of physical VMEM: ~102 MiB on v5e/v6e (128 MiB), ~51 MiB on v7x (64 MiB)."""
    try:
        cap = int(pltpu.get_tpu_info().vmem_capacity_bytes)
    except Exception:
        cap = 128 * 1024 * 1024
    return max(32 * 1024 * 1024, min(int(cap * 0.8), 112 * 1024 * 1024))


def _tensorcores_per_chip():
    try:
        info = pltpu.get_tpu_info()
        for name in ("tensorcores_per_chip", "num_tensorcores", "num_cores", "core_count"):
            v = getattr(info, name, None)
            if v:
                return int(v)
    except Exception:
        pass
    return 1


def _resident_spec(block_shape, index_map, single_buffer):
    """BlockSpec for inputs whose block never changes across the grid.

    With single_buffer=True the default double-buffering (pure VMEM waste for a
    constant-index input) is disabled via pipeline_mode=pl.Buffered(1).
    """
    if single_buffer:
        return pl.BlockSpec(block_shape, index_map, pipeline_mode=pl.Buffered(1))
    return pl.BlockSpec(block_shape, index_map)


def _probe_single_buffering():
    """Check that this Pallas build accepts (and correctly runs) Buffered(1)."""
    if not hasattr(pl, "Buffered"):
        return False
    try:
        def _k(x_ref, o_ref):
            o_ref[...] = x_ref[...] + 1.0

        x = jnp.zeros((8, 128), jnp.float32)
        out = pl.pallas_call(
            _k,
            out_shape=jax.ShapeDtypeStruct((16, 128), jnp.float32),
            grid=(2,),
            in_specs=[pl.BlockSpec((8, 128), lambda i: (0, 0),
                                   pipeline_mode=pl.Buffered(1))],
            out_specs=pl.BlockSpec((8, 128), lambda i: (i, 0)),
        )(x)
        out = jax.block_until_ready(out)
        return bool(jnp.all(out == 1.0))
    except Exception:
        return False


# --------------------- fused multi-layer kernel (A read once) --------------------- #

def _make_fused_kernel(layer_cfgs, orders):
    """layer_cfgs: tuple of (residual_mode, use_relu); orders: 'Ah_first' | 'hW_first'."""

    def kernel(a_ref, ns_ref, nd_ref, x_ref, *rest):
        o_ref = rest[-1]
        refs = rest[:-1]
        a = a_ref[...].astype(jnp.bfloat16)   # int8 {0,1} -> bf16 in-register (lossless)
        ns = ns_ref[...]                      # (N, 1) f32  out_deg^-1/2 (src norm)
        nd = nd_ref[...]                      # (N, 1) f32  in_deg^-1/2  (dst norm)
        h = x_ref[...]                        # (N, F0) f32

        ri = 0
        for (residual_mode, use_relu), order in zip(layer_cfgs, orders):
            w = refs[ri][...].astype(jnp.bfloat16)
            b = refs[ri + 1][...]
            ri += 2
            wres = None
            if residual_mode == "linear":
                wres = refs[ri][...].astype(jnp.bfloat16)
                ri += 1

            h_s = (h * ns).astype(jnp.bfloat16)   # scale h, not A (O(N*F) VPU work)
            if order == "hW_first":
                # contract to the narrower output width before the O(N^2) matmul
                t = jnp.dot(h_s, w, preferred_element_type=jnp.float32)
                rst = jnp.dot(a, t.astype(jnp.bfloat16),
                              preferred_element_type=jnp.float32) + b
            else:
                agg = jnp.dot(a, h_s, preferred_element_type=jnp.float32)
                rst = jnp.dot(agg.astype(jnp.bfloat16), w,
                              preferred_element_type=jnp.float32) + b
            rst = rst * nd

            if residual_mode == "linear":
                rst = rst + jnp.dot(h.astype(jnp.bfloat16), wres,
                                    preferred_element_type=jnp.float32)
            elif residual_mode == "identity":
                rst = rst + h
            if use_relu:
                rst = jnp.maximum(rst, 0.0)
            h = rst

        o_ref[...] = h.astype(o_ref.dtype)

    return kernel


def gcn_forward_fused(a_i8, norm_src, norm_dst, x, layers, orders, *, vmem_limit):
    n = x.shape[0]
    f_out_last = layers[-1]["w"].shape[1]

    inputs = [a_i8, norm_src, norm_dst, x]
    for p in layers:
        inputs += [p["w"], p["b"]]
        if p["residual"] == "linear":
            inputs.append(p["w_res"])

    flops = 0
    for p, order in zip(layers, orders):
        f_in, f_out = p["w"].shape
        f_mm = f_out if order == "hW_first" else f_in
        flops += 2 * n * n * f_mm + 2 * n * f_in * f_out
        if p["residual"] == "linear":
            flops += 2 * n * f_in * f_out
    bytes_accessed = sum(int(t.size) * t.dtype.itemsize for t in inputs) + n * f_out_last * 4

    kernel = _make_fused_kernel(
        tuple((p["residual"], p["relu"]) for p in layers), tuple(orders))

    # Grid-less call: one invocation, every operand lands in VMEM single-buffered
    # (no double-buffer waste -- important inside v7x's 64 MiB VMEM), and A is
    # read from HBM exactly once for all layers.
    return pl.pallas_call(
        kernel,
        out_shape=jax.ShapeDtypeStruct((n, f_out_last), jnp.float32),
        compiler_params=pltpu.CompilerParams(vmem_limit_bytes=vmem_limit),
        cost_estimate=pl.CostEstimate(flops=flops, transcendentals=0,
                                      bytes_accessed=bytes_accessed),
    )(*inputs)


# ----------------- row-tiled per-layer kernel (scalable fallback) ----------------- #

def _make_tiled_layer_kernel(residual_mode, use_relu, emit_next):

    def kernel(*refs):
        it = iter(refs)
        a_ref = next(it)            # (TM, N) int8 A dst-row tile
        hs_ref = next(it)           # (N, Fin) bf16 pre-scaled src features (resident)
        nd_ref = next(it)           # (TM, 1) f32 dst norm tile
        w_ref = next(it)            # (Fin, Fout) f32
        b_ref = next(it)            # (1, Fout) f32
        h_ref = next(it) if residual_mode != "none" else None
        wres_ref = next(it) if residual_mode == "linear" else None
        ns_ref = next(it) if emit_next else None
        o_ref = next(it)
        hs_next_ref = next(it) if emit_next else None

        a = a_ref[...].astype(jnp.bfloat16)        # int8 {0,1} -> bf16 in-register
        agg = jnp.dot(a, hs_ref[...], preferred_element_type=jnp.float32)
        rst = jnp.dot(agg.astype(jnp.bfloat16), w_ref[...].astype(jnp.bfloat16),
                      preferred_element_type=jnp.float32) + b_ref[...]
        rst = rst * nd_ref[...]

        if residual_mode == "linear":
            rst = rst + jnp.dot(h_ref[...].astype(jnp.bfloat16),
                                wres_ref[...].astype(jnp.bfloat16),
                                preferred_element_type=jnp.float32)
        elif residual_mode == "identity":
            rst = rst + h_ref[...]
        if use_relu:
            rst = jnp.maximum(rst, 0.0)

        o_ref[...] = rst.astype(o_ref.dtype)
        if emit_next:
            # Next layer's pre-scaled bf16 input, produced in the epilogue so the
            # wrapper never does an extra scale+cast pass over h between layers.
            hs_next_ref[...] = (rst * ns_ref[...]).astype(jnp.bfloat16)

    return kernel


def gcn_layer_tiled(a_i8, norm_src, norm_dst, h, h_s, w, b, w_res, *,
                    residual_mode, use_relu, emit_next, tm, vmem_limit,
                    single_buffer_resident):
    n, f_in = h_s.shape
    f_out = w.shape[1]
    assert n % tm == 0, (n, tm)
    if residual_mode == "identity":
        assert f_in == f_out

    def res_spec(shape, imap):
        return _resident_spec(shape, imap, single_buffer_resident)

    inputs = [a_i8, h_s, norm_dst, w, b]
    in_specs = [
        pl.BlockSpec((tm, n), lambda i: (i, 0)),       # A dst-row tile (pipelined, int8)
        res_spec((n, f_in), lambda i: (0, 0)),         # scaled bf16 src features (resident)
        pl.BlockSpec((tm, 1), lambda i: (i, 0)),       # dst norm tile
        res_spec((f_in, f_out), lambda i: (0, 0)),
        res_spec((1, f_out), lambda i: (0, 0)),
    ]
    if residual_mode != "none":
        inputs.append(h)
        in_specs.append(pl.BlockSpec((tm, f_in), lambda i: (i, 0)))
    if residual_mode == "linear":
        inputs.append(w_res)
        in_specs.append(res_spec((f_in, f_out), lambda i: (0, 0)))
    if emit_next:
        inputs.append(norm_src)
        in_specs.append(pl.BlockSpec((tm, 1), lambda i: (i, 0)))

    out_shape = [jax.ShapeDtypeStruct((n, f_out), jnp.float32)]
    out_specs = [pl.BlockSpec((tm, f_out), lambda i: (i, 0))]
    if emit_next:
        out_shape.append(jax.ShapeDtypeStruct((n, f_out), jnp.bfloat16))
        out_specs.append(pl.BlockSpec((tm, f_out), lambda i: (i, 0)))

    flops = 2 * n * n * f_in + 2 * n * f_in * f_out
    if residual_mode == "linear":
        flops += 2 * n * f_in * f_out
    out_bytes = n * f_out * (4 + (2 if emit_next else 0))
    bytes_accessed = sum(int(t.size) * t.dtype.itemsize for t in inputs) + out_bytes

    outs = pl.pallas_call(
        _make_tiled_layer_kernel(residual_mode, use_relu, emit_next),
        out_shape=out_shape,
        grid=(n // tm,),
        in_specs=in_specs,
        out_specs=out_specs,
        compiler_params=pltpu.CompilerParams(
            dimension_semantics=("parallel",),         # v7x: split dst rows over 2 TCs
            vmem_limit_bytes=vmem_limit),
        cost_estimate=pl.CostEstimate(flops=flops, transcendentals=0,
                                      bytes_accessed=bytes_accessed),
    )(*inputs)

    if emit_next:
        return outs[0], outs[1]
    return outs[0], None


def gcn_forward_tiled(a_i8, norm_src, norm_dst, x, layers, *, tm, vmem_limit,
                      single_buffer_resident):
    h = x
    # First layer's pre-scaled bf16 features; later layers get theirs from the
    # previous layer's kernel epilogue (no extra HBM round trip between layers).
    h_s = (x * norm_src).astype(jnp.bfloat16)
    for li, p in enumerate(layers):
        # F.dropout in eval mode == identity
        h, h_s = gcn_layer_tiled(
            a_i8, norm_src, norm_dst, h, h_s, p["w"], p["b"], p["w_res"],
            residual_mode=p["residual"], use_relu=p["relu"],
            emit_next=(li + 1 < len(layers)), tm=tm, vmem_limit=vmem_limit,
            single_buffer_resident=single_buffer_resident)
    return h


# ------------------------------ path selection ------------------------------------- #

def gcn_forward(a_i8, norm_src, norm_dst, x, layers, orders, *, tm, vmem_limit,
                single_buffer_resident, num_cores=None):
    """Pick fused (A read once, single-buffered VMEM) vs tiled (dst-row parallel)."""
    if num_cores is None:
        num_cores = _tensorcores_per_chip()
    n = x.shape[0]
    f_max = max(max(p["w"].shape) for p in layers)
    est = int(a_i8.size)                         # int8 A resident
    est += 6 * n * f_max * 4                     # h / h_s / agg / out style f32 temporaries
    est += sum((int(p["w"].size) + int(p["b"].size)
                + (int(p["w_res"].size) if p["w_res"] is not None else 0)) * 4
               for p in layers)
    fused_fits = est <= int(0.7 * vmem_limit)
    # On multi-TensorCore parts (v7x) the grid-less fused kernel runs on a single
    # core; once N is large enough to be MXU-bound, the parallel tiled path wins.
    if fused_fits and (num_cores <= 1 or n <= 1024):
        return gcn_forward_fused(a_i8, norm_src, norm_dst, x, layers, orders,
                                 vmem_limit=vmem_limit)
    return gcn_forward_tiled(a_i8, norm_src, norm_dst, x, layers, tm=tm,
                             vmem_limit=vmem_limit,
                             single_buffer_resident=single_buffer_resident)


# ------------------------------ parameters & refs ---------------------------------- #

def init_linear(key, fan_in, fan_out, with_bias=True):
    """nn.Linear-style init: U(-1/sqrt(fan_in), 1/sqrt(fan_in)); W stored (in, out)."""
    k = 1.0 / jnp.sqrt(jnp.float32(fan_in))
    kw, kb = jax.random.split(key)
    w = jax.random.uniform(kw, (fan_in, fan_out), jnp.float32, -k, k)
    b = jax.random.uniform(kb, (1, fan_out), jnp.float32, -k, k) if with_bias else None
    return w, b


def make_gcn_params(key, in_dim, num_hidden, out_dim, num_layers):
    """Mirrors GCN.__init__ (residual=True, norm=None, encoding=False, relu activation)."""
    layers = []
    keys = jax.random.split(key, max(2 * num_layers, 2))
    if num_layers == 1:
        w, b = init_linear(keys[0], in_dim, out_dim)
        layers.append(dict(w=w, b=b, w_res=None, residual="none", relu=False))
        return layers
    # first layer: in -> hidden, residual (linear if dims differ), relu
    w, b = init_linear(keys[0], in_dim, num_hidden)
    if in_dim != num_hidden:
        w_res, _ = init_linear(keys[1], in_dim, num_hidden, with_bias=False)
        layers.append(dict(w=w, b=b, w_res=w_res, residual="linear", relu=True))
    else:
        layers.append(dict(w=w, b=b, w_res=None, residual="identity", relu=True))
    # middle layers: hidden -> hidden, identity residual, relu
    for l in range(1, num_layers - 1):
        w, b = init_linear(keys[2 * l], num_hidden, num_hidden)
        layers.append(dict(w=w, b=b, w_res=None, residual="identity", relu=True))
    # last layer: hidden -> out, encoding=False => no residual / activation / norm
    w, b = init_linear(keys[2 * (num_layers - 1)], num_hidden, out_dim)
    layers.append(dict(w=w, b=b, w_res=None, residual="none", relu=False))
    return layers


def pad_gcn_params(layers, lane=128):
    padded = []
    for p in layers:
        f_in, f_out = p["w"].shape
        fi, fo = _round_up(f_in, lane), _round_up(f_out, lane)
        padded.append(dict(
            w=_pad2d(p["w"], fi, fo),
            b=_pad2d(p["b"], 1, fo),
            w_res=_pad2d(p["w_res"], fi, fo) if p["w_res"] is not None else None,
            residual=p["residual"], relu=p["relu"]))
    return padded


def gcn_forward_ref(a_i8, norm_src, norm_dst, x, layers, orders):
    """Pure-JAX replica of the kernel math (same bf16 cast points), padded arrays."""
    a = a_i8.astype(jnp.bfloat16)
    h = x
    for p, order in zip(layers, orders):
        w_b = p["w"].astype(jnp.bfloat16)
        h_s = (h * norm_src).astype(jnp.bfloat16)
        if order == "hW_first":
            t = jnp.dot(h_s, w_b, preferred_element_type=jnp.float32)
            rst = jnp.dot(a, t.astype(jnp.bfloat16),
                          preferred_element_type=jnp.float32) + p["b"]
        else:
            agg = jnp.dot(a, h_s, preferred_element_type=jnp.float32)
            rst = jnp.dot(agg.astype(jnp.bfloat16), w_b,
                          preferred_element_type=jnp.float32) + p["b"]
        rst = rst * norm_dst
        if p["residual"] == "linear":
            rst = rst + jnp.dot(h.astype(jnp.bfloat16), p["w_res"].astype(jnp.bfloat16),
                                preferred_element_type=jnp.float32)
        elif p["residual"] == "identity":
            rst = rst + h
        if p["relu"]:
            rst = jnp.maximum(rst, 0.0)
        h = rst
    return h


def gcn_forward_f32_ref(a, x, layers):
    """Plain f32 GraphConv math on the unpadded arrays (the module's semantics)."""
    ns = (jnp.maximum(a.sum(axis=0), 1.0) ** -0.5)[:, None]
    nd = (jnp.maximum(a.sum(axis=1), 1.0) ** -0.5)[:, None]
    h = x
    for p in layers:
        rst = (a @ (h * ns)) @ p["w"] + p["b"]
        rst = rst * nd
        if p["residual"] == "linear":
            rst = rst + h @ p["w_res"]
        elif p["residual"] == "identity":
            rst = rst + h
        if p["relu"]:
            rst = jnp.maximum(rst, 0.0)
        h = rst
    return h


# --------------------------------------- main -------------------------------------- #

if __name__ == "__main__":
    key = jax.random.PRNGKey(0)
    k_graph, k_feat, k_param = jax.random.split(key, 3)

    # Small logical problem (GCN encoder: in_dim -> hidden -> out_dim, 2 layers).
    N = 500
    IN_DIM = 8
    NUM_HIDDEN = 200
    OUT_DIM = 16
    NUM_LAYERS = 2
    TM = 256                     # A dst-row tile: feeds the full 256-wide MXU on v6e/v7x

    # Dense adjacency A[dst, src] in {0,1}, ~15% edge density; node features.
    a = (jax.random.uniform(k_graph, (N, N)) < 0.15).astype(jnp.float32)
    x = jax.random.normal(k_feat, (N, IN_DIM), dtype=jnp.float32)

    layers = make_gcn_params(k_param, IN_DIM, NUM_HIDDEN, OUT_DIM, NUM_LAYERS)

    # TPU-friendly padding: nodes -> multiple of TM, features -> multiple of 128.
    n_pad = _round_up(N, TM)
    a_pad = jnp.pad(a, ((0, n_pad - N), (0, n_pad - N)))
    x_pad = _pad2d(x, n_pad, _round_up(IN_DIM, 128))
    layers_pad = pad_gcn_params(layers)

    # Layer-invariant symmetric-normalization vectors, computed once.
    norm_src = jax.lax.rsqrt(jnp.maximum(a_pad.sum(axis=0), 1.0))[:, None]   # out-deg^-1/2
    norm_dst = jax.lax.rsqrt(jnp.maximum(a_pad.sum(axis=1), 1.0))[:, None]   # in-deg^-1/2
    a_i8 = a_pad.astype(jnp.int8)    # {0,1} lossless; halves A HBM/VMEM vs bf16

    vmem_limit = _vmem_limit_bytes()
    single_buf = _probe_single_buffering()

    # Fused path: contract to the narrower feature width first.
    orders_fused = ["hW_first" if p["w"].shape[1] < p["w"].shape[0] else "Ah_first"
                    for p in layers_pad]

    # Auto path (at this size -> fused, single A read) + tiled fallback for coverage.
    out_fused = jax.block_until_ready(
        gcn_forward(a_i8, norm_src, norm_dst, x_pad, layers_pad, orders_fused,
                    tm=TM, vmem_limit=vmem_limit, single_buffer_resident=single_buf))
    out_tiled = jax.block_until_ready(
        gcn_forward_tiled(a_i8, norm_src, norm_dst, x_pad, layers_pad,
                          tm=TM, vmem_limit=vmem_limit,
                          single_buffer_resident=single_buf))

    of = out_fused[:N, :OUT_DIM]
    ot = out_tiled[:N, :OUT_DIM]
    assert of.shape == (N, OUT_DIM), of.shape
    assert ot.shape == (N, OUT_DIM), ot.shape

    # Exact-parity references (same bf16 cast points) + plain f32 module reference.
    ref_fused = gcn_forward_ref(a_i8, norm_src, norm_dst, x_pad, layers_pad,
                                orders_fused)[:N, :OUT_DIM]
    ref_tiled = gcn_forward_ref(a_i8, norm_src, norm_dst, x_pad, layers_pad,
                                ["Ah_first"] * len(layers_pad))[:N, :OUT_DIM]
    ref_f32 = gcn_forward_f32_ref(a, x, layers)

    assert jnp.allclose(of, ref_fused, atol=3e-2, rtol=3e-2), \
        float(jnp.max(jnp.abs(of - ref_fused)))
    assert jnp.allclose(ot, ref_tiled, atol=3e-2, rtol=3e-2), \
        float(jnp.max(jnp.abs(ot - ref_tiled)))
    assert jnp.allclose(of, ref_f32, atol=6e-2, rtol=6e-2), \
        float(jnp.max(jnp.abs(of - ref_f32)))
    assert jnp.allclose(ot, ref_f32, atol=6e-2, rtol=6e-2), \
        float(jnp.max(jnp.abs(ot - ref_f32)))

    print("KERNEL_OK")
</pallas_src>

<mosaic_0001>
module attributes {stable_mosaic.version = 11 : i64} {
  func.func @_k(%arg0: i32, %arg1: memref<8x128xf32, #tpu.memory_space<vmem>>, %arg2: memref<8x128xf32, #tpu.memory_space<vmem>>) attributes {dimension_semantics = [#tpu.dimension_semantics<arbitrary>], iteration_bounds = array<i64: 2>, scalar_prefetch = 0 : i64, scratch_operands = 0 : i64, tpu.core_type = #tpu.core_type<tc>, window_params = [{pipeline_mode = #tpu.pipeline_mode<synchronous>, transform_indices = @transform_0, window_bounds = array<i64: 8, 128>}, {transform_indices = @transform_1, window_bounds = array<i64: 8, 128>}]} {
    %c0 = arith.constant 0 : index
    %c0_0 = arith.constant 0 : index
    %0 = vector.load %arg1[%c0, %c0_0] : memref<8x128xf32, #tpu.memory_space<vmem>>, vector<8x128xf32>
    %cst = arith.constant 1.000000e+00 : f32
    %1 = vector.broadcast %cst : f32 to vector<8x128xf32>
    %2 = arith.addf %0, %1 : vector<8x128xf32>
    %c0_1 = arith.constant 0 : index
    %c0_2 = arith.constant 0 : index
    %3 = vector.load %arg2[%c0_1, %c0_2] : memref<8x128xf32, #tpu.memory_space<vmem>>, vector<8x128xf32>
    tpu.vector_store %arg2[%c0_1, %c0_2], %2 {strides = array<i32>} : memref<8x128xf32, #tpu.memory_space<vmem>>, vector<8x128xf32>,
    return
  }
  func.func @transform_0(%arg0: i32) -> (i32, i32) {
    %c0_i32 = arith.constant 0 : i32
    %c0_i32_0 = arith.constant 0 : i32
    %c0_i32_1 = arith.constant 0 : i32
    return %c0_i32, %c0_i32_0 : i32, i32
  }
  func.func @transform_1(%arg0: i32) -> (i32, i32) {
    %c0_i32 = arith.constant 0 : i32
    %c0_i32_0 = arith.constant 0 : i32
    return %arg0, %c0_i32 : i32, i32
  }
}

module attributes {stable_mosaic.version = 11 : i64} {
  func.func @kernel(%arg0: memref<512x512xi8, #tpu.memory_space<vmem>>, %arg1: memref<512x1xf32, #tpu.memory_space<vmem>>, %arg2: memref<512x1xf32, #tpu.memory_space<vmem>>, %arg3: memref<512x128xf32, #tpu.memory_space<vmem>>, %arg4: memref<128x256xf32, #tpu.memory_space<vmem>>, %arg5: memref<1x256xf32, #tpu.memory_space<vmem>>, %arg6: memref<128x256xf32, #tpu.memory_space<vmem>>, %arg7: memref<256x128xf32, #tpu.memory_space<vmem>>, %arg8: memref<1x128xf32, #tpu.memory_space<vmem>>, %arg9: memref<512x128xf32, #tpu.memory_space<vmem>>) attributes {dimension_semantics = [], scalar_prefetch = 0 : i64, scratch_operands = 0 : i64, tpu.core_type = #tpu.core_type<tc>} {
    %c0 = arith.constant 0 : index
    %c0_0 = arith.constant 0 : index
    %0 = vector.load %arg0[%c0, %c0_0] : memref<512x512xi8, #tpu.memory_space<vmem>>, vector<512x512xi8>
    %1 = arith.sitofp %0 : vector<512x512xi8> to vector<512x512xbf16>
    %c0_1 = arith.constant 0 : index
    %c0_2 = arith.constant 0 : index
    %2 = vector.load %arg1[%c0_1, %c0_2] : memref<512x1xf32, #tpu.memory_space<vmem>>, vector<512x1xf32>
    %c0_3 = arith.constant 0 : index
    %c0_4 = arith.constant 0 : index
    %3 = vector.load %arg2[%c0_3, %c0_4] : memref<512x1xf32, #tpu.memory_space<vmem>>, vector<512x1xf32>
    %c0_5 = arith.constant 0 : index
    %c0_6 = arith.constant 0 : index
    %4 = vector.load %arg3[%c0_5, %c0_6] : memref<512x128xf32, #tpu.memory_space<vmem>>, vector<512x128xf32>
    %c0_7 = arith.constant 0 : index
    %c0_8 = arith.constant 0 : index
    %5 = vector.load %arg4[%c0_7, %c0_8] : memref<128x256xf32, #tpu.memory_space<vmem>>, vector<128x256xf32>
    %6 = arith.truncf %5 : vector<128x256xf32> to vector<128x256xbf16>
    %c0_9 = arith.constant 0 : index
    %c0_10 = arith.constant 0 : index
    %7 = vector.load %arg5[%c0_9, %c0_10] : memref<1x256xf32, #tpu.memory_space<vmem>>, vector<1x256xf32>
    %c0_11 = arith.constant 0 : index
    %c0_12 = arith.constant 0 : index
    %8 = vector.load %arg6[%c0_11, %c0_12] : memref<128x256xf32, #tpu.memory_space<vmem>>, vector<128x256xf32>
    %9 = arith.truncf %8 : vector<128x256xf32> to vector<128x256xbf16>
    %10 = vector.broadcast %2 : vector<512x1xf32> to vector<512x128xf32>
    %11 = arith.mulf %4, %10 : vector<512x128xf32>
    %12 = arith.truncf %11 : vector<512x128xf32> to vector<512x128xbf16>
    %cst = arith.constant dense<0.000000e+00> : vector<512x128xf32>
    %13 = tpu.matmul %1, %12, %cst {dimension_numbers = #tpu.dot_dimension_numbers<[1], [0], [0], [1], [0, 0, 1, 1], [], []>} : vector<512x512xbf16>, vector<512x128xbf16>, vector<512x128xf32> -> vector<512x128xf32>
    %14 = arith.truncf %13 : vector<512x128xf32> to vector<512x128xbf16>
    %cst_13 = arith.constant dense<0.000000e+00> : vector<512x256xf32>
    %15 = tpu.matmul %14, %6, %cst_13 {dimension_numbers = #tpu.dot_dimension_numbers<[1], [0], [0], [1], [0, 0, 1, 1], [], []>} : vector<512x128xbf16>, vector<128x256xbf16>, vector<512x256xf32> -> vector<512x256xf32>
    %16 = vector.broadcast %7 : vector<1x256xf32> to vector<512x256xf32>
    %17 = arith.addf %15, %16 : vector<512x256xf32>
    %18 = vector.broadcast %3 : vector<512x1xf32> to vector<512x256xf32>
    %19 = arith.mulf %17, %18 : vector<512x256xf32>
    %20 = arith.truncf %4 : vector<512x128xf32> to vector<512x128xbf16>
    %cst_14 = arith.constant dense<0.000000e+00> : vector<512x256xf32>
    %21 = tpu.matmul %20, %9, %cst_14 {dimension_numbers = #tpu.dot_dimension_numbers<[1], [0], [0], [1], [0, 0, 1, 1], [], []>} : vector<512x128xbf16>, vector<128x256xbf16>, vector<512x256xf32> -> vector<512x256xf32>
    %22 = arith.addf %19, %21 : vector<512x256xf32>
    %cst_15 = arith.constant 0.000000e+00 : f32
    %23 = vector.broadcast %cst_15 : f32 to vector<512x256xf32>
    %24 = arith.maximumf %22, %23 : vector<512x256xf32>
    %c0_16 = arith.constant 0 : index
    %c0_17 = arith.constant 0 : index
    %25 = vector.load %arg7[%c0_16, %c0_17] : memref<256x128xf32, #tpu.memory_space<vmem>>, vector<256x128xf32>
    %26 = arith.truncf %25 : vector<256x128xf32> to vector<256x128xbf16>
    %c0_18 = arith.constant 0 : index
    %c0_19 = arith.constant 0 : index
    %27 = vector.load %arg8[%c0_18, %c0_19] : memref<1x128xf32, #tpu.memory_space<vmem>>, vector<1x128xf32>
    %28 = vector.broadcast %2 : vector<512x1xf32> to vector<512x256xf32>
    %29 = arith.mulf %24, %28 : vector<512x256xf32>
    %30 = arith.truncf %29 : vector<512x256xf32> to vector<512x256xbf16>
    %cst_20 = arith.constant dense<0.000000e+00> : vector<512x128xf32>
    %31 = tpu.matmul %30, %26, %cst_20 {dimension_numbers = #tpu.dot_dimension_numbers<[1], [0], [0], [1], [0, 0, 1, 1], [], []>} : vector<512x256xbf16>, vector<256x128xbf16>, vector<512x128xf32> -> vector<512x128xf32>
    %32 = arith.truncf %31 : vector<512x128xf32> to vector<512x128xbf16>
    %cst_21 = arith.constant dense<0.000000e+00> : vector<512x128xf32>
    %33 = tpu.matmul %1, %32, %cst_21 {dimension_numbers = #tpu.dot_dimension_numbers<[1], [0], [0], [1], [0, 0, 1, 1], [], []>} : vector<512x512xbf16>, vector<512x128xbf16>, vector<512x128xf32> -> vector<512x128xf32>
    %34 = vector.broadcast %27 : vector<1x128xf32> to vector<512x128xf32>
    %35 = arith.addf %33, %34 : vector<512x128xf32>
    %36 = vector.broadcast %3 : vector<512x1xf32> to vector<512x128xf32>
    %37 = arith.mulf %35, %36 : vector<512x128xf32>
    %c0_22 = arith.constant 0 : index
    %c0_23 = arith.constant 0 : index
    %38 = vector.load %arg9[%c0_22, %c0_23] : memref<512x128xf32, #tpu.memory_space<vmem>>, vector<512x128xf32>
    tpu.vector_store %arg9[%c0_22, %c0_23], %37 {strides = array<i32>} : memref<512x128xf32, #tpu.memory_space<vmem>>, vector<512x128xf32>,
    return
  }
}

</mosaic_0001>

<bundles_post_ra>
// kernel: tpu_custom_call.1
= control target key start
LH: loop header
LB: loop body
LE: loop exit
PB: predicated region body
PF: predicated region fallthrough
CT: control target
= control target key end

     0   :  { %6 = vsyncpa [#allocation3], 0  ;;  %s482_s0 = inlined_call_operand.hbm [shape: f32[8,128], index: 0, kind: input, shape index: {}]   ;;  %s483_s1 = inlined_call_operand.hbm [shape: f32[16,128], index: 1, kind: output, shape index: {}]  }
   0x1   :  { %7 = vsyncpa [#allocation4], 0 }
   0x2   :  { %9 = vsyncpa [#allocation4 + $0x1], 0  ;;  %s352_s6 = smov 0   ;;  %s354_s7 = smov 0  }
   0x3   :  { %s356_s8 = smov 0   ;;  %s358_s9 = smov 0  }
   0x4 LB: > { %s373_s10 = sadd.s32 4294967295, %s338_s9   ;;  %s184_s11 = sadd.s32 4294967294, %s338_s9   ;;  %s338_s9 = sphi %s358_s9, %s499_s9   ;;  %s334_s8 = sphi %s356_s8, %s498_s8   ;;  %s330_s7 = sphi %s354_s7, %s497_s7   ;;  %s326_s6 = sphi %s352_s6, %s496_s6  }
   0x5   : > { %s377_s12 = sadd.s32 1, %s338_s9   ;;  %s43_s13 = sadd.s32 1, %s334_s8 }
   0x6   : > { %s40_s14 = ssub.s32 %s338_s9, %s377_s12  ;;  %p53_p0 = scmp.ne.s32.totalorder %s334_s8, %s330_s7 }
   0x7   : > { %p41_p1 = scmp.eq.s32.totalorder %s40_s14, 0  ;;  %p54_p2 = scmp.eq.s32.totalorder %s373_s10, 1 }
   0x8   : > { %p59_p3 = scmp.ne.s32.totalorder %s330_s7, %s326_s6  ;;  %p60_p4 = scmp.eq.s32.totalorder %s184_s11, 1 }
   0x9   : > { %s388_s15 = scalar_select %p41_p1, %s334_s8, %s43_s13  }
   0xa   : > { %p390_p5 = por %p54_p2, %p53_p0  ;;  %p394_p6 = por %p60_p4, %p59_p3 }
   0xb   : > { %p185_p7 = scmp.ge.s32.totalorder %s338_s9, 1  ;;  %p67_p8 = scmp.lt.s32.totalorder %s338_s9, 3 }
   0xc   : > { %s487_s16 = scalar_select %p390_p5, 1, 0 }
   0xd   : > { %s488_s17 = scalar_select %p394_p6, 1, 0 }
   0xe   : > { %p484_p9 = scmp.eq.s32.totalorder %s373_s10, 0  ;;  %p401_p10 = pnand %p185_p7, %p67_p8 }
   0xf   : > { %s340_s19 = smov [#allocation2]   ;;  %s244_s24 = scalar_lea.hbm %s482_s0, 128 }
  0x10   : > { %s489_s18 = scalar_select %p401_p10, 1, 0 }
  0x11   : > { %s80_s20 = sshll.u32 %s340_s19, 4  ;;  %p200_p11 = pneg %p401_p10  ;;  %s81_s20 = int_to_ptr.vmem [resolvable:$true] %s80_s20 }
  0x12   : > { %p245_p13 = scmp.ne.s32.totalorder %s482_s0, %s244_s24  ;;  %p251_p3 = scmp.lt.u32.totalorder %s244_s24, %s482_s0 }
  0x13   : > { %p409_p12 = pnand %p484_p9, %p200_p11 }
  0x15   : > { %p246_p0 = pneg %p409_p12 }
  0x17   : > { %p247_p1 = pnand %p246_p0, %p245_p13 }
  0x19   : > { %p248_p2 = pneg %p247_p1 }
  0x1b   : > { %p253_p4 = pnand %p251_p3, %p248_p2 }
  0x1d   : > { %256 = shalt.err (!%p253_p4)
}
  0x1e   : > { %s257_s29 = scalar_lea.vmem %s81_s20, 128  ;;  %p265_p9 = scmp.lt.s32.totalorder %s81_s20, %s81_s20 }
  0x1f   : > { %p258_p7 = scmp.ne.s32.totalorder %s81_s20, %s257_s29  ;;  %p266_p6 = scmp.lt.s32.totalorder %s257_s29, %s257_s29 }
  0x21   : > { %p260_p8 = pnand %p258_p7, %p246_p0  ;;  %p267_p5 = por %p266_p6, %p265_p9 }
  0x23   : > { %p261_p11 = pneg %p260_p8 }
  0x25   : > { %p268_p10 = pnand %p267_p5, %p261_p11 }
  0x27   : > { %271 = shalt.err (!%p268_p10)
}
  0x28   : > { %203 = dma.hbm_to_vmem [thread:$0]  (!%p409_p12), %s482_s0, 128, %s81_s20, [#allocation3]  }
  0x29   : > { %p491_p13 = scmp.ne.s32.totalorder %s489_s18, 0 }
  0x2a   : > { %p492_p1 = scmp.eq.s32.totalorder (!%p491_p13), %s373_s10, 0 }
  0x2b   : > { %93 = sbr.rel (%p491_p13) target bundleno = 77 (0x4d), region = 24 }
  0x32   : > { %317 = dma.done.wait (%p492_p1), [#allocation3], 128   ;;  %p493_p0 = pmov %p492_p1 }
  0x33   : > { %s105_s3 = sand.u32 1, %s330_s7   ;;  %s191_s13 = sshll.u32 %s373_s10, 7  ;;  %v108_v0 = vld [vmem:[#allocation2] sm:$0xff] }
  0x34   : > { %319 = vsyncadd (%p493_p0), [#allocation3], 4294967168  ;;  %s189_s4 = sshll.u32 %s105_s3, 3  ;;  %v109_v1 = vadd.f32 1.0, %v108_v0  ;;  %s442_s19 = scalar_lea.hbm %s483_s1, %s191_s13 }
  0x35   : > { %s107_s5 = scalar_lea.vmem [#allocation5], %s189_s4  ;;  %s112_s20 = scalar_lea.sflag [#allocation4], %s105_s3 }
  0x36   : > { %s125_s11 = sshll.u32 %s107_s5, 4  ;;  %110 = vst [vmem:[%s107_s5] sm:$0xff] %v109_v1  ;;  %p494_p6 = scmp.ne.s32.totalorder %s487_s16, 0  ;;  %s437_s11 = int_to_ptr.vmem [resolvable:$true] %s125_s11 }
  0x37   : > { %s272_s21 = scalar_lea.vmem %s437_s11, 128  ;;  %s341_s10 = smov [#allocation5]  }
  0x38   : > { %p273_p5 = scmp.ne.s32.totalorder %s437_s11, %s272_s21  ;;  %s276_s22 = sshll.u32 %s341_s10, 4  ;;  %s277_s22 = int_to_ptr.vmem [resolvable:$false] %s276_s22 }
  0x39   : > { %s278_s23 = scalar_lea.vmem %s277_s22, 256  ;;  %p279_p12 = scmp.lt.s32.totalorder %s437_s11, %s277_s22 }
  0x3a   : > { %p274_p9 = pnand %p273_p5, %p494_p6  ;;  %p280_p2 = scmp.lt.s32.totalorder %s278_s23, %s272_s21 }
  0x3c   : > { %p275_p10 = pneg %p274_p9  ;;  %p281_p3 = por %p280_p2, %p279_p12 }
  0x3e   : > { %p282_p4 = pnand %p281_p3, %p275_p10 }
  0x40   : > { %285 = shalt.err (!%p282_p4)
}
  0x41   : > { %s286_s24 = scalar_lea.hbm %s442_s19, 128  ;;  %s290_s27 = scalar_lea.hbm %s483_s1, 256 }
  0x42   : > { %p287_p7 = scmp.ne.s32.totalorder %s442_s19, %s286_s24  ;;  %p291_p13 = scmp.lt.u32.totalorder %s442_s19, %s483_s1 }
  0x43   : > { %p292_p1 = scmp.lt.u32.totalorder %s290_s27, %s286_s24  ;;  %p294_p5 = scmp.lt.u32.totalorder %s286_s24, %s442_s19 }
  0x44   : > { %p288_p8 = pnand %p287_p7, %p494_p6 }
  0x45   : > { %p293_p0 = por %p292_p1, %p291_p13 }
  0x46   : > { %p289_p11 = pneg %p288_p8 }
  0x47   : > { %p295_p9 = por %p294_p5, %p293_p0 }
  0x49   : > { %p296_p10 = pnand %p295_p9, %p289_p11 }
  0x4b   : > { %299 = shalt.err (!%p296_p10)
}
  0x4c   : > { %198 = dma.vmem_to_hbm [thread:$0]  (%p494_p6), %s437_s11, 128, %s442_s19, %s112_s20  }
  0x4d PF: > { %p210_p12 = scmp.ge.s32.totalorder %s338_s9, 2  ;;  %s137_s30 = sand.u32 1, %s326_s6  }
  0x4e   : > { %p495_p2 = scmp.ne.s32.totalorder %s488_s17, 0  ;;  %s138_s2 = scalar_lea.sflag [#allocation4], %s137_s30 }
  0x50   : > { %p205_p3 = pnand %p210_p12, %p495_p2 }
  0x52   : > { %321 = dma.done.wait (!%p205_p3), %s138_s2, 128  }
  0x53   : > { %323 = vsyncadd (!%p205_p3), %s138_s2, 4294967168  ;;  %p12_p4 = scmp.ge.s32.totalorder %s377_s12, 4   ;;  %s496_s6 = smov %s330_s7 }
  0x54   : > { %s497_s7 = smov %s334_s8  ;;  %s498_s8 = smov %s388_s15 }
  0x55   : > { %s499_s9 = smov %s377_s12  ;;  %14 = sbr.rel (!%p12_p4) target bundleno = 4 (0x4), region = 61 }
  0x5c   :  { %143 = vsyncpa [#allocation3], 1 }
  0x5d   :  { %145 = vsyncpa [#allocation3 + $0x1], 1 }
  0x5e   :  { %146 = vsyncpa [#allocation4], 1 }
  0x5f   :  { %148 = vsyncpa [#allocation4 + $0x1], 1 }

// kernel: tpu_custom_call.1
= control target key start
LH: loop header
LB: loop body
LE: loop exit
PB: predicated region body
PF: predicated region fallthrough
CT: control target
= control target key end

     0   :  { %14 = vsyncpa [#allocation3], 0  ;;  %s8047_s0 = inlined_call_operand.hbm [shape: s8[512,512], index: 0, kind: input, shape index: {}]   ;;  %s8048_s1 = inlined_call_operand.hbm [shape: f32[512,1], index: 1, kind: input, shape index: {}]   ;;  %s8049_s2 = inlined_call_operand.hbm [shape: f32[512,1], index: 2, kind: input, shape index: {}]   ;;  %s8050_s3 = inlined_call_operand.hbm [shape: f32[512,128], index: 3, kind: input, shape index: {}]   ;;  %s8051_s4 = inlined_call_operand.hbm [shape: f32[128,256], index: 4, kind: input, shape index: {}]   ;;  %s8052_s5 = inlined_call_operand.hbm [shape: f32[1,256], index: 5, kind: input, shape index: {}]   ;;  %s8053_s6 = inlined_call_operand.hbm [shape: f32[128,256], index: 6, kind: input, shape index: {}]   ;;  %s8054_s7 = inlined_call_operand.hbm [shape: f32[256,128], index: 7, kind: input, shape index: {}]   ;;  %s8055_s8 = inlined_call_operand.hbm [shape: f32[1,128], index: 8, kind: input, shape index: {}]   ;;  %s8056_s9 = inlined_call_operand.hbm [shape: f32[512,128], index: 9, kind: output, shape index: {}]  }
   0x1   :  { %15 = vsyncpa [#allocation6], 0 }
   0x2   :  { %16 = vsyncpa [#allocation9], 0 }
   0x3   :  { %17 = vsyncpa [#allocation12], 0 }
   0x4   :  { %18 = vsyncpa [#allocation15], 0 }
   0x5   :  { %19 = vsyncpa [#allocation4], 0  ;;  %s5039_s30 = smov [#allocation5]   ;;  %s4807_s13 = scalar_lea.hbm %s8048_s1, 8192 }
   0x6   :  { %s37_s10 = sshll.u32 %s5039_s30, 4  ;;  %p4808_p0 = scmp.ne.s32.totalorder %s8048_s1, %s4807_s13  ;;  %s38_s10 = int_to_ptr.vmem [resolvable:$true] %s37_s10 }
   0x7   :  { %p4811_p1 = scmp.lt.u32.totalorder %s4807_s13, %s8048_s1 }
   0x9   :  { %p4813_p2 = pnand %p4811_p1, %p4808_p0 }
   0xb   :  { %4816 = shalt.err (!%p4813_p2)
}
   0xc   :  { %s4817_s18 = scalar_lea.vmem %s38_s10, 8192  ;;  %p4822_p4 = scmp.lt.s32.totalorder %s38_s10, %s38_s10 }
   0xd   :  { %p4818_p3 = scmp.ne.s32.totalorder %s38_s10, %s4817_s18  ;;  %p4823_p5 = scmp.lt.s32.totalorder %s4817_s18, %s4817_s18 }
   0xf   :  { %p4824_p6 = por %p4823_p5, %p4822_p4 }
  0x11   :  { %p4825_p7 = pnand %p4824_p6, %p4818_p3 }
  0x13   :  { %4828 = shalt.err (!%p4825_p7)
}
  0x14   :  { %s5040_s19 = smov 128   ;;  %s5041_s20 = smov 8  }
  0x15   :  { %43 = dma.hbm_to_vmem [thread:$0]  %s8048_s1, 8192, %s38_s10, [#allocation6], %s5040_s19, %s5040_s19, %s5041_s20  }
  0x16   :  { %s5042_s23 = smov [#allocation8]   ;;  %s5043_s25 = smov [#allocation11]  }
  0x17   :  { %s61_s24 = sshll.u32 %s5042_s23, 4  ;;  %s86_s26 = sshll.u32 %s5043_s25, 4  ;;  %s62_s24 = int_to_ptr.vmem [resolvable:$true] %s61_s24  ;;  %s87_s26 = int_to_ptr.vmem [resolvable:$true] %s86_s26 }
  0x18   :  { %s4829_s29 = scalar_lea.hbm %s8050_s3, 8192 }
  0x19   :  { %p4830_p8 = scmp.ne.s32.totalorder %s8050_s3, %s4829_s29  ;;  %p4833_p9 = scmp.lt.u32.totalorder %s4829_s29, %s8050_s3 }
  0x1b   :  { %p4835_p10 = pnand %p4833_p9, %p4830_p8 }
  0x1d   :  { %4838 = shalt.err (!%p4835_p10)
}
  0x1e   :  { %s4839_s1 = scalar_lea.vmem %s62_s24, 8192  ;;  %p4844_p12 = scmp.lt.s32.totalorder %s62_s24, %s62_s24 }
  0x1f   :  { %p4840_p11 = scmp.ne.s32.totalorder %s62_s24, %s4839_s1  ;;  %p4845_p13 = scmp.lt.s32.totalorder %s4839_s1, %s4839_s1 }
  0x21   :  { %p4846_p0 = por %p4845_p13, %p4844_p12 }
  0x23   :  { %p4847_p1 = pnand %p4846_p0, %p4840_p11 }
  0x25   :  { %4850 = shalt.err (!%p4847_p1)
}
  0x26   :  { %67 = dma.hbm_to_vmem [thread:$0]  %s8050_s3, 8192, %s62_s24, [#allocation9], %s5040_s19, %s5040_s19, %s5041_s20  }
  0x27   :  { %s4851_s17 = scalar_lea.hbm %s8052_s5, 32 }
  0x28   :  { %p4852_p2 = scmp.ne.s32.totalorder %s8052_s5, %s4851_s17  ;;  %p4855_p3 = scmp.lt.u32.totalorder %s4851_s17, %s8052_s5 }
  0x2a   :  { %p4857_p4 = pnand %p4855_p3, %p4852_p2 }
  0x2c   :  { %4860 = shalt.err (!%p4857_p4)
}
  0x2d   :  { %s4861_s25 = scalar_lea.vmem %s87_s26, 32  ;;  %p4866_p6 = scmp.lt.s32.totalorder %s87_s26, %s87_s26 }
  0x2e   :  { %p4862_p5 = scmp.ne.s32.totalorder %s87_s26, %s4861_s25  ;;  %p4867_p7 = scmp.lt.s32.totalorder %s4861_s25, %s4861_s25 }
  0x30   :  { %p4868_p8 = por %p4867_p7, %p4866_p6 }
  0x32   :  { %p4869_p9 = pnand %p4868_p8, %p4862_p5 }
  0x34   :  { %4872 = shalt.err (!%p4869_p9)
}
  0x35   :  { %89 = dma.hbm_to_vmem [thread:$0]  %s8052_s5, 32, %s87_s26, [#allocation12]  }
  0x36   :  { %s5044_s27 = smov [#allocation14]   ;;  %s5045_s29 = smov [#allocation2]  }
  0x37   :  { %s107_s28 = sshll.u32 %s5044_s27, 4  ;;  %s25_s30 = sshll.u32 %s5045_s29, 4  ;;  %s108_s28 = int_to_ptr.vmem [resolvable:$true] %s107_s28  ;;  %s26_s30 = int_to_ptr.vmem [resolvable:$true] %s25_s30 }
  0x38   :  { %s4873_s13 = scalar_lea.hbm %s8054_s7, 4096 }
  0x39   :  { %p4874_p10 = scmp.ne.s32.totalorder %s8054_s7, %s4873_s13  ;;  %p4877_p11 = scmp.lt.u32.totalorder %s4873_s13, %s8054_s7 }
  0x3b   :  { %p4879_p12 = pnand %p4877_p11, %p4874_p10 }
  0x3d   :  { %4882 = shalt.err (!%p4879_p12)
}
  0x3e   :  { %s4883_s5 = scalar_lea.vmem %s108_s28, 4096  ;;  %p4888_p0 = scmp.lt.s32.totalorder %s108_s28, %s108_s28 }
  0x3f   :  { %p4884_p13 = scmp.ne.s32.totalorder %s108_s28, %s4883_s5  ;;  %p4889_p1 = scmp.lt.s32.totalorder %s4883_s5, %s4883_s5 }
  0x41   :  { %p4890_p2 = por %p4889_p1, %p4888_p0 }
  0x43   :  { %p4891_p3 = pnand %p4890_p2, %p4884_p13 }
  0x45   :  { %4894 = shalt.err (!%p4891_p3)
}
  0x46   :  { %113 = dma.hbm_to_vmem [thread:$0]  %s8054_s7, 4096, %s108_s28, [#allocation15], %s5040_s19, %s5040_s19, %s5041_s20  }
  0x47   :  { %s4895_s21 = scalar_lea.hbm %s8047_s0, 8192 }
  0x48   :  { %p4896_p4 = scmp.ne.s32.totalorder %s8047_s0, %s4895_s21  ;;  %p4899_p5 = scmp.lt.u32.totalorder %s4895_s21, %s8047_s0 }
  0x4a   :  { %p4901_p6 = pnand %p4899_p5, %p4896_p4 }
  0x4c   :  { %4904 = shalt.err (!%p4901_p6)
}
  0x4d   :  { %s4905_s24 = scalar_lea.vmem %s26_s30, 8192  ;;  %p4910_p8 = scmp.lt.s32.totalorder %s26_s30, %s26_s30 }
  0x4e   :  { %p4906_p7 = scmp.ne.s32.totalorder %s26_s30, %s4905_s24  ;;  %p4911_p9 = scmp.lt.s32.totalorder %s4905_s24, %s4905_s24 }
  0x50   :  { %p4912_p10 = por %p4911_p9, %p4910_p8 }
  0x52   :  { %p4913_p11 = pnand %p4912_p10, %p4906_p7 }
  0x54   :  { %4916 = shalt.err (!%p4913_p11)
}
  0x55   :  { %s5046_s7 = smov 512   ;;  %s5047_s27 = smov 32  }
  0x56   :  { %31 = dma.hbm_to_vmem [thread:$0]  %s8047_s0, 8192, %s26_s30, [#allocation3], %s5046_s7, %s5046_s7, %s5047_s27  }
  0x57   :  { %s5048_s11 = smov [#allocation7]   ;;  %s5049_s13 = smov [#allocation10]  }
  0x58   :  { %s49_s12 = sshll.u32 %s5048_s11, 4  ;;  %s73_s1 = sshll.u32 %s5049_s13, 4  ;;  %s50_s12 = int_to_ptr.vmem [resolvable:$true] %s49_s12  ;;  %s74_s1 = int_to_ptr.vmem [resolvable:$true] %s73_s1 }
  0x59   :  { %s4917_s15 = scalar_lea.hbm %s8049_s2, 8192 }
  0x5a   :  { %p4918_p12 = scmp.ne.s32.totalorder %s8049_s2, %s4917_s15  ;;  %p4921_p13 = scmp.lt.u32.totalorder %s4917_s15, %s8049_s2 }
  0x5c   :  { %p4923_p0 = pnand %p4921_p13, %p4918_p12 }
  0x5e   :  { %4926 = shalt.err (!%p4923_p0)
}
  0x5f   :  { %s4927_s0 = scalar_lea.vmem %s50_s12, 8192  ;;  %p4932_p2 = scmp.lt.s32.totalorder %s50_s12, %s50_s12 }
  0x60   :  { %p4928_p1 = scmp.ne.s32.totalorder %s50_s12, %s4927_s0  ;;  %p4933_p3 = scmp.lt.s32.totalorder %s4927_s0, %s4927_s0 }
  0x62   :  { %p4934_p4 = por %p4933_p3, %p4932_p2 }
  0x64   :  { %p4935_p5 = pnand %p4934_p4, %p4928_p1 }
  0x66   :  { %4938 = shalt.err (!%p4935_p5)
}
  0x67   :  { %55 = dma.hbm_to_vmem [thread:$0]  %s8049_s2, 8192, %s50_s12, [#allocation6], %s5040_s19, %s5040_s19, %s5041_s20  }
  0x68   :  { %s4939_s23 = scalar_lea.hbm %s8051_s4, 4096 }
  0x69   :  { %p4940_p6 = scmp.ne.s32.totalorder %s8051_s4, %s4939_s23  ;;  %p4943_p7 = scmp.lt.u32.totalorder %s4939_s23, %s8051_s4 }
  0x6b   :  { %p4945_p8 = pnand %p4943_p7, %p4940_p6 }
  0x6d   :  { %4948 = shalt.err (!%p4945_p8)
}
  0x6e   :  { %s4949_s27 = scalar_lea.vmem %s74_s1, 4096  ;;  %p4954_p10 = scmp.lt.s32.totalorder %s74_s1, %s74_s1 }
  0x6f   :  { %p4950_p9 = scmp.ne.s32.totalorder %s74_s1, %s4949_s27  ;;  %p4955_p11 = scmp.lt.s32.totalorder %s4949_s27, %s4949_s27 }
  0x71   :  { %p4956_p12 = por %p4955_p11, %p4954_p10 }
  0x73   :  { %p4957_p13 = pnand %p4956_p12, %p4950_p9 }
  0x75   :  { %4960 = shalt.err (!%p4957_p13)
}
  0x76   :  { %s5050_s2 = smov 256   ;;  %s5051_s28 = smov 16  }
  0x77   :  { %79 = dma.hbm_to_vmem [thread:$0]  %s8051_s4, 4096, %s74_s1, [#allocation9], %s5050_s2, %s5050_s2, %s5051_s28  }
  0x78   :  { %s5052_s12 = smov [#allocation13]   ;;  %s5053_s10 = smov [#allocation16]  }
  0x79   :  { %s95_s13 = sshll.u32 %s5052_s12, 4  ;;  %s120_s14 = sshll.u32 %s5053_s10, 4  ;;  %s96_s13 = int_to_ptr.vmem [resolvable:$true] %s95_s13  ;;  %s121_s14 = int_to_ptr.vmem [resolvable:$true] %s120_s14 }
  0x7a   :  { %s4961_s26 = scalar_lea.hbm %s8053_s6, 4096 }
  0x7b   :  { %p4962_p0 = scmp.ne.s32.totalorder %s8053_s6, %s4961_s26  ;;  %p4965_p1 = scmp.lt.u32.totalorder %s4961_s26, %s8053_s6 }
  0x7d   :  { %p4967_p2 = pnand %p4965_p1, %p4962_p0 }
  0x7f   :  { %4970 = shalt.err (!%p4967_p2)
}
  0x80   :  { %s4971_s4 = scalar_lea.vmem %s96_s13, 4096  ;;  %p4976_p4 = scmp.lt.s32.totalorder %s96_s13, %s96_s13 }
  0x81   :  { %p4972_p3 = scmp.ne.s32.totalorder %s96_s13, %s4971_s4  ;;  %p4977_p5 = scmp.lt.s32.totalorder %s4971_s4, %s4971_s4 }
  0x83   :  { %p4978_p6 = por %p4977_p5, %p4976_p4 }
  0x85   :  { %p4979_p7 = pnand %p4978_p6, %p4972_p3 }
  0x87   :  { %4982 = shalt.err (!%p4979_p7)
}
  0x88   :  { %101 = dma.hbm_to_vmem [thread:$0]  %s8053_s6, 4096, %s96_s13, [#allocation12], %s5050_s2, %s5050_s2, %s5051_s28  }
  0x89   :  { %s4983_s23 = scalar_lea.hbm %s8055_s8, 16 }
  0x8a   :  { %p4984_p8 = scmp.ne.s32.totalorder %s8055_s8, %s4983_s23  ;;  %p4987_p9 = scmp.lt.u32.totalorder %s4983_s23, %s8055_s8 }
  0x8c   :  { %p4989_p10 = pnand %p4987_p9, %p4984_p8 }
  0x8e   :  { %4992 = shalt.err (!%p4989_p10)
}
  0x8f   :  { %s4993_s27 = scalar_lea.vmem %s121_s14, 16  ;;  %s4997_s29 = scalar_lea.vmem %s121_s14, 32 }
  0x90   :  { %p4994_p11 = scmp.ne.s32.totalorder %s121_s14, %s4993_s27  ;;  %p4998_p12 = scmp.lt.s32.totalorder %s121_s14, %s121_s14 }
  0x91   :  { %p4999_p13 = scmp.lt.s32.totalorder %s4997_s29, %s4993_s27 }
  0x93   :  { %p5000_p0 = por %p4999_p13, %p4998_p12 }
  0x95   :  { %p5001_p1 = pnand %p5000_p0, %p4994_p11 }
  0x97   :  { %5004 = shalt.err (!%p5001_p1)
}
  0x98   :  { %123 = dma.hbm_to_vmem [thread:$0]  %s8055_s8, 16, %s121_s14, [#allocation15]  }
  0x99   :  { %5027 = dma.done.wait [#allocation3], 8192  }
  0x9a   :  { %5028 = vsyncadd [#allocation3], 4294959104 }
  0x9b   :  { %5029 = dma.done.wait [#allocation6], 16384  }
  0x9c   :  { %5030 = vsyncadd [#allocation6], 4294950912 }
  0x9d   :  { %5031 = dma.done.wait [#allocation9], 12288  }
  0x9e   :  { %5032 = vsyncadd [#allocation9], 4294955008 }
  0x9f   :  { %5033 = dma.done.wait [#allocation12], 4128  }
  0xa0   :  { %5034 = vsyncadd [#allocation12], 4294963168 }
  0xa1   :  { %5035 = dma.done.wait [#allocation15], 4112  }
  0xa2   :  { %5036 = vsyncadd [#allocation15], 4294963184  ;;  %v8069_v0 = vmov 0   ;;  %v346_v1 = vld [vmem:[#allocation5 + $0x10] sm:$0xff]  ;;  %v344_v2 = vld [vmem:[#allocation5] sm:$0xff]  ;;  %s5055_s8 = smov [#allocation17]  }
  0xa3   :  { %4742 = vset.pattern.permute.xlu1 %v8069_v0  ;;  %4741 = vset.pattern.permute.xlu0 %v8069_v0  ;;  %v347_v3 = vld [vmem:[#allocation5 + $0x18] sm:$0xff]  ;;  %v345_v4 = vld [vmem:[#allocation5 + $0x8] sm:$0xff]  ;;  %v348_v6 = vld [vmem:[#allocation5 + $0x20] sm:$0xff]  ;;  %s4391_s28 = sshll.u32 %s5055_s8, 4  ;;  %s4392_s28 = int_to_ptr.vmem [resolvable:$true] %s4391_s28 }
  0xa4   :  { %1049 = vmatprep.subr.bf16.mxu0 %v8069_v0  ;;  %1702 = vmatprep.mubr.bf16.mxu1 %v8069_v0  ;;  %v349_v5 = vld [vmem:[#allocation5 + $0x28] sm:$0xff]  ;;  %v351_v7 = vld [vmem:[#allocation5 + $0x38] sm:$0xff]  ;;  %v350_v8 = vld [vmem:[#allocation5 + $0x30] sm:$0xff]  ;;  %s5005_s11 = scalar_lea.vmem %s4392_s28, 8192  ;;  %p5010_p3 = scmp.lt.s32.totalorder %s4392_s28, %s4392_s28 }
  0xa5   :  { %645 = vperm.xlu1 %4742, %v346_v1   ;;  %635 = vperm.xlu0 %4741, %v344_v2   ;;  %v353_v9 = vld [vmem:[#allocation5 + $0x48] sm:$0xff]  ;;  %v352_v10 = vld [vmem:[#allocation5 + $0x40] sm:$0xff]  ;;  %v355_v11 = vld [vmem:[#allocation5 + $0x58] sm:$0xff]  ;;  %p5006_p2 = scmp.ne.s32.totalorder %s4392_s28, %s5005_s11  ;;  %p5011_p4 = scmp.lt.s32.totalorder %s5005_s11, %s5005_s11 }
  0xa6   :  { %v354_v12 = vld [vmem:[#allocation5 + $0x50] sm:$0xff]  ;;  %v357_v13 = vld [vmem:[#allocation5 + $0x68] sm:$0xff]  ;;  %v356_v14 = vld [vmem:[#allocation5 + $0x60] sm:$0xff] }
  0xa7   :  { %v359_v15 = vld [vmem:[#allocation5 + $0x78] sm:$0xff]  ;;  %v358_v16 = vld [vmem:[#allocation5 + $0x70] sm:$0xff]  ;;  %v361_v17 = vld [vmem:[#allocation5 + $0x88] sm:$0xff]  ;;  %p5012_p5 = por %p5011_p4, %p5010_p3 }
  0xa8   :  { %v360_v18 = vld [vmem:[#allocation5 + $0x80] sm:$0xff]  ;;  %v363_v19 = vld [vmem:[#allocation5 + $0x98] sm:$0xff]  ;;  %v362_v20 = vld [vmem:[#allocation5 + $0x90] sm:$0xff] }
  0xa9   :  { %650 = vperm.xlu1 %4742, %v347_v3   ;;  %640 = vperm.xlu0 %4741, %v345_v4   ;;  %v365_v21 = vld [vmem:[#allocation5 + $0xa8] sm:$0xff]  ;;  %v364_v22 = vld [vmem:[#allocation5 + $0xa0] sm:$0xff]  ;;  %v367_v23 = vld [vmem:[#allocation5 + $0xb8] sm:$0xff]  ;;  %p5013_p6 = pnand %p5012_p5, %p5006_p2 }
  0xaa   :  { %v366_v24 = vld [vmem:[#allocation5 + $0xb0] sm:$0xff]  ;;  %v369_v25 = vld [vmem:[#allocation5 + $0xc8] sm:$0xff]  ;;  %v368_v26 = vld [vmem:[#allocation5 + $0xc0] sm:$0xff] }
  0xab   :  { %v371_v27 = vld [vmem:[#allocation5 + $0xd8] sm:$0xff]  ;;  %v370_v28 = vld [vmem:[#allocation5 + $0xd0] sm:$0xff]  ;;  %v373_v29 = vld [vmem:[#allocation5 + $0xe8] sm:$0xff] }
  0xac   :  { %v372_v30 = vld [vmem:[#allocation5 + $0xe0] sm:$0xff]  ;;  %v375_v31 = vld [vmem:[#allocation5 + $0xf8] sm:$0xff]  ;;  %v374_v32 = vld [vmem:[#allocation5 + $0xf0] sm:$0xff] }
  0xad   :  { %660 = vperm.xlu1 %4742, %v349_v5   ;;  %655 = vperm.xlu0 %4741, %v348_v6   ;;  %v377_v33 = vld [vmem:[#allocation5 + $0x108] sm:$0xff]  ;;  %v376_v34 = vld [vmem:[#allocation5 + $0x100] sm:$0xff]  ;;  %v379_v35 = vld [vmem:[#allocation5 + $0x118] sm:$0xff] }
  0xae   :  { %v378_v36 = vld [vmem:[#allocation5 + $0x110] sm:$0xff]  ;;  %v381_v37 = vld [vmem:[#allocation5 + $0x128] sm:$0xff]  ;;  %v380_v38 = vld [vmem:[#allocation5 + $0x120] sm:$0xff] }
  0xaf   :  { %v5230_v39 = vld [vmem:[#allocation2 + $0x8] sm:$0xff]  ;;  %v383_v41 = vld [vmem:[#allocation5 + $0x138] sm:$0xff]  ;;  %v382_v42 = vld [vmem:[#allocation5 + $0x130] sm:$0xff] }
  0xb0   :  { %8457 = vst [vmem:[#allocation24_spill] sm:$0xff] %v5230_v39  ;;  %v8061_v40 = vunpack.c.l.s8.bf16 %v5230_v39  ;;  %v385_v43 = vld [vmem:[#allocation5 + $0x148] sm:$0xff]  ;;  %v384_v44 = vld [vmem:[#allocation5 + $0x140] sm:$0xff]  ;;  %v387_v45 = vld [vmem:[#allocation5 + $0x158] sm:$0xff] }
  0xb1   :  { %670 = vperm.xlu1 %4742, %v351_v7   ;;  %665 = vperm.xlu0 %4741, %v350_v8   ;;  %v386_v46 = vld [vmem:[#allocation5 + $0x150] sm:$0xff]  ;;  %v389_v47 = vld [vmem:[#allocation5 + $0x168] sm:$0xff]  ;;  %v388_v48 = vld [vmem:[#allocation5 + $0x160] sm:$0xff] }
  0xb2   :  { %1081 = vmatprep.mubr.bf16.mxu0 %v8061_v40  ;;  %v391_v49 = vld [vmem:[#allocation5 + $0x178] sm:$0xff]  ;;  %v390_v50 = vld [vmem:[#allocation5 + $0x170] sm:$0xff]  ;;  %v393_v51 = vld [vmem:[#allocation5 + $0x188] sm:$0xff] }
  0xb3   :  { %v392_v52 = vld [vmem:[#allocation5 + $0x180] sm:$0xff]  ;;  %v395_v53 = vld [vmem:[#allocation5 + $0x198] sm:$0xff]  ;;  %v394_v54 = vld [vmem:[#allocation5 + $0x190] sm:$0xff] }
  0xb4   :  { %v397_v55 = vld [vmem:[#allocation5 + $0x1a8] sm:$0xff]  ;;  %v396_v56 = vld [vmem:[#allocation5 + $0x1a0] sm:$0xff]  ;;  %v399_v57 = vld [vmem:[#allocation5 + $0x1b8] sm:$0xff] }
  0xb5   :  { %680 = vperm.xlu1 %4742, %v353_v9   ;;  %675 = vperm.xlu0 %4741, %v352_v10   ;;  %v398_v58 = vld [vmem:[#allocation5 + $0x1b0] sm:$0xff]  ;;  %v401_v59 = vld [vmem:[#allocation5 + $0x1c8] sm:$0xff]  ;;  %v400_v60 = vld [vmem:[#allocation5 + $0x1c0] sm:$0xff] }
  0xb6   :  { %v403_v61 = vld [vmem:[#allocation5 + $0x1d8] sm:$0xff]  ;;  %v402_v62 = vld [vmem:[#allocation5 + $0x1d0] sm:$0xff]  ;;  %v405_v63 = vld [vmem:[#allocation5 + $0x1e8] sm:$0xff] }
  0xb7   :  { %v404_v1 = vld [vmem:[#allocation5 + $0x1e0] sm:$0xff]  ;;  %v407_v2 = vld [vmem:[#allocation5 + $0x1f8] sm:$0xff]  ;;  %v406_v3 = vld [vmem:[#allocation5 + $0x1f0] sm:$0xff] }
  0xb8   :  { %v409_v4 = vld [vmem:[#allocation7 + $0x8] sm:$0xff]  ;;  %v408_v5 = vld [vmem:[#allocation7] sm:$0xff]  ;;  %v411_v8 = vld [vmem:[#allocation7 + $0x18] sm:$0xff] }
  0xb9   :  { %690 = vperm.xlu1 %4742, %v355_v11   ;;  %685 = vperm.xlu0 %4741, %v354_v12   ;;  %v410_v9 = vld [vmem:[#allocation7 + $0x10] sm:$0xff]  ;;  %v472_v10 = vld [vmem:[#allocation8] sm:$0xff]  ;;  %v473_v11 = vld [vmem:[#allocation8 + $0x8] sm:$0xff] }
  0xbd   :  { %700 = vperm.xlu1 %4742, %v357_v13   ;;  %695 = vperm.xlu0 %4741, %v356_v14   ;;  %v474_v14 = vld [vmem:[#allocation8 + $0x10] sm:$0xff] }
  0xc1   :  { %710 = vperm.xlu1 %4742, %v359_v15   ;;  %705 = vperm.xlu0 %4741, %v358_v16   ;;  %v475_v15 = vld [vmem:[#allocation8 + $0x18] sm:$0xff] }
  0xc5   :  { %720 = vperm.xlu1 %4742, %v361_v17   ;;  %715 = vperm.xlu0 %4741, %v360_v18   ;;  %v413_v18 = vld [vmem:[#allocation7 + $0x28] sm:$0xff] }
  0xc9   :  { %730 = vperm.xlu1 %4742, %v363_v19   ;;  %725 = vperm.xlu0 %4741, %v362_v20   ;;  %v412_v19 = vld [vmem:[#allocation7 + $0x20] sm:$0xff] }
  0xcd   :  { %740 = vperm.xlu1 %4742, %v365_v21   ;;  %735 = vperm.xlu0 %4741, %v364_v22  }
  0xd1   :  { %750 = vperm.xlu1 %4742, %v367_v23   ;;  %745 = vperm.xlu0 %4741, %v366_v24  }
  0xd5   :  { %760 = vperm.xlu1 %4742, %v369_v25   ;;  %755 = vperm.xlu0 %4741, %v368_v26   ;;  %v477_v25 = vld [vmem:[#allocation8 + $0x28] sm:$0xff]  ;;  %v476_v26 = vld [vmem:[#allocation8 + $0x20] sm:$0xff] }
  0xd9   :  { %770 = vperm.xlu1 %4742, %v371_v27   ;;  %765 = vperm.xlu0 %4741, %v370_v28   ;;  %v415_v27 = vld [vmem:[#allocation7 + $0x38] sm:$0xff]  ;;  %v414_v28 = vld [vmem:[#allocation7 + $0x30] sm:$0xff] }
  0xdd   :  { %780 = vperm.xlu1 %4742, %v373_v29   ;;  %775 = vperm.xlu0 %4741, %v372_v30  }
  0xe1   :  { %790 = vperm.xlu1 %4742, %v375_v31   ;;  %785 = vperm.xlu0 %4741, %v374_v32  }
  0xe5   :  { %800 = vperm.xlu1 %4742, %v377_v33   ;;  %795 = vperm.xlu0 %4741, %v376_v34   ;;  %v479_v34 = vld [vmem:[#allocation8 + $0x38] sm:$0xff] }
  0xe9   :  { %810 = vperm.xlu1 %4742, %v379_v35   ;;  %805 = vperm.xlu0 %4741, %v378_v36   ;;  %v478_v35 = vld [vmem:[#allocation8 + $0x30] sm:$0xff]  ;;  %v417_v36 = vld [vmem:[#allocation7 + $0x48] sm:$0xff] }
  0xed   :  { %820 = vperm.xlu1 %4742, %v381_v37   ;;  %815 = vperm.xlu0 %4741, %v380_v38   ;;  %v416_v37 = vld [vmem:[#allocation7 + $0x40] sm:$0xff] }
  0xf1   :  { %830 = vperm.xlu1 %4742, %v383_v41   ;;  %825 = vperm.xlu0 %4741, %v382_v42  }
  0xf5   :  { %840 = vperm.xlu1 %4742, %v385_v43   ;;  %835 = vperm.xlu0 %4741, %v384_v44  }
  0xf9   :  { %850 = vperm.xlu1 %4742, %v387_v45   ;;  %845 = vperm.xlu0 %4741, %v386_v46   ;;  %v481_v45 = vld [vmem:[#allocation8 + $0x48] sm:$0xff]  ;;  %v480_v46 = vld [vmem:[#allocation8 + $0x40] sm:$0xff] }
  0xfd   :  { %860 = vperm.xlu1 %4742, %v389_v47   ;;  %855 = vperm.xlu0 %4741, %v388_v48   ;;  %v419_v47 = vld [vmem:[#allocation7 + $0x58] sm:$0xff]  ;;  %v418_v48 = vld [vmem:[#allocation7 + $0x50] sm:$0xff] }
 0x101   :  { %870 = vperm.xlu1 %4742, %v391_v49   ;;  %865 = vperm.xlu0 %4741, %v390_v50  }
 0x105   :  { %880 = vperm.xlu1 %4742, %v393_v51   ;;  %875 = vperm.xlu0 %4741, %v392_v52  }
 0x109   :  { %890 = vperm.xlu1 %4742, %v395_v53   ;;  %885 = vperm.xlu0 %4741, %v394_v54   ;;  %v483_v54 = vld [vmem:[#allocation8 + $0x58] sm:$0xff] }
 0x10d   :  { %900 = vperm.xlu1 %4742, %v397_v55   ;;  %895 = vperm.xlu0 %4741, %v396_v56   ;;  %v482_v55 = vld [vmem:[#allocation8 + $0x50] sm:$0xff]  ;;  %v421_v56 = vld [vmem:[#allocation7 + $0x68] sm:$0xff] }
 0x111   :  { %910 = vperm.xlu1 %4742, %v399_v57   ;;  %905 = vperm.xlu0 %4741, %v398_v58   ;;  %v420_v57 = vld [vmem:[#allocation7 + $0x60] sm:$0xff] }
 0x115   :  { %920 = vperm.xlu1 %4742, %v401_v59   ;;  %915 = vperm.xlu0 %4741, %v400_v60  }
 0x119   :  { %930 = vperm.xlu1 %4742, %v403_v61   ;;  %925 = vperm.xlu0 %4741, %v402_v62  }
 0x11d   :  { %940 = vperm.xlu1 %4742, %v405_v63   ;;  %935 = vperm.xlu0 %4741, %v404_v1   ;;  %v485_v63 = vld [vmem:[#allocation8 + $0x68] sm:$0xff]  ;;  %v484_v1 = vld [vmem:[#allocation8 + $0x60] sm:$0xff] }
 0x121   :  { %950 = vperm.xlu1 %4742, %v407_v2   ;;  %945 = vperm.xlu0 %4741, %v406_v3   ;;  %v423_v2 = vld [vmem:[#allocation7 + $0x78] sm:$0xff]  ;;  %v422_v3 = vld [vmem:[#allocation7 + $0x70] sm:$0xff] }
 0x124   :  { %v5235_v6 = vpop.permute.xlu1 %645  ;;  %v5237_v7 = vpop.permute.xlu0 %635 }
 0x125   :  { %2030 = vperm.xlu1 %4742, %v409_v4   ;;  %2025 = vperm.xlu0 %4741, %v408_v5   ;;  %v953_v16 = vmul.f32 %v5237_v7, %v472_v10  ;;  %v955_v21 = vmul.f32 %v5235_v6, %v474_v14  ;;  %v486_v14 = vld [vmem:[#allocation8 + $0x70] sm:$0xff] }
 0x128   :  { %v5239_v12 = vpop.permute.xlu1 %650  ;;  %v5241_v13 = vpop.permute.xlu0 %640 }
 0x129   :  { %2040 = vperm.xlu1 %4742, %v411_v8   ;;  %2035 = vperm.xlu0 %4741, %v410_v9   ;;  %v954_v17 = vmul.f32 %v5241_v13, %v473_v11  ;;  %v956_v22 = vmul.f32 %v5239_v12, %v475_v15  ;;  %v487_v11 = vld [vmem:[#allocation8 + $0x78] sm:$0xff]  ;;  %v425_v15 = vld [vmem:[#allocation7 + $0x88] sm:$0xff] }
 0x12b   :  { %v1017_v20 = vpack.c.bf16 %v954_v17, %v953_v16  ;;  %v1018_v33 = vpack.c.bf16 %v956_v22, %v955_v21  ;;  %v424_v16 = vld [vmem:[#allocation7 + $0x80] sm:$0xff]  ;;  %v489_v22 = vld [vmem:[#allocation8 + $0x88] sm:$0xff] }
 0x12c   :  { %v5247_v23 = vpop.permute.xlu1 %660  ;;  %v5249_v24 = vpop.permute.xlu0 %655 }
 0x12d   :  { %2050 = vperm.xlu1 %4742, %v413_v18   ;;  %2045 = vperm.xlu0 %4741, %v412_v19   ;;  %v958_v29 = vmul.f32 %v5247_v23, %v477_v25  ;;  %v957_v30 = vmul.f32 %v5249_v24, %v476_v26  ;;  %v488_v25 = vld [vmem:[#allocation8 + $0x80] sm:$0xff]  ;;  %v427_v26 = vld [vmem:[#allocation7 + $0x98] sm:$0xff] }
 0x12e   :  { %1050 = vmatpush1.bf16.msra.mxu0 %v1017_v20 }
 0x12f   :  { %1051 = vmatprep.subr.bf16.mxu0 %v8069_v0  ;;  %v1019_v44 = vpack.c.bf16 %v958_v29, %v957_v30 }
 0x130   :  { %v5254_v31 = vpop.permute.xlu1 %670  ;;  %v5256_v32 = vpop.permute.xlu0 %665 }
 0x131   :  { %2060 = vperm.xlu1 %4742, %v415_v27   ;;  %2055 = vperm.xlu0 %4741, %v414_v28   ;;  %v960_v38 = vmul.f32 %v5254_v31, %v479_v34  ;;  %v959_v41 = vmul.f32 %v5256_v32, %v478_v35  ;;  %v426_v27 = vld [vmem:[#allocation7 + $0x90] sm:$0xff]  ;;  %v491_v35 = vld [vmem:[#allocation8 + $0x98] sm:$0xff] }
 0x132   :  { %1052 = vmatpush1.bf16.msra.mxu0 %v1018_v33 }
 0x133   :  { %1053 = vmatprep.subr.bf16.mxu0 %v8069_v0  ;;  %v1020_v53 = vpack.c.bf16 %v960_v38, %v959_v41  ;;  %v428_v38 = vld [vmem:[#allocation7 + $0xa0] sm:$0xff] }
 0x134   :  { %v5261_v42 = vpop.permute.xlu1 %680  ;;  %v5263_v43 = vpop.permute.xlu0 %675 }
 0x135   :  { %2070 = vperm.xlu1 %4742, %v417_v36   ;;  %2065 = vperm.xlu0 %4741, %v416_v37   ;;  %v962_v49 = vmul.f32 %v5261_v42, %v481_v45  ;;  %v961_v50 = vmul.f32 %v5263_v43, %v480_v46  ;;  %v490_v36 = vld [vmem:[#allocation8 + $0x90] sm:$0xff]  ;;  %v429_v37 = vld [vmem:[#allocation7 + $0xa8] sm:$0xff] }
 0x136   :  { %1054 = vmatpush1.bf16.msra.mxu0 %v1019_v44 }
 0x137   :  { %1055 = vmatprep.subr.bf16.mxu0 %v8069_v0  ;;  %v1021_v62 = vpack.c.bf16 %v962_v49, %v961_v50  ;;  %v492_v49 = vld [vmem:[#allocation8 + $0xa0] sm:$0xff]  ;;  %v431_v50 = vld [vmem:[#allocation7 + $0xb8] sm:$0xff] }
 0x138   :  { %v5268_v51 = vpop.permute.xlu1 %690  ;;  %v5270_v52 = vpop.permute.xlu0 %685 }
 0x139   :  { %2080 = vperm.xlu1 %4742, %v419_v47   ;;  %2075 = vperm.xlu0 %4741, %v418_v48   ;;  %v964_v58 = vmul.f32 %v5268_v51, %v483_v54  ;;  %v963_v59 = vmul.f32 %v5270_v52, %v482_v55  ;;  %v493_v48 = vld [vmem:[#allocation8 + $0xa8] sm:$0xff] }
 0x13a   :  { %1056 = vmatpush1.bf16.msra.mxu0 %v1020_v53  ;;  %v430_v53 = vld [vmem:[#allocation7 + $0xb0] sm:$0xff] }
 0x13b   :  { %1057 = vmatprep.subr.bf16.mxu0 %v8069_v0  ;;  %v1022_v10 = vpack.c.bf16 %v964_v58, %v963_v59  ;;  %v495_v59 = vld [vmem:[#allocation8 + $0xb8] sm:$0xff] }
 0x13c   :  { %v5275_v60 = vpop.permute.xlu1 %700  ;;  %v5277_v61 = vpop.permute.xlu0 %695 }
 0x13d   :  { %8458 = vst [vmem:[#allocation25_spill] sm:$0xff] %v5275_v60  ;;  %8459 = vst [vmem:[#allocation26_spill] sm:$0xff] %v5277_v61  ;;  %2090 = vperm.xlu1 %4742, %v421_v56   ;;  %2085 = vperm.xlu0 %4741, %v420_v57   ;;  %v966_v4 = vmul.f32 %v5275_v60, %v485_v63  ;;  %v965_v5 = vmul.f32 %v5277_v61, %v484_v1  ;;  %v433_v63 = vld [vmem:[#allocation7 + $0xc8] sm:$0xff]  ;;  %v432_v1 = vld [vmem:[#allocation7 + $0xc0] sm:$0xff] }
 0x13e   :  { %1058 = vmatpush1.bf16.msra.mxu0 %v1021_v62  ;;  %v494_v62 = vld [vmem:[#allocation8 + $0xb0] sm:$0xff] }
 0x13f   :  { %1059 = vmatprep.subr.bf16.mxu0 %v8069_v0  ;;  %v1023_v21 = vpack.c.bf16 %v966_v4, %v965_v5 }
 0x140   :  { %v5282_v8 = vpop.permute.xlu1 %710  ;;  %v5284_v9 = vpop.permute.xlu0 %705 }
 0x141   :  { %8460 = vst [vmem:[#allocation27_spill] sm:$0xff] %v5282_v8  ;;  %8461 = vst [vmem:[#allocation28_spill] sm:$0xff] %v5284_v9  ;;  %2100 = vperm.xlu1 %4742, %v423_v2   ;;  %2095 = vperm.xlu0 %4741, %v422_v3   ;;  %v968_v17 = vmul.f32 %v5282_v8, %v487_v11  ;;  %v967_v18 = vmul.f32 %v5284_v9, %v486_v14  ;;  %v497_v11 = vld [vmem:[#allocation8 + $0xc8] sm:$0xff]  ;;  %v496_v14 = vld [vmem:[#allocation8 + $0xc0] sm:$0xff] }
 0x142   :  { %1060 = vmatpush1.bf16.msra.mxu0 %v1022_v10  ;;  %v3118_v9 = vld [vmem:[#allocation14 + $0x30] sm:$0xff] }
 0x143   :  { %1061 = vmatprep.subr.bf16.mxu0 %v8069_v0  ;;  %v1024_v34 = vpack.c.bf16 %v968_v17, %v967_v18 }
 0x144   :  { %v5289_v19 = vpop.permute.xlu1 %720  ;;  %v5291_v20 = vpop.permute.xlu0 %715 }
 0x145   :  { %8462 = vst [vmem:[#allocation29_spill] sm:$0xff] %v5289_v19  ;;  %8463 = vst [vmem:[#allocation30_spill] sm:$0xff] %v5291_v20  ;;  %2110 = vperm.xlu1 %4742, %v425_v15   ;;  %2105 = vperm.xlu0 %4741, %v424_v16   ;;  %v970_v28 = vmul.f32 %v5289_v19, %v489_v22  ;;  %v969_v29 = vmul.f32 %v5291_v20, %v488_v25  ;;  %v435_v15 = vld [vmem:[#allocation7 + $0xd8] sm:$0xff]  ;;  %v434_v16 = vld [vmem:[#allocation7 + $0xd0] sm:$0xff] }
 0x146   :  { %1062 = vmatpush1.bf16.msra.mxu0 %v1023_v21  ;;  %v4752_v19 = vld [vmem:[#allocation8 + $0x40] sm:$0xff] }
 0x147   :  { %1063 = vmatprep.subr.bf16.mxu0 %v8069_v0  ;;  %v1025_v47 = vpack.c.bf16 %v970_v28, %v969_v29  ;;  %v437_v28 = vld [vmem:[#allocation7 + $0xe8] sm:$0xff]  ;;  %v436_v29 = vld [vmem:[#allocation7 + $0xe0] sm:$0xff] }
 0x148   :  { %v5296_v30 = vpop.permute.xlu1 %730  ;;  %v5298_v33 = vpop.permute.xlu0 %725 }
 0x149   :  { %8464 = vst [vmem:[#allocation31_spill] sm:$0xff] %v5296_v30  ;;  %8465 = vst [vmem:[#allocation32_spill] sm:$0xff] %v5298_v33  ;;  %2120 = vperm.xlu1 %4742, %v427_v26   ;;  %2115 = vperm.xlu0 %4741, %v426_v27   ;;  %v972_v41 = vmul.f32 %v5296_v30, %v491_v35  ;;  %v971_v44 = vmul.f32 %v5298_v33, %v490_v36  ;;  %v499_v26 = vld [vmem:[#allocation8 + $0xd8] sm:$0xff]  ;;  %v498_v27 = vld [vmem:[#allocation8 + $0xd0] sm:$0xff] }
 0x14a   :  { %1064 = vmatpush1.bf16.msra.mxu0 %v1024_v34  ;;  %v4751_v33 = vld [vmem:[#allocation8 + $0x48] sm:$0xff] }
 0x14b   :  { %1065 = vmatprep.subr.bf16.mxu0 %v8069_v0  ;;  %v1026_v58 = vpack.c.bf16 %v972_v41, %v971_v44  ;;  %v501_v41 = vld [vmem:[#allocation8 + $0xe8] sm:$0xff]  ;;  %v500_v44 = vld [vmem:[#allocation8 + $0xe0] sm:$0xff] }
 0x14c   :  { %v5303_v45 = vpop.permute.xlu1 %740  ;;  %v5305_v46 = vpop.permute.xlu0 %735 }
 0x14d   :  { %8466 = vst [vmem:[#allocation33_spill] sm:$0xff] %v5303_v45  ;;  %8467 = vst [vmem:[#allocation34_spill] sm:$0xff] %v5305_v46  ;;  %2130 = vperm.xlu1 %4742, %v429_v37   ;;  %2125 = vperm.xlu0 %4741, %v428_v38   ;;  %v974_v54 = vmul.f32 %v5303_v45, %v493_v48  ;;  %v973_v55 = vmul.f32 %v5305_v46, %v492_v49  ;;  %v438_v48 = vld [vmem:[#allocation7 + $0xf0] sm:$0xff]  ;;  %v3116_v46 = vld [vmem:[#allocation14 + $0x20] sm:$0xff] }
 0x14e   :  { %1066 = vmatpush1.bf16.msra.mxu0 %v1025_v47  ;;  %v439_v47 = vld [vmem:[#allocation7 + $0xf8] sm:$0xff] }
 0x14f   :  { %1067 = vmatprep.subr.bf16.mxu0 %v8069_v0  ;;  %v1027_v10 = vpack.c.bf16 %v974_v54, %v973_v55 }
 0x150   :  { %v5310_v56 = vpop.permute.xlu1 %750  ;;  %v5312_v57 = vpop.permute.xlu0 %745 }
 0x151   :  { %8468 = vst [vmem:[#allocation35_spill] sm:$0xff] %v5310_v56  ;;  %8469 = vst [vmem:[#allocation36_spill] sm:$0xff] %v5312_v57  ;;  %2140 = vperm.xlu1 %4742, %v431_v50   ;;  %2135 = vperm.xlu0 %4741, %v430_v53   ;;  %v976_v2 = vmul.f32 %v5310_v56, %v495_v59  ;;  %v975_v3 = vmul.f32 %v5312_v57, %v494_v62  ;;  %v502_v59 = vld [vmem:[#allocation8 + $0xf0] sm:$0xff]  ;;  %v441_v62 = vld [vmem:[#allocation7 + $0x108] sm:$0xff] }
 0x152   :  { %1068 = vmatpush1.bf16.msra.mxu0 %v1026_v58  ;;  %v503_v58 = vld [vmem:[#allocation8 + $0xf8] sm:$0xff] }
 0x153   :  { %1069 = vmatprep.subr.bf16.mxu0 %v8069_v0  ;;  %v1028_v25 = vpack.c.bf16 %v976_v2, %v975_v3 }
 0x154   :  { %v5317_v4 = vpop.permute.xlu1 %760  ;;  %v5319_v5 = vpop.permute.xlu0 %755 }
 0x155   :  { %8470 = vst [vmem:[#allocation37_spill] sm:$0xff] %v5317_v4  ;;  %8471 = vst [vmem:[#allocation38_spill] sm:$0xff] %v5319_v5  ;;  %2150 = vperm.xlu1 %4742, %v433_v63   ;;  %2145 = vperm.xlu0 %4741, %v432_v1   ;;  %v978_v17 = vmul.f32 %v5317_v4, %v497_v11  ;;  %v977_v18 = vmul.f32 %v5319_v5, %v496_v14  ;;  %v440_v63 = vld [vmem:[#allocation7 + $0x100] sm:$0xff]  ;;  %v505_v14 = vld [vmem:[#allocation8 + $0x108] sm:$0xff] }
 0x156   :  { %1070 = vmatpush1.bf16.msra.mxu0 %v1027_v10  ;;  %v4748_v4 = vld [vmem:[#allocation8 + $0x20] sm:$0xff] }
 0x157   :  { %1071 = vmatprep.subr.bf16.mxu0 %v8069_v0  ;;  %v1029_v38 = vpack.c.bf16 %v978_v17, %v977_v18  ;;  %v442_v17 = vld [vmem:[#allocation7 + $0x110] sm:$0xff]  ;;  %v5349_v18 = vld [vmem:[#allocation2] sm:$0xff] }
 0x158   :  { %v5324_v21 = vpop.permute.xlu1 %770  ;;  %v5326_v22 = vpop.permute.xlu0 %765  ;;  %8480 = vst [vmem:[#allocation47_spill] sm:$0xff] %v5349_v18 }
 0x159   :  { %8472 = vst [vmem:[#allocation39_spill] sm:$0xff] %v5324_v21  ;;  %8473 = vst [vmem:[#allocation40_spill] sm:$0xff] %v5326_v22  ;;  %2160 = vperm.xlu1 %4742, %v435_v15   ;;  %2155 = vperm.xlu0 %4741, %v434_v16   ;;  %v980_v34 = vmul.f32 %v5324_v21, %v499_v26  ;;  %v979_v35 = vmul.f32 %v5326_v22, %v498_v27  ;;  %v504_v15 = vld [vmem:[#allocation8 + $0x100] sm:$0xff]  ;;  %v443_v16 = vld [vmem:[#allocation7 + $0x118] sm:$0xff] }
 0x15a   :  { %1072 = vmatpush1.bf16.msra.mxu0 %v1028_v25  ;;  %v4747_v22 = vld [vmem:[#allocation8 + $0x28] sm:$0xff] }
 0x15b   :  { %1073 = vmatprep.subr.bf16.mxu0 %v8069_v0  ;;  %v1030_v55 = vpack.c.bf16 %v980_v34, %v979_v35  ;;  %v507_v34 = vld [vmem:[#allocation8 + $0x118] sm:$0xff]  ;;  %v506_v35 = vld [vmem:[#allocation8 + $0x110] sm:$0xff] }
 0x15c   :  { %v5331_v36 = vpop.permute.xlu1 %780  ;;  %v5333_v37 = vpop.permute.xlu0 %775 }
 0x15d   :  { %8474 = vst [vmem:[#allocation41_spill] sm:$0xff] %v5331_v36  ;;  %8475 = vst [vmem:[#allocation42_spill] sm:$0xff] %v5333_v37  ;;  %2170 = vperm.xlu1 %4742, %v437_v28   ;;  %2165 = vperm.xlu0 %4741, %v436_v29   ;;  %v982_v49 = vmul.f32 %v5331_v36, %v501_v41  ;;  %v981_v50 = vmul.f32 %v5333_v37, %v500_v44  ;;  %v445_v41 = vld [vmem:[#allocation7 + $0x128] sm:$0xff]  ;;  %v8057_v44 = vunpack.c.h.s8.bf16 %v5230_v39 }
 0x15e   :  { %1074 = vmatpush1.bf16.msra.mxu0 %v1029_v38  ;;  %v8059_v38 = vunpack.c.l.s8.bf16 %v5349_v18 }
 0x15f   :  { %1075 = vmatprep.subr.bf16.mxu0 %v8069_v0  ;;  %v1031_v11 = vpack.c.bf16 %v982_v49, %v981_v50 }
 0x160   :  { %v5338_v53 = vpop.permute.xlu1 %790  ;;  %v5340_v54 = vpop.permute.xlu0 %785 }
 0x161   :  { %8476 = vst [vmem:[#allocation43_spill] sm:$0xff] %v5338_v53  ;;  %8477 = vst [vmem:[#allocation44_spill] sm:$0xff] %v5340_v54  ;;  %2180 = vperm.xlu1 %4742, %v439_v47   ;;  %2175 = vperm.xlu0 %4741, %v438_v48   ;;  %v984_v1 = vmul.f32 %v5338_v53, %v503_v58  ;;  %v983_v2 = vmul.f32 %v5340_v54, %v502_v59  ;;  %v444_v47 = vld [vmem:[#allocation7 + $0x120] sm:$0xff]  ;;  %v509_v59 = vld [vmem:[#allocation8 + $0x128] sm:$0xff] }
 0x162   :  { %1076 = vmatpush1.bf16.msra.mxu0 %v1030_v55 }
 0x163   :  { %1077 = vmatprep.subr.bf16.mxu0 %v8069_v0  ;;  %v1032_v29 = vpack.c.bf16 %v984_v1, %v983_v2  ;;  %v446_v1 = vld [vmem:[#allocation7 + $0x130] sm:$0xff] }
 0x164   :  { %v5345_v3 = vpop.permute.xlu1 %800  ;;  %v5347_v10 = vpop.permute.xlu0 %795 }
 0x165   :  { %8478 = vst [vmem:[#allocation45_spill] sm:$0xff] %v5345_v3  ;;  %8479 = vst [vmem:[#allocation46_spill] sm:$0xff] %v5347_v10  ;;  %2190 = vperm.xlu1 %4742, %v441_v62   ;;  %2185 = vperm.xlu0 %4741, %v440_v63   ;;  %v986_v25 = vmul.f32 %v5345_v3, %v505_v14  ;;  %v985_v26 = vmul.f32 %v5347_v10, %v504_v15  ;;  %v508_v62 = vld [vmem:[#allocation8 + $0x120] sm:$0xff]  ;;  %v447_v63 = vld [vmem:[#allocation7 + $0x138] sm:$0xff] }
 0x166   :  { %1078 = vmatpush1.bf16.msra.mxu0 %v1031_v11  ;;  %v4744_v3 = vld [vmem:[#allocation8 + $0x8] sm:$0xff] }
 0x167   :  { %1079 = vmatprep.subr.bf16.mxu0 %v8069_v0  ;;  %v1033_v48 = vpack.c.bf16 %v986_v25, %v985_v26  ;;  %v511_v25 = vld [vmem:[#allocation8 + $0x138] sm:$0xff]  ;;  %v510_v26 = vld [vmem:[#allocation8 + $0x130] sm:$0xff] }
 0x168   :  { %v5354_v27 = vpop.permute.xlu1 %810  ;;  %v5356_v28 = vpop.permute.xlu0 %805 }
 0x169   :  { %8481 = vst [vmem:[#allocation48_spill] sm:$0xff] %v5354_v27  ;;  %8482 = vst [vmem:[#allocation49_spill] sm:$0xff] %v5356_v28  ;;  %2200 = vperm.xlu1 %4742, %v443_v16   ;;  %2195 = vperm.xlu0 %4741, %v442_v17   ;;  %v988_v49 = vmul.f32 %v5354_v27, %v507_v34  ;;  %v987_v50 = vmul.f32 %v5356_v28, %v506_v35  ;;  %v5378_v17 = vld [vmem:[#allocation2 + $0x28] sm:$0xff]  ;;  %v448_v35 = vld [vmem:[#allocation7 + $0x140] sm:$0xff] }
 0x16a   :  { %1080 = vmatpush1.bf16.msra.mxu0 %v1032_v29  ;;  %8487 = vst [vmem:[#allocation54_spill] sm:$0xff] %v5378_v17  ;;  %v8058_v29 = vunpack.c.h.s8.bf16 %v5349_v18  ;;  %v449_v34 = vld [vmem:[#allocation7 + $0x148] sm:$0xff] }
 0x16b   :  { %1338 = vmatprep.subr.bf16.mxu0 %v8069_v0  ;;  %v1034_v2 = vpack.c.bf16 %v988_v49, %v987_v50 }
 0x16c   :  { %v5363_v55 = vpop.permute.xlu1 %820  ;;  %v5365_v58 = vpop.permute.xlu0 %815 }
 0x16d   :  { %8483 = vst [vmem:[#allocation50_spill] sm:$0xff] %v5363_v55  ;;  %8484 = vst [vmem:[#allocation51_spill] sm:$0xff] %v5365_v58  ;;  %1082 = vmatmul.mubr.bf16.vlgmr.msra.gmra.mrb[0].mxu0 %v8059_v38  ;;  %2210 = vperm.xlu1 %4742, %v445_v41   ;;  %v990_v11 = vmul.f32 %v5363_v55, %v509_v59  ;;  %v989_v14 = vmul.f32 %v5365_v58, %v508_v62  ;;  %v8060_v41 = vunpack.c.l.s8.bf16 %v5378_v17  ;;  %v513_v62 = vld [vmem:[#allocation8 + $0x148] sm:$0xff] }
 0x16e   :  { %2205 = vperm.xlu0 %4741, %v444_v47   ;;  %1339 = vmatpush1.bf16.msra.mxu0 %v1033_v48  ;;  %v453_v38 = vld [vmem:[#allocation7 + $0x168] sm:$0xff] }
 0x16f   :  { %1340 = vmatprep.subr.bf16.mxu0 %v8069_v0  ;;  %1089 = vmatprep.mubr.bf16.mxu0 %v8057_v44  ;;  %v1035_v47 = vpack.c.bf16 %v990_v11, %v989_v14  ;;  %v450_v11 = vld [vmem:[#allocation7 + $0x150] sm:$0xff] }
 0x170   :  { %v5374_v15 = vpop.permute.xlu1 %830  ;;  %v5376_v16 = vpop.permute.xlu0 %825 }
 0x171   :  { %8485 = vst [vmem:[#allocation52_spill] sm:$0xff] %v5374_v15  ;;  %8486 = vst [vmem:[#allocation53_spill] sm:$0xff] %v5376_v16  ;;  %2220 = vperm.xlu1 %4742, %v447_v63   ;;  %v992_v48 = vmul.f32 %v5374_v15, %v511_v25  ;;  %v991_v49 = vmul.f32 %v5376_v16, %v510_v26  ;;  %v512_v63 = vld [vmem:[#allocation8 + $0x140] sm:$0xff] }
 0x172   :  { %2215 = vperm.xlu0 %4741, %v446_v1   ;;  %1341 = vmatpush1.bf16.msra.mxu0 %v1034_v2  ;;  %v451_v1 = vld [vmem:[#allocation7 + $0x158] sm:$0xff]  ;;  %v5391_v2 = vld [vmem:[#allocation2 + $0x20] sm:$0xff] }
 0x173   :  { %1342 = vmatprep.subr.bf16.mxu0 %v8069_v0  ;;  %8490 = vst [vmem:[#allocation57_spill] sm:$0xff] %v5391_v2  ;;  %v1036_v14 = vpack.c.bf16 %v992_v48, %v991_v49  ;;  %v8071_v48 = vunpack.c.h.s8.bf16 %v5378_v17 }
 0x174   :  { %v5385_v50 = vpop.permute.xlu1 %840  ;;  %v5387_v59 = vpop.permute.xlu0 %835 }
 0x175   :  { %8488 = vst [vmem:[#allocation55_spill] sm:$0xff] %v5385_v50  ;;  %8489 = vst [vmem:[#allocation56_spill] sm:$0xff] %v5387_v59  ;;  %1090 = vmatmul.mubr.bf16.gmra.mrb[4].mxu0 %v8058_v29  ;;  %2230 = vperm.xlu1 %4742, %v449_v34   ;;  %v994_v25 = vmul.f32 %v5385_v50, %v513_v62  ;;  %v993_v26 = vmul.f32 %v5387_v59, %v512_v63  ;;  %v515_v34 = vld [vmem:[#allocation8 + $0x158] sm:$0xff]  ;;  %v516_v50 = vld [vmem:[#allocation8 + $0x160] sm:$0xff] }
 0x176   :  { %2225 = vperm.xlu0 %4741, %v448_v35   ;;  %1343 = vmatpush1.bf16.msra.mxu0 %v1035_v47  ;;  %v514_v35 = vld [vmem:[#allocation8 + $0x150] sm:$0xff]  ;;  %v8068_v47 = vunpack.c.l.s8.bf16 %v5391_v2 }
 0x177   :  { %1344 = vmatprep.subr.bf16.mxu0 %v8069_v0  ;;  %1097 = vmatprep.mubr.bf16.mxu0 %v8060_v41  ;;  %v452_v41 = vld [vmem:[#allocation7 + $0x160] sm:$0xff]  ;;  %v1037_v49 = vpack.c.bf16 %v994_v25, %v993_v26 }
 0x178   :  { %v5398_v44 = vpop.permute.xlu1 %850  ;;  %v5400_v29 = vpop.permute.xlu0 %845 }
 0x179   :  { %8491 = vst [vmem:[#allocation58_spill] sm:$0xff] %v5398_v44  ;;  %8492 = vst [vmem:[#allocation59_spill] sm:$0xff] %v5400_v29  ;;  %2240 = vperm.xlu1 %4742, %v451_v1   ;;  %v996_v62 = vmul.f32 %v5398_v44, %v515_v34  ;;  %v995_v63 = vmul.f32 %v5400_v29, %v514_v35  ;;  %v517_v1 = vld [vmem:[#allocation8 + $0x168] sm:$0xff]  ;;  %v520_v29 = vld [vmem:[#allocation8 + $0x180] sm:$0xff] }
 0x17a   :  { %2235 = vperm.xlu0 %4741, %v450_v11   ;;  %1345 = vmatpush1.bf16.msra.mxu0 %v1036_v14  ;;  %v455_v11 = vld [vmem:[#allocation7 + $0x178] sm:$0xff]  ;;  %v454_v14 = vld [vmem:[#allocation7 + $0x170] sm:$0xff] }
 0x17b   :  { %1346 = vmatprep.subr.bf16.mxu0 %v8069_v0  ;;  %v1038_v25 = vpack.c.bf16 %v996_v62, %v995_v63  ;;  %v456_v62 = vld [vmem:[#allocation7 + $0x180] sm:$0xff] }
 0x17c   :  { %v5407_v40 = vpop.permute.xlu1 %860  ;;  %v5409_v18 = vpop.permute.xlu0 %855 }
 0x17d   :  { %8493 = vst [vmem:[#allocation60_spill] sm:$0xff] %v5407_v40  ;;  %8494 = vst [vmem:[#allocation61_spill] sm:$0xff] %v5409_v18  ;;  %1098 = vmatmul.mubr.bf16.gmra.mrb[8].mxu0 %v8068_v47  ;;  %2250 = vperm.xlu1 %4742, %v453_v38   ;;  %v998_v26 = vmul.f32 %v5407_v40, %v517_v1  ;;  %v997_v34 = vmul.f32 %v5409_v18, %v516_v50  ;;  %v5422_v47 = vld [vmem:[#allocation2 + $0x48] sm:$0xff]  ;;  %v519_v38 = vld [vmem:[#allocation8 + $0x178] sm:$0xff] }
 0x17e   :  { %2245 = vperm.xlu0 %4741, %v452_v41   ;;  %1347 = vmatpush1.bf16.msra.mxu0 %v1037_v49  ;;  %8497 = vst [vmem:[#allocation64_spill] sm:$0xff] %v5422_v47  ;;  %v518_v41 = vld [vmem:[#allocation8 + $0x170] sm:$0xff]  ;;  %v8082_v49 = vunpack.c.h.s8.bf16 %v5391_v2  ;;  %v8085_v63 = vunpack.c.l.s8.bf16 %v5422_v47  ;;  %v461_v2 = vld [vmem:[#allocation7 + $0x1a8] sm:$0xff] }
 0x17f   :  { %1348 = vmatprep.subr.bf16.mxu0 %v8069_v0  ;;  %1105 = vmatprep.mubr.bf16.mxu0 %v8071_v48  ;;  %v457_v0 = vld [vmem:[#allocation7 + $0x188] sm:$0xff]  ;;  %v8498_v48 = vmov 0   ;;  %v1039_v50 = vpack.c.bf16 %v998_v26, %v997_v34  ;;  %v458_v26 = vld [vmem:[#allocation7 + $0x190] sm:$0xff] }
 0x180   :  { %v5418_v35 = vpop.permute.xlu1 %870  ;;  %v5420_v44 = vpop.permute.xlu0 %865 }
 0x181   :  { %8495 = vst [vmem:[#allocation62_spill] sm:$0xff] %v5418_v35  ;;  %8496 = vst [vmem:[#allocation63_spill] sm:$0xff] %v5420_v44  ;;  %2260 = vperm.xlu1 %4742, %v455_v11   ;;  %v1000_v1 = vmul.f32 %v5418_v35, %v519_v38  ;;  %v999_v17 = vmul.f32 %v5420_v44, %v518_v41  ;;  %v521_v11 = vld [vmem:[#allocation8 + $0x188] sm:$0xff]  ;;  %v524_v44 = vld [vmem:[#allocation8 + $0x1a0] sm:$0xff] }
 0x182   :  { %2255 = vperm.xlu0 %4741, %v454_v14   ;;  %1349 = vmatpush1.bf16.msra.mxu0 %v1038_v25  ;;  %v459_v14 = vld [vmem:[#allocation7 + $0x198] sm:$0xff]  ;;  %v5435_v25 = vld [vmem:[#allocation2 + $0x40] sm:$0xff] }
 0x183   :  { %1350 = vmatprep.subr.bf16.mxu0 %v8498_v48  ;;  %8501 = vst [vmem:[#allocation67_spill] sm:$0xff] %v5435_v25  ;;  %v1040_v34 = vpack.c.bf16 %v1000_v1, %v999_v17  ;;  %v8097_v17 = vunpack.c.h.s8.bf16 %v5422_v47  ;;  %v465_v47 = vld [vmem:[#allocation7 + $0x1c8] sm:$0xff] }
 0x184   :  { %v5429_v40 = vpop.permute.xlu1 %880  ;;  %v5431_v18 = vpop.permute.xlu0 %875 }
 0x185   :  { %8499 = vst [vmem:[#allocation65_spill] sm:$0xff] %v5429_v40  ;;  %8500 = vst [vmem:[#allocation66_spill] sm:$0xff] %v5431_v18  ;;  %1106 = vmatmul.mubr.bf16.gmra.mrb[12].mxu0 %v8082_v49  ;;  %2270 = vperm.xlu1 %4742, %v457_v0   ;;  %v1002_v38 = vmul.f32 %v5429_v40, %v521_v11  ;;  %v1001_v41 = vmul.f32 %v5431_v18, %v520_v29  ;;  %v523_v0 = vld [vmem:[#allocation8 + $0x198] sm:$0xff] }
 0x186   :  { %2265 = vperm.xlu0 %4741, %v456_v62   ;;  %1351 = vmatpush1.bf16.msra.mxu0 %v1039_v50  ;;  %v522_v62 = vld [vmem:[#allocation8 + $0x190] sm:$0xff]  ;;  %v8094_v50 = vunpack.c.l.s8.bf16 %v5435_v25 }
 0x187   :  { %1352 = vmatprep.subr.bf16.mxu0 %v8498_v48  ;;  %1113 = vmatprep.mubr.bf16.mxu0 %v8085_v63  ;;  %v460_v63 = vld [vmem:[#allocation7 + $0x1a0] sm:$0xff]  ;;  %v1041_v1 = vpack.c.bf16 %v1002_v38, %v1001_v41 }
 0x188   :  { %v5442_v35 = vpop.permute.xlu1 %890  ;;  %v5444_v49 = vpop.permute.xlu0 %885 }
 0x189   :  { %8502 = vst [vmem:[#allocation68_spill] sm:$0xff] %v5442_v35  ;;  %8503 = vst [vmem:[#allocation69_spill] sm:$0xff] %v5444_v49  ;;  %2280 = vperm.xlu1 %4742, %v459_v14   ;;  %v1004_v29 = vmul.f32 %v5442_v35, %v523_v0  ;;  %v1003_v11 = vmul.f32 %v5444_v49, %v522_v62  ;;  %v525_v14 = vld [vmem:[#allocation8 + $0x1a8] sm:$0xff]  ;;  %v528_v49 = vld [vmem:[#allocation8 + $0x1c0] sm:$0xff] }
 0x18a   :  { %2275 = vperm.xlu0 %4741, %v458_v26   ;;  %1353 = vmatpush1.bf16.msra.mxu0 %v1040_v34  ;;  %v463_v26 = vld [vmem:[#allocation7 + $0x1b8] sm:$0xff]  ;;  %v462_v34 = vld [vmem:[#allocation7 + $0x1b0] sm:$0xff] }
 0x18b   :  { %1354 = vmatprep.subr.bf16.mxu0 %v8498_v48  ;;  %v1042_v38 = vpack.c.bf16 %v1004_v29, %v1003_v11  ;;  %v464_v29 = vld [vmem:[#allocation7 + $0x1c0] sm:$0xff] }
 0x18c   :  { %v5451_v40 = vpop.permute.xlu1 %900  ;;  %v5453_v18 = vpop.permute.xlu0 %895 }
 0x18d   :  { %8504 = vst [vmem:[#allocation70_spill] sm:$0xff] %v5451_v40  ;;  %8505 = vst [vmem:[#allocation71_spill] sm:$0xff] %v5453_v18  ;;  %1114 = vmatmul.mubr.bf16.gmra.mrb[16].mxu0 %v8094_v50  ;;  %2290 = vperm.xlu1 %4742, %v461_v2   ;;  %v1006_v41 = vmul.f32 %v5451_v40, %v525_v14  ;;  %v1005_v0 = vmul.f32 %v5453_v18, %v524_v44  ;;  %v5466_v50 = vld [vmem:[#allocation2 + $0x68] sm:$0xff]  ;;  %v527_v2 = vld [vmem:[#allocation8 + $0x1b8] sm:$0xff] }
 0x18e   :  { %2285 = vperm.xlu0 %4741, %v460_v63   ;;  %1355 = vmatpush1.bf16.msra.mxu0 %v1041_v1  ;;  %8508 = vst [vmem:[#allocation74_spill] sm:$0xff] %v5466_v50  ;;  %v526_v63 = vld [vmem:[#allocation8 + $0x1b0] sm:$0xff]  ;;  %v8106_v1 = vunpack.c.h.s8.bf16 %v5435_v25  ;;  %v8109_v11 = vunpack.c.l.s8.bf16 %v5466_v50  ;;  %v469_v25 = vld [vmem:[#allocation7 + $0x1e8] sm:$0xff] }
 0x18f   :  { %1356 = vmatprep.subr.bf16.mxu0 %v8498_v48  ;;  %1121 = vmatprep.mubr.bf16.mxu0 %v8097_v17  ;;  %v1043_v44 = vpack.c.bf16 %v1006_v41, %v1005_v0  ;;  %v466_v41 = vld [vmem:[#allocation7 + $0x1d0] sm:$0xff] }
 0x190   :  { %v5462_v62 = vpop.permute.xlu1 %910  ;;  %v5464_v35 = vpop.permute.xlu0 %905 }
 0x191   :  { %8506 = vst [vmem:[#allocation72_spill] sm:$0xff] %v5462_v62  ;;  %8507 = vst [vmem:[#allocation73_spill] sm:$0xff] %v5464_v35  ;;  %2300 = vperm.xlu1 %4742, %v463_v26   ;;  %v1008_v14 = vmul.f32 %v5462_v62, %v527_v2  ;;  %v1007_v17 = vmul.f32 %v5464_v35, %v526_v63  ;;  %v529_v26 = vld [vmem:[#allocation8 + $0x1c8] sm:$0xff]  ;;  %v532_v35 = vld [vmem:[#allocation8 + $0x1e0] sm:$0xff] }
 0x192   :  { %2295 = vperm.xlu0 %4741, %v462_v34   ;;  %1357 = vmatpush1.bf16.msra.mxu0 %v1042_v38  ;;  %v467_v34 = vld [vmem:[#allocation7 + $0x1d8] sm:$0xff]  ;;  %v5479_v38 = vld [vmem:[#allocation2 + $0x60] sm:$0xff] }
 0x193   :  { %1358 = vmatprep.subr.bf16.mxu0 %v8498_v48  ;;  %8511 = vst [vmem:[#allocation77_spill] sm:$0xff] %v5479_v38  ;;  %v1044_v0 = vpack.c.bf16 %v1008_v14, %v1007_v17  ;;  %v8120_v17 = vunpack.c.h.s8.bf16 %v5466_v50  ;;  %v536_v50 = vld [vmem:[#allocation10] sm:$0xff] }
 0x194   :  { %v5473_v40 = vpop.permute.xlu1 %920  ;;  %v5475_v18 = vpop.permute.xlu0 %915 }
 0x195   :  { %8509 = vst [vmem:[#allocation75_spill] sm:$0xff] %v5473_v40  ;;  %8510 = vst [vmem:[#allocation76_spill] sm:$0xff] %v5475_v18  ;;  %1122 = vmatmul.mubr.bf16.gmra.mrb[20].mxu0 %v8106_v1  ;;  %2310 = vperm.xlu1 %4742, %v465_v47   ;;  %v1010_v2 = vmul.f32 %v5473_v40, %v529_v26  ;;  %v1009_v63 = vmul.f32 %v5475_v18, %v528_v49  ;;  %v531_v47 = vld [vmem:[#allocation8 + $0x1d8] sm:$0xff] }
 0x196   :  { %2305 = vperm.xlu0 %4741, %v464_v29   ;;  %1359 = vmatpush1.bf16.msra.mxu0 %v1043_v44  ;;  %v530_v29 = vld [vmem:[#allocation8 + $0x1d0] sm:$0xff]  ;;  %v8134_v44 = vunpack.c.l.s8.bf16 %v5479_v38 }
 0x197   :  { %1360 = vmatprep.subr.bf16.mxu0 %v8498_v48  ;;  %1129 = vmatprep.mubr.bf16.mxu0 %v8109_v11  ;;  %v468_v11 = vld [vmem:[#allocation7 + $0x1e0] sm:$0xff]  ;;  %v1045_v14 = vpack.c.bf16 %v1010_v2, %v1009_v63  ;;  %v5504_v2 = vld [vmem:[#allocation2 + $0x88] sm:$0xff] }
 0x198   :  { %v5486_v62 = vpop.permute.xlu1 %930  ;;  %v5488_v1 = vpop.permute.xlu0 %925  ;;  %8516 = vst [vmem:[#allocation82_spill] sm:$0xff] %v5504_v2 }
 0x199   :  { %8512 = vst [vmem:[#allocation78_spill] sm:$0xff] %v5486_v62  ;;  %8513 = vst [vmem:[#allocation79_spill] sm:$0xff] %v5488_v1  ;;  %2320 = vperm.xlu1 %4742, %v467_v34   ;;  %v1012_v49 = vmul.f32 %v5486_v62, %v531_v47  ;;  %v1011_v26 = vmul.f32 %v5488_v1, %v530_v29  ;;  %v533_v34 = vld [vmem:[#allocation8 + $0x1e8] sm:$0xff]  ;;  %v535_v62 = vld [vmem:[#allocation8 + $0x1f8] sm:$0xff] }
 0x19a   :  { %2315 = vperm.xlu0 %4741, %v466_v41   ;;  %1361 = vmatpush1.bf16.msra.mxu0 %v1044_v0  ;;  %v471_v41 = vld [vmem:[#allocation7 + $0x1f8] sm:$0xff]  ;;  %v470_v0 = vld [vmem:[#allocation7 + $0x1f0] sm:$0xff] }
 0x19b   :  { %1362 = vmatprep.subr.bf16.mxu0 %v8498_v48  ;;  %v1046_v63 = vpack.c.bf16 %v1012_v49, %v1011_v26 }
 0x19c   :  { %v5495_v40 = vpop.permute.xlu1 %940  ;;  %v5497_v18 = vpop.permute.xlu0 %935 }
 0x19d   :  { %8514 = vst [vmem:[#allocation80_spill] sm:$0xff] %v5495_v40  ;;  %8515 = vst [vmem:[#allocation81_spill] sm:$0xff] %v5497_v18  ;;  %1130 = vmatmul.mubr.bf16.gmra.mrb[24].mxu0 %v8134_v44  ;;  %2330 = vperm.xlu1 %4742, %v469_v25   ;;  %v1014_v47 = vmul.f32 %v5495_v40, %v533_v34  ;;  %v1013_v29 = vmul.f32 %v5497_v18, %v532_v35  ;;  %v534_v25 = vld [vmem:[#allocation8 + $0x1f0] sm:$0xff]  ;;  %v5521_v34 = vld [vmem:[#allocation2 + $0x80] sm:$0xff] }
 0x19e   :  { %2325 = vperm.xlu0 %4741, %v468_v11   ;;  %1363 = vmatpush1.bf16.msra.mxu0 %v1045_v14  ;;  %v8132_v14 = vunpack.c.h.s8.bf16 %v5479_v38  ;;  %8519 = vst [vmem:[#allocation85_spill] sm:$0xff] %v5521_v34  ;;  %v5587_v44 = vld [vmem:[#allocation2 + $0x100] sm:$0xff] }
 0x19f   :  { %1364 = vmatprep.subr.bf16.mxu0 %v8498_v48  ;;  %1137 = vmatprep.mubr.bf16.mxu0 %v8120_v17  ;;  %v8129_v17 = vunpack.c.l.s8.bf16 %v5504_v2  ;;  %v1047_v49 = vpack.c.bf16 %v1014_v47, %v1013_v29  ;;  %v8121_v47 = vunpack.c.h.s8.bf16 %v5521_v34  ;;  %8527 = vst [vmem:[#allocation93_spill] sm:$0xff] %v5587_v44 }
 0x1a0   :  { %v5508_v1 = vpop.permute.xlu1 %950  ;;  %v5510_v11 = vpop.permute.xlu0 %945 }
 0x1a1   :  { %8517 = vst [vmem:[#allocation83_spill] sm:$0xff] %v5508_v1  ;;  %8518 = vst [vmem:[#allocation84_spill] sm:$0xff] %v5510_v11  ;;  %2340 = vperm.xlu1 %4742, %v471_v41   ;;  %v1016_v26 = vmul.f32 %v5508_v1, %v535_v62  ;;  %v1015_v35 = vmul.f32 %v5510_v11, %v534_v25  ;;  %v5531_v62 = vld [vmem:[#allocation2 + $0xa8] sm:$0xff]  ;;  %v5539_v25 = vld [vmem:[#allocation2 + $0xa0] sm:$0xff] }
 0x1a2   :  { %2335 = vperm.xlu0 %4741, %v470_v0   ;;  %1365 = vmatpush1.bf16.msra.mxu0 %v1046_v63  ;;  %v8126_v0 = vunpack.c.l.s8.bf16 %v5521_v34  ;;  %v8123_v63 = vunpack.c.h.s8.bf16 %v5504_v2  ;;  %8520 = vst [vmem:[#allocation86_spill] sm:$0xff] %v5531_v62  ;;  %v8122_v29 = vunpack.c.l.s8.bf16 %v5531_v62  ;;  %8521 = vst [vmem:[#allocation87_spill] sm:$0xff] %v5539_v25 }
 0x1a3   :  { %1366 = vmatprep.subr.bf16.mxu0 %v8498_v48  ;;  %v1048_v41 = vpack.c.bf16 %v1016_v26, %v1015_v35  ;;  %v8125_v26 = vunpack.c.h.s8.bf16 %v5531_v62  ;;  %v5547_v35 = vld [vmem:[#allocation2 + $0xc8] sm:$0xff] }
 0x1a4   :  { %8522 = vst [vmem:[#allocation88_spill] sm:$0xff] %v5547_v35 }
 0x1a5   :  { %1138 = vmatmul.mubr.bf16.gmra.mrb[28].mxu0 %v8132_v14 }
 0x1a6   :  { %1367 = vmatpush1.bf16.msra.mxu0 %v1047_v49  ;;  %1145 = vmatprep.mubr.bf16.mxu0 %v8129_v17  ;;  %v8124_v49 = vunpack.c.l.s8.bf16 %v5539_v25 }
 0x1a7   :  { %1368 = vmatprep.subr.bf16.mxu0 %v8498_v48 }
 0x1aa   :  { %1369 = vmatpush1.bf16.msra.mxu0 %v1048_v41  ;;  %v8127_v41 = vunpack.c.h.s8.bf16 %v5539_v25 }
 0x1ab   :  { %3680 = vmatprep.subr.bf16.mxu0 %v8498_v48 }
 0x1ad   :  { %1146 = vmatmul.mubr.bf16.gmra.mrb[32].mxu0 %v8126_v0 }
 0x1ae   :  { %1153 = vmatprep.mubr.bf16.mxu0 %v8123_v63 }
 0x1b5   :  { %1154 = vmatmul.mubr.bf16.gmra.mrb[36].mxu0 %v8121_v47  ;;  %v8128_v47 = vunpack.c.l.s8.bf16 %v5547_v35 }
 0x1b6   :  { %1161 = vmatprep.mubr.bf16.mxu0 %v8122_v29  ;;  %v5555_v29 = vld [vmem:[#allocation2 + $0xc0] sm:$0xff] }
 0x1b7   :  { %8523 = vst [vmem:[#allocation89_spill] sm:$0xff] %v5555_v29  ;;  %v8130_v63 = vunpack.c.l.s8.bf16 %v5555_v29  ;;  %v8133_v0 = vunpack.c.h.s8.bf16 %v5555_v29  ;;  %v8148_v29 = vunpack.c.h.s8.bf16 %v5587_v44 }
 0x1bd   :  { %1162 = vmatmul.mubr.bf16.gmra.mrb[40].mxu0 %v8124_v49  ;;  %v8131_v49 = vunpack.c.h.s8.bf16 %v5547_v35 }
 0x1be   :  { %1169 = vmatprep.mubr.bf16.mxu0 %v8125_v26  ;;  %v5563_v26 = vld [vmem:[#allocation2 + $0xe8] sm:$0xff] }
 0x1bf   :  { %8524 = vst [vmem:[#allocation90_spill] sm:$0xff] %v5563_v26 }
 0x1c5   :  { %1170 = vmatmul.mubr.bf16.gmra.mrb[44].mxu0 %v8127_v41  ;;  %v8135_v41 = vunpack.c.l.s8.bf16 %v5563_v26 }
 0x1c6   :  { %1177 = vmatprep.mubr.bf16.mxu0 %v8128_v47  ;;  %v5571_v47 = vld [vmem:[#allocation2 + $0xe0] sm:$0xff] }
 0x1c7   :  { %8525 = vst [vmem:[#allocation91_spill] sm:$0xff] %v5571_v47  ;;  %v8136_v17 = vunpack.c.l.s8.bf16 %v5571_v47  ;;  %v8140_v14 = vunpack.c.h.s8.bf16 %v5571_v47  ;;  %v542_v47 = vld [vmem:[#allocation10 + $0x30] sm:$0xff] }
 0x1cd   :  { %1178 = vmatmul.mubr.bf16.gmra.mrb[48].mxu0 %v8130_v63  ;;  %v8137_v63 = vunpack.c.h.s8.bf16 %v5563_v26 }
 0x1ce   :  { %1185 = vmatprep.mubr.bf16.mxu0 %v8131_v49  ;;  %v5579_v49 = vld [vmem:[#allocation2 + $0x108] sm:$0xff] }
 0x1cf   :  { %8526 = vst [vmem:[#allocation92_spill] sm:$0xff] %v5579_v49 }
 0x1d5   :  { %1186 = vmatmul.mubr.bf16.gmra.mrb[52].mxu0 %v8133_v0  ;;  %v8141_v0 = vunpack.c.l.s8.bf16 %v5579_v49 }
 0x1d6   :  { %1193 = vmatprep.mubr.bf16.mxu0 %v8135_v41  ;;  %v8144_v41 = vunpack.c.l.s8.bf16 %v5587_v44  ;;  %v543_v44 = vld [vmem:[#allocation10 + $0x38] sm:$0xff] }
 0x1dd   :  { %1194 = vmatmul.mubr.bf16.gmra.mrb[56].mxu0 %v8136_v17  ;;  %v8145_v17 = vunpack.c.h.s8.bf16 %v5579_v49 }
 0x1de   :  { %1201 = vmatprep.mubr.bf16.mxu0 %v8137_v63  ;;  %v5595_v63 = vld [vmem:[#allocation2 + $0x128] sm:$0xff] }
 0x1df   :  { %8528 = vst [vmem:[#allocation94_spill] sm:$0xff] %v5595_v63 }
 0x1e5   :  { %1202 = vmatmul.mubr.bf16.gmra.mrb[60].mxu0 %v8140_v14  ;;  %v8149_v14 = vunpack.c.l.s8.bf16 %v5595_v63 }
 0x1e6   :  { %1209 = vmatprep.mubr.bf16.mxu0 %v8141_v0  ;;  %v5603_v0 = vld [vmem:[#allocation2 + $0x120] sm:$0xff] }
 0x1e7   :  { %8529 = vst [vmem:[#allocation95_spill] sm:$0xff] %v5603_v0  ;;  %v8152_v35 = vunpack.c.l.s8.bf16 %v5603_v0  ;;  %v8156_v25 = vunpack.c.h.s8.bf16 %v5603_v0  ;;  %v538_v0 = vld [vmem:[#allocation10 + $0x10] sm:$0xff] }
 0x1ed   :  { %1210 = vmatmul.mubr.bf16.gmra.mrb[64].mxu0 %v8144_v41  ;;  %v8153_v41 = vunpack.c.h.s8.bf16 %v5595_v63  ;;  %v568_v63 = vpack.c.bf16 %v538_v0, %v536_v50  ;;  %v545_v0 = vld [vmem:[#allocation10 + $0x48] sm:$0xff] }
 0x1ee   :  { %1217 = vmatprep.mubr.bf16.mxu0 %v8145_v17  ;;  %v5611_v17 = vld [vmem:[#allocation2 + $0x148] sm:$0xff] }
 0x1ef   :  { %8530 = vst [vmem:[#allocation96_spill] sm:$0xff] %v5611_v17 }
 0x1f5   :  { %1218 = vmatmul.mubr.bf16.gmra.mrb[68].mxu0 %v8148_v29  ;;  %v8157_v29 = vunpack.c.l.s8.bf16 %v5611_v17 }
 0x1f6   :  { %1225 = vmatprep.mubr.bf16.mxu0 %v8149_v14  ;;  %v5619_v14 = vld [vmem:[#allocation2 + $0x140] sm:$0xff] }
 0x1f7   :  { %8531 = vst [vmem:[#allocation97_spill] sm:$0xff] %v5619_v14  ;;  %v8160_v62 = vunpack.c.l.s8.bf16 %v5619_v14  ;;  %v8164_v34 = vunpack.c.h.s8.bf16 %v5619_v14 }
 0x1fd   :  { %1226 = vmatmul.mubr.bf16.gmra.mrb[72].mxu0 %v8152_v35  ;;  %v8161_v35 = vunpack.c.h.s8.bf16 %v5611_v17 }
 0x1fe   :  { %1233 = vmatprep.mubr.bf16.mxu0 %v8153_v41  ;;  %v5627_v41 = vld [vmem:[#allocation2 + $0x168] sm:$0xff] }
 0x1ff   :  { %8532 = vst [vmem:[#allocation98_spill] sm:$0xff] %v5627_v41 }
 0x205   :  { %1234 = vmatmul.mubr.bf16.gmra.mrb[76].mxu0 %v8156_v25  ;;  %v8165_v25 = vunpack.c.l.s8.bf16 %v5627_v41 }
 0x206   :  { %1241 = vmatprep.mubr.bf16.mxu0 %v8157_v29  ;;  %v5635_v29 = vld [vmem:[#allocation2 + $0x160] sm:$0xff] }
 0x207   :  { %8533 = vst [vmem:[#allocation99_spill] sm:$0xff] %v5635_v29  ;;  %v8168_v2 = vunpack.c.l.s8.bf16 %v5635_v29  ;;  %v8172_v14 = vunpack.c.h.s8.bf16 %v5635_v29 }
 0x20d   :  { %1242 = vmatmul.mubr.bf16.gmra.mrb[80].mxu0 %v8160_v62  ;;  %v8169_v62 = vunpack.c.h.s8.bf16 %v5627_v41 }
 0x20e   :  { %1249 = vmatprep.mubr.bf16.mxu0 %v8161_v35  ;;  %v5643_v35 = vld [vmem:[#allocation2 + $0x188] sm:$0xff] }
 0x20f   :  { %8534 = vst [vmem:[#allocation100_spill] sm:$0xff] %v5643_v35 }
 0x215   :  { %1250 = vmatmul.mubr.bf16.gmra.mrb[84].mxu0 %v8164_v34  ;;  %v8173_v34 = vunpack.c.l.s8.bf16 %v5643_v35 }
 0x216   :  { %1257 = vmatprep.mubr.bf16.mxu0 %v8165_v25  ;;  %v5651_v25 = vld [vmem:[#allocation2 + $0x180] sm:$0xff] }
 0x217   :  { %8535 = vst [vmem:[#allocation101_spill] sm:$0xff] %v5651_v25  ;;  %v8176_v38 = vunpack.c.l.s8.bf16 %v5651_v25  ;;  %v8180_v29 = vunpack.c.h.s8.bf16 %v5651_v25 }
 0x21d   :  { %1258 = vmatmul.mubr.bf16.gmra.mrb[88].mxu0 %v8168_v2  ;;  %v8177_v2 = vunpack.c.h.s8.bf16 %v5643_v35 }
 0x21e   :  { %1265 = vmatprep.mubr.bf16.mxu0 %v8169_v62  ;;  %v5659_v62 = vld [vmem:[#allocation2 + $0x1a8] sm:$0xff] }
 0x21f   :  { %8536 = vst [vmem:[#allocation102_spill] sm:$0xff] %v5659_v62 }
 0x225   :  { %1266 = vmatmul.mubr.bf16.gmra.mrb[92].mxu0 %v8172_v14  ;;  %v8181_v14 = vunpack.c.l.s8.bf16 %v5659_v62 }
 0x226   :  { %1273 = vmatprep.mubr.bf16.mxu0 %v8173_v34  ;;  %v5667_v34 = vld [vmem:[#allocation2 + $0x1a0] sm:$0xff] }
 0x227   :  { %8537 = vst [vmem:[#allocation103_spill] sm:$0xff] %v5667_v34  ;;  %v8184_v41 = vunpack.c.l.s8.bf16 %v5667_v34  ;;  %v8188_v25 = vunpack.c.h.s8.bf16 %v5667_v34 }
 0x22d   :  { %1274 = vmatmul.mubr.bf16.gmra.mrb[96].mxu0 %v8176_v38  ;;  %v8185_v38 = vunpack.c.h.s8.bf16 %v5659_v62 }
 0x22e   :  { %1281 = vmatprep.mubr.bf16.mxu0 %v8177_v2  ;;  %v5675_v2 = vld [vmem:[#allocation2 + $0x1c8] sm:$0xff] }
 0x22f   :  { %8538 = vst [vmem:[#allocation104_spill] sm:$0xff] %v5675_v2 }
 0x235   :  { %1282 = vmatmul.mubr.bf16.gmra.mrb[100].mxu0 %v8180_v29  ;;  %v8189_v29 = vunpack.c.l.s8.bf16 %v5675_v2 }
 0x236   :  { %1289 = vmatprep.mubr.bf16.mxu0 %v8181_v14  ;;  %v5683_v14 = vld [vmem:[#allocation2 + $0x1c0] sm:$0xff] }
 0x237   :  { %8539 = vst [vmem:[#allocation105_spill] sm:$0xff] %v5683_v14  ;;  %v8192_v35 = vunpack.c.l.s8.bf16 %v5683_v14  ;;  %v8196_v34 = vunpack.c.h.s8.bf16 %v5683_v14 }
 0x23d   :  { %1290 = vmatmul.mubr.bf16.gmra.mrb[104].mxu0 %v8184_v41  ;;  %v8193_v41 = vunpack.c.h.s8.bf16 %v5675_v2 }
 0x23e   :  { %1297 = vmatprep.mubr.bf16.mxu0 %v8185_v38  ;;  %v5691_v38 = vld [vmem:[#allocation2 + $0x1e8] sm:$0xff] }
 0x23f   :  { %8540 = vst [vmem:[#allocation106_spill] sm:$0xff] %v5691_v38 }
 0x245   :  { %1298 = vmatmul.mubr.bf16.gmra.mrb[108].mxu0 %v8188_v25  ;;  %v8197_v25 = vunpack.c.l.s8.bf16 %v5691_v38 }
 0x246   :  { %1305 = vmatprep.mubr.bf16.mxu0 %v8189_v29  ;;  %v5699_v29 = vld [vmem:[#allocation2 + $0x1e0] sm:$0xff] }
 0x247   :  { %8541 = vst [vmem:[#allocation107_spill] sm:$0xff] %v5699_v29  ;;  %v8200_v62 = vunpack.c.l.s8.bf16 %v5699_v29  ;;  %v8204_v14 = vunpack.c.h.s8.bf16 %v5699_v29 }
 0x24d   :  { %1306 = vmatmul.mubr.bf16.gmra.mrb[112].mxu0 %v8192_v35  ;;  %v8201_v35 = vunpack.c.h.s8.bf16 %v5691_v38 }
 0x24e   :  { %1313 = vmatprep.mubr.bf16.mxu0 %v8193_v41  ;;  %v5707_v41 = vld [vmem:[#allocation2 + $0x18] sm:$0xff] }
 0x24f   :  { %8542 = vst [vmem:[#allocation108_spill] sm:$0xff] %v5707_v41 }
 0x255   :  { %1314 = vmatmul.mubr.bf16.gmra.mrb[116].mxu0 %v8196_v34  ;;  %v8205_v34 = vunpack.c.l.s8.bf16 %v5707_v41 }
 0x256   :  { %1321 = vmatprep.mubr.bf16.mxu0 %v8197_v25  ;;  %v5715_v25 = vld [vmem:[#allocation2 + $0x10] sm:$0xff] }
 0x257   :  { %8543 = vst [vmem:[#allocation109_spill] sm:$0xff] %v5715_v25  ;;  %v8208_v2 = vunpack.c.l.s8.bf16 %v5715_v25  ;;  %v8212_v29 = vunpack.c.h.s8.bf16 %v5715_v25 }
 0x25d   :  { %1322 = vmatmul.mubr.bf16.gmra.mrb[120].mxu0 %v8200_v62  ;;  %v8209_v62 = vunpack.c.h.s8.bf16 %v5707_v41 }
 0x25e   :  { %1329 = vmatprep.mubr.bf16.mxu0 %v8201_v35  ;;  %v5723_v35 = vld [vmem:[#allocation2 + $0x38] sm:$0xff] }
 0x25f   :  { %8544 = vst [vmem:[#allocation110_spill] sm:$0xff] %v5723_v35 }
 0x265   :  { %1330 = vmatmul.mubr.bf16.gmra.mrb[124].mxu0 %v8204_v14  ;;  %v8213_v14 = vunpack.c.l.s8.bf16 %v5723_v35 }
 0x266   :  { %1370 = vmatprep.mubr.bf16.mxu0 %v8205_v34  ;;  %v5731_v34 = vld [vmem:[#allocation2 + $0x30] sm:$0xff] }
 0x267   :  { %8545 = vst [vmem:[#allocation111_spill] sm:$0xff] %v5731_v34  ;;  %v8216_v38 = vunpack.c.l.s8.bf16 %v5731_v34  ;;  %v8220_v25 = vunpack.c.h.s8.bf16 %v5731_v34 }
 0x26d   :  { %1371 = vmatmul.mubr.bf16.vlgmr.msra.gmra.mrb[0].mxu0 %v8208_v2  ;;  %v8217_v2 = vunpack.c.h.s8.bf16 %v5723_v35 }
 0x26e   :  { %1378 = vmatprep.mubr.bf16.mxu0 %v8209_v62  ;;  %v5739_v62 = vld [vmem:[#allocation2 + $0x58] sm:$0xff] }
 0x26f   :  { %8546 = vst [vmem:[#allocation112_spill] sm:$0xff] %v5739_v62 }
 0x275   :  { %1379 = vmatmul.mubr.bf16.gmra.mrb[4].mxu0 %v8212_v29  ;;  %v8221_v29 = vunpack.c.l.s8.bf16 %v5739_v62 }
 0x276   :  { %1386 = vmatprep.mubr.bf16.mxu0 %v8213_v14  ;;  %v5747_v14 = vld [vmem:[#allocation2 + $0x50] sm:$0xff] }
 0x277   :  { %8547 = vst [vmem:[#allocation113_spill] sm:$0xff] %v5747_v14  ;;  %v8224_v41 = vunpack.c.l.s8.bf16 %v5747_v14  ;;  %v8228_v34 = vunpack.c.h.s8.bf16 %v5747_v14 }
 0x27d   :  { %1387 = vmatmul.mubr.bf16.gmra.mrb[8].mxu0 %v8216_v38  ;;  %v8225_v38 = vunpack.c.h.s8.bf16 %v5739_v62  ;;  %v537_v62 = vld [vmem:[#allocation10 + $0x8] sm:$0xff] }
 0x27e   :  { %1394 = vmatprep.mubr.bf16.mxu0 %v8217_v2  ;;  %v5755_v2 = vld [vmem:[#allocation2 + $0x78] sm:$0xff] }
 0x27f   :  { %8548 = vst [vmem:[#allocation114_spill] sm:$0xff] %v5755_v2 }
 0x285   :  { %1395 = vmatmul.mubr.bf16.gmra.mrb[12].mxu0 %v8220_v25  ;;  %v8231_v25 = vunpack.c.l.s8.bf16 %v5755_v2 }
 0x286   :  { %1402 = vmatprep.mubr.bf16.mxu0 %v8221_v29  ;;  %v5763_v29 = vld [vmem:[#allocation2 + $0x70] sm:$0xff] }
 0x287   :  { %8549 = vst [vmem:[#allocation115_spill] sm:$0xff] %v5763_v29  ;;  %v8240_v35 = vunpack.c.l.s8.bf16 %v5763_v29  ;;  %v8252_v14 = vunpack.c.h.s8.bf16 %v5763_v29  ;;  %v546_v29 = vld [vmem:[#allocation10 + $0x50] sm:$0xff] }
 0x28d   :  { %1403 = vmatmul.mubr.bf16.gmra.mrb[16].mxu0 %v8224_v41  ;;  %v8245_v41 = vunpack.c.h.s8.bf16 %v5755_v2  ;;  %v540_v2 = vld [vmem:[#allocation10 + $0x20] sm:$0xff] }
 0x28e   :  { %1410 = vmatprep.mubr.bf16.mxu0 %v8225_v38  ;;  %v5771_v38 = vld [vmem:[#allocation2 + $0x98] sm:$0xff]  ;;  %v570_v26 = vpack.c.bf16 %v542_v47, %v540_v2  ;;  %v550_v47 = vld [vmem:[#allocation10 + $0x70] sm:$0xff] }
 0x28f   :  { %8550 = vst [vmem:[#allocation116_spill] sm:$0xff] %v5771_v38  ;;  %v8262_v50 = vunpack.c.h.s8.bf16 %v5771_v38 }
 0x295   :  { %1411 = vmatmul.mubr.bf16.gmra.mrb[20].mxu0 %v8228_v34  ;;  %v8258_v34 = vunpack.c.l.s8.bf16 %v5771_v38 }
 0x296   :  { %1418 = vmatprep.mubr.bf16.mxu0 %v8231_v25  ;;  %v539_v25 = vld [vmem:[#allocation10 + $0x18] sm:$0xff] }
 0x297   :  { %v569_v17 = vpack.c.bf16 %v539_v25, %v537_v62 }
 0x299   :  { %1670 = vmatprep.subr.bf16.mxu1 %v569_v17  ;;  %v547_v17 = vld [vmem:[#allocation10 + $0x58] sm:$0xff] }
 0x29a   :  { %1671 = vmatpush1.bf16.msra.mxu1 %v568_v63  ;;  %v573_v25 = vpack.c.bf16 %v547_v17, %v545_v0  ;;  %v549_v63 = vld [vmem:[#allocation10 + $0x68] sm:$0xff]  ;;  %v555_v17 = vld [vmem:[#allocation10 + $0x98] sm:$0xff] }
 0x29d   :  { %1419 = vmatmul.mubr.bf16.gmra.mrb[24].mxu0 %v8240_v35  ;;  %v541_v35 = vld [vmem:[#allocation10 + $0x28] sm:$0xff] }
 0x29e   :  { %1426 = vmatprep.mubr.bf16.mxu0 %v8245_v41  ;;  %v5779_v41 = vld [vmem:[#allocation2 + $0x90] sm:$0xff]  ;;  %v571_v49 = vpack.c.bf16 %v543_v44, %v541_v35  ;;  %v551_v44 = vld [vmem:[#allocation10 + $0x78] sm:$0xff]  ;;  %v548_v35 = vld [vmem:[#allocation10 + $0x60] sm:$0xff] }
 0x29f   :  { %8551 = vst [vmem:[#allocation117_spill] sm:$0xff] %v5779_v41  ;;  %v8257_v62 = vunpack.c.l.s8.bf16 %v5779_v41  ;;  %v575_v2 = vpack.c.bf16 %v551_v44, %v549_v63  ;;  %v8261_v0 = vunpack.c.h.s8.bf16 %v5779_v41  ;;  %v559_v63 = vld [vmem:[#allocation10 + $0xb8] sm:$0xff]  ;;  %v556_v44 = vld [vmem:[#allocation10 + $0xa0] sm:$0xff] }
 0x2a0   :  { %1672 = vmatprep.subr.bf16.mxu1 %v571_v49  ;;  %v5787_v49 = vld [vmem:[#allocation2 + $0xb8] sm:$0xff] }
 0x2a1   :  { %1673 = vmatpush1.bf16.msra.mxu1 %v570_v26  ;;  %8552 = vst [vmem:[#allocation118_spill] sm:$0xff] %v5787_v49  ;;  %v574_v26 = vpack.c.bf16 %v550_v47, %v548_v35  ;;  %v5795_v35 = vld [vmem:[#allocation2 + $0xb0] sm:$0xff] }
 0x2a2   :  { %1674 = vmatprep.subr.bf16.mxu1 %v573_v25  ;;  %8553 = vst [vmem:[#allocation119_spill] sm:$0xff] %v5795_v35  ;;  %v558_v47 = vld [vmem:[#allocation10 + $0xb0] sm:$0xff] }
 0x2a5   :  { %1427 = vmatmul.mubr.bf16.gmra.mrb[28].mxu0 %v8252_v14  ;;  %v544_v14 = vld [vmem:[#allocation10 + $0x40] sm:$0xff] }
 0x2a6   :  { %1434 = vmatprep.mubr.bf16.mxu0 %v8258_v34  ;;  %v572_v1 = vpack.c.bf16 %v546_v29, %v544_v14  ;;  %v8283_v14 = vunpack.c.l.s8.bf16 %v5787_v49  ;;  %v553_v29 = vld [vmem:[#allocation10 + $0x88] sm:$0xff]  ;;  %v554_v34 = vld [vmem:[#allocation10 + $0x90] sm:$0xff] }
 0x2a7   :  { %v577_v25 = vpack.c.bf16 %v555_v17, %v553_v29  ;;  %v8280_v29 = vunpack.c.l.s8.bf16 %v5795_v35  ;;  %v563_v17 = vld [vmem:[#allocation10 + $0xd8] sm:$0xff] }
 0x2a8   :  { %1675 = vmatpush1.bf16.msra.mxu1 %v572_v1  ;;  %v557_v1 = vld [vmem:[#allocation10 + $0xa8] sm:$0xff] }
 0x2a9   :  { %1676 = vmatprep.subr.bf16.mxu1 %v575_v2  ;;  %v579_v2 = vpack.c.bf16 %v559_v63, %v557_v1  ;;  %v567_v1 = vld [vmem:[#allocation10 + $0xf8] sm:$0xff] }
 0x2aa   :  { %v5803_v63 = vld [vmem:[#allocation2 + $0xd8] sm:$0xff] }
 0x2ab   :  { %8554 = vst [vmem:[#allocation120_spill] sm:$0xff] %v5803_v63 }
 0x2ac   :  { %1677 = vmatpush1.bf16.msra.mxu1 %v574_v26  ;;  %v578_v26 = vpack.c.bf16 %v558_v47, %v556_v44  ;;  %v566_v47 = vld [vmem:[#allocation10 + $0xf0] sm:$0xff] }
 0x2ad   :  { %1435 = vmatmul.mubr.bf16.gmra.mrb[32].mxu0 %v8257_v62  ;;  %v552_v62 = vld [vmem:[#allocation10 + $0x80] sm:$0xff]  ;;  %1678 = vmatprep.subr.bf16.mxu1 %v577_v25 }
 0x2ae   :  { %1442 = vmatprep.mubr.bf16.mxu0 %v8262_v50  ;;  %v576_v11 = vpack.c.bf16 %v554_v34, %v552_v62  ;;  %v8277_v34 = vunpack.c.h.s8.bf16 %v5787_v49  ;;  %v561_v62 = vld [vmem:[#allocation10 + $0xc8] sm:$0xff]  ;;  %v562_v50 = vld [vmem:[#allocation10 + $0xd0] sm:$0xff] }
 0x2af   :  { %v581_v25 = vpack.c.bf16 %v563_v17, %v561_v62  ;;  %v8274_v62 = vunpack.c.h.s8.bf16 %v5795_v35  ;;  %v8265_v17 = vunpack.c.h.s8.bf16 %v5803_v63 }
 0x2b0   :  { %1679 = vmatpush1.bf16.msra.mxu1 %v576_v11  ;;  %v565_v11 = vld [vmem:[#allocation10 + $0xe8] sm:$0xff] }
 0x2b1   :  { %1680 = vmatprep.subr.bf16.mxu1 %v579_v2  ;;  %v583_v44 = vpack.c.bf16 %v567_v1, %v565_v11  ;;  %v564_v2 = vld [vmem:[#allocation10 + $0xe0] sm:$0xff] }
 0x2b4   :  { %1681 = vmatpush1.bf16.msra.mxu1 %v578_v26  ;;  %v582_v26 = vpack.c.bf16 %v566_v47, %v564_v2 }
 0x2b5   :  { %1443 = vmatmul.mubr.bf16.gmra.mrb[36].mxu0 %v8261_v0  ;;  %v560_v0 = vld [vmem:[#allocation10 + $0xc0] sm:$0xff]  ;;  %1682 = vmatprep.subr.bf16.mxu1 %v581_v25  ;;  %v5819_v25 = vld [vmem:[#allocation2 + $0xf8] sm:$0xff] }
 0x2b6   :  { %1450 = vmatprep.mubr.bf16.mxu0 %v8283_v14  ;;  %v580_v41 = vpack.c.bf16 %v562_v50, %v560_v0  ;;  %v8271_v50 = vunpack.c.l.s8.bf16 %v5803_v63  ;;  %8556 = vst [vmem:[#allocation122_spill] sm:$0xff] %v5819_v25  ;;  %v8267_v1 = vunpack.c.l.s8.bf16 %v5819_v25  ;;  %v8270_v47 = vunpack.c.h.s8.bf16 %v5819_v25 }
 0x2b8   :  { %1683 = vmatpush1.bf16.msra.mxu1 %v580_v41  ;;  %v5811_v41 = vld [vmem:[#allocation2 + $0xd0] sm:$0xff] }
 0x2b9   :  { %1684 = vmatprep.subr.bf16.mxu1 %v583_v44  ;;  %8555 = vst [vmem:[#allocation121_spill] sm:$0xff] %v5811_v41  ;;  %v8268_v0 = vunpack.c.l.s8.bf16 %v5811_v41  ;;  %v8266_v11 = vunpack.c.h.s8.bf16 %v5811_v41  ;;  %v5827_v44 = vld [vmem:[#allocation2 + $0xf0] sm:$0xff] }
 0x2ba   :  { %8557 = vst [vmem:[#allocation123_spill] sm:$0xff] %v5827_v44  ;;  %v8269_v2 = vunpack.c.l.s8.bf16 %v5827_v44 }
 0x2bc   :  { %1685 = vmatpush1.bf16.msra.mxu1 %v582_v26  ;;  %v5835_v26 = vld [vmem:[#allocation2 + $0x118] sm:$0xff] }
 0x2bd   :  { %1451 = vmatmul.mubr.bf16.gmra.mrb[40].mxu0 %v8280_v29  ;;  %8558 = vst [vmem:[#allocation124_spill] sm:$0xff] %v5835_v26 }
 0x2be   :  { %1458 = vmatprep.mubr.bf16.mxu0 %v8277_v34 }
 0x2c5   :  { %1459 = vmatmul.mubr.bf16.gmra.mrb[44].mxu0 %v8274_v62 }
 0x2c6   :  { %1466 = vmatprep.mubr.bf16.mxu0 %v8271_v50 }
 0x2cd   :  { %1467 = vmatmul.mubr.bf16.gmra.mrb[48].mxu0 %v8268_v0 }
 0x2ce   :  { %1474 = vmatprep.mubr.bf16.mxu0 %v8265_v17  ;;  %v8272_v17 = vunpack.c.h.s8.bf16 %v5827_v44 }
 0x2d5   :  { %1475 = vmatmul.mubr.bf16.gmra.mrb[52].mxu0 %v8266_v11  ;;  %v8273_v11 = vunpack.c.l.s8.bf16 %v5835_v26 }
 0x2d6   :  { %1482 = vmatprep.mubr.bf16.mxu0 %v8267_v1  ;;  %v5843_v1 = vld [vmem:[#allocation2 + $0x110] sm:$0xff] }
 0x2d7   :  { %8559 = vst [vmem:[#allocation125_spill] sm:$0xff] %v5843_v1  ;;  %v8275_v0 = vunpack.c.l.s8.bf16 %v5843_v1  ;;  %v8278_v50 = vunpack.c.h.s8.bf16 %v5843_v1  ;;  %v587_v1 = vld [vmem:[#allocation13 + $0x10] sm:$0xff] }
 0x2dd   :  { %1483 = vmatmul.mubr.bf16.gmra.mrb[56].mxu0 %v8269_v2  ;;  %v8276_v2 = vunpack.c.h.s8.bf16 %v5835_v26 }
 0x2de   :  { %1490 = vmatprep.mubr.bf16.mxu0 %v8270_v47  ;;  %v5851_v47 = vld [vmem:[#allocation2 + $0x138] sm:$0xff] }
 0x2df   :  { %8560 = vst [vmem:[#allocation126_spill] sm:$0xff] %v5851_v47 }
 0x2e5   :  { %1491 = vmatmul.mubr.bf16.gmra.mrb[60].mxu0 %v8272_v17  ;;  %v8279_v17 = vunpack.c.l.s8.bf16 %v5851_v47 }
 0x2e6   :  { %1498 = vmatprep.mubr.bf16.mxu0 %v8273_v11  ;;  %v5859_v11 = vld [vmem:[#allocation2 + $0x130] sm:$0xff] }
 0x2e7   :  { %8561 = vst [vmem:[#allocation127_spill] sm:$0xff] %v5859_v11  ;;  %v8281_v62 = vunpack.c.l.s8.bf16 %v5859_v11  ;;  %v8284_v34 = vunpack.c.h.s8.bf16 %v5859_v11 }
 0x2ed   :  { %1499 = vmatmul.mubr.bf16.gmra.mrb[64].mxu0 %v8275_v0  ;;  %v8282_v0 = vunpack.c.h.s8.bf16 %v5851_v47  ;;  %v588_v47 = vld [vmem:[#allocation13 + $0x18] sm:$0xff] }
 0x2ee   :  { %1506 = vmatprep.mubr.bf16.mxu0 %v8276_v2  ;;  %v5867_v2 = vld [vmem:[#allocation2 + $0x158] sm:$0xff] }
 0x2ef   :  { %8562 = vst [vmem:[#allocation128_spill] sm:$0xff] %v5867_v2 }
 0x2f5   :  { %1507 = vmatmul.mubr.bf16.gmra.mrb[68].mxu0 %v8278_v50  ;;  %v8285_v50 = vunpack.c.l.s8.bf16 %v5867_v2 }
 0x2f6   :  { %1514 = vmatprep.mubr.bf16.mxu0 %v8279_v17  ;;  %v5875_v17 = vld [vmem:[#allocation2 + $0x150] sm:$0xff] }
 0x2f7   :  { %8563 = vst [vmem:[#allocation129_spill] sm:$0xff] %v5875_v17  ;;  %v8288_v29 = vunpack.c.l.s8.bf16 %v5875_v17  ;;  %v8292_v14 = vunpack.c.h.s8.bf16 %v5875_v17 }
 0x2fd   :  { %1515 = vmatmul.mubr.bf16.gmra.mrb[72].mxu0 %v8281_v62  ;;  %v8289_v62 = vunpack.c.h.s8.bf16 %v5867_v2 }
 0x2fe   :  { %1522 = vmatprep.mubr.bf16.mxu0 %v8282_v0  ;;  %v5883_v0 = vld [vmem:[#allocation2 + $0x178] sm:$0xff] }
 0x2ff   :  { %8564 = vst [vmem:[#allocation130_spill] sm:$0xff] %v5883_v0 }
 0x305   :  { %1523 = vmatmul.mubr.bf16.gmra.mrb[76].mxu0 %v8284_v34  ;;  %v8293_v34 = vunpack.c.l.s8.bf16 %v5883_v0 }
 0x306   :  { %1530 = vmatprep.mubr.bf16.mxu0 %v8285_v50  ;;  %v5891_v50 = vld [vmem:[#allocation2 + $0x170] sm:$0xff] }
 0x307   :  { %8565 = vst [vmem:[#allocation131_spill] sm:$0xff] %v5891_v50  ;;  %v8296_v11 = vunpack.c.l.s8.bf16 %v5891_v50  ;;  %v8300_v17 = vunpack.c.h.s8.bf16 %v5891_v50 }
 0x30d   :  { %1531 = vmatmul.mubr.bf16.gmra.mrb[80].mxu0 %v8288_v29  ;;  %v8297_v29 = vunpack.c.h.s8.bf16 %v5883_v0 }
 0x30e   :  { %1538 = vmatprep.mubr.bf16.mxu0 %v8289_v62  ;;  %v5899_v62 = vld [vmem:[#allocation2 + $0x198] sm:$0xff] }
 0x30f   :  { %8566 = vst [vmem:[#allocation132_spill] sm:$0xff] %v5899_v62 }
 0x315   :  { %1539 = vmatmul.mubr.bf16.gmra.mrb[84].mxu0 %v8292_v14  ;;  %v8301_v14 = vunpack.c.l.s8.bf16 %v5899_v62 }
 0x316   :  { %1546 = vmatprep.mubr.bf16.mxu0 %v8293_v34  ;;  %v5907_v34 = vld [vmem:[#allocation2 + $0x190] sm:$0xff] }
 0x317   :  { %8567 = vst [vmem:[#allocation133_spill] sm:$0xff] %v5907_v34  ;;  %v8304_v2 = vunpack.c.l.s8.bf16 %v5907_v34  ;;  %v8310_v50 = vunpack.c.h.s8.bf16 %v5907_v34 }
 0x31d   :  { %1547 = vmatmul.mubr.bf16.gmra.mrb[88].mxu0 %v8296_v11  ;;  %v8307_v11 = vunpack.c.h.s8.bf16 %v5899_v62 }
 0x31e   :  { %1554 = vmatprep.mubr.bf16.mxu0 %v8297_v29  ;;  %v5915_v29 = vld [vmem:[#allocation2 + $0x1b8] sm:$0xff] }
 0x31f   :  { %8568 = vst [vmem:[#allocation134_spill] sm:$0xff] %v5915_v29 }
 0x325   :  { %1555 = vmatmul.mubr.bf16.gmra.mrb[92].mxu0 %v8300_v17  ;;  %v8313_v17 = vunpack.c.l.s8.bf16 %v5915_v29 }
 0x326   :  { %1562 = vmatprep.mubr.bf16.mxu0 %v8301_v14  ;;  %v5923_v14 = vld [vmem:[#allocation2 + $0x1b0] sm:$0xff] }
 0x327   :  { %8569 = vst [vmem:[#allocation135_spill] sm:$0xff] %v5923_v14  ;;  %v8327_v0 = vunpack.c.l.s8.bf16 %v5923_v14  ;;  %v8333_v44 = vunpack.c.h.s8.bf16 %v5923_v14 }
 0x32d   :  { %1563 = vmatmul.mubr.bf16.gmra.mrb[96].mxu0 %v8304_v2  ;;  %v586_v2 = vld [vmem:[#allocation13 + $0x8] sm:$0xff] }
 0x32e   :  { %1570 = vmatprep.mubr.bf16.mxu0 %v8307_v11  ;;  %v8326_v11 = vunpack.c.h.s8.bf16 %v5915_v29  ;;  %v618_v62 = vpack.c.bf16 %v588_v47, %v586_v2  ;;  %v5940_v47 = vld [vmem:[#allocation2 + $0x1d0] sm:$0xff] }
 0x32f   :  { %8571 = vst [vmem:[#allocation137_spill] sm:$0xff] %v5940_v47 }
 0x330   :  { %2503 = vmatprep.subr.bf16.mxu1 %v618_v62 }
 0x335   :  { %1571 = vmatmul.mubr.bf16.gmra.mrb[100].mxu0 %v8310_v50  ;;  %v5931_v50 = vld [vmem:[#allocation2 + $0x1d8] sm:$0xff] }
 0x336   :  { %1578 = vmatprep.mubr.bf16.mxu0 %v8313_v17  ;;  %8570 = vst [vmem:[#allocation136_spill] sm:$0xff] %v5931_v50  ;;  %v585_v17 = vld [vmem:[#allocation13] sm:$0xff]  ;;  %v8330_v41 = vunpack.c.l.s8.bf16 %v5931_v50 }
 0x337   :  { %v617_v62 = vpack.c.bf16 %v587_v1, %v585_v17 }
 0x33d   :  { %1579 = vmatmul.mubr.bf16.gmra.mrb[104].mxu0 %v8327_v0  ;;  %v8332_v0 = vunpack.c.l.s8.bf16 %v5940_v47 }
 0x33e   :  { %1586 = vmatprep.mubr.bf16.mxu0 %v8326_v11 }
 0x340   :  { %v1372_v34 = vpop.f32.mrb[0].mxu0 }
 0x341   :  { %v1374_v26 = vpop.f32.mrb[1].mxu0 }
 0x342   :  { %v1375_v25 = vpop.f32.mrb[2].mxu0 }
 0x343   :  { %v1627_v63 = vpack.c.bf16 %v1375_v25, %v1372_v34  ;;  %v1377_v2 = vpop.f32.mrb[3].mxu0  ;;  %v8331_v34 = vunpack.c.h.s8.bf16 %v5931_v50 }
 0x344   :  { %v8336_v2 = vunpack.c.h.s8.bf16 %v5940_v47  ;;  %v591_v47 = vld [vmem:[#allocation13 + $0x30] sm:$0xff] }
 0x345   :  { %1587 = vmatmul.mubr.bf16.gmra.mrb[108].mxu0 %v8333_v44  ;;  %1703 = vmatmul.mubr.bf16.vlgmr.msra.gmra.mrb[0].mxu1 %v1627_v63  ;;  %v5949_v63 = vld [vmem:[#allocation2 + $0x1f8] sm:$0xff] }
 0x346   :  { %1594 = vmatprep.mubr.bf16.mxu0 %v8330_v41  ;;  %1712 = vmatprep.mubr.bf16.mxu1 %v8498_v48  ;;  %8572 = vst [vmem:[#allocation138_spill] sm:$0xff] %v5949_v63  ;;  %v8339_v41 = vunpack.c.l.s8.bf16 %v5949_v63  ;;  %v592_v44 = vld [vmem:[#allocation13 + $0x38] sm:$0xff] }
 0x347   :  { %2504 = vmatpush1.bf16.msra.mxu1 %v617_v62 }
 0x348   :  { %v1380_v26 = vpop.f32.mrb[4].mxu0 }
 0x349   :  { %v1382_v11 = vpop.f32.mrb[5].mxu0 }
 0x34a   :  { %v1383_v29 = vpop.f32.mrb[6].mxu0 }
 0x34b   :  { %v1628_v17 = vpack.c.bf16 %v1383_v29, %v1380_v26  ;;  %v1385_v25 = vpop.f32.mrb[7].mxu0 }
 0x34d   :  { %1595 = vmatmul.mubr.bf16.gmra.mrb[112].mxu0 %v8332_v0  ;;  %1713 = vmatmul.mubr.bf16.gmra.mrb[4].mxu1 %v1628_v17  ;;  %v5958_v17 = vld [vmem:[#allocation2 + $0x1f0] sm:$0xff] }
 0x34e   :  { %1602 = vmatprep.mubr.bf16.mxu0 %v8331_v34  ;;  %1722 = vmatprep.mubr.bf16.mxu1 %v8498_v48  ;;  %8573 = vst [vmem:[#allocation139_spill] sm:$0xff] %v5958_v17  ;;  %v8344_v34 = vunpack.c.l.s8.bf16 %v5958_v17  ;;  %v590_v0 = vld [vmem:[#allocation13 + $0x28] sm:$0xff] }
 0x350   :  { %v1388_v1 = vpop.f32.mrb[8].mxu0 }
 0x351   :  { %v1390_v11 = vpop.f32.mrb[9].mxu0 }
 0x352   :  { %v1391_v62 = vpop.f32.mrb[10].mxu0 }
 0x353   :  { %v1629_v29 = vpack.c.bf16 %v1391_v62, %v1388_v1  ;;  %v1393_v26 = vpop.f32.mrb[11].mxu0  ;;  %v8342_v1 = vunpack.c.h.s8.bf16 %v5949_v63  ;;  %v620_v62 = vpack.c.bf16 %v592_v44, %v590_v0  ;;  %v8343_v0 = vunpack.c.h.s8.bf16 %v5958_v17 }
 0x355   :  { %1603 = vmatmul.mubr.bf16.gmra.mrb[116].mxu0 %v8336_v2  ;;  %1723 = vmatmul.mubr.bf16.gmra.mrb[8].mxu1 %v1629_v29  ;;  %v589_v29 = vld [vmem:[#allocation13 + $0x20] sm:$0xff] }
 0x356   :  { %1610 = vmatprep.mubr.bf16.mxu0 %v8339_v41  ;;  %1732 = vmatprep.mubr.bf16.mxu1 %v8498_v48  ;;  %v619_v41 = vpack.c.bf16 %v591_v47, %v589_v29  ;;  %v8574_v47 = vunpack.c.l.s8.bf16 %v5230_v39 }
 0x357   :  { %2505 = vmatprep.subr.bf16.mxu1 %v620_v62 }
 0x358   :  { %v1396_v25 = vpop.f32.mrb[12].mxu0  ;;  %2506 = vmatpush1.bf16.msra.mxu1 %v619_v41 }
 0x359   :  { %v1398_v11 = vpop.f32.mrb[13].mxu0 }
 0x35a   :  { %v1399_v50 = vpop.f32.mrb[14].mxu0 }
 0x35b   :  { %v1630_v26 = vpack.c.bf16 %v1399_v50, %v1396_v25  ;;  %v1401_v2 = vpop.f32.mrb[15].mxu0 }
 0x35d   :  { %1611 = vmatmul.mubr.bf16.gmra.mrb[120].mxu0 %v8344_v34  ;;  %1733 = vmatmul.mubr.bf16.gmra.mrb[12].mxu1 %v1630_v26  ;;  %v594_v34 = vld [vmem:[#allocation13 + $0x48] sm:$0xff] }
 0x35e   :  { %1618 = vmatprep.mubr.bf16.mxu0 %v8342_v1  ;;  %1742 = vmatprep.mubr.bf16.mxu1 %v8498_v48 }
 0x360   :  { %v1404_v11 = vpop.f32.mrb[16].mxu0 }
 0x361   :  { %v1406_v14 = vpop.f32.mrb[17].mxu0 }
 0x362   :  { %v1407_v50 = vpop.f32.mrb[18].mxu0 }
 0x363   :  { %v1631_v44 = vpack.c.bf16 %v1407_v50, %v1404_v11  ;;  %v1409_v2 = vpop.f32.mrb[19].mxu0 }
 0x365   :  { %1619 = vmatmul.mubr.bf16.gmra.mrb[124].mxu0 %v8343_v0  ;;  %1743 = vmatmul.mubr.bf16.gmra.mrb[16].mxu1 %v1631_v44 }
 0x366   :  { %1752 = vmatprep.mubr.bf16.mxu1 %v8498_v48  ;;  %3712 = vmatprep.mubr.bf16.mxu0 %v8574_v47  ;;  %v596_v47 = vld [vmem:[#allocation13 + $0x58] sm:$0xff] }
 0x368   :  { %v1412_v25 = vpop.f32.mrb[20].mxu0 }
 0x369   :  { %v1414_v62 = vpop.f32.mrb[21].mxu0 }
 0x36a   :  { %v1415_v26 = vpop.f32.mrb[22].mxu0  ;;  %v622_v62 = vpack.c.bf16 %v596_v47, %v594_v34 }
 0x36b   :  { %v1632_v41 = vpack.c.bf16 %v1415_v26, %v1412_v25  ;;  %v1417_v29 = vpop.f32.mrb[23].mxu0  ;;  %v593_v26 = vld [vmem:[#allocation13 + $0x40] sm:$0xff] }
 0x36c   :  { %2507 = vmatprep.subr.bf16.mxu1 %v622_v62 }
 0x36d   :  { %1753 = vmatmul.mubr.bf16.gmra.mrb[20].mxu1 %v1632_v41  ;;  %v595_v41 = vld [vmem:[#allocation13 + $0x50] sm:$0xff] }
 0x36e   :  { %1762 = vmatprep.mubr.bf16.mxu1 %v8498_v48  ;;  %v621_v29 = vpack.c.bf16 %v595_v41, %v593_v26 }
 0x370   :  { %v1420_v14 = vpop.f32.mrb[24].mxu0  ;;  %2508 = vmatpush1.bf16.msra.mxu1 %v621_v29 }
 0x371   :  { %v1422_v11 = vpop.f32.mrb[25].mxu0 }
 0x372   :  { %v1423_v50 = vpop.f32.mrb[26].mxu0 }
 0x373   :  { %v1633_v2 = vpack.c.bf16 %v1423_v50, %v1420_v14  ;;  %v1425_v1 = vpop.f32.mrb[27].mxu0 }
 0x375   :  { %1763 = vmatmul.mubr.bf16.gmra.mrb[24].mxu1 %v1633_v2 }
 0x376   :  { %1772 = vmatprep.mubr.bf16.mxu1 %v8498_v48 }
 0x378   :  { %v1428_v44 = vpop.f32.mrb[28].mxu0 }
 0x379   :  { %v1430_v0 = vpop.f32.mrb[29].mxu0 }
 0x37a   :  { %v1431_v17 = vpop.f32.mrb[30].mxu0 }
 0x37b   :  { %v1634_v63 = vpack.c.bf16 %v1431_v17, %v1428_v44  ;;  %v1433_v25 = vpop.f32.mrb[31].mxu0 }
 0x37d   :  { %1773 = vmatmul.mubr.bf16.gmra.mrb[28].mxu1 %v1634_v63 }
 0x37e   :  { %1782 = vmatprep.mubr.bf16.mxu1 %v8498_v48 }
 0x380   :  { %v1436_v1 = vpop.f32.mrb[32].mxu0 }
 0x381   :  { %v1438_v14 = vpop.f32.mrb[33].mxu0 }
 0x382   :  { %v1439_v11 = vpop.f32.mrb[34].mxu0 }
 0x383   :  { %v1635_v50 = vpack.c.bf16 %v1439_v11, %v1436_v1  ;;  %v1441_v2 = vpop.f32.mrb[35].mxu0  ;;  %v598_v11 = vld [vmem:[#allocation13 + $0x68] sm:$0xff] }
 0x385   :  { %1783 = vmatmul.mubr.bf16.gmra.mrb[32].mxu1 %v1635_v50  ;;  %v600_v50 = vld [vmem:[#allocation13 + $0x78] sm:$0xff] }
 0x386   :  { %1792 = vmatprep.mubr.bf16.mxu1 %v8498_v48 }
 0x388   :  { %v1444_v0 = vpop.f32.mrb[36].mxu0 }
 0x389   :  { %v1446_v34 = vpop.f32.mrb[37].mxu0 }
 0x38a   :  { %v1447_v17 = vpop.f32.mrb[38].mxu0 }
 0x38b   :  { %v1636_v44 = vpack.c.bf16 %v1447_v17, %v1444_v0  ;;  %v1449_v47 = vpop.f32.mrb[39].mxu0  ;;  %v624_v0 = vpack.c.bf16 %v600_v50, %v598_v11  ;;  %v597_v17 = vld [vmem:[#allocation13 + $0x60] sm:$0xff] }
 0x38d   :  { %1793 = vmatmul.mubr.bf16.gmra.mrb[36].mxu1 %v1636_v44  ;;  %v599_v44 = vld [vmem:[#allocation13 + $0x70] sm:$0xff]  ;;  %2509 = vmatprep.subr.bf16.mxu1 %v624_v0 }
 0x38e   :  { %1802 = vmatprep.mubr.bf16.mxu1 %v8498_v48  ;;  %v623_v47 = vpack.c.bf16 %v599_v44, %v597_v17  ;;  %v602_v17 = vld [vmem:[#allocation13 + $0x88] sm:$0xff]  ;;  %v604_v44 = vld [vmem:[#allocation13 + $0x98] sm:$0xff] }
 0x390   :  { %v1452_v63 = vpop.f32.mrb[40].mxu0  ;;  %2510 = vmatpush1.bf16.msra.mxu1 %v623_v47 }
 0x391   :  { %v1454_v62 = vpop.f32.mrb[41].mxu0 }
 0x392   :  { %v1455_v25 = vpop.f32.mrb[42].mxu0 }
 0x393   :  { %v1637_v26 = vpack.c.bf16 %v1455_v25, %v1452_v63  ;;  %v1457_v41 = vpop.f32.mrb[43].mxu0 }
 0x395   :  { %1803 = vmatmul.mubr.bf16.gmra.mrb[40].mxu1 %v1637_v26 }
 0x396   :  { %1812 = vmatprep.mubr.bf16.mxu1 %v8498_v48 }
 0x398   :  { %v1460_v29 = vpop.f32.mrb[44].mxu0 }
 0x399   :  { %v1462_v1 = vpop.f32.mrb[45].mxu0 }
 0x39a   :  { %v1463_v14 = vpop.f32.mrb[46].mxu0 }
 0x39b   :  { %v1638_v2 = vpack.c.bf16 %v1463_v14, %v1460_v29  ;;  %v1465_v34 = vpop.f32.mrb[47].mxu0 }
 0x39d   :  { %1813 = vmatmul.mubr.bf16.gmra.mrb[44].mxu1 %v1638_v2 }
 0x39e   :  { %1822 = vmatprep.mubr.bf16.mxu1 %v8498_v48 }
 0x3a0   :  { %v1468_v63 = vpop.f32.mrb[48].mxu0 }
 0x3a1   :  { %v1470_v62 = vpop.f32.mrb[49].mxu0 }
 0x3a2   :  { %v1471_v25 = vpop.f32.mrb[50].mxu0 }
 0x3a3   :  { %v1639_v26 = vpack.c.bf16 %v1471_v25, %v1468_v63  ;;  %v1473_v41 = vpop.f32.mrb[51].mxu0  ;;  %v626_v63 = vpack.c.bf16 %v604_v44, %v602_v17  ;;  %v601_v25 = vld [vmem:[#allocation13 + $0x80] sm:$0xff]  ;;  %v612_v17 = vld [vmem:[#allocation13 + $0xd8] sm:$0xff] }
 0x3a5   :  { %1823 = vmatmul.mubr.bf16.gmra.mrb[48].mxu1 %v1639_v26  ;;  %v603_v26 = vld [vmem:[#allocation13 + $0x90] sm:$0xff]  ;;  %2511 = vmatprep.subr.bf16.mxu1 %v626_v63  ;;  %v609_v63 = vld [vmem:[#allocation13 + $0xc0] sm:$0xff] }
 0x3a6   :  { %1832 = vmatprep.mubr.bf16.mxu1 %v8498_v48  ;;  %v625_v41 = vpack.c.bf16 %v603_v26, %v601_v25  ;;  %v611_v25 = vld [vmem:[#allocation13 + $0xd0] sm:$0xff] }
 0x3a7   :  { %v629_v26 = vpack.c.bf16 %v611_v25, %v609_v63 }
 0x3a8   :  { %v1476_v1 = vpop.f32.mrb[52].mxu0  ;;  %2512 = vmatpush1.bf16.msra.mxu1 %v625_v41  ;;  %v614_v41 = vld [vmem:[#allocation13 + $0xe8] sm:$0xff] }
 0x3a9   :  { %v1478_v29 = vpop.f32.mrb[53].mxu0 }
 0x3aa   :  { %v1479_v14 = vpop.f32.mrb[54].mxu0  ;;  %v608_v29 = vld [vmem:[#allocation13 + $0xb8] sm:$0xff] }
 0x3ab   :  { %v1640_v11 = vpack.c.bf16 %v1479_v14, %v1476_v1  ;;  %v1481_v50 = vpop.f32.mrb[55].mxu0  ;;  %v606_v1 = vld [vmem:[#allocation13 + $0xa8] sm:$0xff] }
 0x3ac   :  { %v628_v14 = vpack.c.bf16 %v608_v29, %v606_v1  ;;  %v607_v50 = vld [vmem:[#allocation13 + $0xb0] sm:$0xff]  ;;  %v616_v1 = vld [vmem:[#allocation13 + $0xf8] sm:$0xff] }
 0x3ad   :  { %1833 = vmatmul.mubr.bf16.gmra.mrb[52].mxu1 %v1640_v11  ;;  %v605_v11 = vld [vmem:[#allocation13 + $0xa0] sm:$0xff]  ;;  %v632_v29 = vpack.c.bf16 %v616_v1, %v614_v41 }
 0x3ae   :  { %1842 = vmatprep.mubr.bf16.mxu1 %v8498_v48  ;;  %v627_v35 = vpack.c.bf16 %v607_v50, %v605_v11  ;;  %2513 = vmatprep.subr.bf16.mxu1 %v628_v14  ;;  %v615_v14 = vld [vmem:[#allocation13 + $0xf0] sm:$0xff] }
 0x3b0   :  { %v1484_v2 = vpop.f32.mrb[56].mxu0  ;;  %2514 = vmatpush1.bf16.msra.mxu1 %v627_v35 }
 0x3b1   :  { %v1486_v34 = vpop.f32.mrb[57].mxu0 }
 0x3b2   :  { %v1487_v0 = vpop.f32.mrb[58].mxu0 }
 0x3b3   :  { %v1641_v47 = vpack.c.bf16 %v1487_v0, %v1484_v2  ;;  %v1489_v62 = vpop.f32.mrb[59].mxu0  ;;  %v610_v0 = vld [vmem:[#allocation13 + $0xc8] sm:$0xff] }
 0x3b5   :  { %1843 = vmatmul.mubr.bf16.gmra.mrb[56].mxu1 %v1641_v47  ;;  %v630_v47 = vpack.c.bf16 %v612_v17, %v610_v0 }
 0x3b6   :  { %1852 = vmatprep.mubr.bf16.mxu1 %v8498_v48 }
 0x3b7   :  { %2515 = vmatprep.subr.bf16.mxu1 %v630_v47 }
 0x3b8   :  { %v1492_v34 = vpop.f32.mrb[60].mxu0  ;;  %2516 = vmatpush1.bf16.msra.mxu1 %v629_v26 }
 0x3b9   :  { %v1494_v49 = vpop.f32.mrb[61].mxu0  ;;  %2517 = vmatprep.subr.bf16.mxu1 %v632_v29 }
 0x3ba   :  { %v1495_v2 = vpop.f32.mrb[62].mxu0  ;;  %v613_v49 = vld [vmem:[#allocation13 + $0xe0] sm:$0xff] }
 0x3bb   :  { %v1642_v44 = vpack.c.bf16 %v1495_v2, %v1492_v34  ;;  %v1497_v62 = vpop.f32.mrb[63].mxu0  ;;  %v631_v35 = vpack.c.bf16 %v615_v14, %v613_v49 }
 0x3bd   :  { %1853 = vmatmul.mubr.bf16.gmra.mrb[60].mxu1 %v1642_v44 }
 0x3be   :  { %1862 = vmatprep.mubr.bf16.mxu1 %v8498_v48  ;;  %2518 = vmatpush1.bf16.msra.mxu1 %v631_v35 }
 0x3bf   :  { %3353 = vmatprep.subr.bf16.mxu1 %v8498_v48 }
 0x3c0   :  { %v1500_v11 = vpop.f32.mrb[64].mxu0 }
 0x3c1   :  { %v1502_v50 = vpop.f32.mrb[65].mxu0 }
 0x3c2   :  { %v1503_v34 = vpop.f32.mrb[66].mxu0 }
 0x3c3   :  { %v1643_v2 = vpack.c.bf16 %v1503_v34, %v1500_v11  ;;  %v1505_v0 = vpop.f32.mrb[67].mxu0 }
 0x3c5   :  { %1863 = vmatmul.mubr.bf16.gmra.mrb[64].mxu1 %v1643_v2 }
 0x3c6   :  { %1872 = vmatprep.mubr.bf16.mxu1 %v8498_v48 }
 0x3c8   :  { %v1508_v17 = vpop.f32.mrb[68].mxu0 }
 0x3c9   :  { %v1510_v44 = vpop.f32.mrb[69].mxu0 }
 0x3ca   :  { %v1511_v62 = vpop.f32.mrb[70].mxu0 }
 0x3cb   :  { %v1644_v47 = vpack.c.bf16 %v1511_v62, %v1508_v17  ;;  %v1513_v63 = vpop.f32.mrb[71].mxu0 }
 0x3cd   :  { %1873 = vmatmul.mubr.bf16.gmra.mrb[68].mxu1 %v1644_v47 }
 0x3ce   :  { %1882 = vmatprep.mubr.bf16.mxu1 %v8498_v48 }
 0x3d0   :  { %v1516_v25 = vpop.f32.mrb[72].mxu0 }
 0x3d1   :  { %v1518_v26 = vpop.f32.mrb[73].mxu0 }
 0x3d2   :  { %v1519_v41 = vpop.f32.mrb[74].mxu0 }
 0x3d3   :  { %v1645_v1 = vpack.c.bf16 %v1519_v41, %v1516_v25  ;;  %v1521_v29 = vpop.f32.mrb[75].mxu0 }
 0x3d5   :  { %1883 = vmatmul.mubr.bf16.gmra.mrb[72].mxu1 %v1645_v1 }
 0x3d6   :  { %1892 = vmatprep.mubr.bf16.mxu1 %v8498_v48 }
 0x3d8   :  { %v1524_v49 = vpop.f32.mrb[76].mxu0 }
 0x3d9   :  { %v1526_v14 = vpop.f32.mrb[77].mxu0 }
 0x3da   :  { %v1527_v11 = vpop.f32.mrb[78].mxu0 }
 0x3db   :  { %v1646_v35 = vpack.c.bf16 %v1527_v11, %v1524_v49  ;;  %v1529_v50 = vpop.f32.mrb[79].mxu0 }
 0x3dd   :  { %1893 = vmatmul.mubr.bf16.gmra.mrb[76].mxu1 %v1646_v35 }
 0x3de   :  { %1902 = vmatprep.mubr.bf16.mxu1 %v8498_v48 }
 0x3e0   :  { %v1532_v34 = vpop.f32.mrb[80].mxu0 }
 0x3e1   :  { %v1534_v2 = vpop.f32.mrb[81].mxu0 }
 0x3e2   :  { %v1535_v0 = vpop.f32.mrb[82].mxu0 }
 0x3e3   :  { %v1647_v17 = vpack.c.bf16 %v1535_v0, %v1532_v34  ;;  %v1537_v44 = vpop.f32.mrb[83].mxu0 }
 0x3e5   :  { %1903 = vmatmul.mubr.bf16.gmra.mrb[80].mxu1 %v1647_v17 }
 0x3e6   :  { %1912 = vmatprep.mubr.bf16.mxu1 %v8498_v48 }
 0x3e8   :  { %v1540_v62 = vpop.f32.mrb[84].mxu0 }
 0x3e9   :  { %v1542_v47 = vpop.f32.mrb[85].mxu0 }
 0x3ea   :  { %v1543_v63 = vpop.f32.mrb[86].mxu0 }
 0x3eb   :  { %v1648_v25 = vpack.c.bf16 %v1543_v63, %v1540_v62  ;;  %v1545_v26 = vpop.f32.mrb[87].mxu0 }
 0x3ed   :  { %1913 = vmatmul.mubr.bf16.gmra.mrb[84].mxu1 %v1648_v25 }
 0x3ee   :  { %1922 = vmatprep.mubr.bf16.mxu1 %v8498_v48 }
 0x3f0   :  { %v1548_v41 = vpop.f32.mrb[88].mxu0 }
 0x3f1   :  { %v1550_v1 = vpop.f32.mrb[89].mxu0 }
 0x3f2   :  { %v1551_v29 = vpop.f32.mrb[90].mxu0 }
 0x3f3   :  { %v1649_v49 = vpack.c.bf16 %v1551_v29, %v1548_v41  ;;  %v1553_v14 = vpop.f32.mrb[91].mxu0 }
 0x3f5   :  { %1923 = vmatmul.mubr.bf16.gmra.mrb[88].mxu1 %v1649_v49 }
 0x3f6   :  { %1932 = vmatprep.mubr.bf16.mxu1 %v8498_v48 }
 0x3f8   :  { %v1556_v11 = vpop.f32.mrb[92].mxu0 }
 0x3f9   :  { %v1558_v35 = vpop.f32.mrb[93].mxu0 }
 0x3fa   :  { %v1559_v50 = vpop.f32.mrb[94].mxu0 }
 0x3fb   :  { %v1650_v34 = vpack.c.bf16 %v1559_v50, %v1556_v11  ;;  %v1561_v2 = vpop.f32.mrb[95].mxu0 }
 0x3fd   :  { %1933 = vmatmul.mubr.bf16.gmra.mrb[92].mxu1 %v1650_v34 }
 0x3fe   :  { %1942 = vmatprep.mubr.bf16.mxu1 %v8498_v48 }
 0x400   :  { %v1564_v0 = vpop.f32.mrb[96].mxu0 }
 0x401   :  { %v1566_v17 = vpop.f32.mrb[97].mxu0 }
 0x402   :  { %v1567_v44 = vpop.f32.mrb[98].mxu0 }
 0x403   :  { %v1651_v62 = vpack.c.bf16 %v1567_v44, %v1564_v0  ;;  %v1569_v47 = vpop.f32.mrb[99].mxu0 }
 0x405   :  { %1943 = vmatmul.mubr.bf16.gmra.mrb[96].mxu1 %v1651_v62 }
 0x406   :  { %1952 = vmatprep.mubr.bf16.mxu1 %v8498_v48 }
 0x408   :  { %v1572_v63 = vpop.f32.mrb[100].mxu0 }
 0x409   :  { %v1574_v25 = vpop.f32.mrb[101].mxu0 }
 0x40a   :  { %v1575_v26 = vpop.f32.mrb[102].mxu0 }
 0x40b   :  { %v1652_v41 = vpack.c.bf16 %v1575_v26, %v1572_v63  ;;  %v1577_v1 = vpop.f32.mrb[103].mxu0 }
 0x40d   :  { %1953 = vmatmul.mubr.bf16.gmra.mrb[100].mxu1 %v1652_v41 }
 0x40e   :  { %1962 = vmatprep.mubr.bf16.mxu1 %v8498_v48 }
 0x410   :  { %v1580_v29 = vpop.f32.mrb[104].mxu0 }
 0x411   :  { %v1582_v49 = vpop.f32.mrb[105].mxu0 }
 0x412   :  { %v1583_v14 = vpop.f32.mrb[106].mxu0 }
 0x413   :  { %v1653_v11 = vpack.c.bf16 %v1583_v14, %v1580_v29  ;;  %v1585_v35 = vpop.f32.mrb[107].mxu0 }
 0x415   :  { %1963 = vmatmul.mubr.bf16.gmra.mrb[104].mxu1 %v1653_v11 }
 0x416   :  { %1972 = vmatprep.mubr.bf16.mxu1 %v8498_v48 }
 0x418   :  { %v1588_v50 = vpop.f32.mrb[108].mxu0  ;;  %v5996_v34 = vpop.f32.mrb[0].mxu1 }
 0x419   :  { %v1590_v2 = vpop.f32.mrb[109].mxu0  ;;  %v5998_v0 = vpop.f32.mrb[1].mxu1 }
 0x41a   :  { %v1591_v17 = vpop.f32.mrb[110].mxu0  ;;  %v6000_v44 = vpop.f32.mrb[2].mxu1 }
 0x41b   :  { %v1654_v62 = vpack.c.bf16 %v1591_v17, %v1588_v50  ;;  %v1593_v47 = vpop.f32.mrb[111].mxu0  ;;  %v6002_v63 = vpop.f32.mrb[3].mxu1 }
 0x41d   :  { %1973 = vmatmul.mubr.bf16.gmra.mrb[108].mxu1 %v1654_v62 }
 0x41e   :  { %1982 = vmatprep.mubr.bf16.mxu1 %v8498_v48 }
 0x420   :  { %v1596_v25 = vpop.f32.mrb[112].mxu0  ;;  %v6005_v26 = vpop.f32.mrb[4].mxu1 }
 0x421   :  { %v1598_v41 = vpop.f32.mrb[113].mxu0  ;;  %v6007_v1 = vpop.f32.mrb[5].mxu1 }
 0x422   :  { %v1599_v29 = vpop.f32.mrb[114].mxu0  ;;  %v6009_v49 = vpop.f32.mrb[6].mxu1 }
 0x423   :  { %v1655_v14 = vpack.c.bf16 %v1599_v29, %v1596_v25  ;;  %v1601_v11 = vpop.f32.mrb[115].mxu0  ;;  %v6011_v35 = vpop.f32.mrb[7].mxu1 }
 0x425   :  { %1983 = vmatmul.mubr.bf16.gmra.mrb[112].mxu1 %v1655_v14 }
 0x426   :  { %1992 = vmatprep.mubr.bf16.mxu1 %v8498_v48 }
 0x428   :  { %v1604_v50 = vpop.f32.mrb[116].mxu0  ;;  %v6014_v2 = vpop.f32.mrb[8].mxu1 }
 0x429   :  { %v1606_v17 = vpop.f32.mrb[117].mxu0  ;;  %v6016_v62 = vpop.f32.mrb[9].mxu1 }
 0x42a   :  { %v1607_v47 = vpop.f32.mrb[118].mxu0  ;;  %v6018_v41 = vpop.f32.mrb[10].mxu1 }
 0x42b   :  { %v1656_v38 = vpack.c.bf16 %v1607_v47, %v1604_v50  ;;  %v1609_v39 = vpop.f32.mrb[119].mxu0  ;;  %v6020_v40 = vpop.f32.mrb[11].mxu1 }
 0x42d   :  { %1993 = vmatmul.mubr.bf16.gmra.mrb[116].mxu1 %v1656_v38 }
 0x42e   :  { %2002 = vmatprep.mubr.bf16.mxu1 %v8498_v48 }
 0x430   :  { %v1612_v25 = vpop.f32.mrb[120].mxu0  ;;  %v6023_v29 = vpop.f32.mrb[12].mxu1 }
 0x431   :  { %v1614_v14 = vpop.f32.mrb[121].mxu0  ;;  %v6025_v11 = vpop.f32.mrb[13].mxu1 }
 0x432   :  { %v1615_v18 = vpop.f32.mrb[122].mxu0  ;;  %v6027_v17 = vpop.f32.mrb[14].mxu1 }
 0x433   :  { %v1657_v59 = vpack.c.bf16 %v1615_v18, %v1612_v25  ;;  %v1617_v15 = vpop.f32.mrb[123].mxu0  ;;  %v6029_v16 = vpop.f32.mrb[15].mxu1  ;;  %v3112_v18 = vld [vmem:[#allocation14] sm:$0xff] }
 0x434   :  { %v3113_v15 = vld [vmem:[#allocation14 + $0x8] sm:$0xff]  ;;  %v4743_v25 = vld [vmem:[#allocation8] sm:$0xff] }
 0x435   :  { %2003 = vmatmul.mubr.bf16.gmra.mrb[120].mxu1 %v1657_v59  ;;  %v2471_v10 = vpack.c.bf16 %v4744_v3, %v4743_v25  ;;  %v3144_v54 = vpack.c.bf16 %v3113_v15, %v3112_v18  ;;  %v3114_v18 = vld [vmem:[#allocation14 + $0x10] sm:$0xff]  ;;  %v3115_v15 = vld [vmem:[#allocation14 + $0x18] sm:$0xff] }
 0x436   :  { %2012 = vmatprep.mubr.bf16.mxu1 %v8498_v48  ;;  %v3145_v21 = vpack.c.bf16 %v3115_v15, %v3114_v18  ;;  %v4750_v15 = vld [vmem:[#allocation8 + $0x30] sm:$0xff] }
 0x438   :  { %v1620_v39 = vpop.f32.mrb[124].mxu0  ;;  %v6032_v38 = vpop.f32.mrb[16].mxu1 }
 0x439   :  { %v1622_v50 = vpop.f32.mrb[125].mxu0  ;;  %v6034_v47 = vpop.f32.mrb[17].mxu1 }
 0x43a   :  { %v1623_v55 = vpop.f32.mrb[126].mxu0  ;;  %v6036_v14 = vpop.f32.mrb[18].mxu1 }
 0x43b   :  { %v1658_v58 = vpack.c.bf16 %v1623_v55, %v1620_v39  ;;  %v1625_v27 = vpop.f32.mrb[127].mxu0  ;;  %v6038_v28 = vpop.f32.mrb[19].mxu1  ;;  %v4746_v39 = vld [vmem:[#allocation8 + $0x18] sm:$0xff] }
 0x43d   :  { %2013 = vmatmul.mubr.bf16.gmra.mrb[124].mxu1 %v1658_v58  ;;  %v4745_v58 = vld [vmem:[#allocation8 + $0x10] sm:$0xff] }
 0x43e   :  { %2535 = vmatprep.mubr.bf16.mxu1 %v8498_v48  ;;  %v2472_v3 = vpack.c.bf16 %v4746_v39, %v4745_v58  ;;  %v2473_v58 = vpack.c.bf16 %v4747_v22, %v4748_v4  ;;  %v3117_v4 = vld [vmem:[#allocation14 + $0x28] sm:$0xff] }
 0x43f   :  { %v3146_v22 = vpack.c.bf16 %v3117_v4, %v3116_v46  ;;  %v4753_v4 = vld [vmem:[#allocation8 + $0x58] sm:$0xff] }
 0x440   :  { %v6041_v59 = vpop.f32.mrb[20].mxu1 }
 0x441   :  { %v6043_v50 = vpop.f32.mrb[21].mxu1 }
 0x442   :  { %v6045_v53 = vpop.f32.mrb[22].mxu1 }
 0x443   :  { %v6047_v36 = vpop.f32.mrb[23].mxu1 }
 0x445   :  { %2536 = vmatmul.mubr.bf16.vlgmr.msra.gmra.mrb[128].mxu1 %v2471_v10 }
 0x446   :  { %2545 = vmatprep.mubr.bf16.mxu1 %v8498_v48  ;;  %3354 = vmatpush1.bf16.msra.mxu1 %v3144_v54 }
 0x447   :  { %3355 = vmatprep.subr.bf16.mxu1 %v8498_v48 }
 0x448   :  { %v6051_v27 = vpop.f32.mrb[24].mxu1 }
 0x449   :  { %v6053_v55 = vpop.f32.mrb[25].mxu1 }
 0x44a   :  { %v6055_v25 = vpop.f32.mrb[26].mxu1  ;;  %3356 = vmatpush1.bf16.msra.mxu1 %v3145_v21  ;;  %v4749_v21 = vld [vmem:[#allocation8 + $0x38] sm:$0xff] }
 0x44b   :  { %v6057_v37 = vpop.f32.mrb[27].mxu1  ;;  %3357 = vmatprep.subr.bf16.mxu1 %v8498_v48  ;;  %v2474_v56 = vpack.c.bf16 %v4749_v21, %v4750_v15  ;;  %v2475_v21 = vpack.c.bf16 %v4751_v33, %v4752_v19  ;;  %v3119_v19 = vld [vmem:[#allocation14 + $0x38] sm:$0xff] }
 0x44c   :  { %v3147_v33 = vpack.c.bf16 %v3119_v19, %v3118_v9  ;;  %v4757_v19 = vld [vmem:[#allocation8 + $0x78] sm:$0xff] }
 0x44d   :  { %2546 = vmatmul.mubr.bf16.gmra.mrb[132].mxu1 %v2472_v3 }
 0x44e   :  { %2555 = vmatprep.mubr.bf16.mxu1 %v8498_v48  ;;  %3358 = vmatpush1.bf16.msra.mxu1 %v3146_v22  ;;  %v4754_v22 = vld [vmem:[#allocation8 + $0x50] sm:$0xff] }
 0x44f   :  { %3359 = vmatprep.subr.bf16.mxu1 %v8498_v48  ;;  %v2476_v8 = vpack.c.bf16 %v4753_v4, %v4754_v22 }
 0x450   :  { %v6061_v54 = vpop.f32.mrb[28].mxu1 }
 0x451   :  { %v6063_v10 = vpop.f32.mrb[29].mxu1 }
 0x452   :  { %v6065_v39 = vpop.f32.mrb[30].mxu1  ;;  %3360 = vmatpush1.bf16.msra.mxu1 %v3147_v33  ;;  %v4758_v33 = vld [vmem:[#allocation8 + $0x70] sm:$0xff] }
 0x453   :  { %v6067_v5 = vpop.f32.mrb[31].mxu1  ;;  %3361 = vmatprep.subr.bf16.mxu1 %v8498_v48 }
 0x455   :  { %2556 = vmatmul.mubr.bf16.gmra.mrb[136].mxu1 %v2473_v58 }
 0x456   :  { %2565 = vmatprep.mubr.bf16.mxu1 %v8498_v48 }
 0x458   :  { %v6070_v3 = vpop.f32.mrb[32].mxu1 }
 0x459   :  { %8575 = vst [vmem:[#allocation140_spill] sm:$0xff] %v6070_v3  ;;  %v6072_v18 = vpop.f32.mrb[33].mxu1 }
 0x45a   :  { %8576 = vst [vmem:[#allocation141_spill] sm:$0xff] %v6072_v18  ;;  %v6074_v57 = vpop.f32.mrb[34].mxu1 }
 0x45b   :  { %8577 = vst [vmem:[#allocation142_spill] sm:$0xff] %v6074_v57  ;;  %v6076_v45 = vpop.f32.mrb[35].mxu1 }
 0x45c   :  { %8578 = vst [vmem:[#allocation143_spill] sm:$0xff] %v6076_v45 }
 0x45d   :  { %2566 = vmatmul.mubr.bf16.gmra.mrb[140].mxu1 %v2474_v56 }
 0x45e   :  { %2575 = vmatprep.mubr.bf16.mxu1 %v8498_v48 }
 0x460   :  { %v6080_v58 = vpop.f32.mrb[36].mxu1 }
 0x461   :  { %8579 = vst [vmem:[#allocation144_spill] sm:$0xff] %v6080_v58  ;;  %v6082_v30 = vpop.f32.mrb[37].mxu1 }
 0x462   :  { %8580 = vst [vmem:[#allocation145_spill] sm:$0xff] %v6082_v30  ;;  %v6084_v15 = vpop.f32.mrb[38].mxu1 }
 0x463   :  { %8581 = vst [vmem:[#allocation146_spill] sm:$0xff] %v6084_v15  ;;  %v6086_v20 = vpop.f32.mrb[39].mxu1  ;;  %v3120_v15 = vld [vmem:[#allocation14 + $0x40] sm:$0xff] }
 0x464   :  { %8582 = vst [vmem:[#allocation147_spill] sm:$0xff] %v6086_v20  ;;  %v4756_v20 = vld [vmem:[#allocation8 + $0x60] sm:$0xff] }
 0x465   :  { %2576 = vmatmul.mubr.bf16.gmra.mrb[144].mxu1 %v2475_v21 }
 0x466   :  { %2585 = vmatprep.mubr.bf16.mxu1 %v8498_v48 }
 0x468   :  { %v6089_v46 = vpop.f32.mrb[40].mxu1 }
 0x469   :  { %8583 = vst [vmem:[#allocation148_spill] sm:$0xff] %v6089_v46  ;;  %v6091_v56 = vpop.f32.mrb[41].mxu1 }
 0x46a   :  { %8584 = vst [vmem:[#allocation149_spill] sm:$0xff] %v6091_v56  ;;  %v6093_v58 = vpop.f32.mrb[42].mxu1  ;;  %v4755_v56 = vld [vmem:[#allocation8 + $0x68] sm:$0xff] }
 0x46b   :  { %8585 = vst [vmem:[#allocation150_spill] sm:$0xff] %v6093_v58  ;;  %v6095_v30 = vpop.f32.mrb[43].mxu1  ;;  %v2477_v4 = vpack.c.bf16 %v4755_v56, %v4756_v20  ;;  %v3121_v20 = vld [vmem:[#allocation14 + $0x48] sm:$0xff] }
 0x46c   :  { %8586 = vst [vmem:[#allocation151_spill] sm:$0xff] %v6095_v30  ;;  %v2478_v30 = vpack.c.bf16 %v4757_v19, %v4758_v33  ;;  %v3148_v56 = vpack.c.bf16 %v3121_v20, %v3120_v15  ;;  %v4761_v20 = vld [vmem:[#allocation8 + $0x98] sm:$0xff] }
 0x46d   :  { %2586 = vmatmul.mubr.bf16.gmra.mrb[148].mxu1 %v2476_v8 }
 0x46e   :  { %2595 = vmatprep.mubr.bf16.mxu1 %v8498_v48  ;;  %3362 = vmatpush1.bf16.msra.mxu1 %v3148_v56  ;;  %v4762_v56 = vld [vmem:[#allocation8 + $0x90] sm:$0xff] }
 0x46f   :  { %3363 = vmatprep.subr.bf16.mxu1 %v8498_v48 }
 0x470   :  { %v6099_v21 = vpop.f32.mrb[44].mxu1 }
 0x471   :  { %8587 = vst [vmem:[#allocation152_spill] sm:$0xff] %v6099_v21  ;;  %v6101_v46 = vpop.f32.mrb[45].mxu1 }
 0x472   :  { %8588 = vst [vmem:[#allocation153_spill] sm:$0xff] %v6101_v46  ;;  %v6103_v22 = vpop.f32.mrb[46].mxu1 }
 0x473   :  { %8589 = vst [vmem:[#allocation154_spill] sm:$0xff] %v6103_v22  ;;  %v6105_v58 = vpop.f32.mrb[47].mxu1  ;;  %v3122_v22 = vld [vmem:[#allocation14 + $0x50] sm:$0xff] }
 0x474   :  { %8590 = vst [vmem:[#allocation155_spill] sm:$0xff] %v6105_v58  ;;  %v4760_v58 = vld [vmem:[#allocation8 + $0x80] sm:$0xff] }
 0x475   :  { %2596 = vmatmul.mubr.bf16.gmra.mrb[152].mxu1 %v2477_v4 }
 0x476   :  { %2605 = vmatprep.mubr.bf16.mxu1 %v8498_v48 }
 0x478   :  { %v6108_v8 = vpop.f32.mrb[48].mxu1 }
 0x479   :  { %8591 = vst [vmem:[#allocation156_spill] sm:$0xff] %v6108_v8  ;;  %v6110_v9 = vpop.f32.mrb[49].mxu1 }
 0x47a   :  { %8592 = vst [vmem:[#allocation157_spill] sm:$0xff] %v6110_v9  ;;  %v6112_v21 = vpop.f32.mrb[50].mxu1  ;;  %v4759_v9 = vld [vmem:[#allocation8 + $0x88] sm:$0xff] }
 0x47b   :  { %8593 = vst [vmem:[#allocation158_spill] sm:$0xff] %v6112_v21  ;;  %v6114_v46 = vpop.f32.mrb[51].mxu1  ;;  %v2479_v19 = vpack.c.bf16 %v4759_v9, %v4760_v58  ;;  %v3123_v58 = vld [vmem:[#allocation14 + $0x58] sm:$0xff] }
 0x47c   :  { %8594 = vst [vmem:[#allocation159_spill] sm:$0xff] %v6114_v46  ;;  %v2480_v46 = vpack.c.bf16 %v4761_v20, %v4762_v56  ;;  %v3149_v9 = vpack.c.bf16 %v3123_v58, %v3122_v22  ;;  %v4765_v58 = vld [vmem:[#allocation8 + $0xb8] sm:$0xff] }
 0x47d   :  { %2606 = vmatmul.mubr.bf16.gmra.mrb[156].mxu1 %v2478_v30 }
 0x47e   :  { %2615 = vmatprep.mubr.bf16.mxu1 %v8498_v48  ;;  %3364 = vmatpush1.bf16.msra.mxu1 %v3149_v9  ;;  %v4766_v9 = vld [vmem:[#allocation8 + $0xb0] sm:$0xff] }
 0x47f   :  { %3365 = vmatprep.subr.bf16.mxu1 %v8498_v48 }
 0x480   :  { %v6118_v4 = vpop.f32.mrb[52].mxu1 }
 0x481   :  { %8595 = vst [vmem:[#allocation160_spill] sm:$0xff] %v6118_v4  ;;  %v6120_v8 = vpop.f32.mrb[53].mxu1 }
 0x482   :  { %8596 = vst [vmem:[#allocation161_spill] sm:$0xff] %v6120_v8  ;;  %v6122_v33 = vpop.f32.mrb[54].mxu1 }
 0x483   :  { %8597 = vst [vmem:[#allocation162_spill] sm:$0xff] %v6122_v33  ;;  %v6124_v21 = vpop.f32.mrb[55].mxu1  ;;  %v3124_v33 = vld [vmem:[#allocation14 + $0x60] sm:$0xff] }
 0x484   :  { %8598 = vst [vmem:[#allocation163_spill] sm:$0xff] %v6124_v21  ;;  %v4764_v21 = vld [vmem:[#allocation8 + $0xa0] sm:$0xff] }
 0x485   :  { %2616 = vmatmul.mubr.bf16.gmra.mrb[160].mxu1 %v2479_v19 }
 0x486   :  { %2625 = vmatprep.mubr.bf16.mxu1 %v8498_v48 }
 0x488   :  { %v6127_v30 = vpop.f32.mrb[56].mxu1 }
 0x489   :  { %8599 = vst [vmem:[#allocation164_spill] sm:$0xff] %v6127_v30  ;;  %v6129_v15 = vpop.f32.mrb[57].mxu1 }
 0x48a   :  { %8600 = vst [vmem:[#allocation165_spill] sm:$0xff] %v6129_v15  ;;  %v6131_v4 = vpop.f32.mrb[58].mxu1  ;;  %v4763_v15 = vld [vmem:[#allocation8 + $0xa8] sm:$0xff] }
 0x48b   :  { %8601 = vst [vmem:[#allocation166_spill] sm:$0xff] %v6131_v4  ;;  %v6133_v8 = vpop.f32.mrb[59].mxu1  ;;  %v2481_v20 = vpack.c.bf16 %v4763_v15, %v4764_v21  ;;  %v3125_v21 = vld [vmem:[#allocation14 + $0x68] sm:$0xff] }
 0x48c   :  { %8602 = vst [vmem:[#allocation167_spill] sm:$0xff] %v6133_v8  ;;  %v2482_v8 = vpack.c.bf16 %v4765_v58, %v4766_v9  ;;  %v3150_v15 = vpack.c.bf16 %v3125_v21, %v3124_v33  ;;  %v4767_v58 = vld [vmem:[#allocation8 + $0xc8] sm:$0xff]  ;;  %v4768_v9 = vld [vmem:[#allocation8 + $0xc0] sm:$0xff] }
 0x48d   :  { %2626 = vmatmul.mubr.bf16.gmra.mrb[164].mxu1 %v2480_v46  ;;  %v3129_v21 = vld [vmem:[#allocation14 + $0x88] sm:$0xff] }
 0x48e   :  { %2635 = vmatprep.mubr.bf16.mxu1 %v8498_v48  ;;  %3366 = vmatpush1.bf16.msra.mxu1 %v3150_v15 }
 0x48f   :  { %3367 = vmatprep.subr.bf16.mxu1 %v8498_v48 }
 0x490   :  { %v6137_v19 = vpop.f32.mrb[60].mxu1 }
 0x491   :  { %8603 = vst [vmem:[#allocation168_spill] sm:$0xff] %v6137_v19  ;;  %v6139_v30 = vpop.f32.mrb[61].mxu1 }
 0x492   :  { %8604 = vst [vmem:[#allocation169_spill] sm:$0xff] %v6139_v30  ;;  %v6141_v56 = vpop.f32.mrb[62].mxu1 }
 0x493   :  { %8605 = vst [vmem:[#allocation170_spill] sm:$0xff] %v6141_v56  ;;  %v6143_v4 = vpop.f32.mrb[63].mxu1 }
 0x494   :  { %8606 = vst [vmem:[#allocation171_spill] sm:$0xff] %v6143_v4 }
 0x495   :  { %2636 = vmatmul.mubr.bf16.gmra.mrb[168].mxu1 %v2481_v20  ;;  %v3126_v20 = vld [vmem:[#allocation14 + $0x70] sm:$0xff] }
 0x496   :  { %2645 = vmatprep.mubr.bf16.mxu1 %v8498_v48 }
 0x498   :  { %v6146_v46 = vpop.f32.mrb[64].mxu1 }
 0x499   :  { %8607 = vst [vmem:[#allocation172_spill] sm:$0xff] %v6146_v46  ;;  %v6148_v22 = vpop.f32.mrb[65].mxu1  ;;  %v3127_v46 = vld [vmem:[#allocation14 + $0x78] sm:$0xff] }
 0x49a   :  { %8608 = vst [vmem:[#allocation173_spill] sm:$0xff] %v6148_v22  ;;  %v6150_v19 = vpop.f32.mrb[66].mxu1  ;;  %v3151_v22 = vpack.c.bf16 %v3127_v46, %v3126_v20  ;;  %v3130_v46 = vld [vmem:[#allocation14 + $0x90] sm:$0xff]  ;;  %v3131_v20 = vld [vmem:[#allocation14 + $0x98] sm:$0xff] }
 0x49b   :  { %8609 = vst [vmem:[#allocation174_spill] sm:$0xff] %v6150_v19  ;;  %v6152_v30 = vpop.f32.mrb[67].mxu1  ;;  %v2483_v19 = vpack.c.bf16 %v4767_v58, %v4768_v9  ;;  %v3153_v58 = vpack.c.bf16 %v3131_v20, %v3130_v46  ;;  %v3134_v46 = vld [vmem:[#allocation14 + $0xb0] sm:$0xff]  ;;  %v3135_v20 = vld [vmem:[#allocation14 + $0xb8] sm:$0xff] }
 0x49c   :  { %8610 = vst [vmem:[#allocation175_spill] sm:$0xff] %v6152_v30  ;;  %3368 = vmatpush1.bf16.msra.mxu1 %v3151_v22  ;;  %v4769_v22 = vld [vmem:[#allocation8 + $0xd8] sm:$0xff] }
 0x49d   :  { %2646 = vmatmul.mubr.bf16.gmra.mrb[172].mxu1 %v2482_v8  ;;  %3369 = vmatprep.subr.bf16.mxu1 %v8498_v48  ;;  %v3128_v8 = vld [vmem:[#allocation14 + $0x80] sm:$0xff] }
 0x49e   :  { %2655 = vmatprep.mubr.bf16.mxu1 %v8498_v48  ;;  %v3152_v15 = vpack.c.bf16 %v3129_v21, %v3128_v8  ;;  %v3133_v21 = vld [vmem:[#allocation14 + $0xa8] sm:$0xff] }
 0x4a0   :  { %v6156_v4 = vpop.f32.mrb[68].mxu1  ;;  %3370 = vmatpush1.bf16.msra.mxu1 %v3152_v15 }
 0x4a1   :  { %8611 = vst [vmem:[#allocation176_spill] sm:$0xff] %v6156_v4  ;;  %v6158_v56 = vpop.f32.mrb[69].mxu1  ;;  %3371 = vmatprep.subr.bf16.mxu1 %v8498_v48 }
 0x4a2   :  { %8612 = vst [vmem:[#allocation177_spill] sm:$0xff] %v6158_v56  ;;  %v6160_v30 = vpop.f32.mrb[70].mxu1 }
 0x4a3   :  { %8613 = vst [vmem:[#allocation178_spill] sm:$0xff] %v6160_v30  ;;  %v6162_v33 = vpop.f32.mrb[71].mxu1 }
 0x4a4   :  { %8614 = vst [vmem:[#allocation179_spill] sm:$0xff] %v6162_v33  ;;  %v4770_v33 = vld [vmem:[#allocation8 + $0xd0] sm:$0xff]  ;;  %3372 = vmatpush1.bf16.msra.mxu1 %v3153_v58  ;;  %v4771_v58 = vld [vmem:[#allocation8 + $0xe8] sm:$0xff] }
 0x4a5   :  { %2656 = vmatmul.mubr.bf16.gmra.mrb[176].mxu1 %v2483_v19  ;;  %v2484_v30 = vpack.c.bf16 %v4769_v22, %v4770_v33  ;;  %3373 = vmatprep.subr.bf16.mxu1 %v8498_v48  ;;  %v3132_v19 = vld [vmem:[#allocation14 + $0xa0] sm:$0xff]  ;;  %v3155_v33 = vpack.c.bf16 %v3135_v20, %v3134_v46  ;;  %v3138_v46 = vld [vmem:[#allocation14 + $0xd0] sm:$0xff]  ;;  %v3139_v20 = vld [vmem:[#allocation14 + $0xd8] sm:$0xff] }
 0x4a6   :  { %2665 = vmatprep.mubr.bf16.mxu1 %v8498_v48  ;;  %v3154_v15 = vpack.c.bf16 %v3133_v21, %v3132_v19  ;;  %v3137_v21 = vld [vmem:[#allocation14 + $0xc8] sm:$0xff] }
 0x4a8   :  { %v6167_v56 = vpop.f32.mrb[72].mxu1  ;;  %3374 = vmatpush1.bf16.msra.mxu1 %v3154_v15 }
 0x4a9   :  { %8615 = vst [vmem:[#allocation180_spill] sm:$0xff] %v6167_v56  ;;  %v6169_v9 = vpop.f32.mrb[73].mxu1  ;;  %3375 = vmatprep.subr.bf16.mxu1 %v8498_v48 }
 0x4aa   :  { %8616 = vst [vmem:[#allocation181_spill] sm:$0xff] %v6169_v9  ;;  %v6171_v4 = vpop.f32.mrb[74].mxu1 }
 0x4ab   :  { %8617 = vst [vmem:[#allocation182_spill] sm:$0xff] %v6171_v4  ;;  %v6173_v8 = vpop.f32.mrb[75].mxu1 }
 0x4ac   :  { %8618 = vst [vmem:[#allocation183_spill] sm:$0xff] %v6173_v8  ;;  %v4772_v8 = vld [vmem:[#allocation8 + $0xe0] sm:$0xff]  ;;  %3376 = vmatpush1.bf16.msra.mxu1 %v3155_v33  ;;  %v4773_v33 = vld [vmem:[#allocation8 + $0xf8] sm:$0xff] }
 0x4ad   :  { %2666 = vmatmul.mubr.bf16.gmra.mrb[180].mxu1 %v2484_v30  ;;  %v2485_v4 = vpack.c.bf16 %v4771_v58, %v4772_v8  ;;  %3377 = vmatprep.subr.bf16.mxu1 %v8498_v48  ;;  %v3136_v30 = vld [vmem:[#allocation14 + $0xc0] sm:$0xff]  ;;  %v3157_v8 = vpack.c.bf16 %v3139_v20, %v3138_v46  ;;  %v3142_v46 = vld [vmem:[#allocation14 + $0xf0] sm:$0xff]  ;;  %v3143_v20 = vld [vmem:[#allocation14 + $0xf8] sm:$0xff] }
 0x4ae   :  { %2675 = vmatprep.mubr.bf16.mxu1 %v8498_v48  ;;  %v3156_v15 = vpack.c.bf16 %v3137_v21, %v3136_v30  ;;  %v3141_v21 = vld [vmem:[#allocation14 + $0xe8] sm:$0xff] }
 0x4b0   :  { %v6178_v9 = vpop.f32.mrb[76].mxu1  ;;  %3378 = vmatpush1.bf16.msra.mxu1 %v3156_v15 }
 0x4b1   :  { %8619 = vst [vmem:[#allocation184_spill] sm:$0xff] %v6178_v9  ;;  %v6180_v22 = vpop.f32.mrb[77].mxu1  ;;  %3379 = vmatprep.subr.bf16.mxu1 %v8498_v48 }
 0x4b2   :  { %8620 = vst [vmem:[#allocation185_spill] sm:$0xff] %v6180_v22  ;;  %v6182_v56 = vpop.f32.mrb[78].mxu1 }
 0x4b3   :  { %8621 = vst [vmem:[#allocation186_spill] sm:$0xff] %v6182_v56  ;;  %v6184_v19 = vpop.f32.mrb[79].mxu1 }
 0x4b4   :  { %8622 = vst [vmem:[#allocation187_spill] sm:$0xff] %v6184_v19  ;;  %v4774_v19 = vld [vmem:[#allocation8 + $0xf0] sm:$0xff]  ;;  %3380 = vmatpush1.bf16.msra.mxu1 %v3157_v8  ;;  %v4775_v8 = vld [vmem:[#allocation8 + $0x108] sm:$0xff] }
 0x4b5   :  { %2676 = vmatmul.mubr.bf16.gmra.mrb[184].mxu1 %v2485_v4  ;;  %v2486_v56 = vpack.c.bf16 %v4773_v33, %v4774_v19  ;;  %3381 = vmatprep.subr.bf16.mxu1 %v8498_v48  ;;  %v3140_v4 = vld [vmem:[#allocation14 + $0xe0] sm:$0xff]  ;;  %v3159_v19 = vpack.c.bf16 %v3143_v20, %v3142_v46  ;;  %v4778_v46 = vld [vmem:[#allocation8 + $0x110] sm:$0xff] }
 0x4b6   :  { %2685 = vmatprep.mubr.bf16.mxu1 %v8498_v48  ;;  %v3158_v15 = vpack.c.bf16 %v3141_v21, %v3140_v4 }
 0x4b8   :  { %v6189_v22 = vpop.f32.mrb[80].mxu1  ;;  %3382 = vmatpush1.bf16.msra.mxu1 %v3158_v15  ;;  %v4777_v15 = vld [vmem:[#allocation8 + $0x118] sm:$0xff] }
 0x4b9   :  { %8623 = vst [vmem:[#allocation188_spill] sm:$0xff] %v6189_v22  ;;  %v6191_v58 = vpop.f32.mrb[81].mxu1  ;;  %3383 = vmatprep.subr.bf16.mxu1 %v8498_v48  ;;  %v2488_v20 = vpack.c.bf16 %v4777_v15, %v4778_v46 }
 0x4ba   :  { %8624 = vst [vmem:[#allocation189_spill] sm:$0xff] %v6191_v58  ;;  %v6193_v9 = vpop.f32.mrb[82].mxu1 }
 0x4bb   :  { %8625 = vst [vmem:[#allocation190_spill] sm:$0xff] %v6193_v9  ;;  %v6195_v30 = vpop.f32.mrb[83].mxu1 }
 0x4bc   :  { %8626 = vst [vmem:[#allocation191_spill] sm:$0xff] %v6195_v30  ;;  %v4776_v30 = vld [vmem:[#allocation8 + $0x100] sm:$0xff]  ;;  %3384 = vmatpush1.bf16.msra.mxu1 %v3159_v19 }
 0x4bd   :  { %2686 = vmatmul.mubr.bf16.gmra.mrb[188].mxu1 %v2486_v56  ;;  %v2487_v9 = vpack.c.bf16 %v4775_v8, %v4776_v30  ;;  %4408 = vmatprep.subr.bf16.mxu1 %v8498_v48 }
 0x4be   :  { %2695 = vmatprep.mubr.bf16.mxu1 %v8498_v48 }
 0x4c0   :  { %v6200_v58 = vpop.f32.mrb[84].mxu1 }
 0x4c1   :  { %8627 = vst [vmem:[#allocation192_spill] sm:$0xff] %v6200_v58  ;;  %v6202_v33 = vpop.f32.mrb[85].mxu1 }
 0x4c2   :  { %8628 = vst [vmem:[#allocation193_spill] sm:$0xff] %v6202_v33  ;;  %v6204_v22 = vpop.f32.mrb[86].mxu1 }
 0x4c3   :  { %8629 = vst [vmem:[#allocation194_spill] sm:$0xff] %v6204_v22  ;;  %v6206_v4 = vpop.f32.mrb[87].mxu1 }
 0x4c4   :  { %8630 = vst [vmem:[#allocation195_spill] sm:$0xff] %v6206_v4  ;;  %v4780_v4 = vld [vmem:[#allocation8 + $0x120] sm:$0xff] }
 0x4c5   :  { %2696 = vmatmul.mubr.bf16.gmra.mrb[192].mxu1 %v2487_v9  ;;  %v4779_v9 = vld [vmem:[#allocation8 + $0x128] sm:$0xff] }
 0x4c6   :  { %2705 = vmatprep.mubr.bf16.mxu1 %v8498_v48  ;;  %v2489_v22 = vpack.c.bf16 %v4779_v9, %v4780_v4 }
 0x4c8   :  { %v6210_v56 = vpop.f32.mrb[88].mxu1 }
 0x4c9   :  { %8631 = vst [vmem:[#allocation196_spill] sm:$0xff] %v6210_v56  ;;  %v6212_v21 = vpop.f32.mrb[89].mxu1 }
 0x4ca   :  { %8632 = vst [vmem:[#allocation197_spill] sm:$0xff] %v6212_v21  ;;  %v6214_v33 = vpop.f32.mrb[90].mxu1 }
 0x4cb   :  { %8633 = vst [vmem:[#allocation198_spill] sm:$0xff] %v6214_v33  ;;  %v6216_v30 = vpop.f32.mrb[91].mxu1 }
 0x4cc   :  { %8634 = vst [vmem:[#allocation199_spill] sm:$0xff] %v6216_v30  ;;  %v4782_v30 = vld [vmem:[#allocation8 + $0x130] sm:$0xff] }
 0x4cd   :  { %2706 = vmatmul.mubr.bf16.gmra.mrb[196].mxu1 %v2488_v20  ;;  %v4781_v20 = vld [vmem:[#allocation8 + $0x138] sm:$0xff] }
 0x4ce   :  { %2715 = vmatprep.mubr.bf16.mxu1 %v8498_v48  ;;  %v2490_v33 = vpack.c.bf16 %v4781_v20, %v4782_v30 }
 0x4d0   :  { %v6219_v19 = vpop.f32.mrb[92].mxu1 }
 0x4d1   :  { %8635 = vst [vmem:[#allocation200_spill] sm:$0xff] %v6219_v19  ;;  %v6221_v8 = vpop.f32.mrb[93].mxu1 }
 0x4d2   :  { %8636 = vst [vmem:[#allocation201_spill] sm:$0xff] %v6221_v8  ;;  %v6223_v56 = vpop.f32.mrb[94].mxu1 }
 0x4d3   :  { %8637 = vst [vmem:[#allocation202_spill] sm:$0xff] %v6223_v56  ;;  %v6225_v21 = vpop.f32.mrb[95].mxu1 }
 0x4d4   :  { %8638 = vst [vmem:[#allocation203_spill] sm:$0xff] %v6225_v21  ;;  %v4784_v21 = vld [vmem:[#allocation8 + $0x140] sm:$0xff] }
 0x4d5   :  { %2716 = vmatmul.mubr.bf16.gmra.mrb[200].mxu1 %v2489_v22  ;;  %v4783_v22 = vld [vmem:[#allocation8 + $0x148] sm:$0xff] }
 0x4d6   :  { %2725 = vmatprep.mubr.bf16.mxu1 %v8498_v48  ;;  %v2491_v56 = vpack.c.bf16 %v4783_v22, %v4784_v21 }
 0x4d8   :  { %v6228_v15 = vpop.f32.mrb[96].mxu1 }
 0x4d9   :  { %8639 = vst [vmem:[#allocation204_spill] sm:$0xff] %v6228_v15  ;;  %v6230_v46 = vpop.f32.mrb[97].mxu1 }
 0x4da   :  { %8640 = vst [vmem:[#allocation205_spill] sm:$0xff] %v6230_v46  ;;  %v6232_v19 = vpop.f32.mrb[98].mxu1 }
 0x4db   :  { %8641 = vst [vmem:[#allocation206_spill] sm:$0xff] %v6232_v19  ;;  %v6234_v8 = vpop.f32.mrb[99].mxu1 }
 0x4dc   :  { %8642 = vst [vmem:[#allocation207_spill] sm:$0xff] %v6234_v8  ;;  %v4786_v8 = vld [vmem:[#allocation8 + $0x150] sm:$0xff] }
 0x4dd   :  { %2726 = vmatmul.mubr.bf16.gmra.mrb[204].mxu1 %v2490_v33  ;;  %v4785_v33 = vld [vmem:[#allocation8 + $0x158] sm:$0xff] }
 0x4de   :  { %2735 = vmatprep.mubr.bf16.mxu1 %v8498_v48  ;;  %v2492_v19 = vpack.c.bf16 %v4785_v33, %v4786_v8 }
 0x4e0   :  { %v6237_v4 = vpop.f32.mrb[100].mxu1 }
 0x4e1   :  { %8643 = vst [vmem:[#allocation208_spill] sm:$0xff] %v6237_v4  ;;  %v6239_v9 = vpop.f32.mrb[101].mxu1 }
 0x4e2   :  { %8644 = vst [vmem:[#allocation209_spill] sm:$0xff] %v6239_v9  ;;  %v6241_v15 = vpop.f32.mrb[102].mxu1 }
 0x4e3   :  { %8645 = vst [vmem:[#allocation210_spill] sm:$0xff] %v6241_v15  ;;  %v6243_v46 = vpop.f32.mrb[103].mxu1 }
 0x4e4   :  { %8646 = vst [vmem:[#allocation211_spill] sm:$0xff] %v6243_v46  ;;  %v4788_v46 = vld [vmem:[#allocation8 + $0x160] sm:$0xff] }
 0x4e5   :  { %2736 = vmatmul.mubr.bf16.gmra.mrb[208].mxu1 %v2491_v56  ;;  %v4787_v56 = vld [vmem:[#allocation8 + $0x168] sm:$0xff] }
 0x4e6   :  { %2745 = vmatprep.mubr.bf16.mxu1 %v8498_v48  ;;  %v2493_v15 = vpack.c.bf16 %v4787_v56, %v4788_v46 }
 0x4e8   :  { %v6246_v30 = vpop.f32.mrb[104].mxu1 }
 0x4e9   :  { %8647 = vst [vmem:[#allocation212_spill] sm:$0xff] %v6246_v30  ;;  %v6248_v20 = vpop.f32.mrb[105].mxu1 }
 0x4ea   :  { %8648 = vst [vmem:[#allocation213_spill] sm:$0xff] %v6248_v20  ;;  %v6250_v4 = vpop.f32.mrb[106].mxu1 }
 0x4eb   :  { %8649 = vst [vmem:[#allocation214_spill] sm:$0xff] %v6250_v4  ;;  %v6252_v9 = vpop.f32.mrb[107].mxu1 }
 0x4ec   :  { %8650 = vst [vmem:[#allocation215_spill] sm:$0xff] %v6252_v9  ;;  %v4790_v9 = vld [vmem:[#allocation8 + $0x170] sm:$0xff] }
 0x4ed   :  { %2746 = vmatmul.mubr.bf16.gmra.mrb[212].mxu1 %v2492_v19  ;;  %v4789_v19 = vld [vmem:[#allocation8 + $0x178] sm:$0xff] }
 0x4ee   :  { %2755 = vmatprep.mubr.bf16.mxu1 %v8498_v48  ;;  %v2494_v4 = vpack.c.bf16 %v4789_v19, %v4790_v9 }
 0x4f0   :  { %v6255_v21 = vpop.f32.mrb[108].mxu1 }
 0x4f1   :  { %8651 = vst [vmem:[#allocation216_spill] sm:$0xff] %v6255_v21  ;;  %v6257_v22 = vpop.f32.mrb[109].mxu1 }
 0x4f2   :  { %8652 = vst [vmem:[#allocation217_spill] sm:$0xff] %v6257_v22  ;;  %v6259_v30 = vpop.f32.mrb[110].mxu1 }
 0x4f3   :  { %8653 = vst [vmem:[#allocation218_spill] sm:$0xff] %v6259_v30  ;;  %v6261_v20 = vpop.f32.mrb[111].mxu1 }
 0x4f4   :  { %8654 = vst [vmem:[#allocation219_spill] sm:$0xff] %v6261_v20  ;;  %v4792_v20 = vld [vmem:[#allocation8 + $0x180] sm:$0xff] }
 0x4f5   :  { %2756 = vmatmul.mubr.bf16.gmra.mrb[216].mxu1 %v2493_v15  ;;  %v4791_v15 = vld [vmem:[#allocation8 + $0x188] sm:$0xff] }
 0x4f6   :  { %2765 = vmatprep.mubr.bf16.mxu1 %v8498_v48  ;;  %v2495_v30 = vpack.c.bf16 %v4791_v15, %v4792_v20  ;;  %v584_v15 = vld [vmem:[#allocation11] sm:$0x3] }
 0x4f8   :  { %v6264_v8 = vpop.f32.mrb[112].mxu1 }
 0x4f9   :  { %8655 = vst [vmem:[#allocation220_spill] sm:$0xff] %v6264_v8  ;;  %v6266_v33 = vpop.f32.mrb[113].mxu1 }
 0x4fa   :  { %8656 = vst [vmem:[#allocation221_spill] sm:$0xff] %v6266_v33  ;;  %v6268_v21 = vpop.f32.mrb[114].mxu1  ;;  %v1660_v33 = vlaneseq }
 0x4fb   :  { %8657 = vst [vmem:[#allocation222_spill] sm:$0xff] %v6268_v21  ;;  %v6270_v22 = vpop.f32.mrb[115].mxu1 }
 0x4fc   :  { %8658 = vst [vmem:[#allocation223_spill] sm:$0xff] %v6270_v22  ;;  %v1661_v9 = vshrl.u32 %v1660_v33, 7  ;;  %v4793_v22 = vld [vmem:[#allocation8 + $0x198] sm:$0xff] }
 0x4fd   :  { %2766 = vmatmul.mubr.bf16.gmra.mrb[220].mxu1 %v2494_v4 }
 0x4fe   :  { %2775 = vmatprep.mubr.bf16.mxu1 %v8498_v48  ;;  %v1662_v45 = vsub.s32 0, %v1661_v9 }
 0x500   :  { %v6273_v46 = vpop.f32.mrb[116].mxu1 }
 0x501   :  { %8659 = vst [vmem:[#allocation224_spill] sm:$0xff] %v6273_v46  ;;  %v6275_v56 = vpop.f32.mrb[117].mxu1  ;;  %v4794_v46 = vld [vmem:[#allocation8 + $0x190] sm:$0xff] }
 0x502   :  { %8660 = vst [vmem:[#allocation225_spill] sm:$0xff] %v6275_v56  ;;  %v6277_v8 = vpop.f32.mrb[118].mxu1  ;;  %v2496_v21 = vpack.c.bf16 %v4793_v22, %v4794_v46  ;;  %v4796_v22 = vld [vmem:[#allocation8 + $0x1a0] sm:$0xff] }
 0x503   :  { %8661 = vst [vmem:[#allocation226_spill] sm:$0xff] %v6277_v8  ;;  %v6279_v58 = vpop.f32.mrb[119].mxu1  ;;  %v1666_v8 = vsub.s32 1, %v1661_v9 }
 0x504   :  { %8662 = vst [vmem:[#allocation227_spill] sm:$0xff] %v6279_v58  ;;  %v4795_v58 = vld [vmem:[#allocation8 + $0x1a8] sm:$0xff] }
 0x505   :  { %2776 = vmatmul.mubr.bf16.gmra.mrb[224].mxu1 %v2495_v30  ;;  %v6291_v30 = vrot.slane %v584_v15, %v1662_v45  ;;  %v6293_v33 = vrot.slane %v584_v15, %v1666_v8  ;;  %v2497_v46 = vpack.c.bf16 %v4795_v58, %v4796_v22  ;;  %v6309_v8 = vpop.permute.xlu0 %2025  ;;  %v6315_v22 = vpop.permute.xlu1 %2030 }
 0x506   :  { %2785 = vmatprep.mubr.bf16.mxu1 %v8498_v48  ;;  %8671 = vst [vmem:[#allocation236_spill] sm:$0xff] %v6309_v8 }
 0x507   :  { %v1707_v45 = vadd.f32 %v5998_v0, %v6293_v33  ;;  %v1711_v15 = vadd.f32 %v6002_v63, %v6293_v33  ;;  %v1715_v3 = vadd.f32 %v6005_v26, %v6291_v30 }
 0x508   :  { %v6282_v19 = vpop.f32.mrb[120].mxu1 }
 0x509   :  { %8663 = vst [vmem:[#allocation228_spill] sm:$0xff] %v6282_v19  ;;  %v6284_v4 = vpop.f32.mrb[121].mxu1  ;;  %v2346_v63 = vmul.f32 %v6315_v22, %v1711_v15  ;;  %v1721_v15 = vadd.f32 %v6011_v35, %v6293_v33 }
 0x50a   :  { %8664 = vst [vmem:[#allocation229_spill] sm:$0xff] %v6284_v4  ;;  %v6286_v56 = vpop.f32.mrb[122].mxu1 }
 0x50b   :  { %8665 = vst [vmem:[#allocation230_spill] sm:$0xff] %v6286_v56  ;;  %v6288_v20 = vpop.f32.mrb[123].mxu1 }
 0x50c   :  { %8666 = vst [vmem:[#allocation231_spill] sm:$0xff] %v6288_v20  ;;  %v1705_v20 = vadd.f32 %v5996_v34, %v6291_v30 }
 0x50d   :  { %2786 = vmatmul.mubr.bf16.gmra.mrb[228].mxu1 %v2496_v21  ;;  %v1709_v21 = vadd.f32 %v6000_v44, %v6291_v30  ;;  %v4797_v44 = vld [vmem:[#allocation8 + $0x1b8] sm:$0xff] }
 0x50e   :  { %2795 = vmatprep.mubr.bf16.mxu1 %v8498_v48  ;;  %v2343_v58 = vmul.f32 %v6309_v8, %v1705_v20 }
 0x510   :  { %v6295_v19 = vpop.f32.mrb[124].mxu1 }
 0x511   :  { %8667 = vst [vmem:[#allocation232_spill] sm:$0xff] %v6295_v19  ;;  %v6297_v4 = vpop.f32.mrb[125].mxu1 }
 0x512   :  { %8668 = vst [vmem:[#allocation233_spill] sm:$0xff] %v6297_v4  ;;  %v6299_v56 = vpop.f32.mrb[126].mxu1  ;;  %v2345_v4 = vmul.f32 %v6315_v22, %v1709_v21  ;;  %v1719_v21 = vadd.f32 %v6009_v49, %v6291_v30 }
 0x513   :  { %8669 = vst [vmem:[#allocation234_spill] sm:$0xff] %v6299_v56  ;;  %v6303_v9 = vpop.f32.mrb[127].mxu1 }
 0x514   :  { %8670 = vst [vmem:[#allocation235_spill] sm:$0xff] %v6303_v9  ;;  %v2344_v9 = vmul.f32 %v6309_v8, %v1707_v45  ;;  %v1717_v45 = vadd.f32 %v6007_v1, %v6293_v33 }
 0x515   :  { %2796 = vmatmul.mubr.bf16.gmra.mrb[232].mxu1 %v2497_v46  ;;  %v4798_v46 = vld [vmem:[#allocation8 + $0x1b0] sm:$0xff] }
 0x516   :  { %2805 = vmatprep.mubr.bf16.mxu1 %v8498_v48  ;;  %v2498_v19 = vpack.c.bf16 %v4797_v44, %v4798_v46  ;;  %v4799_v44 = vld [vmem:[#allocation8 + $0x1c8] sm:$0xff] }
 0x518   :  { %v2537_v34 = vpop.f32.mrb[128].mxu1 }
 0x519   :  { %v2856_v56 = vadd.f32 %v2537_v34, %v2343_v58  ;;  %v2539_v0 = vpop.f32.mrb[129].mxu1 }
 0x51a   :  { %v2857_v57 = vadd.f32 %v2539_v0, %v2344_v9  ;;  %v2541_v18 = vpop.f32.mrb[130].mxu1  ;;  %v6326_v9 = vpop.permute.xlu0 %2035 }
 0x51b   :  { %v2984_v20 = vmax.f32 %v2856_v56, 0.0  ;;  %v2858_v60 = vadd.f32 %v2541_v18, %v2345_v4  ;;  %v2543_v61 = vpop.f32.mrb[131].mxu1  ;;  %v2348_v49 = vmul.f32 %v6326_v9, %v1717_v45 }
 0x51c   :  { %v2985_v58 = vmax.f32 %v2857_v57, 0.0  ;;  %v2859_v34 = vadd.f32 %v2543_v61, %v2346_v63  ;;  %v2347_v61 = vmul.f32 %v6326_v9, %v1715_v3  ;;  %v6338_v57 = vpop.permute.xlu1 %2040  ;;  %v4800_v3 = vld [vmem:[#allocation8 + $0x1c0] sm:$0xff] }
 0x51d   :  { %v2986_v8 = vmax.f32 %v2858_v60, 0.0  ;;  %2806 = vmatmul.mubr.bf16.gmra.mrb[236].mxu1 %v2498_v19  ;;  %v6332_v26 = vmul.f32 %v2984_v20, %v5237_v7  ;;  %v2499_v46 = vpack.c.bf16 %v4799_v44, %v4800_v3  ;;  %v2350_v45 = vmul.f32 %v6338_v57, %v1721_v15 }
 0x51e   :  { %v2987_v0 = vmax.f32 %v2859_v34, 0.0  ;;  %2815 = vmatprep.mubr.bf16.mxu1 %v8498_v48  ;;  %v6342_v18 = vmul.f32 %v2985_v58, %v5237_v7  ;;  %v6359_v15 = vpop.permute.xlu0 %2045  ;;  %v1731_v44 = vadd.f32 %v6020_v40, %v6293_v33 }
 0x51f   :  { %v6335_v1 = vmul.f32 %v2986_v8, %v5241_v13  ;;  %v2349_v8 = vmul.f32 %v6338_v57, %v1719_v21 }
 0x520   :  { %v2547_v60 = vpop.f32.mrb[132].mxu1  ;;  %v6345_v35 = vmul.f32 %v2987_v0, %v5241_v13  ;;  %v1725_v13 = vadd.f32 %v6014_v2, %v6291_v30 }
 0x521   :  { %v2860_v19 = vadd.f32 %v2547_v60, %v2347_v61  ;;  %v2549_v4 = vpop.f32.mrb[133].mxu1  ;;  %v1727_v61 = vadd.f32 %v6016_v62, %v6293_v33 }
 0x522   :  { %v2861_v63 = vadd.f32 %v2549_v4, %v2348_v49  ;;  %v2551_v20 = vpop.f32.mrb[134].mxu1  ;;  %v3290_v7 = vpack.c.bf16 %v6345_v35, %v6342_v18  ;;  %v1729_v49 = vadd.f32 %v6018_v41, %v6291_v30 }
 0x523   :  { %v2988_v58 = vmax.f32 %v2860_v19, 0.0  ;;  %v2862_v34 = vadd.f32 %v2551_v20, %v2349_v8  ;;  %v2553_v0 = vpop.f32.mrb[135].mxu1  ;;  %v2351_v19 = vmul.f32 %v6359_v15, %v1725_v13  ;;  %v6371_v8 = vpop.permute.xlu1 %2050  ;;  %v4802_v13 = vld [vmem:[#allocation8 + $0x1d0] sm:$0xff] }
 0x524   :  { %v2989_v21 = vmax.f32 %v2861_v63, 0.0  ;;  %v2863_v60 = vadd.f32 %v2553_v0, %v2350_v45  ;;  %v4801_v0 = vld [vmem:[#allocation8 + $0x1d8] sm:$0xff] }
 0x525   :  { %v2990_v4 = vmax.f32 %v2862_v34, 0.0  ;;  %2816 = vmatmul.mubr.bf16.gmra.mrb[240].mxu1 %v2499_v46  ;;  %v6365_v2 = vmul.f32 %v2988_v58, %v5235_v6  ;;  %v2352_v46 = vmul.f32 %v6359_v15, %v1727_v61  ;;  %v2353_v34 = vmul.f32 %v6371_v8, %v1729_v49 }
 0x526   :  { %v2991_v3 = vmax.f32 %v2863_v60, 0.0  ;;  %2825 = vmatprep.mubr.bf16.mxu1 %v8498_v48  ;;  %v6375_v63 = vmul.f32 %v2989_v21, %v5235_v6  ;;  %v2500_v60 = vpack.c.bf16 %v4801_v0, %v4802_v13  ;;  %v2354_v61 = vmul.f32 %v6371_v8, %v1731_v44  ;;  %v6392_v44 = vpop.permute.xlu0 %2055 }
 0x527   :  { %v6368_v62 = vmul.f32 %v2990_v4, %v5239_v12  ;;  %v1741_v0 = vadd.f32 %v6029_v16, %v6293_v33 }
 0x528   :  { %v2557_v41 = vpop.f32.mrb[136].mxu1  ;;  %v6378_v40 = vmul.f32 %v2991_v3, %v5239_v12  ;;  %v1735_v12 = vadd.f32 %v6023_v29, %v6291_v30 }
 0x529   :  { %v2864_v45 = vadd.f32 %v2557_v41, %v2351_v19  ;;  %v2559_v58 = vpop.f32.mrb[137].mxu1  ;;  %v1737_v19 = vadd.f32 %v6025_v11, %v6293_v33 }
 0x52a   :  { %v2865_v4 = vadd.f32 %v2559_v58, %v2352_v46  ;;  %v2561_v56 = vpop.f32.mrb[138].mxu1  ;;  %v1739_v46 = vadd.f32 %v6027_v17, %v6291_v30 }
 0x52b   :  { %v2992_v21 = vmax.f32 %v2864_v45, 0.0  ;;  %v2866_v3 = vadd.f32 %v2561_v56, %v2353_v34  ;;  %v2563_v20 = vpop.f32.mrb[139].mxu1  ;;  %v2355_v56 = vmul.f32 %v6392_v44, %v1735_v12  ;;  %v2356_v45 = vmul.f32 %v6392_v44, %v1737_v19  ;;  %v4804_v12 = vld [vmem:[#allocation8 + $0x1e0] sm:$0xff] }
 0x52c   :  { %v2993_v49 = vmax.f32 %v2865_v4, 0.0  ;;  %v2867_v41 = vadd.f32 %v2563_v20, %v2354_v61  ;;  %v6404_v20 = vpop.permute.xlu1 %2060 }
 0x52d   :  { %v2994_v58 = vmax.f32 %v2866_v3, 0.0  ;;  %2826 = vmatmul.mubr.bf16.gmra.mrb[244].mxu1 %v2500_v60  ;;  %v6398_v29 = vmul.f32 %v2992_v21, %v5249_v24  ;;  %v2357_v21 = vmul.f32 %v6404_v20, %v1739_v46  ;;  %v4803_v3 = vld [vmem:[#allocation8 + $0x1e8] sm:$0xff]  ;;  %v2358_v19 = vmul.f32 %v6404_v20, %v1741_v0  ;;  %v6425_v0 = vpop.permute.xlu0 %2065 }
 0x52e   :  { %v2995_v13 = vmax.f32 %v2867_v41, 0.0  ;;  %2835 = vmatprep.mubr.bf16.mxu1 %v8498_v48  ;;  %v6408_v34 = vmul.f32 %v2993_v49, %v5249_v24  ;;  %v2501_v41 = vpack.c.bf16 %v4803_v3, %v4804_v12  ;;  %v1751_v3 = vadd.f32 %v6038_v28, %v6293_v33 }
 0x52f   :  { %v6401_v11 = vmul.f32 %v2994_v58, %v5247_v23 }
 0x530   :  { %v2567_v17 = vpop.f32.mrb[140].mxu1  ;;  %v6411_v16 = vmul.f32 %v2995_v13, %v5247_v23  ;;  %v1745_v23 = vadd.f32 %v6032_v38, %v6291_v30 }
 0x531   :  { %v2868_v4 = vadd.f32 %v2567_v17, %v2355_v56  ;;  %v2569_v61 = vpop.f32.mrb[141].mxu1  ;;  %v1747_v56 = vadd.f32 %v6034_v47, %v6293_v33 }
 0x532   :  { %v2869_v58 = vadd.f32 %v2569_v61, %v2356_v45  ;;  %v2571_v6 = vpop.f32.mrb[142].mxu1  ;;  %v1749_v45 = vadd.f32 %v6036_v14, %v6291_v30 }
 0x533   :  { %v2996_v49 = vmax.f32 %v2868_v4, 0.0  ;;  %v2870_v13 = vadd.f32 %v2571_v6, %v2357_v21  ;;  %v2573_v60 = vpop.f32.mrb[143].mxu1  ;;  %v2359_v6 = vmul.f32 %v6425_v0, %v1745_v23  ;;  %v2360_v4 = vmul.f32 %v6425_v0, %v1747_v56  ;;  %v4806_v23 = vld [vmem:[#allocation8 + $0x1f0] sm:$0xff] }
 0x534   :  { %v2997_v46 = vmax.f32 %v2869_v58, 0.0  ;;  %v2871_v17 = vadd.f32 %v2573_v60, %v2358_v19  ;;  %v6437_v60 = vpop.permute.xlu1 %2070 }
 0x535   :  { %v2998_v61 = vmax.f32 %v2870_v13, 0.0  ;;  %2836 = vmatmul.mubr.bf16.gmra.mrb[248].mxu1 %v2501_v41  ;;  %v6431_v38 = vmul.f32 %v2996_v49, %v5256_v32  ;;  %v2361_v49 = vmul.f32 %v6437_v60, %v1749_v45  ;;  %v4805_v13 = vld [vmem:[#allocation8 + $0x1f8] sm:$0xff]  ;;  %v2362_v56 = vmul.f32 %v6437_v60, %v1751_v3  ;;  %v6458_v3 = vpop.permute.xlu0 %2075 }
 0x536   :  { %v2999_v12 = vmax.f32 %v2871_v17, 0.0  ;;  %2845 = vmatprep.mubr.bf16.mxu1 %v8498_v48  ;;  %v6441_v21 = vmul.f32 %v2997_v46, %v5256_v32  ;;  %v2502_v17 = vpack.c.bf16 %v4805_v13, %v4806_v23  ;;  %v1761_v13 = vadd.f32 %v6047_v36, %v6293_v33 }
 0x537   :  { %v6434_v47 = vmul.f32 %v2998_v61, %v5254_v31 }
 0x538   :  { %v2577_v14 = vpop.f32.mrb[144].mxu1  ;;  %v6444_v28 = vmul.f32 %v2999_v12, %v5254_v31  ;;  %v1755_v31 = vadd.f32 %v6041_v59, %v6291_v30 }
 0x539   :  { %v2872_v58 = vadd.f32 %v2577_v14, %v2359_v6  ;;  %v2579_v19 = vpop.f32.mrb[145].mxu1  ;;  %v1757_v6 = vadd.f32 %v6043_v50, %v6293_v33 }
 0x53a   :  { %v2873_v61 = vadd.f32 %v2579_v19, %v2360_v4  ;;  %v2581_v24 = vpop.f32.mrb[146].mxu1  ;;  %v3296_v32 = vpack.c.bf16 %v6444_v28, %v6441_v21  ;;  %v1759_v4 = vadd.f32 %v6045_v53, %v6291_v30  ;;  %v2363_v53 = vmul.f32 %v6458_v3, %v1755_v31 }
 0x53b   :  { %v3000_v46 = vmax.f32 %v2872_v58, 0.0  ;;  %v2874_v12 = vadd.f32 %v2581_v24, %v2361_v49  ;;  %v2583_v41 = vpop.f32.mrb[147].mxu1  ;;  %v6472_v24 = vpop.permute.xlu1 %2080  ;;  %v2364_v58 = vmul.f32 %v6458_v3, %v1757_v6 }
 0x53c   :  { %v3001_v45 = vmax.f32 %v2873_v61, 0.0  ;;  %v2875_v14 = vadd.f32 %v2583_v41, %v2362_v56  ;;  %v2366_v31 = vmul.f32 %v6472_v24, %v1761_v13  ;;  %v8672_v13 = vpack.c.bf16 %v6335_v1, %v6332_v26 }
 0x53d   :  { %v3002_v19 = vmax.f32 %v2874_v12, 0.0  ;;  %2846 = vmatmul.mubr.bf16.gmra.mrb[252].mxu1 %v2502_v17  ;;  %v6466_v59 = vmul.f32 %v3000_v46, %v5263_v43  ;;  %v2365_v17 = vmul.f32 %v6472_v24, %v1759_v4  ;;  %v1769_v4 = vadd.f32 %v6055_v25, %v6291_v30 }
 0x53e   :  { %v3003_v23 = vmax.f32 %v2875_v14, 0.0  ;;  %3385 = vmatprep.mubr.bf16.mxu1 %v3290_v7  ;;  %v6476_v36 = vmul.f32 %v3001_v45, %v5263_v43  ;;  %v1765_v43 = vadd.f32 %v6051_v27, %v6291_v30  ;;  %v1767_v45 = vadd.f32 %v6053_v55, %v6293_v33 }
 0x53f   :  { %v6469_v50 = vmul.f32 %v3002_v19, %v5261_v42  ;;  %v1771_v27 = vadd.f32 %v6057_v37, %v6293_v33  ;;  %v6510_v26 = vpop.permute.xlu1 %2090 }
 0x540   :  { %v2587_v41 = vpop.f32.mrb[148].mxu1  ;;  %v6479_v49 = vmul.f32 %v3003_v23, %v5261_v42 }
 0x541   :  { %v3297_v18 = vpack.c.bf16 %v6469_v50, %v6466_v59  ;;  %v2876_v35 = vadd.f32 %v2587_v41, %v2363_v53  ;;  %v2589_v7 = vpop.f32.mrb[149].mxu1  ;;  %v6496_v53 = vpop.permute.xlu0 %2085 }
 0x542   :  { %v2877_v61 = vadd.f32 %v2589_v7, %v2364_v58  ;;  %v2591_v56 = vpop.f32.mrb[150].mxu1  ;;  %v3298_v46 = vpack.c.bf16 %v6479_v49, %v6476_v36  ;;  %v8673_v58 = vpack.c.bf16 %v6378_v40, %v6375_v63  ;;  %v2368_v7 = vmul.f32 %v6496_v53, %v1767_v45 }
 0x543   :  { %v3004_v12 = vmax.f32 %v2876_v35, 0.0  ;;  %v2878_v42 = vadd.f32 %v2591_v56, %v2365_v17  ;;  %v2593_v6 = vpop.f32.mrb[151].mxu1  ;;  %v2367_v35 = vmul.f32 %v6496_v53, %v1765_v43  ;;  %v2369_v56 = vmul.f32 %v6510_v26, %v1769_v4 }
 0x544   :  { %v3005_v14 = vmax.f32 %v2877_v61, 0.0  ;;  %v2879_v19 = vadd.f32 %v2593_v6, %v2366_v31  ;;  %v1779_v4 = vadd.f32 %v6065_v39, %v6291_v30 }
 0x545   :  { %v3006_v23 = vmax.f32 %v2878_v42, 0.0  ;;  %3386 = vmatmul.mubr.bf16.vlgmr.msra.gmra.mrb[0].mxu1 %v8672_v13  ;;  %v6504_v55 = vmul.f32 %v3004_v12, %v5270_v52  ;;  %v2370_v12 = vmul.f32 %v6510_v26, %v1771_v27  ;;  %v8674_v27 = vpack.c.bf16 %v6368_v62, %v6365_v2  ;;  %v6548_v2 = vpop.permute.xlu1 %2100 }
 0x546   :  { %v3007_v41 = vmax.f32 %v2879_v19, 0.0  ;;  %3393 = vmatprep.mubr.bf16.mxu1 %v8673_v58  ;;  %v6514_v37 = vmul.f32 %v3005_v14, %v5270_v52  ;;  %v1775_v52 = vadd.f32 %v6061_v54, %v6291_v30  ;;  %v1777_v14 = vadd.f32 %v6063_v10, %v6293_v33  ;;  %v8676_v10 = vld [vmem:[#allocation26_spill] sm:$0xff] }
 0x547   :  { %v6507_v25 = vmul.f32 %v3006_v23, %v5268_v51  ;;  %v1781_v54 = vadd.f32 %v6067_v5, %v6293_v33 }
 0x548   :  { %v2597_v1 = vpop.f32.mrb[152].mxu1  ;;  %v6517_v17 = vmul.f32 %v3007_v41, %v5268_v51  ;;  %v6534_v41 = vpop.permute.xlu0 %2095 }
 0x549   :  { %v3299_v63 = vpack.c.bf16 %v6507_v25, %v6504_v55  ;;  %v2880_v40 = vadd.f32 %v2597_v1, %v2367_v35  ;;  %v2599_v61 = vpop.f32.mrb[153].mxu1  ;;  %v8675_v35 = vpack.c.bf16 %v6411_v16, %v6408_v34 }
 0x54a   :  { %v2881_v31 = vadd.f32 %v2599_v61, %v2368_v7  ;;  %v2601_v43 = vpop.f32.mrb[154].mxu1  ;;  %v3300_v42 = vpack.c.bf16 %v6517_v17, %v6514_v37  ;;  %v8677_v7 = vld [vmem:[#allocation25_spill] sm:$0xff]  ;;  %v2372_v61 = vmul.f32 %v6534_v41, %v1777_v14 }
 0x54b   :  { %v3008_v6 = vmax.f32 %v2880_v40, 0.0  ;;  %v2882_v51 = vadd.f32 %v2601_v43, %v2369_v56  ;;  %v2603_v45 = vpop.f32.mrb[155].mxu1  ;;  %v2371_v40 = vmul.f32 %v6534_v41, %v1775_v52  ;;  %v2373_v43 = vmul.f32 %v6548_v2, %v1779_v4  ;;  %v8680_v4 = vld [vmem:[#allocation142_spill] sm:$0xff] }
 0x54c   :  { %v3009_v19 = vmax.f32 %v2881_v31, 0.0  ;;  %v2883_v23 = vadd.f32 %v2603_v45, %v2370_v12  ;;  %v8678_v45 = vld [vmem:[#allocation140_spill] sm:$0xff] }
 0x54d   :  { %v3010_v13 = vmax.f32 %v2882_v51, 0.0  ;;  %3394 = vmatmul.mubr.bf16.gmra.mrb[4].mxu1 %v8674_v27  ;;  %v6542_v1 = vmul.f32 %v3008_v6, %v8676_v10  ;;  %v2374_v6 = vmul.f32 %v6548_v2, %v1781_v54  ;;  %v1785_v14 = vadd.f32 %v8678_v45, %v6291_v30  ;;  %v8679_v27 = vld [vmem:[#allocation141_spill] sm:$0xff] }
 0x54e   :  { %v3011_v58 = vmax.f32 %v2883_v23, 0.0  ;;  %3401 = vmatprep.mubr.bf16.mxu1 %v8675_v35  ;;  %v6552_v5 = vmul.f32 %v3009_v19, %v8676_v10  ;;  %v8681_v54 = vpack.c.bf16 %v6401_v11, %v6398_v29  ;;  %v6586_v29 = vpop.permute.xlu1 %2110 }
 0x54f   :  { %v6545_v39 = vmul.f32 %v3010_v13, %v8677_v7 }
 0x550   :  { %v2607_v62 = vpop.f32.mrb[156].mxu1  ;;  %v6555_v56 = vmul.f32 %v3011_v58, %v8677_v7  ;;  %v1787_v58 = vadd.f32 %v8679_v27, %v6293_v33  ;;  %v1789_v7 = vadd.f32 %v8680_v4, %v6291_v30 }
 0x551   :  { %v3301_v34 = vpack.c.bf16 %v6545_v39, %v6542_v1  ;;  %v2884_v16 = vadd.f32 %v2607_v62, %v2371_v40  ;;  %v2609_v31 = vpop.f32.mrb[157].mxu1  ;;  %v6572_v62 = vpop.permute.xlu0 %2105 }
 0x552   :  { %v2885_v12 = vadd.f32 %v2609_v31, %v2372_v61  ;;  %v2611_v52 = vpop.f32.mrb[158].mxu1  ;;  %v3302_v51 = vpack.c.bf16 %v6555_v56, %v6552_v5  ;;  %v8682_v61 = vld [vmem:[#allocation143_spill] sm:$0xff]  ;;  %v2375_v45 = vmul.f32 %v6572_v62, %v1785_v14 }
 0x553   :  { %v3012_v19 = vmax.f32 %v2884_v16, 0.0  ;;  %v2886_v23 = vadd.f32 %v2611_v52, %v2373_v43  ;;  %v2613_v13 = vpop.f32.mrb[159].mxu1  ;;  %v1791_v16 = vadd.f32 %v8682_v61, %v6293_v33  ;;  %v8683_v43 = vld [vmem:[#allocation28_spill] sm:$0xff]  ;;  %v8684_v52 = vld [vmem:[#allocation27_spill] sm:$0xff] }
 0x554   :  { %v3013_v35 = vmax.f32 %v2885_v12, 0.0  ;;  %v2887_v10 = vadd.f32 %v2613_v13, %v2374_v6 }
 0x555   :  { %v3014_v40 = vmax.f32 %v2886_v23, 0.0  ;;  %3402 = vmatmul.mubr.bf16.gmra.mrb[8].mxu1 %v8681_v54  ;;  %v6580_v12 = vmul.f32 %v3012_v19, %v8683_v43  ;;  %v2376_v23 = vmul.f32 %v6572_v62, %v1787_v58  ;;  %v2377_v19 = vmul.f32 %v6586_v29, %v1789_v7  ;;  %v8687_v7 = vld [vmem:[#allocation146_spill] sm:$0xff]  ;;  %v6610_v21 = vpop.permute.xlu0 %2115  ;;  %v8693_v58 = vld [vmem:[#allocation149_spill] sm:$0xff] }
 0x556   :  { %v3015_v31 = vmax.f32 %v2887_v10, 0.0  ;;  %3409 = vmatprep.mubr.bf16.mxu1 %v3296_v32  ;;  %v6590_v13 = vmul.f32 %v3013_v35, %v8683_v43  ;;  %v2378_v4 = vmul.f32 %v6586_v29, %v1791_v16  ;;  %v8685_v35 = vld [vmem:[#allocation144_spill] sm:$0xff]  ;;  %v8686_v43 = vld [vmem:[#allocation145_spill] sm:$0xff]  ;;  %v8688_v16 = vpack.c.bf16 %v6434_v47, %v6431_v38  ;;  %v6624_v38 = vpop.permute.xlu1 %2120 }
 0x557   :  { %v6583_v6 = vmul.f32 %v3014_v40, %v8684_v52  ;;  %v1795_v40 = vadd.f32 %v8685_v35, %v6291_v30  ;;  %v8689_v35 = vld [vmem:[#allocation147_spill] sm:$0xff]  ;;  %v1807_v36 = vadd.f32 %v8693_v58, %v6293_v33  ;;  %v8696_v58 = vld [vmem:[#allocation32_spill] sm:$0xff] }
 0x558   :  { %v2617_v11 = vpop.f32.mrb[160].mxu1  ;;  %v6593_v27 = vmul.f32 %v3015_v31, %v8684_v52  ;;  %v1797_v52 = vadd.f32 %v8686_v43, %v6293_v33 }
 0x559   :  { %v2888_v28 = vadd.f32 %v2617_v11, %v2375_v45  ;;  %v2619_v32 = vpop.f32.mrb[161].mxu1 }
 0x55a   :  { %v2889_v10 = vadd.f32 %v2619_v32, %v2376_v23  ;;  %v2621_v14 = vpop.f32.mrb[162].mxu1  ;;  %v1799_v23 = vadd.f32 %v8687_v7, %v6291_v30  ;;  %v2380_v43 = vmul.f32 %v6610_v21, %v1797_v52  ;;  %v6662_v59 = vpop.permute.xlu1 %2130  ;;  %v8699_v52 = vld [vmem:[#allocation153_spill] sm:$0xff] }
 0x55b   :  { %v3016_v54 = vmax.f32 %v2888_v28, 0.0  ;;  %v2890_v61 = vadd.f32 %v2621_v14, %v2377_v19  ;;  %v2623_v31 = vpop.f32.mrb[163].mxu1  ;;  %v1801_v28 = vadd.f32 %v8689_v35, %v6293_v33  ;;  %v1817_v37 = vadd.f32 %v8699_v52, %v6293_v33  ;;  %v8702_v52 = vld [vmem:[#allocation34_spill] sm:$0xff] }
 0x55c   :  { %v3017_v45 = vmax.f32 %v2889_v10, 0.0  ;;  %v2891_v11 = vadd.f32 %v2623_v31, %v2378_v4  ;;  %v8690_v10 = vld [vmem:[#allocation30_spill] sm:$0xff]  ;;  %v8691_v4 = vld [vmem:[#allocation29_spill] sm:$0xff] }
 0x55d   :  { %v3018_v32 = vmax.f32 %v2890_v61, 0.0  ;;  %3410 = vmatmul.mubr.bf16.gmra.mrb[12].mxu1 %v8688_v16  ;;  %v6618_v14 = vmul.f32 %v3016_v54, %v8690_v10  ;;  %v2379_v61 = vmul.f32 %v6610_v21, %v1795_v40  ;;  %v2381_v54 = vmul.f32 %v6624_v38, %v1799_v23  ;;  %v8694_v23 = vld [vmem:[#allocation150_spill] sm:$0xff] }
 0x55e   :  { %v3019_v19 = vmax.f32 %v2891_v11, 0.0  ;;  %3417 = vmatprep.mubr.bf16.mxu1 %v3298_v46  ;;  %v6628_v7 = vmul.f32 %v3017_v45, %v8690_v10  ;;  %v2382_v16 = vmul.f32 %v6624_v38, %v1801_v28  ;;  %v8692_v45 = vld [vmem:[#allocation148_spill] sm:$0xff]  ;;  %v6648_v28 = vpop.permute.xlu0 %2125  ;;  %v6700_v55 = vpop.permute.xlu1 %2140 }
 0x55f   :  { %v6621_v31 = vmul.f32 %v3018_v32, %v8691_v4  ;;  %v1805_v35 = vadd.f32 %v8692_v45, %v6291_v30  ;;  %v8695_v45 = vld [vmem:[#allocation151_spill] sm:$0xff] }
 0x560   :  { %v2627_v47 = vpop.f32.mrb[164].mxu1  ;;  %v6631_v11 = vmul.f32 %v3019_v19, %v8691_v4 }
 0x561   :  { %v2892_v49 = vadd.f32 %v2627_v47, %v2379_v61  ;;  %v2629_v46 = vpop.f32.mrb[165].mxu1 }
 0x562   :  { %v2893_v32 = vadd.f32 %v2629_v46, %v2380_v43  ;;  %v2631_v40 = vpop.f32.mrb[166].mxu1  ;;  %v1809_v43 = vadd.f32 %v8694_v23, %v6291_v30  ;;  %v6738_v1 = vpop.permute.xlu1 %2150 }
 0x563   :  { %v3020_v10 = vmax.f32 %v2892_v49, 0.0  ;;  %v2894_v19 = vadd.f32 %v2631_v40, %v2381_v54  ;;  %v2633_v4 = vpop.f32.mrb[167].mxu1  ;;  %v1811_v49 = vadd.f32 %v8695_v45, %v6293_v33  ;;  %v8697_v40 = vld [vmem:[#allocation31_spill] sm:$0xff]  ;;  %8712 = vst [vmem:[#allocation25_spill] sm:$0xff] %v6738_v1 }
 0x564   :  { %v3021_v61 = vmax.f32 %v2893_v32, 0.0  ;;  %v2895_v47 = vadd.f32 %v2633_v4, %v2382_v16 }
 0x565   :  { %v3022_v46 = vmax.f32 %v2894_v19, 0.0  ;;  %3418 = vmatmul.mubr.bf16.gmra.mrb[16].mxu1 %v3297_v18  ;;  %v6656_v32 = vmul.f32 %v3020_v10, %v8696_v58  ;;  %v2383_v19 = vmul.f32 %v6648_v28, %v1805_v35  ;;  %v2384_v18 = vmul.f32 %v6648_v28, %v1807_v36  ;;  %v8705_v36 = vld [vmem:[#allocation157_spill] sm:$0xff] }
 0x566   :  { %v3023_v54 = vmax.f32 %v2895_v47, 0.0  ;;  %3425 = vmatprep.mubr.bf16.mxu1 %v3300_v42  ;;  %v6666_v4 = vmul.f32 %v3021_v61, %v8696_v58  ;;  %v2385_v10 = vmul.f32 %v6662_v59, %v1809_v43  ;;  %v8698_v61 = vld [vmem:[#allocation152_spill] sm:$0xff]  ;;  %v8700_v43 = vld [vmem:[#allocation154_spill] sm:$0xff]  ;;  %v1827_v5 = vadd.f32 %v8705_v36, %v6293_v33 }
 0x567   :  { %v6659_v16 = vmul.f32 %v3022_v46, %v8697_v40  ;;  %v2386_v46 = vmul.f32 %v6662_v59, %v1811_v49  ;;  %v1815_v45 = vadd.f32 %v8698_v61, %v6291_v30  ;;  %v6686_v49 = vpop.permute.xlu0 %2135  ;;  %v8701_v61 = vld [vmem:[#allocation155_spill] sm:$0xff]  ;;  %v8710_v36 = vld [vmem:[#allocation36_spill] sm:$0xff] }
 0x568   :  { %v2637_v50 = vpop.f32.mrb[168].mxu1  ;;  %v6669_v47 = vmul.f32 %v3023_v54, %v8697_v40 }
 0x569   :  { %v2896_v17 = vadd.f32 %v2637_v50, %v2383_v19  ;;  %v2639_v42 = vpop.f32.mrb[169].mxu1 }
 0x56a   :  { %v2897_v23 = vadd.f32 %v2639_v42, %v2384_v18  ;;  %v2641_v35 = vpop.f32.mrb[170].mxu1  ;;  %v1819_v18 = vadd.f32 %v8700_v43, %v6291_v30 }
 0x56b   :  { %v3024_v58 = vmax.f32 %v2896_v17, 0.0  ;;  %v2898_v54 = vadd.f32 %v2641_v35, %v2385_v10  ;;  %v2643_v40 = vpop.f32.mrb[171].mxu1  ;;  %v1821_v17 = vadd.f32 %v8701_v61, %v6293_v33  ;;  %v8703_v35 = vld [vmem:[#allocation33_spill] sm:$0xff] }
 0x56c   :  { %v3025_v19 = vmax.f32 %v2897_v23, 0.0  ;;  %v2899_v50 = vadd.f32 %v2643_v40, %v2386_v46 }
 0x56d   :  { %v3026_v42 = vmax.f32 %v2898_v54, 0.0  ;;  %3426 = vmatmul.mubr.bf16.gmra.mrb[20].mxu1 %v3299_v63  ;;  %v6694_v23 = vmul.f32 %v3024_v58, %v8702_v52  ;;  %v2387_v54 = vmul.f32 %v6686_v49, %v1815_v45  ;;  %v2388_v63 = vmul.f32 %v6686_v49, %v1817_v37 }
 0x56e   :  { %v3027_v10 = vmax.f32 %v2899_v50, 0.0  ;;  %3433 = vmatprep.mubr.bf16.mxu1 %v3302_v51  ;;  %v6704_v40 = vmul.f32 %v3025_v19, %v8702_v52  ;;  %v2389_v58 = vmul.f32 %v6700_v55, %v1819_v18  ;;  %v8704_v19 = vld [vmem:[#allocation156_spill] sm:$0xff]  ;;  %v8706_v18 = vld [vmem:[#allocation158_spill] sm:$0xff] }
 0x56f   :  { %v6697_v46 = vmul.f32 %v3026_v42, %v8703_v35  ;;  %v2390_v42 = vmul.f32 %v6700_v55, %v1821_v17  ;;  %v1825_v61 = vadd.f32 %v8704_v19, %v6291_v30  ;;  %v6724_v17 = vpop.permute.xlu0 %2145  ;;  %v8708_v19 = vld [vmem:[#allocation159_spill] sm:$0xff] }
 0x570   :  { %v2647_v25 = vpop.f32.mrb[172].mxu1  ;;  %v6707_v50 = vmul.f32 %v3027_v10, %v8703_v35  ;;  %8707 = vst [vmem:[#allocation26_spill] sm:$0xff] %v6724_v17 }
 0x571   :  { %v2900_v56 = vadd.f32 %v2647_v25, %v2387_v54  ;;  %v2649_v51 = vpop.f32.mrb[173].mxu1 }
 0x572   :  { %v2901_v43 = vadd.f32 %v2649_v51, %v2388_v63  ;;  %v2651_v45 = vpop.f32.mrb[174].mxu1  ;;  %v1829_v63 = vadd.f32 %v8706_v18, %v6291_v30 }
 0x573   :  { %v3028_v52 = vmax.f32 %v2900_v56, 0.0  ;;  %v2902_v10 = vadd.f32 %v2651_v45, %v2389_v58  ;;  %v2653_v35 = vpop.f32.mrb[175].mxu1  ;;  %v1831_v56 = vadd.f32 %v8708_v19, %v6293_v33  ;;  %v8709_v45 = vpack.c.bf16 %v6593_v27, %v6590_v13 }
 0x574   :  { %v3029_v54 = vmax.f32 %v2901_v43, 0.0  ;;  %v2903_v25 = vadd.f32 %v2653_v35, %v2390_v42  ;;  %v8711_v42 = vld [vmem:[#allocation35_spill] sm:$0xff] }
 0x575   :  { %v3030_v51 = vmax.f32 %v2902_v10, 0.0  ;;  %3434 = vmatmul.mubr.bf16.gmra.mrb[24].mxu1 %v3301_v34  ;;  %v6732_v43 = vmul.f32 %v3028_v52, %v8710_v36  ;;  %v2391_v10 = vmul.f32 %v6724_v17, %v1825_v61  ;;  %v2392_v34 = vmul.f32 %v6724_v17, %v1827_v5  ;;  %v8714_v17 = vld [vmem:[#allocation161_spill] sm:$0xff]  ;;  %v6762_v5 = vpop.permute.xlu0 %2155 }
 0x576   :  { %v3031_v58 = vmax.f32 %v2903_v25, 0.0  ;;  %3441 = vmatprep.mubr.bf16.mxu1 %v8709_v45  ;;  %v6742_v18 = vmul.f32 %v3029_v54, %v8710_v36  ;;  %v2394_v45 = vmul.f32 %v6738_v1, %v1831_v56  ;;  %v8713_v54 = vld [vmem:[#allocation160_spill] sm:$0xff]  ;;  %v1837_v13 = vadd.f32 %v8714_v17, %v6293_v33  ;;  %8717 = vst [vmem:[#allocation140_spill] sm:$0xff] %v6762_v5  ;;  %v8720_v17 = vld [vmem:[#allocation38_spill] sm:$0xff] }
 0x577   :  { %v6735_v35 = vmul.f32 %v3030_v51, %v8711_v42  ;;  %v2393_v51 = vmul.f32 %v6738_v1, %v1829_v63  ;;  %v1835_v36 = vadd.f32 %v8713_v54, %v6291_v30  ;;  %v8715_v63 = vld [vmem:[#allocation162_spill] sm:$0xff]  ;;  %v8716_v56 = vpack.c.bf16 %v6583_v6, %v6580_v12  ;;  %v8718_v54 = vld [vmem:[#allocation163_spill] sm:$0xff]  ;;  %v6776_v12 = vpop.permute.xlu1 %2160  ;;  %v8724_v1 = vld [vmem:[#allocation165_spill] sm:$0xff] }
 0x578   :  { %v2657_v39 = vpop.f32.mrb[176].mxu1  ;;  %v6745_v25 = vmul.f32 %v3031_v58, %v8711_v42  ;;  %8722 = vst [vmem:[#allocation141_spill] sm:$0xff] %v6776_v12 }
 0x579   :  { %v2904_v27 = vadd.f32 %v2657_v39, %v2391_v10  ;;  %v2659_v52 = vpop.f32.mrb[177].mxu1 }
 0x57a   :  { %v2905_v19 = vadd.f32 %v2659_v52, %v2392_v34  ;;  %v2661_v61 = vpop.f32.mrb[178].mxu1  ;;  %v1839_v34 = vadd.f32 %v8715_v63, %v6291_v30  ;;  %v2396_v63 = vmul.f32 %v6762_v5, %v1837_v13  ;;  %v6800_v13 = vpop.permute.xlu0 %2165 }
 0x57b   :  { %v3032_v37 = vmax.f32 %v2904_v27, 0.0  ;;  %v2906_v58 = vadd.f32 %v2661_v61, %v2393_v51  ;;  %v2663_v42 = vpop.f32.mrb[179].mxu1  ;;  %v1841_v27 = vadd.f32 %v8718_v54, %v6293_v33  ;;  %v8719_v61 = vpack.c.bf16 %v6631_v11, %v6628_v7  ;;  %8727 = vst [vmem:[#allocation142_spill] sm:$0xff] %v6800_v13 }
 0x57c   :  { %v3033_v10 = vmax.f32 %v2905_v19, 0.0  ;;  %v2907_v39 = vadd.f32 %v2663_v42, %v2394_v45  ;;  %v8721_v45 = vld [vmem:[#allocation37_spill] sm:$0xff]  ;;  %v1847_v7 = vadd.f32 %v8724_v1, %v6293_v33  ;;  %v8730_v1 = vld [vmem:[#allocation40_spill] sm:$0xff] }
 0x57d   :  { %v3034_v52 = vmax.f32 %v2906_v58, 0.0  ;;  %3442 = vmatmul.mubr.bf16.gmra.mrb[28].mxu1 %v8716_v56  ;;  %v6770_v19 = vmul.f32 %v3032_v37, %v8720_v17  ;;  %v2395_v58 = vmul.f32 %v6762_v5, %v1835_v36 }
 0x57e   :  { %v3035_v51 = vmax.f32 %v2907_v39, 0.0  ;;  %3449 = vmatprep.mubr.bf16.mxu1 %v8719_v61  ;;  %v6780_v56 = vmul.f32 %v3033_v10, %v8720_v17  ;;  %v2398_v61 = vmul.f32 %v6776_v12, %v1841_v27  ;;  %v8723_v10 = vld [vmem:[#allocation164_spill] sm:$0xff]  ;;  %v8726_v27 = vpack.c.bf16 %v6621_v31, %v6618_v14  ;;  %v6814_v14 = vpop.permute.xlu1 %2170 }
 0x57f   :  { %v6773_v42 = vmul.f32 %v3034_v52, %v8721_v45  ;;  %v2397_v52 = vmul.f32 %v6776_v12, %v1839_v34  ;;  %v1845_v17 = vadd.f32 %v8723_v10, %v6291_v30  ;;  %v8725_v34 = vld [vmem:[#allocation166_spill] sm:$0xff]  ;;  %v8728_v10 = vld [vmem:[#allocation167_spill] sm:$0xff]  ;;  %8732 = vst [vmem:[#allocation143_spill] sm:$0xff] %v6814_v14  ;;  %v8734_v12 = vld [vmem:[#allocation169_spill] sm:$0xff] }
 0x580   :  { %v2667_v6 = vpop.f32.mrb[180].mxu1  ;;  %v6783_v39 = vmul.f32 %v3035_v51, %v8721_v45 }
 0x581   :  { %v2908_v11 = vadd.f32 %v2667_v6, %v2395_v58  ;;  %v2669_v37 = vpop.f32.mrb[181].mxu1 }
 0x582   :  { %v2909_v54 = vadd.f32 %v2669_v37, %v2396_v63  ;;  %v2671_v36 = vpop.f32.mrb[182].mxu1  ;;  %v1849_v63 = vadd.f32 %v8725_v34, %v6291_v30  ;;  %v2400_v34 = vmul.f32 %v6800_v13, %v1847_v7  ;;  %v6838_v7 = vpop.permute.xlu0 %2175 }
 0x583   :  { %v3036_v5 = vmax.f32 %v2908_v11, 0.0  ;;  %v2910_v51 = vadd.f32 %v2671_v36, %v2397_v52  ;;  %v2673_v45 = vpop.f32.mrb[183].mxu1  ;;  %v1851_v11 = vadd.f32 %v8728_v10, %v6293_v33  ;;  %v8729_v36 = vpack.c.bf16 %v6669_v47, %v6666_v4  ;;  %8737 = vst [vmem:[#allocation28_spill] sm:$0xff] %v6838_v7 }
 0x584   :  { %v3037_v58 = vmax.f32 %v2909_v54, 0.0  ;;  %v2911_v6 = vadd.f32 %v2673_v45, %v2398_v61  ;;  %v8731_v61 = vld [vmem:[#allocation39_spill] sm:$0xff]  ;;  %v1857_v4 = vadd.f32 %v8734_v12, %v6293_v33  ;;  %v8740_v12 = vld [vmem:[#allocation42_spill] sm:$0xff] }
 0x585   :  { %v3038_v37 = vmax.f32 %v2910_v51, 0.0  ;;  %3450 = vmatmul.mubr.bf16.gmra.mrb[32].mxu1 %v8726_v27  ;;  %v6808_v54 = vmul.f32 %v3036_v5, %v8730_v1  ;;  %v2399_v51 = vmul.f32 %v6800_v13, %v1845_v17 }
 0x586   :  { %v3039_v52 = vmax.f32 %v2911_v6, 0.0  ;;  %3457 = vmatprep.mubr.bf16.mxu1 %v8729_v36  ;;  %v6818_v27 = vmul.f32 %v3037_v58, %v8730_v1  ;;  %v2402_v36 = vmul.f32 %v6814_v14, %v1851_v11  ;;  %v8733_v58 = vld [vmem:[#allocation168_spill] sm:$0xff]  ;;  %v8736_v11 = vpack.c.bf16 %v6659_v16, %v6656_v32  ;;  %v6852_v32 = vpop.permute.xlu1 %2180 }
 0x587   :  { %v6811_v45 = vmul.f32 %v3038_v37, %v8731_v61  ;;  %v2401_v37 = vmul.f32 %v6814_v14, %v1849_v63  ;;  %v1855_v1 = vadd.f32 %v8733_v58, %v6291_v30  ;;  %v8735_v63 = vld [vmem:[#allocation170_spill] sm:$0xff]  ;;  %v8738_v58 = vld [vmem:[#allocation171_spill] sm:$0xff]  ;;  %8742 = vst [vmem:[#allocation27_spill] sm:$0xff] %v6852_v32  ;;  %v8744_v14 = vld [vmem:[#allocation173_spill] sm:$0xff] }
 0x588   :  { %v2677_v31 = vpop.f32.mrb[184].mxu1  ;;  %v6821_v6 = vmul.f32 %v3039_v52, %v8731_v61 }
 0x589   :  { %v2912_v47 = vadd.f32 %v2677_v31, %v2399_v51  ;;  %v2679_v5 = vpop.f32.mrb[185].mxu1 }
 0x58a   :  { %v2913_v10 = vadd.f32 %v2679_v5, %v2400_v34  ;;  %v2681_v17 = vpop.f32.mrb[186].mxu1  ;;  %v1859_v34 = vadd.f32 %v8735_v63, %v6291_v30  ;;  %v2404_v63 = vmul.f32 %v6838_v7, %v1857_v4  ;;  %v6876_v4 = vpop.permute.xlu0 %2185 }
 0x58b   :  { %v3040_v13 = vmax.f32 %v2912_v47, 0.0  ;;  %v2914_v52 = vadd.f32 %v2681_v17, %v2401_v37  ;;  %v2683_v61 = vpop.f32.mrb[187].mxu1  ;;  %v1861_v47 = vadd.f32 %v8738_v58, %v6293_v33  ;;  %v8739_v17 = vpack.c.bf16 %v6707_v50, %v6704_v40  ;;  %8747 = vst [vmem:[#allocation144_spill] sm:$0xff] %v6876_v4 }
 0x58c   :  { %v3041_v51 = vmax.f32 %v2913_v10, 0.0  ;;  %v2915_v31 = vadd.f32 %v2683_v61, %v2402_v36  ;;  %v8741_v36 = vld [vmem:[#allocation41_spill] sm:$0xff]  ;;  %v1867_v40 = vadd.f32 %v8744_v14, %v6293_v33  ;;  %v8750_v14 = vld [vmem:[#allocation44_spill] sm:$0xff] }
 0x58d   :  { %v3042_v5 = vmax.f32 %v2914_v52, 0.0  ;;  %3458 = vmatmul.mubr.bf16.gmra.mrb[36].mxu1 %v8736_v11  ;;  %v6846_v10 = vmul.f32 %v3040_v13, %v8740_v12  ;;  %v2403_v52 = vmul.f32 %v6838_v7, %v1855_v1 }
 0x58e   :  { %v3043_v37 = vmax.f32 %v2915_v31, 0.0  ;;  %3465 = vmatprep.mubr.bf16.mxu1 %v8739_v17  ;;  %v6856_v11 = vmul.f32 %v3041_v51, %v8740_v12  ;;  %v2406_v17 = vmul.f32 %v6852_v32, %v1861_v47  ;;  %v8743_v51 = vld [vmem:[#allocation172_spill] sm:$0xff]  ;;  %v8746_v47 = vpack.c.bf16 %v6697_v46, %v6694_v23  ;;  %v6890_v23 = vpop.permute.xlu1 %2190 }
 0x58f   :  { %v6849_v61 = vmul.f32 %v3042_v5, %v8741_v36  ;;  %v2405_v5 = vmul.f32 %v6852_v32, %v1859_v34  ;;  %v1865_v12 = vadd.f32 %v8743_v51, %v6291_v30  ;;  %v8745_v34 = vld [vmem:[#allocation174_spill] sm:$0xff]  ;;  %v8748_v51 = vld [vmem:[#allocation175_spill] sm:$0xff]  ;;  %8752 = vst [vmem:[#allocation145_spill] sm:$0xff] %v6890_v23  ;;  %v8754_v32 = vld [vmem:[#allocation177_spill] sm:$0xff] }
 0x590   :  { %v2687_v16 = vpop.f32.mrb[188].mxu1  ;;  %v6859_v31 = vmul.f32 %v3043_v37, %v8741_v36 }
 0x591   :  { %v2916_v50 = vadd.f32 %v2687_v16, %v2403_v52  ;;  %v2689_v13 = vpop.f32.mrb[189].mxu1 }
 0x592   :  { %v2917_v58 = vadd.f32 %v2689_v13, %v2404_v63  ;;  %v2691_v1 = vpop.f32.mrb[190].mxu1  ;;  %v1869_v63 = vadd.f32 %v8745_v34, %v6291_v30  ;;  %v2408_v34 = vmul.f32 %v6876_v4, %v1867_v40  ;;  %v6914_v40 = vpop.permute.xlu0 %2195 }
 0x593   :  { %v3044_v7 = vmax.f32 %v2916_v50, 0.0  ;;  %v2918_v37 = vadd.f32 %v2691_v1, %v2405_v5  ;;  %v2693_v36 = vpop.f32.mrb[191].mxu1  ;;  %v1871_v50 = vadd.f32 %v8748_v51, %v6293_v33  ;;  %v8749_v1 = vpack.c.bf16 %v6745_v25, %v6742_v18  ;;  %8757 = vst [vmem:[#allocation146_spill] sm:$0xff] %v6914_v40 }
 0x594   :  { %v3045_v52 = vmax.f32 %v2917_v58, 0.0  ;;  %v2919_v16 = vadd.f32 %v2693_v36, %v2406_v17  ;;  %v8751_v17 = vld [vmem:[#allocation43_spill] sm:$0xff]  ;;  %v1877_v18 = vadd.f32 %v8754_v32, %v6293_v33  ;;  %v8760_v32 = vld [vmem:[#allocation46_spill] sm:$0xff] }
 0x595   :  { %v3046_v13 = vmax.f32 %v2918_v37, 0.0  ;;  %3466 = vmatmul.mubr.bf16.gmra.mrb[40].mxu1 %v8746_v47  ;;  %v6884_v58 = vmul.f32 %v3044_v7, %v8750_v14  ;;  %v2407_v37 = vmul.f32 %v6876_v4, %v1865_v12 }
 0x596   :  { %v3047_v5 = vmax.f32 %v2919_v16, 0.0  ;;  %3473 = vmatprep.mubr.bf16.mxu1 %v8749_v1  ;;  %v6894_v47 = vmul.f32 %v3045_v52, %v8750_v14  ;;  %v2410_v1 = vmul.f32 %v6890_v23, %v1871_v50  ;;  %v8753_v52 = vld [vmem:[#allocation176_spill] sm:$0xff]  ;;  %v8756_v50 = vpack.c.bf16 %v6735_v35, %v6732_v43  ;;  %v6928_v43 = vpop.permute.xlu1 %2200 }
 0x597   :  { %v6887_v36 = vmul.f32 %v3046_v13, %v8751_v17  ;;  %v2409_v13 = vmul.f32 %v6890_v23, %v1869_v63  ;;  %v1875_v14 = vadd.f32 %v8753_v52, %v6291_v30  ;;  %v8755_v63 = vld [vmem:[#allocation178_spill] sm:$0xff]  ;;  %v8758_v52 = vld [vmem:[#allocation179_spill] sm:$0xff]  ;;  %8762 = vst [vmem:[#allocation147_spill] sm:$0xff] %v6928_v43  ;;  %v8764_v23 = vld [vmem:[#allocation181_spill] sm:$0xff] }
 0x598   :  { %v2697_v46 = vpop.f32.mrb[192].mxu1  ;;  %v6897_v16 = vmul.f32 %v3047_v5, %v8751_v17 }
 0x599   :  { %v2920_v25 = vadd.f32 %v2697_v46, %v2407_v37  ;;  %v2699_v7 = vpop.f32.mrb[193].mxu1 }
 0x59a   :  { %v2921_v51 = vadd.f32 %v2699_v7, %v2408_v34  ;;  %v2701_v12 = vpop.f32.mrb[194].mxu1  ;;  %v1879_v34 = vadd.f32 %v8755_v63, %v6291_v30  ;;  %v2412_v63 = vmul.f32 %v6914_v40, %v1877_v18  ;;  %v6952_v18 = vpop.permute.xlu0 %2205 }
 0x59b   :  { %v3048_v4 = vmax.f32 %v2920_v25, 0.0  ;;  %v2922_v5 = vadd.f32 %v2701_v12, %v2409_v13  ;;  %v2703_v17 = vpop.f32.mrb[195].mxu1  ;;  %v1881_v25 = vadd.f32 %v8758_v52, %v6293_v33  ;;  %v8759_v12 = vpack.c.bf16 %v6783_v39, %v6780_v56  ;;  %8767 = vst [vmem:[#allocation30_spill] sm:$0xff] %v6952_v18 }
 0x59c   :  { %v3049_v37 = vmax.f32 %v2921_v51, 0.0  ;;  %v2923_v46 = vadd.f32 %v2703_v17, %v2410_v1  ;;  %v8761_v1 = vld [vmem:[#allocation45_spill] sm:$0xff]  ;;  %v1887_v56 = vadd.f32 %v8764_v23, %v6293_v33 }
 0x59d   :  { %v3050_v7 = vmax.f32 %v2922_v5, 0.0  ;;  %3474 = vmatmul.mubr.bf16.gmra.mrb[44].mxu1 %v8756_v50  ;;  %v6922_v51 = vmul.f32 %v3048_v4, %v8760_v32  ;;  %v2411_v5 = vmul.f32 %v6914_v40, %v1875_v14  ;;  %v8770_v23 = vld [vmem:[#allocation49_spill] sm:$0xff] }
 0x59e   :  { %v3051_v13 = vmax.f32 %v2923_v46, 0.0  ;;  %3481 = vmatprep.mubr.bf16.mxu1 %v8759_v12  ;;  %v6932_v50 = vmul.f32 %v3049_v37, %v8760_v32  ;;  %v2414_v12 = vmul.f32 %v6928_v43, %v1881_v25  ;;  %v8763_v37 = vld [vmem:[#allocation180_spill] sm:$0xff]  ;;  %v8766_v25 = vpack.c.bf16 %v6773_v42, %v6770_v19  ;;  %v6966_v19 = vpop.permute.xlu1 %2210 }
 0x59f   :  { %v6925_v17 = vmul.f32 %v3050_v7, %v8761_v1  ;;  %v2413_v7 = vmul.f32 %v6928_v43, %v1879_v34  ;;  %v1885_v32 = vadd.f32 %v8763_v37, %v6291_v30  ;;  %v8765_v34 = vld [vmem:[#allocation182_spill] sm:$0xff]  ;;  %v8768_v37 = vld [vmem:[#allocation183_spill] sm:$0xff]  ;;  %8772 = vst [vmem:[#allocation29_spill] sm:$0xff] %v6966_v19  ;;  %v8774_v43 = vld [vmem:[#allocation185_spill] sm:$0xff] }
 0x5a0   :  { %v2707_v35 = vpop.f32.mrb[196].mxu1  ;;  %v6935_v46 = vmul.f32 %v3051_v13, %v8761_v1 }
 0x5a1   :  { %v2924_v39 = vadd.f32 %v2707_v35, %v2411_v5  ;;  %v2709_v4 = vpop.f32.mrb[197].mxu1 }
 0x5a2   :  { %v2925_v52 = vadd.f32 %v2709_v4, %v2412_v63  ;;  %v2711_v14 = vpop.f32.mrb[198].mxu1  ;;  %v1889_v63 = vadd.f32 %v8765_v34, %v6291_v30  ;;  %v2416_v34 = vmul.f32 %v6952_v18, %v1887_v56  ;;  %v6990_v56 = vpop.permute.xlu0 %2215 }
 0x5a3   :  { %v3052_v40 = vmax.f32 %v2924_v39, 0.0  ;;  %v2926_v13 = vadd.f32 %v2711_v14, %v2413_v7  ;;  %v2713_v1 = vpop.f32.mrb[199].mxu1  ;;  %v1891_v39 = vadd.f32 %v8768_v37, %v6293_v33  ;;  %v8769_v14 = vpack.c.bf16 %v6821_v6, %v6818_v27  ;;  %8777 = vst [vmem:[#allocation148_spill] sm:$0xff] %v6990_v56 }
 0x5a4   :  { %v3053_v5 = vmax.f32 %v2925_v52, 0.0  ;;  %v2927_v35 = vadd.f32 %v2713_v1, %v2414_v12  ;;  %v8771_v12 = vld [vmem:[#allocation48_spill] sm:$0xff]  ;;  %v1897_v27 = vadd.f32 %v8774_v43, %v6293_v33  ;;  %v8780_v43 = vld [vmem:[#allocation51_spill] sm:$0xff] }
 0x5a5   :  { %v3054_v4 = vmax.f32 %v2926_v13, 0.0  ;;  %3482 = vmatmul.mubr.bf16.gmra.mrb[48].mxu1 %v8766_v25  ;;  %v6960_v52 = vmul.f32 %v3052_v40, %v8770_v23  ;;  %v2415_v13 = vmul.f32 %v6952_v18, %v1885_v32 }
 0x5a6   :  { %v3055_v7 = vmax.f32 %v2927_v35, 0.0  ;;  %3489 = vmatprep.mubr.bf16.mxu1 %v8769_v14  ;;  %v6970_v25 = vmul.f32 %v3053_v5, %v8770_v23  ;;  %v2418_v14 = vmul.f32 %v6966_v19, %v1891_v39  ;;  %v8773_v5 = vld [vmem:[#allocation184_spill] sm:$0xff]  ;;  %v8776_v39 = vpack.c.bf16 %v6811_v45, %v6808_v54  ;;  %v7004_v54 = vpop.permute.xlu1 %2220 }
 0x5a7   :  { %v6963_v1 = vmul.f32 %v3054_v4, %v8771_v12  ;;  %v2417_v4 = vmul.f32 %v6966_v19, %v1889_v63  ;;  %v1895_v23 = vadd.f32 %v8773_v5, %v6291_v30  ;;  %v8775_v63 = vld [vmem:[#allocation186_spill] sm:$0xff]  ;;  %v8778_v5 = vld [vmem:[#allocation187_spill] sm:$0xff]  ;;  %8782 = vst [vmem:[#allocation149_spill] sm:$0xff] %v7004_v54 }
 0x5a8   :  { %v2717_v42 = vpop.f32.mrb[200].mxu1  ;;  %v6973_v35 = vmul.f32 %v3055_v7, %v8771_v12 }
 0x5a9   :  { %v2928_v6 = vadd.f32 %v2717_v42, %v2415_v13  ;;  %v2719_v40 = vpop.f32.mrb[201].mxu1 }
 0x5aa   :  { %v2929_v37 = vadd.f32 %v2719_v40, %v2416_v34  ;;  %v2721_v32 = vpop.f32.mrb[202].mxu1  ;;  %v1899_v34 = vadd.f32 %v8775_v63, %v6291_v30 }
 0x5ab   :  { %v3056_v18 = vmax.f32 %v2928_v6, 0.0  ;;  %v2930_v7 = vadd.f32 %v2721_v32, %v2417_v4  ;;  %v2723_v12 = vpop.f32.mrb[203].mxu1  ;;  %v1901_v6 = vadd.f32 %v8778_v5, %v6293_v33  ;;  %v8779_v32 = vpack.c.bf16 %v6859_v31, %v6856_v11 }
 0x5ac   :  { %v3057_v13 = vmax.f32 %v2929_v37, 0.0  ;;  %v2931_v42 = vadd.f32 %v2723_v12, %v2418_v14  ;;  %v8781_v14 = vld [vmem:[#allocation50_spill] sm:$0xff]  ;;  %v2420_v11 = vmul.f32 %v6990_v56, %v1897_v27 }
 0x5ad   :  { %v3058_v40 = vmax.f32 %v2930_v7, 0.0  ;;  %3490 = vmatmul.mubr.bf16.gmra.mrb[52].mxu1 %v8776_v39  ;;  %v6998_v37 = vmul.f32 %v3056_v18, %v8780_v43  ;;  %v2419_v7 = vmul.f32 %v6990_v56, %v1895_v23  ;;  %v8784_v56 = vld [vmem:[#allocation189_spill] sm:$0xff] }
 0x5ae   :  { %v3059_v4 = vmax.f32 %v2931_v42, 0.0  ;;  %3497 = vmatprep.mubr.bf16.mxu1 %v8779_v32  ;;  %v7007_v45 = vmul.f32 %v3057_v13, %v8780_v43  ;;  %v2422_v32 = vmul.f32 %v7004_v54, %v1901_v6  ;;  %v1907_v31 = vadd.f32 %v8784_v56, %v6293_v33  ;;  %v7028_v13 = vpop.permute.xlu0 %2225  ;;  %v8790_v56 = vld [vmem:[#allocation53_spill] sm:$0xff] }
 0x5af   :  { %v7001_v12 = vmul.f32 %v3058_v40, %v8781_v14  ;;  %v2421_v40 = vmul.f32 %v7004_v54, %v1899_v34  ;;  %v8785_v34 = vld [vmem:[#allocation190_spill] sm:$0xff]  ;;  %v8786_v6 = vpack.c.bf16 %v6849_v61, %v6846_v10  ;;  %8787 = vst [vmem:[#allocation150_spill] sm:$0xff] %v7028_v13  ;;  %v7042_v10 = vpop.permute.xlu1 %2230 }
 0x5b0   :  { %v7010_v63 = vmul.f32 %v3059_v4, %v8781_v14  ;;  %v2727_v42 = vpop.f32.mrb[204].mxu1  ;;  %v8783_v4 = vld [vmem:[#allocation188_spill] sm:$0xff]  ;;  %8792 = vst [vmem:[#allocation151_spill] sm:$0xff] %v7042_v10 }
 0x5b1   :  { %v2932_v18 = vadd.f32 %v2727_v42, %v2419_v7  ;;  %v2729_v39 = vpop.f32.mrb[205].mxu1  ;;  %v1905_v43 = vadd.f32 %v8783_v4, %v6291_v30  ;;  %v8788_v4 = vld [vmem:[#allocation191_spill] sm:$0xff] }
 0x5b2   :  { %v2933_v5 = vadd.f32 %v2729_v39, %v2420_v11  ;;  %v2731_v23 = vpop.f32.mrb[206].mxu1  ;;  %v1909_v11 = vadd.f32 %v8785_v34, %v6291_v30 }
 0x5b3   :  { %v3060_v14 = vmax.f32 %v2932_v18, 0.0  ;;  %v2934_v19 = vadd.f32 %v2731_v23, %v2421_v40  ;;  %v2733_v27 = vpop.f32.mrb[207].mxu1  ;;  %v1911_v18 = vadd.f32 %v8788_v4, %v6293_v33  ;;  %v8789_v23 = vpack.c.bf16 %v6897_v16, %v6894_v47 }
 0x5b4   :  { %v3061_v7 = vmax.f32 %v2933_v5, 0.0  ;;  %v2935_v42 = vadd.f32 %v2733_v27, %v2422_v32  ;;  %v8791_v32 = vld [vmem:[#allocation52_spill] sm:$0xff]  ;;  %v2424_v47 = vmul.f32 %v7028_v13, %v1907_v31 }
 0x5b5   :  { %v3062_v39 = vmax.f32 %v2934_v19, 0.0  ;;  %3498 = vmatmul.mubr.bf16.gmra.mrb[56].mxu1 %v8786_v6  ;;  %v7036_v5 = vmul.f32 %v3060_v14, %v8790_v56  ;;  %v2423_v19 = vmul.f32 %v7028_v13, %v1905_v43  ;;  %v8794_v13 = vld [vmem:[#allocation193_spill] sm:$0xff] }
 0x5b6   :  { %v3063_v40 = vmax.f32 %v2935_v42, 0.0  ;;  %3505 = vmatprep.mubr.bf16.mxu1 %v8789_v23  ;;  %v7045_v61 = vmul.f32 %v3061_v7, %v8790_v56  ;;  %v2426_v23 = vmul.f32 %v7042_v10, %v1911_v18  ;;  %v1917_v16 = vadd.f32 %v8794_v13, %v6293_v33  ;;  %v7066_v7 = vpop.permute.xlu0 %2235  ;;  %v8800_v13 = vld [vmem:[#allocation56_spill] sm:$0xff] }
 0x5b7   :  { %v7039_v27 = vmul.f32 %v3062_v39, %v8791_v32  ;;  %v2425_v39 = vmul.f32 %v7042_v10, %v1909_v11  ;;  %v8795_v11 = vld [vmem:[#allocation194_spill] sm:$0xff]  ;;  %v8796_v18 = vpack.c.bf16 %v6887_v36, %v6884_v58  ;;  %8797 = vst [vmem:[#allocation32_spill] sm:$0xff] %v7066_v7  ;;  %v7080_v58 = vpop.permute.xlu1 %2240 }
 0x5b8   :  { %v7048_v34 = vmul.f32 %v3063_v40, %v8791_v32  ;;  %v2737_v42 = vpop.f32.mrb[208].mxu1  ;;  %v8793_v40 = vld [vmem:[#allocation192_spill] sm:$0xff]  ;;  %8802 = vst [vmem:[#allocation31_spill] sm:$0xff] %v7080_v58 }
 0x5b9   :  { %v2936_v14 = vadd.f32 %v2737_v42, %v2423_v19  ;;  %v2739_v6 = vpop.f32.mrb[209].mxu1  ;;  %v1915_v56 = vadd.f32 %v8793_v40, %v6291_v30  ;;  %v8798_v40 = vld [vmem:[#allocation195_spill] sm:$0xff] }
 0x5ba   :  { %v2937_v4 = vadd.f32 %v2739_v6, %v2424_v47  ;;  %v2741_v43 = vpop.f32.mrb[210].mxu1  ;;  %v1919_v47 = vadd.f32 %v8795_v11, %v6291_v30 }
 0x5bb   :  { %v3064_v32 = vmax.f32 %v2936_v14, 0.0  ;;  %v2938_v54 = vadd.f32 %v2741_v43, %v2425_v39  ;;  %v2743_v31 = vpop.f32.mrb[211].mxu1  ;;  %v1921_v14 = vadd.f32 %v8798_v40, %v6293_v33  ;;  %v8799_v43 = vpack.c.bf16 %v6935_v46, %v6932_v50 }
 0x5bc   :  { %v3065_v19 = vmax.f32 %v2937_v4, 0.0  ;;  %v2939_v42 = vadd.f32 %v2743_v31, %v2426_v23  ;;  %v8801_v23 = vld [vmem:[#allocation55_spill] sm:$0xff]  ;;  %v2428_v50 = vmul.f32 %v7066_v7, %v1917_v16 }
 0x5bd   :  { %v3066_v6 = vmax.f32 %v2938_v54, 0.0  ;;  %3506 = vmatmul.mubr.bf16.gmra.mrb[60].mxu1 %v8796_v18  ;;  %v7074_v4 = vmul.f32 %v3064_v32, %v8800_v13  ;;  %v2427_v54 = vmul.f32 %v7066_v7, %v1915_v56  ;;  %v8804_v7 = vld [vmem:[#allocation197_spill] sm:$0xff] }
 0x5be   :  { %v3067_v39 = vmax.f32 %v2939_v42, 0.0  ;;  %3513 = vmatprep.mubr.bf16.mxu1 %v8799_v43  ;;  %v7083_v36 = vmul.f32 %v3065_v19, %v8800_v13  ;;  %v2430_v43 = vmul.f32 %v7080_v58, %v1921_v14  ;;  %v1927_v46 = vadd.f32 %v8804_v7, %v6293_v33  ;;  %v7104_v19 = vpop.permute.xlu0 %2245  ;;  %v8810_v7 = vld [vmem:[#allocation59_spill] sm:$0xff] }
 0x5bf   :  { %v7077_v31 = vmul.f32 %v3066_v6, %v8801_v23  ;;  %v2429_v6 = vmul.f32 %v7080_v58, %v1919_v47  ;;  %v8805_v47 = vld [vmem:[#allocation198_spill] sm:$0xff]  ;;  %v8806_v14 = vpack.c.bf16 %v6925_v17, %v6922_v51  ;;  %8807 = vst [vmem:[#allocation152_spill] sm:$0xff] %v7104_v19  ;;  %v7118_v51 = vpop.permute.xlu1 %2250 }
 0x5c0   :  { %v7086_v11 = vmul.f32 %v3067_v39, %v8801_v23  ;;  %v2747_v42 = vpop.f32.mrb[212].mxu1  ;;  %v8803_v39 = vld [vmem:[#allocation196_spill] sm:$0xff]  ;;  %8812 = vst [vmem:[#allocation153_spill] sm:$0xff] %v7118_v51 }
 0x5c1   :  { %v2940_v32 = vadd.f32 %v2747_v42, %v2427_v54  ;;  %v2749_v18 = vpop.f32.mrb[213].mxu1  ;;  %v1925_v13 = vadd.f32 %v8803_v39, %v6291_v30  ;;  %v8808_v39 = vld [vmem:[#allocation199_spill] sm:$0xff] }
 0x5c2   :  { %v2941_v40 = vadd.f32 %v2749_v18, %v2428_v50  ;;  %v2751_v56 = vpop.f32.mrb[214].mxu1  ;;  %v1929_v50 = vadd.f32 %v8805_v47, %v6291_v30 }
 0x5c3   :  { %v3068_v23 = vmax.f32 %v2940_v32, 0.0  ;;  %v2942_v10 = vadd.f32 %v2751_v56, %v2429_v6  ;;  %v2753_v16 = vpop.f32.mrb[215].mxu1  ;;  %v1931_v32 = vadd.f32 %v8808_v39, %v6293_v33  ;;  %v8809_v56 = vpack.c.bf16 %v6973_v35, %v6970_v25 }
 0x5c4   :  { %v3069_v54 = vmax.f32 %v2941_v40, 0.0  ;;  %v2943_v42 = vadd.f32 %v2753_v16, %v2430_v43  ;;  %v8811_v43 = vld [vmem:[#allocation58_spill] sm:$0xff]  ;;  %v2432_v25 = vmul.f32 %v7104_v19, %v1927_v46 }
 0x5c5   :  { %v3070_v18 = vmax.f32 %v2942_v10, 0.0  ;;  %3514 = vmatmul.mubr.bf16.gmra.mrb[64].mxu1 %v8806_v14  ;;  %v7112_v40 = vmul.f32 %v3068_v23, %v8810_v7  ;;  %v2431_v10 = vmul.f32 %v7104_v19, %v1925_v13  ;;  %v8814_v19 = vld [vmem:[#allocation201_spill] sm:$0xff] }
 0x5c6   :  { %v3071_v6 = vmax.f32 %v2943_v42, 0.0  ;;  %3521 = vmatprep.mubr.bf16.mxu1 %v8809_v56  ;;  %v7121_v17 = vmul.f32 %v3069_v54, %v8810_v7  ;;  %v2434_v56 = vmul.f32 %v7118_v51, %v1931_v32  ;;  %v1937_v35 = vadd.f32 %v8814_v19, %v6293_v33  ;;  %v7142_v54 = vpop.permute.xlu0 %2255  ;;  %v8820_v19 = vld [vmem:[#allocation61_spill] sm:$0xff] }
 0x5c7   :  { %v7115_v16 = vmul.f32 %v3070_v18, %v8811_v43  ;;  %v2433_v18 = vmul.f32 %v7118_v51, %v1929_v50  ;;  %v8815_v50 = vld [vmem:[#allocation202_spill] sm:$0xff]  ;;  %v8816_v32 = vpack.c.bf16 %v6963_v1, %v6960_v52  ;;  %8817 = vst [vmem:[#allocation154_spill] sm:$0xff] %v7142_v54  ;;  %v7156_v52 = vpop.permute.xlu1 %2260 }
 0x5c8   :  { %v7124_v47 = vmul.f32 %v3071_v6, %v8811_v43  ;;  %v2757_v42 = vpop.f32.mrb[216].mxu1  ;;  %v8813_v6 = vld [vmem:[#allocation200_spill] sm:$0xff]  ;;  %8822 = vst [vmem:[#allocation155_spill] sm:$0xff] %v7156_v52 }
 0x5c9   :  { %v2944_v23 = vadd.f32 %v2757_v42, %v2431_v10  ;;  %v2759_v14 = vpop.f32.mrb[217].mxu1  ;;  %v1935_v7 = vadd.f32 %v8813_v6, %v6291_v30  ;;  %v8818_v6 = vld [vmem:[#allocation203_spill] sm:$0xff] }
 0x5ca   :  { %v2945_v39 = vadd.f32 %v2759_v14, %v2432_v25  ;;  %v2761_v13 = vpop.f32.mrb[218].mxu1  ;;  %v1939_v25 = vadd.f32 %v8815_v50, %v6291_v30 }
 0x5cb   :  { %v3072_v43 = vmax.f32 %v2944_v23, 0.0  ;;  %v2946_v58 = vadd.f32 %v2761_v13, %v2433_v18  ;;  %v2763_v46 = vpop.f32.mrb[219].mxu1  ;;  %v1941_v23 = vadd.f32 %v8818_v6, %v6293_v33  ;;  %v8819_v13 = vpack.c.bf16 %v7010_v63, %v7007_v45 }
 0x5cc   :  { %v3073_v10 = vmax.f32 %v2945_v39, 0.0  ;;  %v2947_v42 = vadd.f32 %v2763_v46, %v2434_v56  ;;  %v8821_v56 = vld [vmem:[#allocation60_spill] sm:$0xff]  ;;  %v2436_v45 = vmul.f32 %v7142_v54, %v1937_v35 }
 0x5cd   :  { %v3074_v14 = vmax.f32 %v2946_v58, 0.0  ;;  %3522 = vmatmul.mubr.bf16.gmra.mrb[68].mxu1 %v8816_v32  ;;  %v7150_v39 = vmul.f32 %v3072_v43, %v8820_v19  ;;  %v2435_v58 = vmul.f32 %v7142_v54, %v1935_v7  ;;  %v8824_v54 = vld [vmem:[#allocation205_spill] sm:$0xff] }
 0x5ce   :  { %v3075_v18 = vmax.f32 %v2947_v42, 0.0  ;;  %3529 = vmatprep.mubr.bf16.mxu1 %v8819_v13  ;;  %v7159_v1 = vmul.f32 %v3073_v10, %v8820_v19  ;;  %v2438_v13 = vmul.f32 %v7156_v52, %v1941_v23  ;;  %v1947_v63 = vadd.f32 %v8824_v54, %v6293_v33  ;;  %v7180_v10 = vpop.permute.xlu0 %2265  ;;  %v8830_v54 = vld [vmem:[#allocation63_spill] sm:$0xff] }
 0x5cf   :  { %v7153_v46 = vmul.f32 %v3074_v14, %v8821_v56  ;;  %v2437_v14 = vmul.f32 %v7156_v52, %v1939_v25  ;;  %v8825_v25 = vld [vmem:[#allocation206_spill] sm:$0xff]  ;;  %v8826_v23 = vpack.c.bf16 %v7001_v12, %v6998_v37  ;;  %8827 = vst [vmem:[#allocation34_spill] sm:$0xff] %v7180_v10  ;;  %v7194_v37 = vpop.permute.xlu1 %2270 }
 0x5d0   :  { %v7162_v50 = vmul.f32 %v3075_v18, %v8821_v56  ;;  %v2767_v42 = vpop.f32.mrb[220].mxu1  ;;  %v8823_v18 = vld [vmem:[#allocation204_spill] sm:$0xff]  ;;  %8832 = vst [vmem:[#allocation33_spill] sm:$0xff] %v7194_v37 }
 0x5d1   :  { %v2948_v43 = vadd.f32 %v2767_v42, %v2435_v58  ;;  %v2769_v32 = vpop.f32.mrb[221].mxu1  ;;  %v1945_v19 = vadd.f32 %v8823_v18, %v6291_v30  ;;  %v8828_v18 = vld [vmem:[#allocation207_spill] sm:$0xff] }
 0x5d2   :  { %v2949_v6 = vadd.f32 %v2769_v32, %v2436_v45  ;;  %v2771_v7 = vpop.f32.mrb[222].mxu1  ;;  %v1949_v45 = vadd.f32 %v8825_v25, %v6291_v30 }
 0x5d3   :  { %v3076_v56 = vmax.f32 %v2948_v43, 0.0  ;;  %v2950_v51 = vadd.f32 %v2771_v7, %v2437_v14  ;;  %v2773_v35 = vpop.f32.mrb[223].mxu1  ;;  %v1951_v43 = vadd.f32 %v8828_v18, %v6293_v33  ;;  %v8829_v7 = vpack.c.bf16 %v7048_v34, %v7045_v61 }
 0x5d4   :  { %v3077_v58 = vmax.f32 %v2949_v6, 0.0  ;;  %v2951_v42 = vadd.f32 %v2773_v35, %v2438_v13  ;;  %v8831_v13 = vld [vmem:[#allocation62_spill] sm:$0xff]  ;;  %v2440_v61 = vmul.f32 %v7180_v10, %v1947_v63 }
 0x5d5   :  { %v3078_v32 = vmax.f32 %v2950_v51, 0.0  ;;  %3530 = vmatmul.mubr.bf16.gmra.mrb[72].mxu1 %v8826_v23  ;;  %v7188_v6 = vmul.f32 %v3076_v56, %v8830_v54  ;;  %v2439_v51 = vmul.f32 %v7180_v10, %v1945_v19  ;;  %v8834_v10 = vld [vmem:[#allocation209_spill] sm:$0xff] }
 0x5d6   :  { %v3079_v14 = vmax.f32 %v2951_v42, 0.0  ;;  %3537 = vmatprep.mubr.bf16.mxu1 %v8829_v7  ;;  %v7197_v12 = vmul.f32 %v3077_v58, %v8830_v54  ;;  %v2442_v7 = vmul.f32 %v7194_v37, %v1951_v43  ;;  %v1957_v34 = vadd.f32 %v8834_v10, %v6293_v33  ;;  %v7218_v58 = vpop.permute.xlu0 %2275  ;;  %v8840_v10 = vld [vmem:[#allocation66_spill] sm:$0xff] }
 0x5d7   :  { %v7191_v35 = vmul.f32 %v3078_v32, %v8831_v13  ;;  %v2441_v32 = vmul.f32 %v7194_v37, %v1949_v45  ;;  %v8835_v45 = vld [vmem:[#allocation210_spill] sm:$0xff]  ;;  %v8836_v43 = vpack.c.bf16 %v7039_v27, %v7036_v5  ;;  %8837 = vst [vmem:[#allocation156_spill] sm:$0xff] %v7218_v58  ;;  %v7232_v5 = vpop.permute.xlu1 %2280 }
 0x5d8   :  { %v7200_v25 = vmul.f32 %v3079_v14, %v8831_v13  ;;  %v2777_v42 = vpop.f32.mrb[224].mxu1  ;;  %v8833_v14 = vld [vmem:[#allocation208_spill] sm:$0xff]  ;;  %8842 = vst [vmem:[#allocation157_spill] sm:$0xff] %v7232_v5 }
 0x5d9   :  { %v2952_v56 = vadd.f32 %v2777_v42, %v2439_v51  ;;  %v2779_v23 = vpop.f32.mrb[225].mxu1  ;;  %v1955_v54 = vadd.f32 %v8833_v14, %v6291_v30  ;;  %v8838_v14 = vld [vmem:[#allocation211_spill] sm:$0xff] }
 0x5da   :  { %v2953_v18 = vadd.f32 %v2779_v23, %v2440_v61  ;;  %v2781_v19 = vpop.f32.mrb[226].mxu1  ;;  %v1959_v61 = vadd.f32 %v8835_v45, %v6291_v30 }
 0x5db   :  { %v3080_v13 = vmax.f32 %v2952_v56, 0.0  ;;  %v2954_v52 = vadd.f32 %v2781_v19, %v2441_v32  ;;  %v2783_v63 = vpop.f32.mrb[227].mxu1  ;;  %v1961_v56 = vadd.f32 %v8838_v14, %v6293_v33  ;;  %v8839_v19 = vpack.c.bf16 %v7086_v11, %v7083_v36 }
 0x5dc   :  { %v3081_v51 = vmax.f32 %v2953_v18, 0.0  ;;  %v2955_v42 = vadd.f32 %v2783_v63, %v2442_v7  ;;  %v8841_v7 = vld [vmem:[#allocation65_spill] sm:$0xff]  ;;  %v2444_v36 = vmul.f32 %v7218_v58, %v1957_v34 }
 0x5dd   :  { %v3082_v23 = vmax.f32 %v2954_v52, 0.0  ;;  %3538 = vmatmul.mubr.bf16.gmra.mrb[76].mxu1 %v8836_v43  ;;  %v7226_v18 = vmul.f32 %v3080_v13, %v8840_v10  ;;  %v2443_v52 = vmul.f32 %v7218_v58, %v1955_v54  ;;  %v8844_v58 = vld [vmem:[#allocation213_spill] sm:$0xff] }
 0x5de   :  { %v3083_v32 = vmax.f32 %v2955_v42, 0.0  ;;  %3545 = vmatprep.mubr.bf16.mxu1 %v8839_v19  ;;  %v7235_v27 = vmul.f32 %v3081_v51, %v8840_v10  ;;  %v2446_v19 = vmul.f32 %v7232_v5, %v1961_v56  ;;  %v1967_v11 = vadd.f32 %v8844_v58, %v6293_v33  ;;  %v7256_v51 = vpop.permute.xlu0 %2285  ;;  %v8850_v58 = vld [vmem:[#allocation69_spill] sm:$0xff] }
 0x5df   :  { %v7229_v63 = vmul.f32 %v3082_v23, %v8841_v7  ;;  %v2445_v23 = vmul.f32 %v7232_v5, %v1959_v61  ;;  %v8845_v61 = vld [vmem:[#allocation214_spill] sm:$0xff]  ;;  %v8846_v56 = vpack.c.bf16 %v7077_v31, %v7074_v4  ;;  %8847 = vst [vmem:[#allocation158_spill] sm:$0xff] %v7256_v51  ;;  %v7270_v4 = vpop.permute.xlu1 %2290 }
 0x5e0   :  { %v7238_v45 = vmul.f32 %v3083_v32, %v8841_v7  ;;  %v2787_v42 = vpop.f32.mrb[228].mxu1  ;;  %v8843_v32 = vld [vmem:[#allocation212_spill] sm:$0xff]  ;;  %8852 = vst [vmem:[#allocation159_spill] sm:$0xff] %v7270_v4 }
 0x5e1   :  { %v2956_v13 = vadd.f32 %v2787_v42, %v2443_v52  ;;  %v2789_v43 = vpop.f32.mrb[229].mxu1  ;;  %v1965_v10 = vadd.f32 %v8843_v32, %v6291_v30  ;;  %v8848_v32 = vld [vmem:[#allocation215_spill] sm:$0xff] }
 0x5e2   :  { %v2957_v14 = vadd.f32 %v2789_v43, %v2444_v36  ;;  %v2791_v54 = vpop.f32.mrb[230].mxu1  ;;  %v1969_v36 = vadd.f32 %v8845_v61, %v6291_v30 }
 0x5e3   :  { %v3084_v7 = vmax.f32 %v2956_v13, 0.0  ;;  %v2958_v37 = vadd.f32 %v2791_v54, %v2445_v23  ;;  %v2793_v34 = vpop.f32.mrb[231].mxu1  ;;  %v1971_v13 = vadd.f32 %v8848_v32, %v6293_v33  ;;  %v8849_v54 = vpack.c.bf16 %v7124_v47, %v7121_v17 }
 0x5e4   :  { %v3085_v52 = vmax.f32 %v2957_v14, 0.0  ;;  %v2959_v42 = vadd.f32 %v2793_v34, %v2446_v19  ;;  %v8851_v19 = vld [vmem:[#allocation68_spill] sm:$0xff]  ;;  %v2448_v17 = vmul.f32 %v7256_v51, %v1967_v11 }
 0x5e5   :  { %v3086_v43 = vmax.f32 %v2958_v37, 0.0  ;;  %3546 = vmatmul.mubr.bf16.gmra.mrb[80].mxu1 %v8846_v56  ;;  %v7264_v14 = vmul.f32 %v3084_v7, %v8850_v58  ;;  %v2447_v37 = vmul.f32 %v7256_v51, %v1965_v10  ;;  %v8854_v51 = vld [vmem:[#allocation217_spill] sm:$0xff] }
 0x5e6   :  { %v3087_v23 = vmax.f32 %v2959_v42, 0.0  ;;  %3553 = vmatprep.mubr.bf16.mxu1 %v8849_v54  ;;  %v7273_v31 = vmul.f32 %v3085_v52, %v8850_v58  ;;  %v2450_v54 = vmul.f32 %v7270_v4, %v1971_v13  ;;  %v1977_v47 = vadd.f32 %v8854_v51, %v6293_v33  ;;  %v7294_v52 = vpop.permute.xlu0 %2295  ;;  %v8860_v51 = vld [vmem:[#allocation71_spill] sm:$0xff] }
 0x5e7   :  { %v7267_v34 = vmul.f32 %v3086_v43, %v8851_v19  ;;  %v2449_v43 = vmul.f32 %v7270_v4, %v1969_v36  ;;  %v8855_v36 = vld [vmem:[#allocation218_spill] sm:$0xff]  ;;  %v8856_v13 = vpack.c.bf16 %v7115_v16, %v7112_v40  ;;  %8857 = vst [vmem:[#allocation36_spill] sm:$0xff] %v7294_v52  ;;  %v7308_v40 = vpop.permute.xlu1 %2300 }
 0x5e8   :  { %v7276_v61 = vmul.f32 %v3087_v23, %v8851_v19  ;;  %v2797_v42 = vpop.f32.mrb[232].mxu1  ;;  %v8853_v23 = vld [vmem:[#allocation216_spill] sm:$0xff]  ;;  %8862 = vst [vmem:[#allocation35_spill] sm:$0xff] %v7308_v40 }
 0x5e9   :  { %v2960_v7 = vadd.f32 %v2797_v42, %v2447_v37  ;;  %v2799_v56 = vpop.f32.mrb[233].mxu1  ;;  %v1975_v58 = vadd.f32 %v8853_v23, %v6291_v30  ;;  %v8858_v23 = vld [vmem:[#allocation219_spill] sm:$0xff] }
 0x5ea   :  { %v2961_v32 = vadd.f32 %v2799_v56, %v2448_v17  ;;  %v2801_v10 = vpop.f32.mrb[234].mxu1  ;;  %v1979_v17 = vadd.f32 %v8855_v36, %v6291_v30 }
 0x5eb   :  { %v3088_v19 = vmax.f32 %v2960_v7, 0.0  ;;  %v2962_v5 = vadd.f32 %v2801_v10, %v2449_v43  ;;  %v2803_v11 = vpop.f32.mrb[235].mxu1  ;;  %v1981_v7 = vadd.f32 %v8858_v23, %v6293_v33  ;;  %v8859_v10 = vpack.c.bf16 %v7162_v50, %v7159_v1 }
 0x5ec   :  { %v3089_v37 = vmax.f32 %v2961_v32, 0.0  ;;  %v2963_v42 = vadd.f32 %v2803_v11, %v2450_v54  ;;  %v8861_v54 = vld [vmem:[#allocation70_spill] sm:$0xff]  ;;  %v2452_v1 = vmul.f32 %v7294_v52, %v1977_v47 }
 0x5ed   :  { %v3090_v56 = vmax.f32 %v2962_v5, 0.0  ;;  %3554 = vmatmul.mubr.bf16.gmra.mrb[84].mxu1 %v8856_v13  ;;  %v7302_v32 = vmul.f32 %v3088_v19, %v8860_v51  ;;  %v2451_v5 = vmul.f32 %v7294_v52, %v1975_v58  ;;  %v8864_v52 = vld [vmem:[#allocation221_spill] sm:$0xff] }
 0x5ee   :  { %v3091_v43 = vmax.f32 %v2963_v42, 0.0  ;;  %3561 = vmatprep.mubr.bf16.mxu1 %v8859_v10  ;;  %v7311_v16 = vmul.f32 %v3089_v37, %v8860_v51  ;;  %v2454_v10 = vmul.f32 %v7308_v40, %v1981_v7  ;;  %v1987_v50 = vadd.f32 %v8864_v52, %v6293_v33  ;;  %v7332_v37 = vpop.permute.xlu0 %2305  ;;  %v8870_v52 = vld [vmem:[#allocation73_spill] sm:$0xff] }
 0x5ef   :  { %v7305_v11 = vmul.f32 %v3090_v56, %v8861_v54  ;;  %v2453_v56 = vmul.f32 %v7308_v40, %v1979_v17  ;;  %v8865_v17 = vld [vmem:[#allocation222_spill] sm:$0xff]  ;;  %v8866_v7 = vpack.c.bf16 %v7153_v46, %v7150_v39  ;;  %8867 = vst [vmem:[#allocation160_spill] sm:$0xff] %v7332_v37  ;;  %v7346_v39 = vpop.permute.xlu1 %2310 }
 0x5f0   :  { %v7314_v36 = vmul.f32 %v3091_v43, %v8861_v54  ;;  %v2807_v42 = vpop.f32.mrb[236].mxu1  ;;  %v8863_v43 = vld [vmem:[#allocation220_spill] sm:$0xff]  ;;  %8872 = vst [vmem:[#allocation161_spill] sm:$0xff] %v7346_v39 }
 0x5f1   :  { %v2964_v19 = vadd.f32 %v2807_v42, %v2451_v5  ;;  %v2809_v13 = vpop.f32.mrb[237].mxu1  ;;  %v1985_v51 = vadd.f32 %v8863_v43, %v6291_v30  ;;  %v8868_v43 = vld [vmem:[#allocation223_spill] sm:$0xff] }
 0x5f2   :  { %v2965_v23 = vadd.f32 %v2809_v13, %v2452_v1  ;;  %v2811_v58 = vpop.f32.mrb[238].mxu1  ;;  %v1989_v1 = vadd.f32 %v8865_v17, %v6291_v30 }
 0x5f3   :  { %v3092_v54 = vmax.f32 %v2964_v19, 0.0  ;;  %v2966_v4 = vadd.f32 %v2811_v58, %v2453_v56  ;;  %v2813_v47 = vpop.f32.mrb[239].mxu1  ;;  %v1991_v19 = vadd.f32 %v8868_v43, %v6293_v33  ;;  %v8869_v58 = vpack.c.bf16 %v7200_v25, %v7197_v12 }
 0x5f4   :  { %v3093_v5 = vmax.f32 %v2965_v23, 0.0  ;;  %v2967_v42 = vadd.f32 %v2813_v47, %v2454_v10  ;;  %v8871_v10 = vld [vmem:[#allocation72_spill] sm:$0xff]  ;;  %v2456_v12 = vmul.f32 %v7332_v37, %v1987_v50 }
 0x5f5   :  { %v3094_v13 = vmax.f32 %v2966_v4, 0.0  ;;  %3562 = vmatmul.mubr.bf16.gmra.mrb[88].mxu1 %v8866_v7  ;;  %v7340_v23 = vmul.f32 %v3092_v54, %v8870_v52  ;;  %v2455_v4 = vmul.f32 %v7332_v37, %v1985_v51  ;;  %v8874_v37 = vld [vmem:[#allocation225_spill] sm:$0xff] }
 0x5f6   :  { %v3095_v56 = vmax.f32 %v2967_v42, 0.0  ;;  %3569 = vmatprep.mubr.bf16.mxu1 %v8869_v58  ;;  %v7349_v46 = vmul.f32 %v3093_v5, %v8870_v52  ;;  %v2458_v58 = vmul.f32 %v7346_v39, %v1991_v19  ;;  %v1997_v25 = vadd.f32 %v8874_v37, %v6293_v33  ;;  %v7370_v5 = vpop.permute.xlu0 %2315  ;;  %v8880_v37 = vld [vmem:[#allocation76_spill] sm:$0xff] }
 0x5f7   :  { %v7343_v47 = vmul.f32 %v3094_v13, %v8871_v10  ;;  %v2457_v13 = vmul.f32 %v7346_v39, %v1989_v1  ;;  %v8875_v1 = vld [vmem:[#allocation226_spill] sm:$0xff]  ;;  %v8876_v19 = vpack.c.bf16 %v7191_v35, %v7188_v6  ;;  %8877 = vst [vmem:[#allocation162_spill] sm:$0xff] %v7370_v5  ;;  %v7384_v6 = vpop.permute.xlu1 %2320 }
 0x5f8   :  { %v7352_v17 = vmul.f32 %v3095_v56, %v8871_v10  ;;  %v2817_v42 = vpop.f32.mrb[240].mxu1  ;;  %v8873_v56 = vld [vmem:[#allocation224_spill] sm:$0xff]  ;;  %8882 = vst [vmem:[#allocation163_spill] sm:$0xff] %v7384_v6 }
 0x5f9   :  { %v2968_v54 = vadd.f32 %v2817_v42, %v2455_v4  ;;  %v2819_v7 = vpop.f32.mrb[241].mxu1  ;;  %v1995_v52 = vadd.f32 %v8873_v56, %v6291_v30  ;;  %v8878_v56 = vld [vmem:[#allocation227_spill] sm:$0xff] }
 0x5fa   :  { %v2969_v43 = vadd.f32 %v2819_v7, %v2456_v12  ;;  %v2821_v51 = vpop.f32.mrb[242].mxu1  ;;  %v1999_v12 = vadd.f32 %v8875_v1, %v6291_v30 }
 0x5fb   :  { %v3096_v10 = vmax.f32 %v2968_v54, 0.0  ;;  %v2970_v40 = vadd.f32 %v2821_v51, %v2457_v13  ;;  %v2823_v50 = vpop.f32.mrb[243].mxu1  ;;  %v2001_v54 = vadd.f32 %v8878_v56, %v6293_v33  ;;  %v8879_v51 = vpack.c.bf16 %v7238_v45, %v7235_v27 }
 0x5fc   :  { %v3097_v4 = vmax.f32 %v2969_v43, 0.0  ;;  %v2971_v42 = vadd.f32 %v2823_v50, %v2458_v58  ;;  %v8881_v58 = vld [vmem:[#allocation75_spill] sm:$0xff]  ;;  %v2460_v27 = vmul.f32 %v7370_v5, %v1997_v25 }
 0x5fd   :  { %v3098_v7 = vmax.f32 %v2970_v40, 0.0  ;;  %3570 = vmatmul.mubr.bf16.gmra.mrb[92].mxu1 %v8876_v19  ;;  %v7378_v43 = vmul.f32 %v3096_v10, %v8880_v37  ;;  %v2459_v40 = vmul.f32 %v7370_v5, %v1995_v52  ;;  %v8884_v5 = vld [vmem:[#allocation229_spill] sm:$0xff] }
 0x5fe   :  { %v3099_v13 = vmax.f32 %v2971_v42, 0.0  ;;  %3577 = vmatprep.mubr.bf16.mxu1 %v8879_v51  ;;  %v7387_v35 = vmul.f32 %v3097_v4, %v8880_v37  ;;  %v2462_v51 = vmul.f32 %v7384_v6, %v2001_v54  ;;  %v2007_v45 = vadd.f32 %v8884_v5, %v6293_v33  ;;  %v7408_v4 = vpop.permute.xlu0 %2325  ;;  %v8890_v5 = vld [vmem:[#allocation79_spill] sm:$0xff] }
 0x5ff   :  { %v7381_v50 = vmul.f32 %v3098_v7, %v8881_v58  ;;  %v2461_v7 = vmul.f32 %v7384_v6, %v1999_v12  ;;  %v8885_v12 = vld [vmem:[#allocation230_spill] sm:$0xff]  ;;  %v8886_v54 = vpack.c.bf16 %v7229_v63, %v7226_v18  ;;  %8887 = vst [vmem:[#allocation38_spill] sm:$0xff] %v7408_v4  ;;  %v7422_v18 = vpop.permute.xlu1 %2330 }
 0x600   :  { %v7390_v1 = vmul.f32 %v3099_v13, %v8881_v58  ;;  %v2827_v42 = vpop.f32.mrb[244].mxu1  ;;  %v8883_v13 = vld [vmem:[#allocation228_spill] sm:$0xff]  ;;  %8892 = vst [vmem:[#allocation37_spill] sm:$0xff] %v7422_v18 }
 0x601   :  { %v2972_v10 = vadd.f32 %v2827_v42, %v2459_v40  ;;  %v2829_v19 = vpop.f32.mrb[245].mxu1  ;;  %v2005_v37 = vadd.f32 %v8883_v13, %v6291_v30  ;;  %v8888_v13 = vld [vmem:[#allocation231_spill] sm:$0xff] }
 0x602   :  { %v2973_v56 = vadd.f32 %v2829_v19, %v2460_v27  ;;  %v2831_v52 = vpop.f32.mrb[246].mxu1  ;;  %v2009_v27 = vadd.f32 %v8885_v12, %v6291_v30 }
 0x603   :  { %v3100_v58 = vmax.f32 %v2972_v10, 0.0  ;;  %v2974_v39 = vadd.f32 %v2831_v52, %v2461_v7  ;;  %v2833_v25 = vpop.f32.mrb[247].mxu1  ;;  %v2011_v10 = vadd.f32 %v8888_v13, %v6293_v33  ;;  %v8889_v52 = vpack.c.bf16 %v7276_v61, %v7273_v31 }
 0x604   :  { %v3101_v40 = vmax.f32 %v2973_v56, 0.0  ;;  %v2975_v42 = vadd.f32 %v2833_v25, %v2462_v51  ;;  %v8891_v51 = vld [vmem:[#allocation78_spill] sm:$0xff]  ;;  %v2464_v31 = vmul.f32 %v7408_v4, %v2007_v45 }
 0x605   :  { %v3102_v19 = vmax.f32 %v2974_v39, 0.0  ;;  %3578 = vmatmul.mubr.bf16.gmra.mrb[96].mxu1 %v8886_v54  ;;  %v7416_v56 = vmul.f32 %v3100_v58, %v8890_v5  ;;  %v2463_v39 = vmul.f32 %v7408_v4, %v2005_v37  ;;  %v8894_v4 = vld [vmem:[#allocation233_spill] sm:$0xff] }
 0x606   :  { %v3103_v7 = vmax.f32 %v2975_v42, 0.0  ;;  %3585 = vmatprep.mubr.bf16.mxu1 %v8889_v52  ;;  %v7425_v63 = vmul.f32 %v3101_v40, %v8890_v5  ;;  %v2466_v52 = vmul.f32 %v7422_v18, %v2011_v10  ;;  %v2017_v61 = vadd.f32 %v8894_v4, %v6293_v33  ;;  %v7446_v40 = vpop.permute.xlu0 %2335  ;;  %v8899_v4 = vld [vmem:[#allocation81_spill] sm:$0xff] }
 0x607   :  { %v7419_v25 = vmul.f32 %v3102_v19, %v8891_v51  ;;  %v2465_v19 = vmul.f32 %v7422_v18, %v2009_v27  ;;  %v8895_v27 = vld [vmem:[#allocation234_spill] sm:$0xff]  ;;  %v8896_v10 = vpack.c.bf16 %v7267_v34, %v7264_v14  ;;  %v7460_v14 = vpop.permute.xlu1 %2340 }
 0x608   :  { %v7428_v12 = vmul.f32 %v3103_v7, %v8891_v51  ;;  %v2837_v42 = vpop.f32.mrb[248].mxu1  ;;  %v8893_v7 = vld [vmem:[#allocation232_spill] sm:$0xff] }
 0x609   :  { %v2976_v58 = vadd.f32 %v2837_v42, %v2463_v39  ;;  %v2839_v54 = vpop.f32.mrb[249].mxu1  ;;  %v2015_v5 = vadd.f32 %v8893_v7, %v6291_v30  ;;  %v8897_v7 = vld [vmem:[#allocation235_spill] sm:$0xff] }
 0x60a   :  { %v2977_v13 = vadd.f32 %v2839_v54, %v2464_v31  ;;  %v2841_v37 = vpop.f32.mrb[250].mxu1  ;;  %v2019_v31 = vadd.f32 %v8895_v27, %v6291_v30 }
 0x60b   :  { %v3104_v51 = vmax.f32 %v2976_v58, 0.0  ;;  %v2978_v6 = vadd.f32 %v2841_v37, %v2465_v19  ;;  %v2843_v45 = vpop.f32.mrb[251].mxu1  ;;  %v2021_v58 = vadd.f32 %v8897_v7, %v6293_v33  ;;  %v8898_v37 = vpack.c.bf16 %v7314_v36, %v7311_v16 }
 0x60c   :  { %v3105_v39 = vmax.f32 %v2977_v13, 0.0  ;;  %v2979_v42 = vadd.f32 %v2843_v45, %v2466_v52  ;;  %v8900_v52 = vld [vmem:[#allocation80_spill] sm:$0xff]  ;;  %v2469_v27 = vmul.f32 %v7460_v14, %v2019_v31 }
 0x60d   :  { %v3106_v54 = vmax.f32 %v2978_v6, 0.0  ;;  %3586 = vmatmul.mubr.bf16.gmra.mrb[100].mxu1 %v8896_v10  ;;  %v7454_v13 = vmul.f32 %v3104_v51, %v8899_v4  ;;  %v2467_v6 = vmul.f32 %v7446_v40, %v2015_v5  ;;  %v2470_v5 = vmul.f32 %v7460_v14, %v2021_v58  ;;  %v8903_v31 = vld [vmem:[#allocation84_spill] sm:$0xff] }
 0x60e   :  { %v3107_v19 = vmax.f32 %v2979_v42, 0.0  ;;  %3593 = vmatprep.mubr.bf16.mxu1 %v8898_v37  ;;  %v3282_v34 = vmul.f32 %v3105_v39, %v8899_v4  ;;  %v2468_v42 = vmul.f32 %v7446_v40, %v2017_v61  ;;  %v8901_v61 = vpack.c.bf16 %v7305_v11, %v7302_v32 }
 0x60f   :  { %v7457_v30 = vmul.f32 %v3106_v54, %v8900_v52 }
 0x610   :  { %v3284_v45 = vmul.f32 %v3107_v19, %v8900_v52  ;;  %v2847_v33 = vpop.f32.mrb[252].mxu1 }
 0x611   :  { %v3349_v16 = vpack.c.bf16 %v7457_v30, %v7454_v13  ;;  %v2980_v36 = vadd.f32 %v2847_v33, %v2467_v6  ;;  %v2849_v51 = vpop.f32.mrb[253].mxu1  ;;  %v8902_v30 = vpack.c.bf16 %v7352_v17, %v7349_v46  ;;  %v8904_v33 = vld [vmem:[#allocation83_spill] sm:$0xff]  ;;  %v8906_v46 = vpack.c.bf16 %v7390_v1, %v7387_v35 }
 0x612   :  { %v2981_v54 = vadd.f32 %v2849_v51, %v2468_v42  ;;  %v2851_v10 = vpop.f32.mrb[254].mxu1  ;;  %v3350_v7 = vpack.c.bf16 %v3284_v45, %v3282_v34 }
 0x613   :  { %v3108_v37 = vmax.f32 %v2980_v36, 0.0  ;;  %v2982_v18 = vadd.f32 %v2851_v10, %v2469_v27  ;;  %v2853_v39 = vpop.f32.mrb[255].mxu1 }
 0x614   :  { %v3109_v4 = vmax.f32 %v2981_v54, 0.0  ;;  %v2983_v19 = vadd.f32 %v2853_v39, %v2470_v5  ;;  %v8905_v54 = vpack.c.bf16 %v7343_v47, %v7340_v23  ;;  %v8908_v23 = vpack.c.bf16 %v7428_v12, %v7425_v63 }
 0x615   :  { %v3110_v52 = vmax.f32 %v2982_v18, 0.0  ;;  %3594 = vmatmul.mubr.bf16.gmra.mrb[104].mxu1 %v8901_v61  ;;  %v3285_v6 = vmul.f32 %v3108_v37, %v8903_v31  ;;  %v8909_v61 = vpack.c.bf16 %v7419_v25, %v7416_v56 }
 0x616   :  { %v3111_v13 = vmax.f32 %v2983_v19, 0.0  ;;  %3601 = vmatprep.mubr.bf16.mxu1 %v8902_v30  ;;  %v3286_v34 = vmul.f32 %v3109_v4, %v8903_v31  ;;  %v8907_v4 = vpack.c.bf16 %v7381_v50, %v7378_v43 }
 0x617   :  { %v3287_v58 = vmul.f32 %v3110_v52, %v8904_v33 }
 0x618   :  { %v3288_v45 = vmul.f32 %v3111_v13, %v8904_v33  ;;  %v3387_v42 = vpop.f32.mrb[0].mxu1 }
 0x619   :  { %v3351_v36 = vpack.c.bf16 %v3287_v58, %v3285_v6  ;;  %v3389_v18 = vpop.f32.mrb[1].mxu1 }
 0x61a   :  { %v3390_v51 = vpop.f32.mrb[2].mxu1  ;;  %v3352_v27 = vpack.c.bf16 %v3288_v45, %v3286_v34 }
 0x61b   :  { %v3642_v32 = vpack.c.bf16 %v3390_v51, %v3387_v42  ;;  %v3392_v11 = vpop.f32.mrb[3].mxu1 }
 0x61d   :  { %3602 = vmatmul.mubr.bf16.gmra.mrb[108].mxu1 %v8905_v54  ;;  %3681 = vmatpush1.bf16.msra.mxu0 %v3642_v32 }
 0x61e   :  { %4424 = vmatpush1.bf16.msra.mxu1 %v3642_v32  ;;  %3609 = vmatprep.mubr.bf16.mxu1 %v8906_v46 }
 0x61f   :  { %3682 = vmatprep.subr.bf16.mxu0 %v8498_v48  ;;  %4409 = vmatprep.subr.bf16.mxu1 %v8498_v48 }
 0x620   :  { %v3395_v17 = vpop.f32.mrb[4].mxu1 }
 0x621   :  { %v3397_v10 = vpop.f32.mrb[5].mxu1 }
 0x622   :  { %v3398_v5 = vpop.f32.mrb[6].mxu1 }
 0x623   :  { %v3643_v37 = vpack.c.bf16 %v3398_v5, %v3395_v17  ;;  %v3400_v39 = vpop.f32.mrb[7].mxu1 }
 0x625   :  { %3610 = vmatmul.mubr.bf16.gmra.mrb[112].mxu1 %v8907_v4  ;;  %3683 = vmatpush1.bf16.msra.mxu0 %v3643_v37 }
 0x626   :  { %4425 = vmatpush1.bf16.msra.mxu1 %v3643_v37  ;;  %3617 = vmatprep.mubr.bf16.mxu1 %v8908_v23 }
 0x627   :  { %3684 = vmatprep.subr.bf16.mxu0 %v8498_v48  ;;  %4410 = vmatprep.subr.bf16.mxu1 %v8498_v48 }
 0x628   :  { %v3403_v47 = vpop.f32.mrb[8].mxu1 }
 0x629   :  { %v3405_v35 = vpop.f32.mrb[9].mxu1 }
 0x62a   :  { %v3406_v1 = vpop.f32.mrb[10].mxu1 }
 0x62b   :  { %v3644_v19 = vpack.c.bf16 %v3406_v1, %v3403_v47  ;;  %v3408_v52 = vpop.f32.mrb[11].mxu1 }
 0x62d   :  { %3618 = vmatmul.mubr.bf16.gmra.mrb[116].mxu1 %v8909_v61  ;;  %3685 = vmatpush1.bf16.msra.mxu0 %v3644_v19 }
 0x62e   :  { %4426 = vmatpush1.bf16.msra.mxu1 %v3644_v19  ;;  %3625 = vmatprep.mubr.bf16.mxu1 %v3350_v7 }
 0x62f   :  { %3686 = vmatprep.subr.bf16.mxu0 %v8498_v48  ;;  %4411 = vmatprep.subr.bf16.mxu1 %v8498_v48 }
 0x630   :  { %v3411_v43 = vpop.f32.mrb[12].mxu1 }
 0x631   :  { %v3413_v50 = vpop.f32.mrb[13].mxu1 }
 0x632   :  { %v3414_v63 = vpop.f32.mrb[14].mxu1 }
 0x633   :  { %v3645_v12 = vpack.c.bf16 %v3414_v63, %v3411_v43  ;;  %v3416_v13 = vpop.f32.mrb[15].mxu1 }
 0x635   :  { %3626 = vmatmul.mubr.bf16.gmra.mrb[120].mxu1 %v3349_v16  ;;  %3687 = vmatpush1.bf16.msra.mxu0 %v3645_v12  ;;  %v8910_v16 = vld [vmem:[#allocation90_spill] sm:$0xff] }
 0x636   :  { %4427 = vmatpush1.bf16.msra.mxu1 %v3645_v12  ;;  %3633 = vmatprep.mubr.bf16.mxu1 %v3352_v27  ;;  %v8911_v6 = vunpack.c.l.s8.bf16 %v8910_v16 }
 0x637   :  { %3688 = vmatprep.subr.bf16.mxu0 %v8498_v48  ;;  %4412 = vmatprep.subr.bf16.mxu1 %v8498_v48 }
 0x638   :  { %v3419_v56 = vpop.f32.mrb[16].mxu1 }
 0x639   :  { %v3421_v25 = vpop.f32.mrb[17].mxu1 }
 0x63a   :  { %v3422_v7 = vpop.f32.mrb[18].mxu1 }
 0x63b   :  { %v3646_v30 = vpack.c.bf16 %v3422_v7, %v3419_v56  ;;  %v3424_v31 = vpop.f32.mrb[19].mxu1 }
 0x63d   :  { %3634 = vmatmul.mubr.bf16.gmra.mrb[124].mxu1 %v3351_v36  ;;  %3689 = vmatpush1.bf16.msra.mxu0 %v3646_v30 }
 0x63e   :  { %4428 = vmatpush1.bf16.msra.mxu1 %v3646_v30  ;;  %3690 = vmatprep.subr.bf16.mxu0 %v8498_v48 }
 0x63f   :  { %4413 = vmatprep.subr.bf16.mxu1 %v8498_v48  ;;  %3824 = vmatprep.mubr.bf16.mxu1 %v8911_v6 }
 0x640   :  { %v3427_v33 = vpop.f32.mrb[20].mxu1 }
 0x641   :  { %v3429_v58 = vpop.f32.mrb[21].mxu1 }
 0x642   :  { %v3430_v34 = vpop.f32.mrb[22].mxu1 }
 0x643   :  { %v3647_v45 = vpack.c.bf16 %v3430_v34, %v3427_v33  ;;  %v3432_v42 = vpop.f32.mrb[23].mxu1 }
 0x645   :  { %3691 = vmatpush1.bf16.msra.mxu0 %v3647_v45  ;;  %4429 = vmatpush1.bf16.msra.mxu1 %v3647_v45 }
 0x646   :  { %3692 = vmatprep.subr.bf16.mxu0 %v8498_v48  ;;  %4414 = vmatprep.subr.bf16.mxu1 %v8498_v48 }
 0x648   :  { %v3435_v36 = vpop.f32.mrb[24].mxu1 }
 0x649   :  { %v3437_v18 = vpop.f32.mrb[25].mxu1 }
 0x64a   :  { %v3438_v51 = vpop.f32.mrb[26].mxu1 }
 0x64b   :  { %v3648_v27 = vpack.c.bf16 %v3438_v51, %v3435_v36  ;;  %v3440_v32 = vpop.f32.mrb[27].mxu1 }
 0x64d   :  { %3693 = vmatpush1.bf16.msra.mxu0 %v3648_v27  ;;  %4430 = vmatpush1.bf16.msra.mxu1 %v3648_v27 }
 0x64e   :  { %3694 = vmatprep.subr.bf16.mxu0 %v8498_v48  ;;  %4415 = vmatprep.subr.bf16.mxu1 %v8498_v48 }
 0x650   :  { %v3443_v11 = vpop.f32.mrb[28].mxu1 }
 0x651   :  { %v3445_v54 = vpop.f32.mrb[29].mxu1 }
 0x652   :  { %v3446_v46 = vpop.f32.mrb[30].mxu1 }
 0x653   :  { %v3649_v17 = vpack.c.bf16 %v3446_v46, %v3443_v11  ;;  %v3448_v10 = vpop.f32.mrb[31].mxu1 }
 0x655   :  { %3695 = vmatpush1.bf16.msra.mxu0 %v3649_v17  ;;  %4431 = vmatpush1.bf16.msra.mxu1 %v3649_v17 }
 0x656   :  { %3696 = vmatprep.subr.bf16.mxu0 %v8498_v48  ;;  %4416 = vmatprep.subr.bf16.mxu1 %v8498_v48 }
 0x658   :  { %v3451_v5 = vpop.f32.mrb[32].mxu1 }
 0x659   :  { %v3453_v37 = vpop.f32.mrb[33].mxu1 }
 0x65a   :  { %v3454_v39 = vpop.f32.mrb[34].mxu1 }
 0x65b   :  { %v3650_v4 = vpack.c.bf16 %v3454_v39, %v3451_v5  ;;  %v3456_v23 = vpop.f32.mrb[35].mxu1 }
 0x65c   :  { %v8912_v23 = vld [vmem:[#allocation47_spill] sm:$0xff] }
 0x65d   :  { %3697 = vmatpush1.bf16.msra.mxu0 %v3650_v4  ;;  %4432 = vmatpush1.bf16.msra.mxu1 %v3650_v4 }
 0x65e   :  { %3698 = vmatprep.subr.bf16.mxu0 %v8498_v48  ;;  %4417 = vmatprep.subr.bf16.mxu1 %v8498_v48 }
 0x660   :  { %v3459_v47 = vpop.f32.mrb[36].mxu1 }
 0x661   :  { %v3461_v35 = vpop.f32.mrb[37].mxu1 }
 0x662   :  { %v3462_v1 = vpop.f32.mrb[38].mxu1  ;;  %v8914_v35 = vld [vmem:[#allocation91_spill] sm:$0xff] }
 0x663   :  { %v3651_v19 = vpack.c.bf16 %v3462_v1, %v3459_v47  ;;  %v3464_v52 = vpop.f32.mrb[39].mxu1  ;;  %v8913_v47 = vunpack.c.l.s8.bf16 %v8912_v23  ;;  %v8915_v1 = vunpack.c.l.s8.bf16 %v8914_v35 }
 0x664   :  { %v8916_v52 = vld [vmem:[#allocation24_spill] sm:$0xff] }
 0x665   :  { %3699 = vmatpush1.bf16.msra.mxu0 %v3651_v19  ;;  %4433 = vmatpush1.bf16.msra.mxu1 %v3651_v19 }
 0x666   :  { %3700 = vmatprep.subr.bf16.mxu0 %v8498_v48  ;;  %4418 = vmatprep.subr.bf16.mxu1 %v8498_v48 }
 0x668   :  { %v3467_v61 = vpop.f32.mrb[40].mxu1 }
 0x669   :  { %v3469_v43 = vpop.f32.mrb[41].mxu1 }
 0x66a   :  { %v3470_v50 = vpop.f32.mrb[42].mxu1  ;;  %v8918_v43 = vunpack.c.h.s8.bf16 %v8910_v16 }
 0x66b   :  { %v3652_v63 = vpack.c.bf16 %v3470_v50, %v3467_v61  ;;  %v3472_v12 = vpop.f32.mrb[43].mxu1  ;;  %v8917_v61 = vunpack.c.h.s8.bf16 %v8916_v52 }
 0x66d   :  { %3701 = vmatpush1.bf16.msra.mxu0 %v3652_v63  ;;  %4434 = vmatpush1.bf16.msra.mxu1 %v3652_v63 }
 0x66e   :  { %3702 = vmatprep.subr.bf16.mxu0 %v8498_v48  ;;  %4419 = vmatprep.subr.bf16.mxu1 %v8498_v48 }
 0x670   :  { %v3475_v13 = vpop.f32.mrb[44].mxu1 }
 0x671   :  { %v3477_v56 = vpop.f32.mrb[45].mxu1 }
 0x672   :  { %v3478_v25 = vpop.f32.mrb[46].mxu1  ;;  %v8919_v56 = vunpack.c.h.s8.bf16 %v8912_v23 }
 0x673   :  { %v3653_v7 = vpack.c.bf16 %v3478_v25, %v3475_v13  ;;  %v3480_v30 = vpop.f32.mrb[47].mxu1  ;;  %v8920_v25 = vunpack.c.h.s8.bf16 %v8914_v35 }
 0x674   :  { %v8921_v30 = vld [vmem:[#allocation54_spill] sm:$0xff] }
 0x675   :  { %3703 = vmatpush1.bf16.msra.mxu0 %v3653_v7  ;;  %4435 = vmatpush1.bf16.msra.mxu1 %v3653_v7 }
 0x676   :  { %3704 = vmatprep.subr.bf16.mxu0 %v8498_v48  ;;  %4420 = vmatprep.subr.bf16.mxu1 %v8498_v48 }
 0x678   :  { %v3483_v31 = vpop.f32.mrb[48].mxu1 }
 0x679   :  { %v3485_v6 = vpop.f32.mrb[49].mxu1 }
 0x67a   :  { %v3486_v33 = vpop.f32.mrb[50].mxu1  ;;  %v8923_v6 = vld [vmem:[#allocation92_spill] sm:$0xff] }
 0x67b   :  { %v3654_v58 = vpack.c.bf16 %v3486_v33, %v3483_v31  ;;  %v3488_v34 = vpop.f32.mrb[51].mxu1  ;;  %v8922_v31 = vunpack.c.l.s8.bf16 %v8921_v30  ;;  %v8924_v16 = vunpack.c.l.s8.bf16 %v8923_v6 }
 0x67d   :  { %3705 = vmatpush1.bf16.msra.mxu0 %v3654_v58  ;;  %4436 = vmatpush1.bf16.msra.mxu1 %v3654_v58 }
 0x67e   :  { %3706 = vmatprep.subr.bf16.mxu0 %v8498_v48  ;;  %4421 = vmatprep.subr.bf16.mxu1 %v8498_v48 }
 0x680   :  { %v3491_v45 = vpop.f32.mrb[52].mxu1 }
 0x681   :  { %v3493_v42 = vpop.f32.mrb[53].mxu1 }
 0x682   :  { %v3494_v36 = vpop.f32.mrb[54].mxu1  ;;  %v8925_v42 = vld [vmem:[#allocation57_spill] sm:$0xff] }
 0x683   :  { %v3655_v18 = vpack.c.bf16 %v3494_v36, %v3491_v45  ;;  %v3496_v51 = vpop.f32.mrb[55].mxu1  ;;  %v8926_v36 = vunpack.c.l.s8.bf16 %v8925_v42 }
 0x685   :  { %3707 = vmatpush1.bf16.msra.mxu0 %v3655_v18  ;;  %4437 = vmatpush1.bf16.msra.mxu1 %v3655_v18  ;;  %v8927_v18 = vld [vmem:[#allocation93_spill] sm:$0xff] }
 0x686   :  { %3708 = vmatprep.subr.bf16.mxu0 %v8498_v48  ;;  %4422 = vmatprep.subr.bf16.mxu1 %v8498_v48  ;;  %v8928_v51 = vunpack.c.l.s8.bf16 %v8927_v18 }
 0x688   :  { %v3499_v27 = vpop.f32.mrb[56].mxu1 }
 0x689   :  { %v3501_v32 = vpop.f32.mrb[57].mxu1 }
 0x68a   :  { %v3502_v11 = vpop.f32.mrb[58].mxu1  ;;  %v8929_v32 = vunpack.c.h.s8.bf16 %v8921_v30 }
 0x68b   :  { %v3656_v54 = vpack.c.bf16 %v3502_v11, %v3499_v27  ;;  %v3504_v46 = vpop.f32.mrb[59].mxu1  ;;  %v8930_v11 = vunpack.c.h.s8.bf16 %v8923_v6 }
 0x68d   :  { %3709 = vmatpush1.bf16.msra.mxu0 %v3656_v54  ;;  %4438 = vmatpush1.bf16.msra.mxu1 %v3656_v54 }
 0x68e   :  { %3710 = vmatprep.subr.bf16.mxu0 %v8498_v48  ;;  %4423 = vmatprep.subr.bf16.mxu1 %v8498_v48 }
 0x690   :  { %v3507_v17 = vpop.f32.mrb[60].mxu1 }
 0x691   :  { %v3509_v10 = vpop.f32.mrb[61].mxu1 }
 0x692   :  { %v3510_v5 = vpop.f32.mrb[62].mxu1 }
 0x693   :  { %v3657_v37 = vpack.c.bf16 %v3510_v5, %v3507_v17  ;;  %v3512_v39 = vpop.f32.mrb[63].mxu1  ;;  %v8931_v5 = vunpack.c.h.s8.bf16 %v8925_v42  ;;  %v8947_v42 = vld [vmem:[#allocation96_spill] sm:$0xff] }
 0x695   :  { %3711 = vmatpush1.bf16.msra.mxu0 %v3657_v37  ;;  %4439 = vmatpush1.bf16.msra.mxu1 %v3657_v37  ;;  %v8932_v37 = vunpack.c.h.s8.bf16 %v8927_v18 }
 0x696   :  { %3969 = vmatprep.subr.bf16.mxu0 %v8498_v48 }
 0x698   :  { %v3515_v4 = vpop.f32.mrb[64].mxu1  ;;  %3713 = vmatmul.mubr.bf16.vlgmr.msra.gmra.mrb[128].mxu0 %v8913_v47  ;;  %3825 = vmatmul.mubr.bf16.vlgmr.msra.gmra.mrb[128].mxu1 %v8915_v1  ;;  %v8935_v47 = vld [vmem:[#allocation94_spill] sm:$0xff] }
 0x699   :  { %v3517_v19 = vpop.f32.mrb[65].mxu1  ;;  %3720 = vmatprep.mubr.bf16.mxu0 %v8917_v61  ;;  %3832 = vmatprep.mubr.bf16.mxu1 %v8918_v43  ;;  %v8936_v35 = vunpack.c.l.s8.bf16 %v8935_v47  ;;  %v8937_v43 = vld [vmem:[#allocation67_spill] sm:$0xff] }
 0x69a   :  { %v3518_v50 = vpop.f32.mrb[66].mxu1 }
 0x69b   :  { %v3658_v63 = vpack.c.bf16 %v3518_v50, %v3515_v4  ;;  %v3520_v12 = vpop.f32.mrb[67].mxu1  ;;  %v8933_v4 = vld [vmem:[#allocation64_spill] sm:$0xff]  ;;  %v8938_v50 = vunpack.c.l.s8.bf16 %v8937_v43 }
 0x69c   :  { %v8934_v23 = vunpack.c.l.s8.bf16 %v8933_v4 }
 0x69d   :  { %3970 = vmatpush1.bf16.msra.mxu0 %v3658_v63  ;;  %v8939_v63 = vld [vmem:[#allocation95_spill] sm:$0xff] }
 0x69e   :  { %3971 = vmatprep.subr.bf16.mxu0 %v8498_v48  ;;  %v8940_v12 = vunpack.c.l.s8.bf16 %v8939_v63 }
 0x6a0   :  { %v3523_v13 = vpop.f32.mrb[68].mxu1  ;;  %3721 = vmatmul.mubr.bf16.gmra.mrb[132].mxu0 %v8919_v56  ;;  %3833 = vmatmul.mubr.bf16.gmra.mrb[132].mxu1 %v8920_v25  ;;  %v8941_v56 = vunpack.c.h.s8.bf16 %v8933_v4  ;;  %v8942_v25 = vunpack.c.h.s8.bf16 %v8935_v47 }
 0x6a1   :  { %v3525_v7 = vpop.f32.mrb[69].mxu1  ;;  %3728 = vmatprep.mubr.bf16.mxu0 %v8922_v31  ;;  %3840 = vmatprep.mubr.bf16.mxu1 %v8924_v16  ;;  %v8943_v16 = vunpack.c.h.s8.bf16 %v8937_v43  ;;  %v8959_v43 = vld [vmem:[#allocation98_spill] sm:$0xff] }
 0x6a2   :  { %v3526_v33 = vpop.f32.mrb[70].mxu1 }
 0x6a3   :  { %v3659_v58 = vpack.c.bf16 %v3526_v33, %v3523_v13  ;;  %v3528_v34 = vpop.f32.mrb[71].mxu1  ;;  %v8944_v33 = vunpack.c.h.s8.bf16 %v8939_v63 }
 0x6a4   :  { %v8945_v34 = vld [vmem:[#allocation74_spill] sm:$0xff] }
 0x6a5   :  { %3972 = vmatpush1.bf16.msra.mxu0 %v3659_v58 }
 0x6a6   :  { %3973 = vmatprep.subr.bf16.mxu0 %v8498_v48 }
 0x6a8   :  { %v3531_v45 = vpop.f32.mrb[72].mxu1  ;;  %3729 = vmatmul.mubr.bf16.gmra.mrb[136].mxu0 %v8926_v36  ;;  %3841 = vmatmul.mubr.bf16.gmra.mrb[136].mxu1 %v8928_v51  ;;  %v8948_v36 = vunpack.c.l.s8.bf16 %v8947_v42 }
 0x6a9   :  { %v3533_v27 = vpop.f32.mrb[73].mxu1  ;;  %3736 = vmatprep.mubr.bf16.mxu0 %v8929_v32  ;;  %3848 = vmatprep.mubr.bf16.mxu1 %v8930_v11  ;;  %v8949_v11 = vld [vmem:[#allocation77_spill] sm:$0xff] }
 0x6aa   :  { %v3534_v54 = vpop.f32.mrb[74].mxu1 }
 0x6ab   :  { %v3660_v46 = vpack.c.bf16 %v3534_v54, %v3531_v45  ;;  %v3536_v17 = vpop.f32.mrb[75].mxu1  ;;  %v8946_v45 = vunpack.c.l.s8.bf16 %v8945_v34  ;;  %v8950_v54 = vunpack.c.l.s8.bf16 %v8949_v11 }
 0x6ad   :  { %3974 = vmatpush1.bf16.msra.mxu0 %v3660_v46  ;;  %v8951_v46 = vld [vmem:[#allocation97_spill] sm:$0xff] }
 0x6ae   :  { %3975 = vmatprep.subr.bf16.mxu0 %v8498_v48  ;;  %v8952_v17 = vunpack.c.l.s8.bf16 %v8951_v46 }
 0x6b0   :  { %v3539_v10 = vpop.f32.mrb[76].mxu1  ;;  %3737 = vmatmul.mubr.bf16.gmra.mrb[140].mxu0 %v8931_v5  ;;  %3849 = vmatmul.mubr.bf16.gmra.mrb[140].mxu1 %v8932_v37  ;;  %v8953_v5 = vunpack.c.h.s8.bf16 %v8945_v34  ;;  %v8954_v37 = vunpack.c.h.s8.bf16 %v8947_v42 }
 0x6b1   :  { %v3541_v39 = vpop.f32.mrb[77].mxu1  ;;  %3744 = vmatprep.mubr.bf16.mxu0 %v8934_v23  ;;  %3856 = vmatprep.mubr.bf16.mxu1 %v8936_v35  ;;  %v8955_v35 = vunpack.c.h.s8.bf16 %v8949_v11  ;;  %v8971_v11 = vld [vmem:[#allocation100_spill] sm:$0xff] }
 0x6b2   :  { %v3542_v1 = vpop.f32.mrb[78].mxu1 }
 0x6b3   :  { %v3661_v19 = vpack.c.bf16 %v3542_v1, %v3539_v10  ;;  %v3544_v52 = vpop.f32.mrb[79].mxu1  ;;  %v8956_v1 = vunpack.c.h.s8.bf16 %v8951_v46 }
 0x6b4   :  { %v8957_v52 = vld [vmem:[#allocation82_spill] sm:$0xff] }
 0x6b5   :  { %3976 = vmatpush1.bf16.msra.mxu0 %v3661_v19 }
 0x6b6   :  { %3977 = vmatprep.subr.bf16.mxu0 %v8498_v48 }
 0x6b8   :  { %v3547_v61 = vpop.f32.mrb[80].mxu1  ;;  %3745 = vmatmul.mubr.bf16.gmra.mrb[144].mxu0 %v8938_v50  ;;  %3857 = vmatmul.mubr.bf16.gmra.mrb[144].mxu1 %v8940_v12  ;;  %v8960_v50 = vunpack.c.l.s8.bf16 %v8959_v43 }
 0x6b9   :  { %v3549_v13 = vpop.f32.mrb[81].mxu1  ;;  %3752 = vmatprep.mubr.bf16.mxu0 %v8941_v56  ;;  %3864 = vmatprep.mubr.bf16.mxu1 %v8942_v25  ;;  %v8961_v25 = vld [vmem:[#allocation85_spill] sm:$0xff] }
 0x6ba   :  { %v3550_v7 = vpop.f32.mrb[82].mxu1 }
 0x6bb   :  { %v3662_v30 = vpack.c.bf16 %v3550_v7, %v3547_v61  ;;  %v3552_v31 = vpop.f32.mrb[83].mxu1  ;;  %v8958_v61 = vunpack.c.l.s8.bf16 %v8957_v52  ;;  %v8962_v7 = vunpack.c.l.s8.bf16 %v8961_v25 }
 0x6bd   :  { %3978 = vmatpush1.bf16.msra.mxu0 %v3662_v30  ;;  %v8963_v30 = vld [vmem:[#allocation99_spill] sm:$0xff] }
 0x6be   :  { %3979 = vmatprep.subr.bf16.mxu0 %v8498_v48  ;;  %v8964_v31 = vunpack.c.l.s8.bf16 %v8963_v30 }
 0x6c0   :  { %v3555_v6 = vpop.f32.mrb[84].mxu1  ;;  %3753 = vmatmul.mubr.bf16.gmra.mrb[148].mxu0 %v8943_v16  ;;  %3865 = vmatmul.mubr.bf16.gmra.mrb[148].mxu1 %v8944_v33  ;;  %v8965_v16 = vunpack.c.h.s8.bf16 %v8957_v52  ;;  %v8966_v33 = vunpack.c.h.s8.bf16 %v8959_v43 }
 0x6c1   :  { %v3557_v58 = vpop.f32.mrb[85].mxu1  ;;  %3760 = vmatprep.mubr.bf16.mxu0 %v8946_v45  ;;  %3872 = vmatprep.mubr.bf16.mxu1 %v8948_v36  ;;  %v8967_v36 = vunpack.c.h.s8.bf16 %v8961_v25  ;;  %v8983_v25 = vld [vmem:[#allocation102_spill] sm:$0xff] }
 0x6c2   :  { %v3558_v18 = vpop.f32.mrb[86].mxu1 }
 0x6c3   :  { %v3663_v51 = vpack.c.bf16 %v3558_v18, %v3555_v6  ;;  %v3560_v27 = vpop.f32.mrb[87].mxu1  ;;  %v8968_v18 = vunpack.c.h.s8.bf16 %v8963_v30 }
 0x6c4   :  { %v8969_v27 = vld [vmem:[#allocation86_spill] sm:$0xff] }
 0x6c5   :  { %3980 = vmatpush1.bf16.msra.mxu0 %v3663_v51 }
 0x6c6   :  { %3981 = vmatprep.subr.bf16.mxu0 %v8498_v48 }
 0x6c8   :  { %v3563_v32 = vpop.f32.mrb[88].mxu1  ;;  %3761 = vmatmul.mubr.bf16.gmra.mrb[152].mxu0 %v8950_v54  ;;  %3873 = vmatmul.mubr.bf16.gmra.mrb[152].mxu1 %v8952_v17  ;;  %v8972_v54 = vunpack.c.l.s8.bf16 %v8971_v11 }
 0x6c9   :  { %v3565_v10 = vpop.f32.mrb[89].mxu1  ;;  %3768 = vmatprep.mubr.bf16.mxu0 %v8953_v5  ;;  %3880 = vmatprep.mubr.bf16.mxu1 %v8954_v37  ;;  %v8973_v37 = vld [vmem:[#allocation87_spill] sm:$0xff] }
 0x6ca   :  { %v3566_v39 = vpop.f32.mrb[90].mxu1 }
 0x6cb   :  { %v3664_v4 = vpack.c.bf16 %v3566_v39, %v3563_v32  ;;  %v3568_v23 = vpop.f32.mrb[91].mxu1  ;;  %v8970_v32 = vunpack.c.l.s8.bf16 %v8969_v27  ;;  %v8974_v39 = vunpack.c.l.s8.bf16 %v8973_v37 }
 0x6cd   :  { %3982 = vmatpush1.bf16.msra.mxu0 %v3664_v4  ;;  %v8975_v4 = vld [vmem:[#allocation101_spill] sm:$0xff] }
 0x6ce   :  { %3983 = vmatprep.subr.bf16.mxu0 %v8498_v48  ;;  %v8976_v23 = vunpack.c.l.s8.bf16 %v8975_v4 }
 0x6d0   :  { %v3571_v47 = vpop.f32.mrb[92].mxu1  ;;  %3769 = vmatmul.mubr.bf16.gmra.mrb[156].mxu0 %v8955_v35  ;;  %3881 = vmatmul.mubr.bf16.gmra.mrb[156].mxu1 %v8956_v1  ;;  %v8977_v35 = vunpack.c.h.s8.bf16 %v8969_v27  ;;  %v8978_v1 = vunpack.c.h.s8.bf16 %v8971_v11 }
 0x6d1   :  { %v3573_v19 = vpop.f32.mrb[93].mxu1  ;;  %3776 = vmatprep.mubr.bf16.mxu0 %v8958_v61  ;;  %3888 = vmatprep.mubr.bf16.mxu1 %v8960_v50  ;;  %v8979_v50 = vunpack.c.h.s8.bf16 %v8973_v37  ;;  %v8995_v37 = vld [vmem:[#allocation104_spill] sm:$0xff] }
 0x6d2   :  { %v3574_v63 = vpop.f32.mrb[94].mxu1 }
 0x6d3   :  { %v3665_v12 = vpack.c.bf16 %v3574_v63, %v3571_v47  ;;  %v3576_v13 = vpop.f32.mrb[95].mxu1  ;;  %v8980_v63 = vunpack.c.h.s8.bf16 %v8975_v4 }
 0x6d4   :  { %v8981_v13 = vld [vmem:[#allocation88_spill] sm:$0xff] }
 0x6d5   :  { %3984 = vmatpush1.bf16.msra.mxu0 %v3665_v12 }
 0x6d6   :  { %3985 = vmatprep.subr.bf16.mxu0 %v8498_v48 }
 0x6d8   :  { %v3579_v56 = vpop.f32.mrb[96].mxu1  ;;  %3777 = vmatmul.mubr.bf16.gmra.mrb[160].mxu0 %v8962_v7  ;;  %3889 = vmatmul.mubr.bf16.gmra.mrb[160].mxu1 %v8964_v31  ;;  %v8984_v7 = vunpack.c.l.s8.bf16 %v8983_v25 }
 0x6d9   :  { %v3581_v6 = vpop.f32.mrb[97].mxu1  ;;  %3784 = vmatprep.mubr.bf16.mxu0 %v8965_v16  ;;  %3896 = vmatprep.mubr.bf16.mxu1 %v8966_v33  ;;  %v8985_v33 = vld [vmem:[#allocation89_spill] sm:$0xff] }
 0x6da   :  { %v3582_v58 = vpop.f32.mrb[98].mxu1 }
 0x6db   :  { %v3666_v34 = vpack.c.bf16 %v3582_v58, %v3579_v56  ;;  %v3584_v45 = vpop.f32.mrb[99].mxu1  ;;  %v8982_v56 = vunpack.c.l.s8.bf16 %v8981_v13  ;;  %v8986_v58 = vunpack.c.l.s8.bf16 %v8985_v33 }
 0x6dd   :  { %3986 = vmatpush1.bf16.msra.mxu0 %v3666_v34  ;;  %v8987_v34 = vld [vmem:[#allocation103_spill] sm:$0xff] }
 0x6de   :  { %3987 = vmatprep.subr.bf16.mxu0 %v8498_v48  ;;  %v8988_v45 = vunpack.c.l.s8.bf16 %v8987_v34 }
 0x6e0   :  { %v3587_v42 = vpop.f32.mrb[100].mxu1  ;;  %3785 = vmatmul.mubr.bf16.gmra.mrb[164].mxu0 %v8967_v36  ;;  %3897 = vmatmul.mubr.bf16.gmra.mrb[164].mxu1 %v8968_v18  ;;  %v8989_v36 = vunpack.c.h.s8.bf16 %v8981_v13  ;;  %v8990_v18 = vunpack.c.h.s8.bf16 %v8983_v25  ;;  %v9001_v25 = vld [vmem:[#allocation106_spill] sm:$0xff] }
 0x6e1   :  { %v3589_v51 = vpop.f32.mrb[101].mxu1  ;;  %3792 = vmatprep.mubr.bf16.mxu0 %v8970_v32  ;;  %3904 = vmatprep.mubr.bf16.mxu1 %v8972_v54  ;;  %v8991_v54 = vunpack.c.h.s8.bf16 %v8985_v33 }
 0x6e2   :  { %v3590_v46 = vpop.f32.mrb[102].mxu1 }
 0x6e3   :  { %v3667_v17 = vpack.c.bf16 %v3590_v46, %v3587_v42  ;;  %v3592_v10 = vpop.f32.mrb[103].mxu1  ;;  %v8992_v46 = vunpack.c.h.s8.bf16 %v8987_v34 }
 0x6e4   :  { %v8993_v10 = vld [vmem:[#allocation108_spill] sm:$0xff] }
 0x6e5   :  { %3988 = vmatpush1.bf16.msra.mxu0 %v3667_v17 }
 0x6e6   :  { %3989 = vmatprep.subr.bf16.mxu0 %v8498_v48 }
 0x6e8   :  { %v3595_v5 = vpop.f32.mrb[104].mxu1  ;;  %3793 = vmatmul.mubr.bf16.gmra.mrb[168].mxu0 %v8974_v39  ;;  %3905 = vmatmul.mubr.bf16.gmra.mrb[168].mxu1 %v8976_v23  ;;  %v8996_v39 = vunpack.c.l.s8.bf16 %v8995_v37 }
 0x6e9   :  { %v3597_v47 = vpop.f32.mrb[105].mxu1  ;;  %3800 = vmatprep.mubr.bf16.mxu0 %v8977_v35  ;;  %3912 = vmatprep.mubr.bf16.mxu1 %v8978_v1  ;;  %v8997_v1 = vld [vmem:[#allocation105_spill] sm:$0xff] }
 0x6ea   :  { %v3598_v19 = vpop.f32.mrb[106].mxu1  ;;  %v9000_v13 = vunpack.c.h.s8.bf16 %v8997_v1 }
 0x6eb   :  { %v3668_v52 = vpack.c.bf16 %v3598_v19, %v3595_v5  ;;  %v3600_v61 = vpop.f32.mrb[107].mxu1  ;;  %v8994_v5 = vunpack.c.l.s8.bf16 %v8993_v10  ;;  %v8998_v19 = vunpack.c.l.s8.bf16 %v8997_v1 }
 0x6ec   :  { %v8999_v61 = vunpack.c.h.s8.bf16 %v8995_v37 }
 0x6ed   :  { %3990 = vmatpush1.bf16.msra.mxu0 %v3668_v52 }
 0x6ee   :  { %3991 = vmatprep.subr.bf16.mxu0 %v8498_v48 }
 0x6f0   :  { %v3603_v43 = vpop.f32.mrb[108].mxu1  ;;  %3801 = vmatmul.mubr.bf16.gmra.mrb[172].mxu0 %v8979_v50  ;;  %3913 = vmatmul.mubr.bf16.gmra.mrb[172].mxu1 %v8980_v63 }
 0x6f1   :  { %v3605_v12 = vpop.f32.mrb[109].mxu1  ;;  %3808 = vmatprep.mubr.bf16.mxu0 %v8982_v56  ;;  %3920 = vmatprep.mubr.bf16.mxu1 %v8984_v7  ;;  %v9002_v7 = vunpack.c.l.s8.bf16 %v9001_v25 }
 0x6f2   :  { %v3606_v30 = vpop.f32.mrb[110].mxu1 }
 0x6f3   :  { %v3669_v31 = vpack.c.bf16 %v3606_v30, %v3603_v43  ;;  %v3608_v6 = vpop.f32.mrb[111].mxu1 }
 0x6f5   :  { %3992 = vmatpush1.bf16.msra.mxu0 %v3669_v31 }
 0x6f6   :  { %3993 = vmatprep.subr.bf16.mxu0 %v8498_v48 }
 0x6f8   :  { %v3611_v16 = vpop.f32.mrb[112].mxu1  ;;  %3809 = vmatmul.mubr.bf16.gmra.mrb[176].mxu0 %v8986_v58  ;;  %3921 = vmatmul.mubr.bf16.gmra.mrb[176].mxu1 %v8988_v45  ;;  %v9005_v58 = vld [vmem:[#allocation107_spill] sm:$0xff]  ;;  %v9008_v45 = vunpack.c.h.s8.bf16 %v9001_v25 }
 0x6f9   :  { %v3613_v42 = vpop.f32.mrb[113].mxu1  ;;  %3816 = vmatprep.mubr.bf16.mxu0 %v8989_v36  ;;  %3928 = vmatprep.mubr.bf16.mxu1 %v8990_v18  ;;  %v9006_v34 = vunpack.c.l.s8.bf16 %v9005_v58  ;;  %v9010_v36 = vunpack.c.h.s8.bf16 %v9005_v58  ;;  %v9011_v18 = vld [vmem:[#allocation110_spill] sm:$0xff]  ;;  %v9037_v25 = vld [vmem:[#allocation119_spill] sm:$0xff] }
 0x6fa   :  { %v3614_v51 = vpop.f32.mrb[114].mxu1 }
 0x6fb   :  { %v3670_v27 = vpack.c.bf16 %v3614_v51, %v3611_v16  ;;  %v3616_v32 = vpop.f32.mrb[115].mxu1  ;;  %v9003_v16 = vld [vmem:[#allocation109_spill] sm:$0xff]  ;;  %v9012_v51 = vunpack.c.l.s8.bf16 %v9011_v18 }
 0x6fc   :  { %v9004_v33 = vunpack.c.l.s8.bf16 %v9003_v16  ;;  %v9009_v42 = vunpack.c.h.s8.bf16 %v9003_v16 }
 0x6fd   :  { %3994 = vmatpush1.bf16.msra.mxu0 %v3670_v27  ;;  %v9013_v27 = vld [vmem:[#allocation111_spill] sm:$0xff] }
 0x6fe   :  { %3995 = vmatprep.subr.bf16.mxu0 %v8498_v48  ;;  %v9014_v32 = vunpack.c.l.s8.bf16 %v9013_v27 }
 0x700   :  { %v3619_v11 = vpop.f32.mrb[116].mxu1  ;;  %3817 = vmatmul.mubr.bf16.gmra.mrb[180].mxu0 %v8991_v54  ;;  %3929 = vmatmul.mubr.bf16.gmra.mrb[180].mxu1 %v8992_v46  ;;  %v9016_v54 = vunpack.c.h.s8.bf16 %v9013_v27  ;;  %v9017_v46 = vld [vmem:[#allocation112_spill] sm:$0xff] }
 0x701   :  { %v3621_v17 = vpop.f32.mrb[117].mxu1  ;;  %4001 = vmatprep.mubr.bf16.mxu0 %v8994_v5  ;;  %3936 = vmatprep.mubr.bf16.mxu1 %v8996_v39  ;;  %v9021_v37 = vunpack.c.h.s8.bf16 %v9017_v46 }
 0x702   :  { %v3622_v4 = vpop.f32.mrb[118].mxu1  ;;  %v9018_v17 = vunpack.c.l.s8.bf16 %v9017_v46 }
 0x703   :  { %v3671_v23 = vpack.c.bf16 %v3622_v4, %v3619_v11  ;;  %v3624_v47 = vpop.f32.mrb[119].mxu1  ;;  %v9015_v11 = vunpack.c.h.s8.bf16 %v9011_v18  ;;  %v9023_v4 = vld [vmem:[#allocation114_spill] sm:$0xff] }
 0x704   :  { %v9025_v47 = vld [vmem:[#allocation115_spill] sm:$0xff]  ;;  %v9027_v1 = vunpack.c.h.s8.bf16 %v9023_v4 }
 0x705   :  { %3996 = vmatpush1.bf16.msra.mxu0 %v3671_v23  ;;  %v9024_v23 = vunpack.c.l.s8.bf16 %v9023_v4 }
 0x706   :  { %3997 = vmatprep.subr.bf16.mxu0 %v8498_v48 }
 0x708   :  { %v3627_v35 = vpop.f32.mrb[120].mxu1  ;;  %3937 = vmatmul.mubr.bf16.gmra.mrb[184].mxu1 %v8998_v19  ;;  %v9028_v19 = vunpack.c.h.s8.bf16 %v9025_v47 }
 0x709   :  { %v3629_v52 = vpop.f32.mrb[121].mxu1  ;;  %3944 = vmatprep.mubr.bf16.mxu1 %v8999_v61 }
 0x70a   :  { %v3630_v43 = vpop.f32.mrb[122].mxu1  ;;  %v9029_v52 = vld [vmem:[#allocation116_spill] sm:$0xff] }
 0x70b   :  { %v3672_v50 = vpack.c.bf16 %v3630_v43, %v3627_v35  ;;  %v3632_v63 = vpop.f32.mrb[123].mxu1  ;;  %v9026_v35 = vunpack.c.l.s8.bf16 %v9025_v47  ;;  %v9030_v61 = vunpack.c.l.s8.bf16 %v9029_v52  ;;  %v9031_v43 = vld [vmem:[#allocation117_spill] sm:$0xff] }
 0x70c   :  { %v9033_v63 = vunpack.c.h.s8.bf16 %v9029_v52 }
 0x70d   :  { %3998 = vmatpush1.bf16.msra.mxu0 %v3672_v50  ;;  %v9032_v50 = vunpack.c.l.s8.bf16 %v9031_v43 }
 0x70e   :  { %3999 = vmatprep.subr.bf16.mxu0 %v8498_v48  ;;  %v9007_v48 = vunpack.c.h.s8.bf16 %v8993_v10  ;;  %v9019_v10 = vld [vmem:[#allocation113_spill] sm:$0xff] }
 0x70f   :  { %v9020_v5 = vunpack.c.l.s8.bf16 %v9019_v10  ;;  %v9022_v39 = vunpack.c.h.s8.bf16 %v9019_v10 }
 0x710   :  { %v3635_v12 = vpop.f32.mrb[124].mxu1  ;;  %3945 = vmatmul.mubr.bf16.gmra.mrb[188].mxu1 %v9000_v13  ;;  %v9035_v13 = vld [vmem:[#allocation118_spill] sm:$0xff] }
 0x711   :  { %v3637_v56 = vpop.f32.mrb[125].mxu1  ;;  %3952 = vmatprep.mubr.bf16.mxu1 %v9002_v7  ;;  %v9038_v7 = vunpack.c.l.s8.bf16 %v9037_v25 }
 0x712   :  { %v3638_v30 = vpop.f32.mrb[126].mxu1  ;;  %v9036_v56 = vunpack.c.l.s8.bf16 %v9035_v13 }
 0x713   :  { %v3673_v31 = vpack.c.bf16 %v3638_v30, %v3635_v12  ;;  %v3640_v6 = vpop.f32.mrb[127].mxu1  ;;  %v9034_v12 = vunpack.c.h.s8.bf16 %v9031_v43  ;;  %v9039_v30 = vunpack.c.h.s8.bf16 %v9035_v13 }
 0x714   :  { %v9041_v6 = vld [vmem:[#allocation120_spill] sm:$0xff] }
 0x715   :  { %4000 = vmatpush1.bf16.msra.mxu0 %v3673_v31  ;;  %v9040_v31 = vunpack.c.h.s8.bf16 %v9037_v25  ;;  %v9042_v16 = vunpack.c.l.s8.bf16 %v9041_v6 }
 0x718   :  { %4002 = vmatmul.mubr.bf16.vlgmr.msra.gmra.mrb[128].mxu0 %v9004_v33  ;;  %3953 = vmatmul.mubr.bf16.gmra.mrb[192].mxu1 %v9006_v34  ;;  %v9043_v33 = vld [vmem:[#allocation121_spill] sm:$0xff]  ;;  %v9045_v34 = vunpack.c.h.s8.bf16 %v9041_v6 }
 0x719   :  { %4009 = vmatprep.mubr.bf16.mxu0 %v9007_v48  ;;  %3960 = vmatprep.mubr.bf16.mxu1 %v9008_v45  ;;  %v9044_v58 = vunpack.c.l.s8.bf16 %v9043_v33  ;;  %v9046_v48 = vunpack.c.h.s8.bf16 %v9043_v33  ;;  %v9047_v45 = vld [vmem:[#allocation122_spill] sm:$0xff]  ;;  %v9079_v6 = vld [vmem:[#allocation133_spill] sm:$0xff] }
 0x720   :  { %4010 = vmatmul.mubr.bf16.gmra.mrb[132].mxu0 %v9009_v42  ;;  %3961 = vmatmul.mubr.bf16.gmra.mrb[196].mxu1 %v9010_v36  ;;  %v9048_v42 = vunpack.c.l.s8.bf16 %v9047_v45  ;;  %v9049_v36 = vld [vmem:[#allocation123_spill] sm:$0xff] }
 0x721   :  { %4017 = vmatprep.mubr.bf16.mxu0 %v9012_v51  ;;  %v9050_v18 = vunpack.c.l.s8.bf16 %v9049_v36  ;;  %v9051_v51 = vunpack.c.h.s8.bf16 %v9047_v45  ;;  %v9052_v27 = vunpack.c.h.s8.bf16 %v9049_v36 }
 0x728   :  { %4018 = vmatmul.mubr.bf16.gmra.mrb[136].mxu0 %v9014_v32  ;;  %v9053_v32 = vld [vmem:[#allocation124_spill] sm:$0xff] }
 0x729   :  { %4025 = vmatprep.mubr.bf16.mxu0 %v9015_v11  ;;  %v9054_v11 = vunpack.c.l.s8.bf16 %v9053_v32 }
 0x730   :  { %4026 = vmatmul.mubr.bf16.gmra.mrb[140].mxu0 %v9016_v54  ;;  %v9055_v54 = vld [vmem:[#allocation125_spill] sm:$0xff] }
 0x731   :  { %4033 = vmatprep.mubr.bf16.mxu0 %v9018_v17  ;;  %v9056_v46 = vunpack.c.l.s8.bf16 %v9055_v54  ;;  %v9057_v17 = vunpack.c.h.s8.bf16 %v9053_v32  ;;  %v9058_v10 = vunpack.c.h.s8.bf16 %v9055_v54  ;;  %v9085_v54 = vld [vmem:[#allocation135_spill] sm:$0xff] }
 0x738   :  { %4034 = vmatmul.mubr.bf16.gmra.mrb[144].mxu0 %v9020_v5  ;;  %v9059_v5 = vld [vmem:[#allocation126_spill] sm:$0xff] }
 0x739   :  { %4041 = vmatprep.mubr.bf16.mxu0 %v9021_v37  ;;  %v9060_v37 = vunpack.c.l.s8.bf16 %v9059_v5 }
 0x740   :  { %4042 = vmatmul.mubr.bf16.gmra.mrb[148].mxu0 %v9022_v39  ;;  %v9061_v39 = vld [vmem:[#allocation127_spill] sm:$0xff] }
 0x741   :  { %4049 = vmatprep.mubr.bf16.mxu0 %v9024_v23  ;;  %v9062_v4 = vunpack.c.l.s8.bf16 %v9061_v39  ;;  %v9063_v23 = vunpack.c.h.s8.bf16 %v9059_v5  ;;  %v9064_v47 = vunpack.c.h.s8.bf16 %v9061_v39 }
 0x748   :  { %4050 = vmatmul.mubr.bf16.gmra.mrb[152].mxu0 %v9026_v35  ;;  %v9065_v35 = vld [vmem:[#allocation128_spill] sm:$0xff] }
 0x749   :  { %4057 = vmatprep.mubr.bf16.mxu0 %v9027_v1  ;;  %v9066_v1 = vunpack.c.l.s8.bf16 %v9065_v35 }
 0x750   :  { %4058 = vmatmul.mubr.bf16.gmra.mrb[156].mxu0 %v9028_v19  ;;  %v9067_v19 = vld [vmem:[#allocation129_spill] sm:$0xff] }
 0x751   :  { %4065 = vmatprep.mubr.bf16.mxu0 %v9030_v61  ;;  %v9068_v52 = vunpack.c.l.s8.bf16 %v9067_v19  ;;  %v9069_v61 = vunpack.c.h.s8.bf16 %v9065_v35  ;;  %v9070_v43 = vunpack.c.h.s8.bf16 %v9067_v19 }
 0x758   :  { %4066 = vmatmul.mubr.bf16.gmra.mrb[160].mxu0 %v9032_v50  ;;  %v9071_v50 = vld [vmem:[#allocation130_spill] sm:$0xff] }
 0x759   :  { %4073 = vmatprep.mubr.bf16.mxu0 %v9033_v63  ;;  %v9072_v63 = vunpack.c.l.s8.bf16 %v9071_v50 }
 0x760   :  { %4074 = vmatmul.mubr.bf16.gmra.mrb[164].mxu0 %v9034_v12  ;;  %v9073_v12 = vld [vmem:[#allocation131_spill] sm:$0xff] }
 0x761   :  { %4081 = vmatprep.mubr.bf16.mxu0 %v9036_v56  ;;  %v9074_v13 = vunpack.c.l.s8.bf16 %v9073_v12  ;;  %v9075_v56 = vunpack.c.h.s8.bf16 %v9071_v50  ;;  %v9076_v25 = vunpack.c.h.s8.bf16 %v9073_v12 }
 0x768   :  { %4082 = vmatmul.mubr.bf16.gmra.mrb[168].mxu0 %v9038_v7  ;;  %v9077_v7 = vld [vmem:[#allocation132_spill] sm:$0xff] }
 0x769   :  { %4089 = vmatprep.mubr.bf16.mxu0 %v9039_v30  ;;  %v9078_v30 = vunpack.c.l.s8.bf16 %v9077_v7 }
 0x770   :  { %4090 = vmatmul.mubr.bf16.gmra.mrb[172].mxu0 %v9040_v31  ;;  %v7764_v31 = vpop.f32.mrb[128].mxu1 }
 0x771   :  { %4097 = vmatprep.mubr.bf16.mxu0 %v9042_v16  ;;  %v9080_v16 = vunpack.c.l.s8.bf16 %v9079_v6  ;;  %v3828_v33 = vpop.f32.mrb[129].mxu1 }
 0x778   :  { %4098 = vmatmul.mubr.bf16.gmra.mrb[176].mxu0 %v9044_v58  ;;  %v9081_v58 = vunpack.c.h.s8.bf16 %v9077_v7 }
 0x779   :  { %4105 = vmatprep.mubr.bf16.mxu0 %v9045_v34  ;;  %v7770_v34 = vpop.f32.mrb[130].mxu1 }
 0x780   :  { %4106 = vmatmul.mubr.bf16.gmra.mrb[180].mxu0 %v9046_v48  ;;  %v3831_v48 = vpop.f32.mrb[131].mxu1 }
 0x781   :  { %4113 = vmatprep.mubr.bf16.mxu0 %v9048_v42  ;;  %v7772_v45 = vpop.f32.mrb[132].mxu1  ;;  %v9082_v42 = vunpack.c.h.s8.bf16 %v9079_v6 }
 0x782   :  { %v3836_v36 = vpop.f32.mrb[133].mxu1 }
 0x788   :  { %4114 = vmatmul.mubr.bf16.gmra.mrb[184].mxu0 %v9050_v18  ;;  %v9083_v18 = vld [vmem:[#allocation134_spill] sm:$0xff] }
 0x789   :  { %4121 = vmatprep.mubr.bf16.mxu0 %v9051_v51  ;;  %v9084_v51 = vunpack.c.l.s8.bf16 %v9083_v18  ;;  %v9087_v5 = vunpack.c.h.s8.bf16 %v9083_v18  ;;  %v9092_v18 = vld [vmem:[#allocation137_spill] sm:$0xff] }
 0x790   :  { %4122 = vmatmul.mubr.bf16.gmra.mrb[188].mxu0 %v9052_v27  ;;  %v7778_v27 = vpop.f32.mrb[134].mxu1 }
 0x791   :  { %4129 = vmatprep.mubr.bf16.mxu0 %v9054_v11  ;;  %v3839_v32 = vpop.f32.mrb[135].mxu1 }
 0x792   :  { %v7780_v11 = vpop.f32.mrb[136].mxu1 }
 0x798   :  { %4130 = vmatmul.mubr.bf16.gmra.mrb[192].mxu0 %v9056_v46  ;;  %v9086_v46 = vunpack.c.l.s8.bf16 %v9085_v54 }
 0x799   :  { %4137 = vmatprep.mubr.bf16.mxu0 %v9057_v17  ;;  %v3844_v17 = vpop.f32.mrb[137].mxu1 }
 0x7a0   :  { %4138 = vmatmul.mubr.bf16.gmra.mrb[196].mxu0 %v9058_v10  ;;  %v7784_v10 = vld [vmem:[#allocation16] ss:$0 sm:$0xff] }
 0x7a1   :  { %4145 = vmatprep.mubr.bf16.mxu0 %v9060_v37  ;;  %v7788_v37 = vpop.f32.mrb[138].mxu1 }
 0x7a2   :  { %v3847_v39 = vpop.f32.mrb[139].mxu1 }
 0x7a8   :  { %4146 = vmatmul.mubr.bf16.gmra.mrb[200].mxu0 %v9062_v4 }
 0x7a9   :  { %4153 = vmatprep.mubr.bf16.mxu0 %v9063_v23 }
 0x7b0   :  { %4154 = vmatmul.mubr.bf16.gmra.mrb[204].mxu0 %v9064_v47 }
 0x7b1   :  { %4161 = vmatprep.mubr.bf16.mxu0 %v9066_v1  ;;  %v9088_v1 = vld [vmem:[#allocation236_spill] sm:$0xff] }
 0x7b8   :  { %4162 = vmatmul.mubr.bf16.gmra.mrb[208].mxu0 %v9068_v52 }
 0x7b9   :  { %4169 = vmatprep.mubr.bf16.mxu0 %v9069_v61 }
 0x7c0   :  { %4170 = vmatmul.mubr.bf16.gmra.mrb[212].mxu0 %v9070_v43  ;;  %v7793_v43 = vpop.f32.mrb[140].mxu1 }
 0x7c1   :  { %4177 = vmatprep.mubr.bf16.mxu0 %v9072_v63  ;;  %v9089_v63 = vunpack.c.h.s8.bf16 %v9085_v54  ;;  %v3852_v12 = vpop.f32.mrb[141].mxu1 }
 0x7c8   :  { %4178 = vmatmul.mubr.bf16.gmra.mrb[216].mxu0 %v9074_v13  ;;  %v9090_v13 = vld [vmem:[#allocation136_spill] sm:$0xff] }
 0x7c9   :  { %4185 = vmatprep.mubr.bf16.mxu0 %v9075_v56  ;;  %v9091_v56 = vunpack.c.l.s8.bf16 %v9090_v13  ;;  %v9094_v54 = vunpack.c.h.s8.bf16 %v9090_v13 }
 0x7d0   :  { %4186 = vmatmul.mubr.bf16.gmra.mrb[220].mxu0 %v9076_v25  ;;  %v7800_v25 = vpop.f32.mrb[142].mxu1 }
 0x7d1   :  { %4193 = vmatprep.mubr.bf16.mxu0 %v9078_v30  ;;  %v3855_v7 = vpop.f32.mrb[143].mxu1 }
 0x7d8   :  { %4194 = vmatmul.mubr.bf16.gmra.mrb[224].mxu0 %v9080_v16 }
 0x7d9   :  { %4201 = vmatprep.mubr.bf16.mxu0 %v9081_v58 }
 0x7e0   :  { %4202 = vmatmul.mubr.bf16.gmra.mrb[228].mxu0 %v9082_v42  ;;  %v7805_v42 = vpop.f32.mrb[144].mxu1 }
 0x7e1   :  { %4209 = vmatprep.mubr.bf16.mxu0 %v9084_v51  ;;  %v9093_v51 = vunpack.c.l.s8.bf16 %v9092_v18  ;;  %v3860_v32 = vpop.f32.mrb[145].mxu1 }
 0x7e8   :  { %4210 = vmatmul.mubr.bf16.gmra.mrb[232].mxu0 %v9086_v46  ;;  %v7812_v46 = vpop.f32.mrb[146].mxu1 }
 0x7e9   :  { %4217 = vmatprep.mubr.bf16.mxu0 %v9087_v5  ;;  %v3863_v17 = vpop.f32.mrb[147].mxu1 }
 0x7eb   :  { %v4003_v4 = vpop.f32.mrb[128].mxu0 }
 0x7ec   :  { %v4440_v23 = vadd.f32 %v7784_v10, %v4003_v4  ;;  %v4005_v47 = vpop.f32.mrb[129].mxu0 }
 0x7ed   :  { %v4006_v35 = vpop.f32.mrb[130].mxu0 }
 0x7ee   :  { %v4258_v19 = vmul.f32 %v4440_v23, %v9088_v1  ;;  %v4441_v52 = vadd.f32 %v7784_v10, %v4006_v35  ;;  %v4008_v61 = vpop.f32.mrb[131].mxu0  ;;  %v7817_v35 = vpop.f32.mrb[148].mxu1 }
 0x7ef   :  { %v9096_v61 = vld [vmem:[#allocation138_spill] sm:$0xff] }
 0x7f0   :  { %4322 = vst [vmem:[#allocation17] sm:$0xff] %v4258_v19  ;;  %v4259_v50 = vmul.f32 %v4441_v52, %v6315_v22  ;;  %4218 = vmatmul.mubr.bf16.gmra.mrb[236].mxu0 %v9089_v63  ;;  %v9095_v19 = vunpack.c.h.s8.bf16 %v9092_v18  ;;  %v3868_v52 = vpop.f32.mrb[149].mxu1 }
 0x7f1   :  { %4225 = vmatprep.mubr.bf16.mxu0 %v9091_v56  ;;  %v7824_v63 = vpop.f32.mrb[150].mxu1 }
 0x7f2   :  { %4323 = vst [vmem:[#allocation17 + $0x8] sm:$0xff] %v4259_v50  ;;  %v9097_v50 = vunpack.c.l.s8.bf16 %v9096_v61  ;;  %v3871_v12 = vpop.f32.mrb[151].mxu1 }
 0x7f3   :  { %v4011_v30 = vpop.f32.mrb[132].mxu0 }
 0x7f4   :  { %v4442_v6 = vadd.f32 %v7784_v10, %v4011_v30  ;;  %v4013_v16 = vpop.f32.mrb[133].mxu0 }
 0x7f5   :  { %v4014_v33 = vpop.f32.mrb[134].mxu0  ;;  %v7829_v16 = vpop.f32.mrb[152].mxu1 }
 0x7f6   :  { %v4260_v58 = vmul.f32 %v4442_v6, %v6326_v9  ;;  %v4443_v22 = vadd.f32 %v7784_v10, %v4014_v33  ;;  %v4016_v48 = vpop.f32.mrb[135].mxu0 }
 0x7f7   :  { %v3876_v48 = vpop.f32.mrb[153].mxu1 }
 0x7f8   :  { %4324 = vst [vmem:[#allocation17 + $0x10] sm:$0xff] %v4260_v58  ;;  %v4261_v36 = vmul.f32 %v4443_v22, %v6338_v57  ;;  %4226 = vmatmul.mubr.bf16.gmra.mrb[240].mxu0 %v9093_v51  ;;  %v9098_v58 = vld [vmem:[#allocation139_spill] sm:$0xff]  ;;  %v7836_v18 = vpop.f32.mrb[154].mxu1 }
 0x7f9   :  { %4233 = vmatprep.mubr.bf16.mxu0 %v9094_v54  ;;  %v9099_v22 = vunpack.c.l.s8.bf16 %v9098_v58  ;;  %v3879_v51 = vpop.f32.mrb[155].mxu1 }
 0x7fa   :  { %4325 = vst [vmem:[#allocation17 + $0x18] sm:$0xff] %v4261_v36  ;;  %v9100_v36 = vunpack.c.h.s8.bf16 %v9096_v61 }
 0x7fb   :  { %v4019_v9 = vpop.f32.mrb[136].mxu0 }
 0x7fc   :  { %v4444_v5 = vadd.f32 %v7784_v10, %v4019_v9  ;;  %v4021_v39 = vpop.f32.mrb[137].mxu0 }
 0x7fd   :  { %v4022_v4 = vpop.f32.mrb[138].mxu0  ;;  %v7841_v39 = vpop.f32.mrb[156].mxu1 }
 0x7fe   :  { %v4262_v23 = vmul.f32 %v4444_v5, %v6359_v15  ;;  %v4445_v57 = vadd.f32 %v7784_v10, %v4022_v4  ;;  %v4024_v47 = vpop.f32.mrb[139].mxu0 }
 0x800   :  { %4326 = vst [vmem:[#allocation17 + $0x20] sm:$0xff] %v4262_v23  ;;  %v4263_v1 = vmul.f32 %v4445_v57, %v6371_v8  ;;  %4234 = vmatmul.mubr.bf16.gmra.mrb[244].mxu0 %v9095_v19  ;;  %v9101_v23 = vunpack.c.h.s8.bf16 %v9098_v58  ;;  %v3884_v57 = vpop.f32.mrb[157].mxu1 }
 0x801   :  { %4241 = vmatprep.mubr.bf16.mxu0 %v9097_v50  ;;  %v7846_v47 = vpop.f32.mrb[158].mxu1 }
 0x802   :  { %4327 = vst [vmem:[#allocation17 + $0x28] sm:$0xff] %v4263_v1  ;;  %v3887_v1 = vpop.f32.mrb[159].mxu1 }
 0x803   :  { %v4027_v15 = vpop.f32.mrb[140].mxu0 }
 0x804   :  { %v4446_v13 = vadd.f32 %v7784_v10, %v4027_v15  ;;  %v4029_v56 = vpop.f32.mrb[141].mxu0 }
 0x805   :  { %v4030_v7 = vpop.f32.mrb[142].mxu0 }
 0x806   :  { %v4264_v30 = vmul.f32 %v4446_v13, %v6392_v44  ;;  %v4447_v8 = vadd.f32 %v7784_v10, %v4030_v7  ;;  %v4032_v6 = vpop.f32.mrb[143].mxu0  ;;  %v7851_v13 = vpop.f32.mrb[160].mxu1 }
 0x807   :  { %v3892_v56 = vpop.f32.mrb[161].mxu1 }
 0x808   :  { %4328 = vst [vmem:[#allocation17 + $0x30] sm:$0xff] %v4264_v30  ;;  %v4265_v33 = vmul.f32 %v4447_v8, %v6404_v20  ;;  %4242 = vmatmul.mubr.bf16.gmra.mrb[248].mxu0 %v9099_v22  ;;  %v7854_v7 = vpop.f32.mrb[162].mxu1 }
 0x809   :  { %4249 = vmatprep.mubr.bf16.mxu0 %v9100_v36  ;;  %v3895_v30 = vpop.f32.mrb[163].mxu1 }
 0x80a   :  { %4329 = vst [vmem:[#allocation17 + $0x38] sm:$0xff] %v4265_v33  ;;  %v7859_v36 = vpop.f32.mrb[164].mxu1 }
 0x80b   :  { %v4035_v44 = vpop.f32.mrb[144].mxu0  ;;  %v3900_v51 = vpop.f32.mrb[165].mxu1 }
 0x80c   :  { %v4448_v32 = vadd.f32 %v7784_v10, %v4035_v44  ;;  %v4037_v54 = vpop.f32.mrb[145].mxu0  ;;  %v7862_v44 = vpop.f32.mrb[166].mxu1 }
 0x80d   :  { %v4038_v17 = vpop.f32.mrb[146].mxu0 }
 0x80e   :  { %v4266_v9 = vmul.f32 %v4448_v32, %v6425_v0  ;;  %v4449_v20 = vadd.f32 %v7784_v10, %v4038_v17  ;;  %v4040_v5 = vpop.f32.mrb[147].mxu0  ;;  %v3903_v32 = vpop.f32.mrb[167].mxu1 }
 0x810   :  { %4330 = vst [vmem:[#allocation17 + $0x40] sm:$0xff] %v4266_v9  ;;  %v4267_v4 = vmul.f32 %v4449_v20, %v6437_v60  ;;  %4250 = vmatmul.mubr.bf16.gmra.mrb[252].mxu0 %v9101_v23  ;;  %v7867_v23 = vpop.f32.mrb[168].mxu1 }
 0x811   :  { %v3908_v57 = vpop.f32.mrb[169].mxu1 }
 0x812   :  { %4331 = vst [vmem:[#allocation17 + $0x48] sm:$0xff] %v4267_v4  ;;  %v7870_v1 = vpop.f32.mrb[170].mxu1 }
 0x813   :  { %v4043_v19 = vpop.f32.mrb[148].mxu0 }
 0x814   :  { %v4450_v52 = vadd.f32 %v7784_v10, %v4043_v19  ;;  %v4045_v0 = vpop.f32.mrb[149].mxu0  ;;  %v3911_v19 = vpop.f32.mrb[171].mxu1 }
 0x815   :  { %v4046_v61 = vpop.f32.mrb[150].mxu0 }
 0x816   :  { %v4268_v50 = vmul.f32 %v4450_v52, %v6458_v3  ;;  %v4451_v12 = vadd.f32 %v7784_v10, %v4046_v61  ;;  %v4048_v15 = vpop.f32.mrb[151].mxu0 }
 0x818   :  { %4332 = vst [vmem:[#allocation17 + $0x50] sm:$0xff] %v4268_v50  ;;  %v4269_v60 = vmul.f32 %v4451_v12, %v6472_v24 }
 0x81a   :  { %4333 = vst [vmem:[#allocation17 + $0x58] sm:$0xff] %v4269_v60  ;;  %v7875_v60 = vpop.f32.mrb[172].mxu1 }
 0x81b   :  { %v4051_v8 = vpop.f32.mrb[152].mxu0  ;;  %v3916_v56 = vpop.f32.mrb[173].mxu1 }
 0x81c   :  { %v4452_v6 = vadd.f32 %v7784_v10, %v4051_v8  ;;  %v4053_v33 = vpop.f32.mrb[153].mxu0  ;;  %v7878_v30 = vpop.f32.mrb[174].mxu1 }
 0x81d   :  { %v4054_v58 = vpop.f32.mrb[154].mxu0  ;;  %v3919_v8 = vpop.f32.mrb[175].mxu1 }
 0x81e   :  { %v4270_v3 = vmul.f32 %v4452_v6, %v6496_v53  ;;  %v4453_v22 = vadd.f32 %v7784_v10, %v4054_v58  ;;  %v4056_v48 = vpop.f32.mrb[155].mxu0 }
 0x820   :  { %4334 = vst [vmem:[#allocation17 + $0x60] sm:$0xff] %v4270_v3  ;;  %v4271_v24 = vmul.f32 %v4453_v22, %v6510_v26 }
 0x822   :  { %4335 = vst [vmem:[#allocation17 + $0x68] sm:$0xff] %v4271_v24  ;;  %v7883_v24 = vpop.f32.mrb[176].mxu1 }
 0x823   :  { %v4059_v54 = vpop.f32.mrb[156].mxu0  ;;  %v3924_v51 = vpop.f32.mrb[177].mxu1 }
 0x824   :  { %v4454_v17 = vadd.f32 %v7784_v10, %v4059_v54  ;;  %v4061_v9 = vpop.f32.mrb[157].mxu0  ;;  %v7886_v32 = vpop.f32.mrb[178].mxu1 }
 0x825   :  { %v4062_v20 = vpop.f32.mrb[158].mxu0  ;;  %v3927_v54 = vpop.f32.mrb[179].mxu1 }
 0x826   :  { %v4272_v53 = vmul.f32 %v4454_v17, %v6534_v41  ;;  %v4455_v5 = vadd.f32 %v7784_v10, %v4062_v20  ;;  %v4064_v4 = vpop.f32.mrb[159].mxu0  ;;  %v9103_v54 = vld [vmem:[#allocation25_spill] sm:$0xff] }
 0x828   :  { %4336 = vst [vmem:[#allocation17 + $0x70] sm:$0xff] %v4272_v53  ;;  %v4273_v26 = vmul.f32 %v4455_v5, %v6548_v2 }
 0x82a   :  { %4337 = vst [vmem:[#allocation17 + $0x78] sm:$0xff] %v4273_v26  ;;  %v7891_v26 = vpop.f32.mrb[180].mxu1 }
 0x82b   :  { %v4067_v52 = vpop.f32.mrb[160].mxu0  ;;  %v3932_v57 = vpop.f32.mrb[181].mxu1 }
 0x82c   :  { %v4456_v0 = vadd.f32 %v7784_v10, %v4067_v52  ;;  %v4069_v61 = vpop.f32.mrb[161].mxu0  ;;  %v7894_v19 = vpop.f32.mrb[182].mxu1 }
 0x82d   :  { %v4070_v50 = vpop.f32.mrb[162].mxu0  ;;  %v3935_v52 = vpop.f32.mrb[183].mxu1 }
 0x82e   :  { %v4274_v41 = vmul.f32 %v4456_v0, %v6572_v62  ;;  %v4457_v12 = vadd.f32 %v7784_v10, %v4070_v50  ;;  %v4072_v15 = vpop.f32.mrb[163].mxu0 }
 0x830   :  { %4338 = vst [vmem:[#allocation17 + $0x80] sm:$0xff] %v4274_v41  ;;  %v4275_v2 = vmul.f32 %v4457_v12, %v6586_v29 }
 0x832   :  { %4339 = vst [vmem:[#allocation17 + $0x88] sm:$0xff] %v4275_v2  ;;  %v7899_v2 = vpop.f32.mrb[184].mxu1 }
 0x833   :  { %v4075_v6 = vpop.f32.mrb[164].mxu0  ;;  %v3940_v56 = vpop.f32.mrb[185].mxu1 }
 0x834   :  { %v4458_v33 = vadd.f32 %v7784_v10, %v4075_v6  ;;  %v4077_v58 = vpop.f32.mrb[165].mxu0  ;;  %v7902_v8 = vpop.f32.mrb[186].mxu1 }
 0x835   :  { %v4078_v3 = vpop.f32.mrb[166].mxu0  ;;  %v3943_v6 = vpop.f32.mrb[187].mxu1 }
 0x836   :  { %v4276_v62 = vmul.f32 %v4458_v33, %v6610_v21  ;;  %v4459_v22 = vadd.f32 %v7784_v10, %v4078_v3  ;;  %v4080_v48 = vpop.f32.mrb[167].mxu0  ;;  %v7907_v51 = vpop.f32.mrb[188].mxu1  ;;  %v3830_v6 = vadd.f32 %v7784_v10, %v7770_v34 }
 0x838   :  { %4340 = vst [vmem:[#allocation17 + $0x90] sm:$0xff] %v4276_v62  ;;  %v4277_v29 = vmul.f32 %v4459_v22, %v6624_v38  ;;  %v9102_v22 = vld [vmem:[#allocation26_spill] sm:$0xff] }
 0x83a   :  { %4341 = vst [vmem:[#allocation17 + $0x98] sm:$0xff] %v4277_v29 }
 0x83b   :  { %v4083_v17 = vpop.f32.mrb[168].mxu0 }
 0x83c   :  { %v4460_v9 = vadd.f32 %v7784_v10, %v4083_v17  ;;  %v4085_v20 = vpop.f32.mrb[169].mxu0  ;;  %v3948_v17 = vpop.f32.mrb[189].mxu1 }
 0x83d   :  { %v4086_v53 = vpop.f32.mrb[170].mxu0 }
 0x83e   :  { %v4278_v21 = vmul.f32 %v4460_v9, %v6648_v28  ;;  %v4461_v5 = vadd.f32 %v7784_v10, %v4086_v53  ;;  %v4088_v4 = vpop.f32.mrb[171].mxu0  ;;  %v7910_v9 = vpop.f32.mrb[190].mxu1 }
 0x83f   :  { %v3951_v20 = vpop.f32.mrb[191].mxu1 }
 0x840   :  { %4342 = vst [vmem:[#allocation17 + $0xa0] sm:$0xff] %v4278_v21  ;;  %v4279_v38 = vmul.f32 %v4461_v5, %v6662_v59 }
 0x842   :  { %4343 = vst [vmem:[#allocation17 + $0xa8] sm:$0xff] %v4279_v38  ;;  %v9104_v38 = vld [vmem:[#allocation140_spill] sm:$0xff] }
 0x843   :  { %v4091_v0 = vpop.f32.mrb[172].mxu0 }
 0x844   :  { %v4462_v61 = vadd.f32 %v7784_v10, %v4091_v0  ;;  %v4093_v50 = vpop.f32.mrb[173].mxu0 }
 0x845   :  { %v4094_v41 = vpop.f32.mrb[174].mxu0  ;;  %v9105_v50 = vld [vmem:[#allocation141_spill] sm:$0xff] }
 0x846   :  { %v4280_v28 = vmul.f32 %v4462_v61, %v6686_v49  ;;  %v4463_v12 = vadd.f32 %v7784_v10, %v4094_v41  ;;  %v4096_v15 = vpop.f32.mrb[175].mxu0  ;;  %v7915_v61 = vpop.f32.mrb[192].mxu1 }
 0x848   :  { %4344 = vst [vmem:[#allocation17 + $0xb0] sm:$0xff] %v4280_v28  ;;  %v4281_v59 = vmul.f32 %v4463_v12, %v6700_v55  ;;  %v3827_v28 = vadd.f32 %v7784_v10, %v7764_v31  ;;  %v3956_v12 = vpop.f32.mrb[193].mxu1  ;;  %v9107_v31 = vld [vmem:[#allocation143_spill] sm:$0xff] }
 0x849   :  { %v7920_v15 = vpop.f32.mrb[194].mxu1 }
 0x84a   :  { %4345 = vst [vmem:[#allocation17 + $0xb8] sm:$0xff] %v4281_v59  ;;  %v3959_v59 = vpop.f32.mrb[195].mxu1 }
 0x84b   :  { %v4099_v33 = vpop.f32.mrb[176].mxu0  ;;  %v3846_v59 = vadd.f32 %v7784_v10, %v7788_v37 }
 0x84c   :  { %v4464_v58 = vadd.f32 %v7784_v10, %v4099_v33  ;;  %v4101_v3 = vpop.f32.mrb[177].mxu0 }
 0x84d   :  { %v4102_v62 = vpop.f32.mrb[178].mxu0 }
 0x84e   :  { %v4282_v49 = vmul.f32 %v4464_v58, %v9102_v22  ;;  %v4465_v48 = vadd.f32 %v7784_v10, %v4102_v62  ;;  %v4104_v29 = vpop.f32.mrb[179].mxu0  ;;  %v9106_v62 = vld [vmem:[#allocation142_spill] sm:$0xff] }
 0x84f   :  { %v7925_v29 = vpop.f32.mrb[196].mxu1 }
 0x850   :  { %4346 = vst [vmem:[#allocation17 + $0xc0] sm:$0xff] %v4282_v49  ;;  %v4283_v55 = vmul.f32 %v4465_v48, %v9103_v54  ;;  %v3964_v17 = vpop.f32.mrb[197].mxu1 }
 0x851   :  { %v7930_v20 = vpop.f32.mrb[198].mxu1  ;;  %v9112_v17 = vld [vmem:[#allocation146_spill] sm:$0xff] }
 0x852   :  { %4347 = vst [vmem:[#allocation17 + $0xc8] sm:$0xff] %v4283_v55  ;;  %v3835_v55 = vadd.f32 %v7784_v10, %v7772_v45  ;;  %v3967_v34 = vpop.f32.mrb[199].mxu1  ;;  %v3843_v45 = vadd.f32 %v7784_v10, %v7780_v11 }
 0x853   :  { %v4107_v53 = vpop.f32.mrb[180].mxu0 }
 0x854   :  { %v4466_v21 = vadd.f32 %v7784_v10, %v4107_v53  ;;  %v4109_v5 = vpop.f32.mrb[181].mxu0 }
 0x855   :  { %v4110_v4 = vpop.f32.mrb[182].mxu0 }
 0x856   :  { %v4284_v57 = vmul.f32 %v4466_v21, %v9104_v38  ;;  %v4467_v52 = vadd.f32 %v7784_v10, %v4110_v4  ;;  %v4112_v0 = vpop.f32.mrb[183].mxu0  ;;  %v3838_v21 = vadd.f32 %v7784_v10, %v7778_v27 }
 0x858   :  { %4348 = vst [vmem:[#allocation17 + $0xd0] sm:$0xff] %v4284_v57  ;;  %v4285_v41 = vmul.f32 %v4467_v52, %v9105_v50  ;;  %v9108_v57 = vld [vmem:[#allocation28_spill] sm:$0xff] }
 0x85a   :  { %4349 = vst [vmem:[#allocation17 + $0xd8] sm:$0xff] %v4285_v41  ;;  %v9109_v41 = vld [vmem:[#allocation27_spill] sm:$0xff] }
 0x85b   :  { %v4115_v56 = vpop.f32.mrb[184].mxu0 }
 0x85c   :  { %v4116_v33 = vadd.f32 %v4115_v56, %v3827_v28  ;;  %v4117_v58 = vpop.f32.mrb[185].mxu0 }
 0x85d   :  { %v4118_v3 = vpop.f32.mrb[186].mxu0 }
 0x85e   :  { %v4286_v22 = vmul.f32 %v4116_v33, %v9106_v62  ;;  %v4119_v49 = vadd.f32 %v4118_v3, %v3830_v6  ;;  %v4120_v48 = vpop.f32.mrb[187].mxu0  ;;  %v9110_v33 = vld [vmem:[#allocation144_spill] sm:$0xff] }
 0x85f   :  { %v3851_v48 = vadd.f32 %v7784_v10, %v7793_v43 }
 0x860   :  { %4350 = vst [vmem:[#allocation17 + $0xe0] sm:$0xff] %v4286_v22  ;;  %v4287_v54 = vmul.f32 %v4119_v49, %v9107_v31  ;;  %v9111_v22 = vld [vmem:[#allocation145_spill] sm:$0xff]  ;;  %v3854_v31 = vadd.f32 %v7784_v10, %v7800_v25 }
 0x862   :  { %4351 = vst [vmem:[#allocation17 + $0xe8] sm:$0xff] %v4287_v54 }
 0x863   :  { %v4123_v53 = vpop.f32.mrb[188].mxu0 }
 0x864   :  { %v4124_v5 = vadd.f32 %v4123_v53, %v3835_v55  ;;  %v4125_v4 = vpop.f32.mrb[189].mxu0 }
 0x865   :  { %v4126_v38 = vpop.f32.mrb[190].mxu0 }
 0x866   :  { %v4288_v52 = vmul.f32 %v4124_v5, %v9108_v57  ;;  %v4127_v0 = vadd.f32 %v4126_v38, %v3838_v21  ;;  %v4128_v50 = vpop.f32.mrb[191].mxu0  ;;  %v9113_v5 = vld [vmem:[#allocation147_spill] sm:$0xff]  ;;  %v3859_v38 = vadd.f32 %v7784_v10, %v7805_v42  ;;  %v3862_v57 = vadd.f32 %v7784_v10, %v7812_v46 }
 0x867   :  { %v9114_v50 = vld [vmem:[#allocation30_spill] sm:$0xff] }
 0x868   :  { %4352 = vst [vmem:[#allocation17 + $0xf0] sm:$0xff] %v4288_v52  ;;  %v4289_v28 = vmul.f32 %v4127_v0, %v9109_v41 }
 0x86a   :  { %4353 = vst [vmem:[#allocation17 + $0xf8] sm:$0xff] %v4289_v28 }
 0x86b   :  { %v4131_v12 = vpop.f32.mrb[192].mxu0 }
 0x86c   :  { %v4132_v56 = vadd.f32 %v4131_v12, %v3843_v45  ;;  %v4133_v27 = vpop.f32.mrb[193].mxu0  ;;  %v9115_v12 = vld [vmem:[#allocation29_spill] sm:$0xff] }
 0x86d   :  { %v4134_v6 = vpop.f32.mrb[194].mxu0  ;;  %v3870_v27 = vadd.f32 %v7784_v10, %v7824_v63 }
 0x86e   :  { %v4290_v58 = vmul.f32 %v4132_v56, %v9110_v33  ;;  %v4135_v3 = vadd.f32 %v4134_v6, %v3846_v59  ;;  %v4136_v62 = vpop.f32.mrb[195].mxu0  ;;  %v3867_v56 = vadd.f32 %v7784_v10, %v7817_v35 }
 0x870   :  { %4354 = vst [vmem:[#allocation17 + $0x100] sm:$0xff] %v4290_v58  ;;  %v4291_v49 = vmul.f32 %v4135_v3, %v9111_v22  ;;  %v9116_v58 = vld [vmem:[#allocation148_spill] sm:$0xff] }
 0x872   :  { %4355 = vst [vmem:[#allocation17 + $0x108] sm:$0xff] %v4291_v49  ;;  %v9117_v49 = vld [vmem:[#allocation149_spill] sm:$0xff] }
 0x873   :  { %v4139_v11 = vpop.f32.mrb[196].mxu0 }
 0x874   :  { %v4140_v54 = vadd.f32 %v4139_v11, %v3851_v48  ;;  %v4141_v37 = vpop.f32.mrb[197].mxu0  ;;  %v3875_v11 = vadd.f32 %v7784_v10, %v7829_v16 }
 0x875   :  { %v4142_v55 = vpop.f32.mrb[198].mxu0 }
 0x876   :  { %v4292_v34 = vmul.f32 %v4140_v54, %v9112_v17  ;;  %v4143_v53 = vadd.f32 %v4142_v55, %v3854_v31  ;;  %v4144_v21 = vpop.f32.mrb[199].mxu0  ;;  %v3878_v31 = vadd.f32 %v7784_v10, %v7836_v18  ;;  %v9118_v55 = vld [vmem:[#allocation150_spill] sm:$0xff] }
 0x877   :  { %v9119_v21 = vld [vmem:[#allocation151_spill] sm:$0xff] }
 0x878   :  { %4356 = vst [vmem:[#allocation17 + $0x110] sm:$0xff] %v4292_v34  ;;  %v4293_v4 = vmul.f32 %v4143_v53, %v9113_v5 }
 0x87a   :  { %4357 = vst [vmem:[#allocation17 + $0x118] sm:$0xff] %v4293_v4  ;;  %v3883_v4 = vadd.f32 %v7784_v10, %v7841_v39 }
 0x87b   :  { %v4147_v43 = vpop.f32.mrb[200].mxu0 }
 0x87c   :  { %v4148_v52 = vadd.f32 %v4147_v43, %v3859_v38  ;;  %v4149_v25 = vpop.f32.mrb[201].mxu0  ;;  %v3886_v38 = vadd.f32 %v7784_v10, %v7846_v47 }
 0x87d   :  { %v4150_v0 = vpop.f32.mrb[202].mxu0 }
 0x87e   :  { %v4294_v41 = vmul.f32 %v4148_v52, %v9114_v50  ;;  %v4151_v28 = vadd.f32 %v4150_v0, %v3862_v57  ;;  %v4152_v45 = vpop.f32.mrb[203].mxu0  ;;  %v9120_v52 = vld [vmem:[#allocation32_spill] sm:$0xff] }
 0x87f   :  { %v3891_v45 = vadd.f32 %v7784_v10, %v7851_v13 }
 0x880   :  { %4358 = vst [vmem:[#allocation17 + $0x120] sm:$0xff] %v4294_v41  ;;  %v4295_v59 = vmul.f32 %v4151_v28, %v9115_v12  ;;  %v9121_v41 = vld [vmem:[#allocation31_spill] sm:$0xff]  ;;  %v3894_v12 = vadd.f32 %v7784_v10, %v7854_v7 }
 0x882   :  { %4359 = vst [vmem:[#allocation17 + $0x128] sm:$0xff] %v4295_v59 }
 0x883   :  { %v4155_v42 = vpop.f32.mrb[204].mxu0 }
 0x884   :  { %v4156_v6 = vadd.f32 %v4155_v42, %v3867_v56  ;;  %v4157_v46 = vpop.f32.mrb[205].mxu0  ;;  %v9122_v42 = vld [vmem:[#allocation152_spill] sm:$0xff] }
 0x885   :  { %v4158_v33 = vpop.f32.mrb[206].mxu0 }
 0x886   :  { %v4296_v3 = vmul.f32 %v4156_v6, %v9116_v58  ;;  %v4159_v62 = vadd.f32 %v4158_v33, %v3870_v27  ;;  %v4160_v22 = vpop.f32.mrb[207].mxu0  ;;  %v9123_v33 = vld [vmem:[#allocation153_spill] sm:$0xff] }
 0x888   :  { %4360 = vst [vmem:[#allocation17 + $0x130] sm:$0xff] %v4296_v3  ;;  %v4297_v48 = vmul.f32 %v4159_v62, %v9117_v49  ;;  %v3899_v3 = vadd.f32 %v7784_v10, %v7859_v36  ;;  %v3902_v62 = vadd.f32 %v7784_v10, %v7862_v44 }
 0x88a   :  { %4361 = vst [vmem:[#allocation17 + $0x138] sm:$0xff] %v4297_v48  ;;  %v9124_v48 = vld [vmem:[#allocation154_spill] sm:$0xff] }
 0x88b   :  { %v4163_v35 = vpop.f32.mrb[208].mxu0 }
 0x88c   :  { %v4164_v54 = vadd.f32 %v4163_v35, %v3875_v11  ;;  %v4165_v63 = vpop.f32.mrb[209].mxu0 }
 0x88d   :  { %v4166_v37 = vpop.f32.mrb[210].mxu0 }
 0x88e   :  { %v4298_v17 = vmul.f32 %v4164_v54, %v9118_v55  ;;  %v4167_v34 = vadd.f32 %v4166_v37, %v3878_v31  ;;  %v4168_v53 = vpop.f32.mrb[211].mxu0  ;;  %v9125_v54 = vld [vmem:[#allocation155_spill] sm:$0xff]  ;;  %v3907_v37 = vadd.f32 %v7784_v10, %v7867_v23  ;;  %v3910_v55 = vadd.f32 %v7784_v10, %v7870_v1 }
 0x88f   :  { %v9126_v53 = vld [vmem:[#allocation34_spill] sm:$0xff] }
 0x890   :  { %4362 = vst [vmem:[#allocation17 + $0x140] sm:$0xff] %v4298_v17  ;;  %v4299_v5 = vmul.f32 %v4167_v34, %v9119_v21 }
 0x892   :  { %4363 = vst [vmem:[#allocation17 + $0x148] sm:$0xff] %v4299_v5 }
 0x893   :  { %v4171_v16 = vpop.f32.mrb[212].mxu0 }
 0x894   :  { %v4172_v43 = vadd.f32 %v4171_v16, %v3883_v4  ;;  %v4173_v18 = vpop.f32.mrb[213].mxu0  ;;  %v9127_v16 = vld [vmem:[#allocation33_spill] sm:$0xff] }
 0x895   :  { %v4174_v57 = vpop.f32.mrb[214].mxu0  ;;  %v3918_v18 = vadd.f32 %v7784_v10, %v7878_v30 }
 0x896   :  { %v4300_v25 = vmul.f32 %v4172_v43, %v9120_v52  ;;  %v4175_v0 = vadd.f32 %v4174_v57, %v3886_v38  ;;  %v4176_v50 = vpop.f32.mrb[215].mxu0  ;;  %v3915_v43 = vadd.f32 %v7784_v10, %v7875_v60 }
 0x898   :  { %4364 = vst [vmem:[#allocation17 + $0x150] sm:$0xff] %v4300_v25  ;;  %v4301_v28 = vmul.f32 %v4175_v0, %v9121_v41  ;;  %v9128_v25 = vld [vmem:[#allocation156_spill] sm:$0xff] }
 0x89a   :  { %4365 = vst [vmem:[#allocation17 + $0x158] sm:$0xff] %v4301_v28  ;;  %v9129_v28 = vld [vmem:[#allocation157_spill] sm:$0xff] }
 0x89b   :  { %v4179_v39 = vpop.f32.mrb[216].mxu0 }
 0x89c   :  { %v4180_v59 = vadd.f32 %v4179_v39, %v3891_v45  ;;  %v4181_v47 = vpop.f32.mrb[217].mxu0  ;;  %v3923_v39 = vadd.f32 %v7784_v10, %v7883_v24 }
 0x89d   :  { %v4182_v56 = vpop.f32.mrb[218].mxu0 }
 0x89e   :  { %v4302_v27 = vmul.f32 %v4180_v59, %v9122_v42  ;;  %v4183_v6 = vadd.f32 %v4182_v56, %v3894_v12  ;;  %v4184_v46 = vpop.f32.mrb[219].mxu0  ;;  %v3926_v12 = vadd.f32 %v7784_v10, %v7886_v32  ;;  %v9130_v56 = vld [vmem:[#allocation158_spill] sm:$0xff] }
 0x89f   :  { %v9131_v46 = vld [vmem:[#allocation159_spill] sm:$0xff] }
 0x8a0   :  { %4366 = vst [vmem:[#allocation17 + $0x160] sm:$0xff] %v4302_v27  ;;  %v4303_v58 = vmul.f32 %v4183_v6, %v9123_v33 }
 0x8a2   :  { %4367 = vst [vmem:[#allocation17 + $0x168] sm:$0xff] %v4303_v58  ;;  %v3931_v58 = vadd.f32 %v7784_v10, %v7891_v26 }
 0x8a3   :  { %v4187_v13 = vpop.f32.mrb[220].mxu0 }
 0x8a4   :  { %v4188_v22 = vadd.f32 %v4187_v13, %v3899_v3  ;;  %v4189_v7 = vpop.f32.mrb[221].mxu0  ;;  %v3934_v3 = vadd.f32 %v7784_v10, %v7894_v19 }
 0x8a5   :  { %v4190_v49 = vpop.f32.mrb[222].mxu0 }
 0x8a6   :  { %v4304_v11 = vmul.f32 %v4188_v22, %v9124_v48  ;;  %v4191_v35 = vadd.f32 %v4190_v49, %v3902_v62  ;;  %v4192_v31 = vpop.f32.mrb[223].mxu0  ;;  %v9132_v22 = vld [vmem:[#allocation36_spill] sm:$0xff] }
 0x8a7   :  { %v3939_v31 = vadd.f32 %v7784_v10, %v7899_v2 }
 0x8a8   :  { %4368 = vst [vmem:[#allocation17 + $0x170] sm:$0xff] %v4304_v11  ;;  %v4305_v63 = vmul.f32 %v4191_v35, %v9125_v54  ;;  %v9133_v11 = vld [vmem:[#allocation35_spill] sm:$0xff]  ;;  %v3942_v54 = vadd.f32 %v7784_v10, %v7902_v8 }
 0x8aa   :  { %4369 = vst [vmem:[#allocation17 + $0x178] sm:$0xff] %v4305_v63 }
 0x8ab   :  { %v4195_v36 = vpop.f32.mrb[224].mxu0 }
 0x8ac   :  { %v4196_v17 = vadd.f32 %v4195_v36, %v3907_v37  ;;  %v4197_v44 = vpop.f32.mrb[225].mxu0  ;;  %v9134_v36 = vld [vmem:[#allocation160_spill] sm:$0xff] }
 0x8ad   :  { %v4198_v34 = vpop.f32.mrb[226].mxu0 }
 0x8ae   :  { %v4306_v21 = vmul.f32 %v4196_v17, %v9126_v53  ;;  %v4199_v5 = vadd.f32 %v4198_v34, %v3910_v55  ;;  %v4200_v4 = vpop.f32.mrb[227].mxu0  ;;  %v9135_v34 = vld [vmem:[#allocation161_spill] sm:$0xff] }
 0x8b0   :  { %4370 = vst [vmem:[#allocation17 + $0x180] sm:$0xff] %v4306_v21  ;;  %v4307_v38 = vmul.f32 %v4199_v5, %v9127_v16  ;;  %v3947_v21 = vadd.f32 %v7784_v10, %v7907_v51  ;;  %v3950_v5 = vadd.f32 %v7784_v10, %v7910_v9 }
 0x8b2   :  { %4371 = vst [vmem:[#allocation17 + $0x188] sm:$0xff] %v4307_v38  ;;  %v9136_v38 = vld [vmem:[#allocation162_spill] sm:$0xff] }
 0x8b3   :  { %v4203_v23 = vpop.f32.mrb[228].mxu0 }
 0x8b4   :  { %v4204_v57 = vadd.f32 %v4203_v23, %v3915_v43  ;;  %v4205_v1 = vpop.f32.mrb[229].mxu0 }
 0x8b5   :  { %v4206_v52 = vpop.f32.mrb[230].mxu0 }
 0x8b6   :  { %v4308_v0 = vmul.f32 %v4204_v57, %v9128_v25  ;;  %v4207_v50 = vadd.f32 %v4206_v52, %v3918_v18  ;;  %v4208_v41 = vpop.f32.mrb[231].mxu0  ;;  %v9137_v57 = vld [vmem:[#allocation163_spill] sm:$0xff]  ;;  %v3955_v52 = vadd.f32 %v7784_v10, %v7915_v61  ;;  %v3958_v25 = vadd.f32 %v7784_v10, %v7920_v15 }
 0x8b7   :  { %v9138_v41 = vld [vmem:[#allocation38_spill] sm:$0xff] }
 0x8b8   :  { %4372 = vst [vmem:[#allocation17 + $0x190] sm:$0xff] %v4308_v0  ;;  %v4309_v45 = vmul.f32 %v4207_v50, %v9129_v28 }
 0x8ba   :  { %4373 = vst [vmem:[#allocation17 + $0x198] sm:$0xff] %v4309_v45 }
 0x8bb   :  { %v4211_v60 = vpop.f32.mrb[232].mxu0 }
 0x8bc   :  { %v4212_v59 = vadd.f32 %v4211_v60, %v3923_v39  ;;  %v4213_v30 = vpop.f32.mrb[233].mxu0  ;;  %v9139_v60 = vld [vmem:[#allocation37_spill] sm:$0xff] }
 0x8bd   :  { %v4214_v47 = vpop.f32.mrb[234].mxu0  ;;  %v3966_v30 = vadd.f32 %v7784_v10, %v7930_v20 }
 0x8be   :  { %v4310_v42 = vmul.f32 %v4212_v59, %v9130_v56  ;;  %v4215_v27 = vadd.f32 %v4214_v47, %v3926_v12  ;;  %v4216_v6 = vpop.f32.mrb[235].mxu0  ;;  %v3963_v59 = vadd.f32 %v7784_v10, %v7925_v29 }
 0x8c0   :  { %4374 = vst [vmem:[#allocation17 + $0x1a0] sm:$0xff] %v4310_v42  ;;  %v4311_v33 = vmul.f32 %v4215_v27, %v9131_v46 }
 0x8c2   :  { %4375 = vst [vmem:[#allocation17 + $0x1a8] sm:$0xff] %v4311_v33 }
 0x8c3   :  { %v4219_v24 = vpop.f32.mrb[236].mxu0 }
 0x8c4   :  { %v4220_v13 = vadd.f32 %v4219_v24, %v3931_v58  ;;  %v4221_v32 = vpop.f32.mrb[237].mxu0 }
 0x8c5   :  { %v4222_v62 = vpop.f32.mrb[238].mxu0 }
 0x8c6   :  { %v4312_v7 = vmul.f32 %v4220_v13, %v9132_v22  ;;  %v4223_v49 = vadd.f32 %v4222_v62, %v3934_v3  ;;  %v4224_v48 = vpop.f32.mrb[239].mxu0 }
 0x8c8   :  { %4376 = vst [vmem:[#allocation17 + $0x1b0] sm:$0xff] %v4312_v7  ;;  %v4313_v35 = vmul.f32 %v4223_v49, %v9133_v11 }
 0x8ca   :  { %4377 = vst [vmem:[#allocation17 + $0x1b8] sm:$0xff] %v4313_v35 }
 0x8cb   :  { %v4227_v26 = vpop.f32.mrb[240].mxu0 }
 0x8cc   :  { %v4228_v63 = vadd.f32 %v4227_v26, %v3939_v31  ;;  %v4229_v19 = vpop.f32.mrb[241].mxu0 }
 0x8cd   :  { %v4230_v37 = vpop.f32.mrb[242].mxu0 }
 0x8ce   :  { %v4314_v55 = vmul.f32 %v4228_v63, %v9134_v36  ;;  %v4231_v17 = vadd.f32 %v4230_v37, %v3942_v54  ;;  %v4232_v44 = vpop.f32.mrb[243].mxu0 }
 0x8d0   :  { %4378 = vst [vmem:[#allocation17 + $0x1c0] sm:$0xff] %v4314_v55  ;;  %v4315_v53 = vmul.f32 %v4231_v17, %v9135_v34 }
 0x8d2   :  { %4379 = vst [vmem:[#allocation17 + $0x1c8] sm:$0xff] %v4315_v53 }
 0x8d3   :  { %v4235_v2 = vpop.f32.mrb[244].mxu0 }
 0x8d4   :  { %v4236_v4 = vadd.f32 %v4235_v2, %v3947_v21  ;;  %v4237_v8 = vpop.f32.mrb[245].mxu0 }
 0x8d5   :  { %v4238_v16 = vpop.f32.mrb[246].mxu0 }
 0x8d6   :  { %v4316_v43 = vmul.f32 %v4236_v4, %v9136_v38  ;;  %v4239_v23 = vadd.f32 %v4238_v16, %v3950_v5  ;;  %v4240_v18 = vpop.f32.mrb[247].mxu0 }
 0x8d8   :  { %4380 = vst [vmem:[#allocation17 + $0x1d0] sm:$0xff] %v4316_v43  ;;  %v4317_v1 = vmul.f32 %v4239_v23, %v9137_v57 }
 0x8da   :  { %4381 = vst [vmem:[#allocation17 + $0x1d8] sm:$0xff] %v4317_v1 }
 0x8db   :  { %v4243_v51 = vpop.f32.mrb[248].mxu0 }
 0x8dc   :  { %v4244_v0 = vadd.f32 %v4243_v51, %v3955_v52  ;;  %v4245_v9 = vpop.f32.mrb[249].mxu0 }
 0x8dd   :  { %v4246_v50 = vpop.f32.mrb[250].mxu0 }
 0x8de   :  { %v4318_v28 = vmul.f32 %v4244_v0, %v9138_v41  ;;  %v4247_v45 = vadd.f32 %v4246_v50, %v3958_v25  ;;  %v4248_v39 = vpop.f32.mrb[251].mxu0 }
 0x8e0   :  { %4382 = vst [vmem:[#allocation17 + $0x1e0] sm:$0xff] %v4318_v28  ;;  %v4319_v12 = vmul.f32 %v4247_v45, %v9139_v60 }
 0x8e2   :  { %4383 = vst [vmem:[#allocation17 + $0x1e8] sm:$0xff] %v4319_v12 }
 0x8e3   :  { %v4251_v61 = vpop.f32.mrb[252].mxu0 }
 0x8e4   :  { %v4252_v47 = vadd.f32 %v4251_v61, %v3963_v59  ;;  %v4253_v15 = vpop.f32.mrb[253].mxu0 }
 0x8e5   :  { %v4254_v56 = vpop.f32.mrb[254].mxu0 }
 0x8e6   :  { %v4320_v42 = vmul.f32 %v4252_v47, %v7446_v40  ;;  %v4255_v27 = vadd.f32 %v4254_v56, %v3966_v30  ;;  %v4256_v6 = vpop.f32.mrb[255].mxu0 }
 0x8e8   :  { %4384 = vst [vmem:[#allocation17 + $0x1f0] sm:$0xff] %v4320_v42  ;;  %v4321_v46 = vmul.f32 %v4255_v27, %v7460_v14 }
 0x8ea   :  { %4385 = vst [vmem:[#allocation17 + $0x1f8] sm:$0xff] %v4321_v46 }
 0x8eb   :  { %5016 = shalt.err (!%p5013_p6)
}
 0x8ec   :  { %s5017_s10 = scalar_lea.hbm %s8056_s9, 8192 }
 0x8ed   :  { %p5018_p7 = scmp.ne.s32.totalorder %s8056_s9, %s5017_s10  ;;  %p5021_p8 = scmp.lt.u32.totalorder %s5017_s10, %s8056_s9 }
 0x8ef   :  { %p5023_p9 = pnand %p5021_p8, %p5018_p7 }
 0x8f1   :  { %5026 = shalt.err (!%p5023_p9)
}
 0x8f2   :  { %4397 = dma.vmem_to_hbm [thread:$0]  %s4392_s28, 8192, %s8056_s9, [#allocation4], %s5040_s19, %s5040_s19, %s5041_s20  }
 0x8f3   :  { %5037 = dma.done.wait [#allocation4], 8192  }
 0x8f4   :  { %5038 = vsyncadd [#allocation4], 4294959104 }
 0x8f5   :  { %4401 = vsyncpa [#allocation3], 1 }
 0x8f6   :  { %4402 = vsyncpa [#allocation6], 1 }
 0x8f7   :  { %4403 = vsyncpa [#allocation9], 1 }
 0x8f8   :  { %4404 = vsyncpa [#allocation12], 1 }
 0x8f9   :  { %4405 = vsyncpa [#allocation15], 1 }
 0x8fa   :  { %4406 = vsyncpa [#allocation4], 1 }

</bundles_post_ra>
